<compile_context>
chip_gen: v5e
topology: v5e:2x2
jax: 0.10.0
libtpu: 0.0.40
codegen_flags: <defaults>
</compile_context>

<pallas_src>
import functools

import jax
import jax.numpy as jnp
from jax import lax
from jax.experimental import pallas as pl
from jax.experimental.pallas import tpu as pltpu


_TAPS = tuple((ky, kx) for ky in range(3) for kx in range(3))   # row-major 3x3 taps


def _fused_unit_kernel(x_ref, mask_ref, w1_ref, b1_ref, wm_ref, bm_ref, w9_ref, b9_ref,
                       o_ref,
                       o1_buf, o2_buf, o3_buf, pp_a, pp_b,
                       *, H, W, slope):
    """Fused 9-layer forward for one image; all activations stay in VMEM.

    x_ref   : (1, 2, NB)  f32  flat zero-padded input (NB = (H+2)*(W+2)+2)
    mask_ref: (1, L)      f32  1 on interior columns, 0 on left/right halo columns
    w1_ref  : (9, 32, 2)  bf16 conv1 per-tap (Cout, Cin) weights;  b1_ref: (32, 1) f32
    wm_ref  : (7, 9, 32, 32) bf16 conv2..conv8;                    bm_ref: (7, 32, 1) f32
    w9_ref  : (9, 2, 32)  bf16 conv9;                              b9_ref: (2, 1) f32
    o_ref   : (1, 2, L)   f32  rows 1..H of the padded image, flattened (L = H*(W+2))
    o1..o3  : (32, NB) bf16 VMEM  padded out1/out2/out3 (residuals of layers 8/7/6)
    pp_a/b  : (32, NB) bf16 VMEM  ping-pong buffers for out4..out8
    """
    C = 32
    RW = W + 2                      # padded row width
    L = H * RW                      # number of output positions written per layer
    base = RW + 1                   # buffer index of padded position (row 1, col 0)
    NB = (H + 2) * RW + 2

    mask = mask_ref[...]            # (1, L) f32; zeroes the left/right halo columns

    # Zero ONLY the top/bottom halo (never written below) - a few hundred lanes per
    # channel per buffer instead of the full buffer.  Done every grid step so each
    # TensorCore's private scratch is initialized regardless of batch sharding.
    halo = jnp.zeros((C, base), dtype=o1_buf.dtype)
    for buf in (o1_buf, o2_buf, o3_buf, pp_a, pp_b):
        buf[:, 0:base] = halo
        buf[:, base + L:NB] = halo          # NB - (base + L) == base

    xv = x_ref[0]                           # (2, NB) f32  (kept f32 for the residual)
    xv16 = xv.astype(jnp.bfloat16)          # bf16 copy feeding conv1's MXU dots

    def conv(src, w_taps, bias):
        """3x3 SAME conv: 9 accumulated (Cout,Cin)@(Cin,L) bf16 dots, f32 accumulate."""
        y = None
        for t, (ky, kx) in enumerate(_TAPS):
            s = base + (ky - 1) * RW + (kx - 1)          # constant lane offset per tap
            rhs = src[:, s:s + L].astype(jnp.bfloat16)   # (Cin, L), no reshape needed
            part = jnp.dot(w_taps[t], rhs, preferred_element_type=jnp.float32)
            y = part if y is None else y + part
        return y + bias                                   # (Cout, 1) broadcast, f32

    def lrelu(y):
        return jnp.where(y >= 0.0, y, slope * y)          # f32 elementwise tail

    def store(dst, y):
        # Mask keeps the left/right halo columns of the padded buffer at zero so the
        # SAME-conv zero-padding invariant holds for the next layer.
        dst[:, base:base + L] = (y * mask).astype(dst.dtype)

    def resid(buf):
        return buf[:, base:base + L].astype(jnp.float32)

    # out1..out5 (no residual)
    store(o1_buf, lrelu(conv(xv16,   w1_ref[...], b1_ref[...])))     # conv1 (2 -> 32)
    store(o2_buf, lrelu(conv(o1_buf, wm_ref[0],   bm_ref[0])))
    store(o3_buf, lrelu(conv(o2_buf, wm_ref[1],   bm_ref[1])))
    store(pp_a,   lrelu(conv(o3_buf, wm_ref[2],   bm_ref[2])))       # out4
    store(pp_b,   lrelu(conv(pp_a,   wm_ref[3],   bm_ref[3])))       # out5
    # out6..out8 (residuals from out3/out2/out1), ping-ponging the spare buffers
    store(pp_a,   lrelu(conv(pp_b,   wm_ref[4],   bm_ref[4]) + resid(o3_buf)))   # out6
    store(pp_b,   lrelu(conv(pp_a,   wm_ref[5],   bm_ref[5]) + resid(o2_buf)))   # out7
    store(pp_a,   lrelu(conv(pp_b,   wm_ref[6],   bm_ref[6]) + resid(o1_buf)))   # out8
    # out9 = LeakyReLU(x + conv9(out8)) -> HBM (border columns discarded by wrapper)
    y9 = lrelu(conv(pp_a, w9_ref[...], b9_ref[...]) + xv[:, base:base + L])
    o_ref[0] = y9.astype(o_ref.dtype)


def feature_residual_unit(x_nchw, params, negative_slope=0.01):
    """FeatureResidualUnit forward. Input/output are NCHW, matching the PyTorch module."""
    N, Cin, H, W = x_nchw.shape
    C = 32
    assert Cin == 2 and len(params) == 9
    RW = W + 2
    P = (H + 2) * RW
    NB = P + 2
    L = H * RW

    # Flat zero-padded input (channel-major, spatial axis minor): cheap XLA pads, no
    # transposes, and the zero halo never has to be rebuilt inside the kernel.
    x = x_nchw.astype(jnp.float32)
    xp = jnp.pad(x, ((0, 0), (0, 0), (1, 1), (1, 1)))          # (N, 2, H+2, W+2)
    x_flat = jnp.pad(xp.reshape(N, Cin, P), ((0, 0), (0, 0), (1, 1)))   # (N, 2, NB)

    # Interior-column mask for the flattened rows 1..H (period W+2).
    col = jnp.arange(L, dtype=jnp.int32) % RW
    mask = ((col >= 1) & (col <= W)).astype(jnp.float32).reshape(1, L)

    def taps(w):   # HWIO (3, 3, cin, cout) -> (9, cout, cin) bf16, tap order ky*3+kx
        cin, cout = w.shape[2], w.shape[3]
        return jnp.transpose(w, (0, 1, 3, 2)).reshape(9, cout, cin).astype(jnp.bfloat16)

    (w1, b1), *mid, (w9, b9) = params
    w1t = taps(w1)                                                     # (9, 32, 2)
    b1c = b1.astype(jnp.float32).reshape(C, 1)
    wmt = jnp.stack([taps(w) for w, _ in mid])                         # (7, 9, 32, 32)
    bmc = jnp.stack([b.astype(jnp.float32).reshape(C, 1) for _, b in mid])   # (7, 32, 1)
    w9t = taps(w9)                                                     # (9, 2, 32)
    b9c = b9.astype(jnp.float32).reshape(Cin, 1)

    kernel = functools.partial(_fused_unit_kernel, H=H, W=W, slope=negative_slope)

    # VMEM budget from the actual footprint (+25% headroom), not a hard-coded value.
    scratch_bytes = 5 * C * NB * 2                        # five bf16 activation buffers
    io_bytes = 2 * (Cin * NB * 4) + 2 * (Cin * L * 4)     # double-buffered x / out blocks
    weight_bytes = 2 * (9 * C * Cin + 7 * 9 * C * C + 9 * Cin * C) + 4 * (8 * C + Cin) + 4 * L
    temp_bytes = 4 * C * L * 4                            # f32 accumulator / staging slack
    vmem_limit = int(min(max(1.25 * (scratch_bytes + io_bytes + weight_bytes + temp_bytes),
                             32 * 1024 * 1024), 110 * 1024 * 1024))

    out_flat = pl.pallas_call(
        kernel,
        out_shape=jax.ShapeDtypeStruct((N, Cin, L), jnp.float32),
        grid=(N,),
        in_specs=[
            pl.BlockSpec((1, Cin, NB), lambda n: (n, 0, 0)),       # x: one image per step
            pl.BlockSpec((1, L), lambda n: (0, 0)),                # column mask
            pl.BlockSpec((9, C, Cin), lambda n: (0, 0, 0)),        # conv1 taps
            pl.BlockSpec((C, 1), lambda n: (0, 0)),                # conv1 bias
            pl.BlockSpec((7, 9, C, C), lambda n: (0, 0, 0, 0)),    # conv2..8 taps
            pl.BlockSpec((7, C, 1), lambda n: (0, 0, 0)),          # conv2..8 biases
            pl.BlockSpec((9, Cin, C), lambda n: (0, 0, 0)),        # conv9 taps
            pl.BlockSpec((Cin, 1), lambda n: (0, 0)),              # conv9 bias
        ],
        out_specs=pl.BlockSpec((1, Cin, L), lambda n: (n, 0, 0)),
        scratch_shapes=[pltpu.VMEM((C, NB), jnp.bfloat16) for _ in range(5)],
        compiler_params=pltpu.CompilerParams(
            dimension_semantics=("parallel",),    # batch across TCs (use even N on v7x)
            vmem_limit_bytes=vmem_limit,
        ),
    )(x_flat, mask, w1t, b1c, wmt, bmc, w9t, b9c)

    # Rows 1..H of the padded image were written; drop the left/right halo columns.
    return out_flat.reshape(N, Cin, H, RW)[:, :, :, 1:W + 1]


def init_params(key):
    """Deterministic synthetic parameters matching the module's __init__ shapes.

    conv1: (2->32), conv2..conv8: (32->32), conv9: (32->2); all 3x3, stored HWIO.
    """
    chans = [(2, 32)] + [(32, 32)] * 7 + [(32, 2)]
    params = []
    for i, (cin, cout) in enumerate(chans):
        kw, kb = jax.random.split(jax.random.fold_in(key, i))
        fan_in = 3 * 3 * cin
        scale = (2.0 / fan_in) ** 0.5
        w = scale * jax.random.normal(kw, (3, 3, cin, cout), dtype=jnp.float32)
        b = 0.01 * jax.random.normal(kb, (cout,), dtype=jnp.float32)
        params.append((w, b))
    return params


# ---------------------------------------------------------------------------
# Pure-JAX reference (lax.conv, f32) for correctness checking.
# ---------------------------------------------------------------------------
def _ref_layer(x, w, b, res=None, slope=0.01):
    y = lax.conv_general_dilated(
        x, w, window_strides=(1, 1), padding="SAME",
        dimension_numbers=("NHWC", "HWIO", "NHWC"))
    y = y + b.reshape(1, 1, 1, -1)
    if res is not None:
        y = y + res
    return jnp.where(y >= 0, y, slope * y)


def feature_residual_unit_ref(x_nchw, params, negative_slope=0.01):
    x = jnp.transpose(x_nchw, (0, 2, 3, 1)).astype(jnp.float32)
    (w1, b1), (w2, b2), (w3, b3), (w4, b4), (w5, b5), \
        (w6, b6), (w7, b7), (w8, b8), (w9, b9) = params
    s = negative_slope
    o1 = _ref_layer(x, w1, b1, slope=s)
    o2 = _ref_layer(o1, w2, b2, slope=s)
    o3 = _ref_layer(o2, w3, b3, slope=s)
    o4 = _ref_layer(o3, w4, b4, slope=s)
    o5 = _ref_layer(o4, w5, b5, slope=s)
    o6 = _ref_layer(o5, w6, b6, res=o3, slope=s)
    o7 = _ref_layer(o6, w7, b7, res=o2, slope=s)
    o8 = _ref_layer(o7, w8, b8, res=o1, slope=s)
    o9 = _ref_layer(o8, w9, b9, res=x, slope=s)
    return jnp.transpose(o9, (0, 3, 1, 2))


if __name__ == "__main__":
    key = jax.random.PRNGKey(0)
    kx, kp = jax.random.split(key)

    # Module expects 2 input channels (NCHW). Small test: batch=2 (even for v7x), 16x16.
    x = jax.random.normal(kx, (2, 2, 16, 16), dtype=jnp.float32)
    params = init_params(kp)

    fwd = jax.jit(feature_residual_unit)
    out = jax.block_until_ready(fwd(x, params))
    ref = jax.block_until_ready(feature_residual_unit_ref(x, params))

    assert out.shape == (2, 2, 16, 16), out.shape
    err = float(jnp.max(jnp.abs(out - ref)))
    scale = float(jnp.max(jnp.abs(ref)))
    # bf16 MXU operands with f32 accumulation: tolerance loosened per review.
    assert err <= 3e-2 * scale + 3e-2, f"mismatch vs reference: max abs err={err}, scale={scale}"

    print("KERNEL_OK")
</pallas_src>

<mosaic_0001>
module attributes {stable_mosaic.version = 11 : i64} {
  func.func @_fused_unit_kernel(%arg0: i32, %arg1: memref<1x2x326xf32, #tpu.memory_space<vmem>>, %arg2: memref<1x288xf32, #tpu.memory_space<vmem>>, %arg3: memref<9x32x2xbf16, #tpu.memory_space<vmem>>, %arg4: memref<32x1xf32, #tpu.memory_space<vmem>>, %arg5: memref<7x9x32x32xbf16, #tpu.memory_space<vmem>>, %arg6: memref<7x32x1xf32, #tpu.memory_space<vmem>>, %arg7: memref<9x2x32xbf16, #tpu.memory_space<vmem>>, %arg8: memref<2x1xf32, #tpu.memory_space<vmem>>, %arg9: memref<1x2x288xf32, #tpu.memory_space<vmem>>, %arg10: memref<32x326xbf16, #tpu.memory_space<vmem>>, %arg11: memref<32x326xbf16, #tpu.memory_space<vmem>>, %arg12: memref<32x326xbf16, #tpu.memory_space<vmem>>, %arg13: memref<32x326xbf16, #tpu.memory_space<vmem>>, %arg14: memref<32x326xbf16, #tpu.memory_space<vmem>>) attributes {dimension_semantics = [#tpu.dimension_semantics<parallel>], iteration_bounds = array<i64: 2>, scalar_prefetch = 0 : i64, scratch_operands = 5 : i64, tpu.core_type = #tpu.core_type<tc>, window_params = [{transform_indices = @transform_0, window_bounds = array<i64: 1, 2, 326>}, {pipeline_mode = #tpu.pipeline_mode<synchronous>, transform_indices = @transform_1, window_bounds = array<i64: 1, 288>}, {pipeline_mode = #tpu.pipeline_mode<synchronous>, transform_indices = @transform_2, window_bounds = array<i64: 9, 32, 2>}, {pipeline_mode = #tpu.pipeline_mode<synchronous>, transform_indices = @transform_3, window_bounds = array<i64: 32, 1>}, {pipeline_mode = #tpu.pipeline_mode<synchronous>, transform_indices = @transform_4, window_bounds = array<i64: 7, 9, 32, 32>}, {pipeline_mode = #tpu.pipeline_mode<synchronous>, transform_indices = @transform_5, window_bounds = array<i64: 7, 32, 1>}, {pipeline_mode = #tpu.pipeline_mode<synchronous>, transform_indices = @transform_6, window_bounds = array<i64: 9, 2, 32>}, {pipeline_mode = #tpu.pipeline_mode<synchronous>, transform_indices = @transform_7, window_bounds = array<i64: 2, 1>}, {transform_indices = @transform_8, window_bounds = array<i64: 1, 2, 288>}]} {
    %c0 = arith.constant 0 : index
    %c0_0 = arith.constant 0 : index
    %0 = vector.load %arg2[%c0, %c0_0] : memref<1x288xf32, #tpu.memory_space<vmem>>, vector<1x288xf32>
    %cst = arith.constant 0.000000e+00 : bf16
    %1 = vector.broadcast %cst : bf16 to vector<32x19xbf16>
    %c0_1 = arith.constant 0 : index
    %c0_2 = arith.constant 0 : index
    %2 = vector.load %arg10[%c0_1, %c0_2] : memref<32x326xbf16, #tpu.memory_space<vmem>>, vector<32x19xbf16>
    tpu.vector_store %arg10[%c0_1, %c0_2], %1 {strides = array<i32>} : memref<32x326xbf16, #tpu.memory_space<vmem>>, vector<32x19xbf16>,
    %c0_3 = arith.constant 0 : index
    %c307 = arith.constant 307 : index
    %3 = vector.load %arg10[%c0_3, %c307] : memref<32x326xbf16, #tpu.memory_space<vmem>>, vector<32x19xbf16>
    tpu.vector_store %arg10[%c0_3, %c307], %1 {strides = array<i32>} : memref<32x326xbf16, #tpu.memory_space<vmem>>, vector<32x19xbf16>,
    %c0_4 = arith.constant 0 : index
    %c0_5 = arith.constant 0 : index
    %4 = vector.load %arg11[%c0_4, %c0_5] : memref<32x326xbf16, #tpu.memory_space<vmem>>, vector<32x19xbf16>
    tpu.vector_store %arg11[%c0_4, %c0_5], %1 {strides = array<i32>} : memref<32x326xbf16, #tpu.memory_space<vmem>>, vector<32x19xbf16>,
    %c0_6 = arith.constant 0 : index
    %c307_7 = arith.constant 307 : index
    %5 = vector.load %arg11[%c0_6, %c307_7] : memref<32x326xbf16, #tpu.memory_space<vmem>>, vector<32x19xbf16>
    tpu.vector_store %arg11[%c0_6, %c307_7], %1 {strides = array<i32>} : memref<32x326xbf16, #tpu.memory_space<vmem>>, vector<32x19xbf16>,
    %c0_8 = arith.constant 0 : index
    %c0_9 = arith.constant 0 : index
    %6 = vector.load %arg12[%c0_8, %c0_9] : memref<32x326xbf16, #tpu.memory_space<vmem>>, vector<32x19xbf16>
    tpu.vector_store %arg12[%c0_8, %c0_9], %1 {strides = array<i32>} : memref<32x326xbf16, #tpu.memory_space<vmem>>, vector<32x19xbf16>,
    %c0_10 = arith.constant 0 : index
    %c307_11 = arith.constant 307 : index
    %7 = vector.load %arg12[%c0_10, %c307_11] : memref<32x326xbf16, #tpu.memory_space<vmem>>, vector<32x19xbf16>
    tpu.vector_store %arg12[%c0_10, %c307_11], %1 {strides = array<i32>} : memref<32x326xbf16, #tpu.memory_space<vmem>>, vector<32x19xbf16>,
    %c0_12 = arith.constant 0 : index
    %c0_13 = arith.constant 0 : index
    %8 = vector.load %arg13[%c0_12, %c0_13] : memref<32x326xbf16, #tpu.memory_space<vmem>>, vector<32x19xbf16>
    tpu.vector_store %arg13[%c0_12, %c0_13], %1 {strides = array<i32>} : memref<32x326xbf16, #tpu.memory_space<vmem>>, vector<32x19xbf16>,
    %c0_14 = arith.constant 0 : index
    %c307_15 = arith.constant 307 : index
    %9 = vector.load %arg13[%c0_14, %c307_15] : memref<32x326xbf16, #tpu.memory_space<vmem>>, vector<32x19xbf16>
    tpu.vector_store %arg13[%c0_14, %c307_15], %1 {strides = array<i32>} : memref<32x326xbf16, #tpu.memory_space<vmem>>, vector<32x19xbf16>,
    %c0_16 = arith.constant 0 : index
    %c0_17 = arith.constant 0 : index
    %10 = vector.load %arg14[%c0_16, %c0_17] : memref<32x326xbf16, #tpu.memory_space<vmem>>, vector<32x19xbf16>
    tpu.vector_store %arg14[%c0_16, %c0_17], %1 {strides = array<i32>} : memref<32x326xbf16, #tpu.memory_space<vmem>>, vector<32x19xbf16>,
    %c0_18 = arith.constant 0 : index
    %c307_19 = arith.constant 307 : index
    %11 = vector.load %arg14[%c0_18, %c307_19] : memref<32x326xbf16, #tpu.memory_space<vmem>>, vector<32x19xbf16>
    tpu.vector_store %arg14[%c0_18, %c307_19], %1 {strides = array<i32>} : memref<32x326xbf16, #tpu.memory_space<vmem>>, vector<32x19xbf16>,
    %c0_20 = arith.constant 0 : index
    %c0_21 = arith.constant 0 : index
    %c0_22 = arith.constant 0 : index
    %12 = vector.load %arg1[%c0_20, %c0_21, %c0_22] : memref<1x2x326xf32, #tpu.memory_space<vmem>>, vector<1x2x326xf32>
    %13 = vector.shape_cast %12 : vector<1x2x326xf32> to vector<2x326xf32>
    %14 = arith.truncf %13 : vector<2x326xf32> to vector<2x326xbf16>
    %c0_23 = arith.constant 0 : index
    %c0_24 = arith.constant 0 : index
    %c0_25 = arith.constant 0 : index
    %15 = vector.load %arg3[%c0_23, %c0_24, %c0_25] : memref<9x32x2xbf16, #tpu.memory_space<vmem>>, vector<9x32x2xbf16>
    %c0_26 = arith.constant 0 : index
    %c0_27 = arith.constant 0 : index
    %16 = vector.load %arg4[%c0_26, %c0_27] : memref<32x1xf32, #tpu.memory_space<vmem>>, vector<32x1xf32>
    %17 = vector.extract_strided_slice %14 {offsets = [0, 0], sizes = [2, 288], strides = [1, 1]} : vector<2x326xbf16> to vector<2x288xbf16>
    %18 = vector.extract_strided_slice %15 {offsets = [0, 0, 0], sizes = [1, 32, 2], strides = [1, 1, 1]} : vector<9x32x2xbf16> to vector<1x32x2xbf16>
    %19 = vector.shape_cast %18 : vector<1x32x2xbf16> to vector<32x2xbf16>
    %cst_28 = arith.constant dense<0.000000e+00> : vector<32x288xf32>
    %20 = tpu.matmul %19, %17, %cst_28 {dimension_numbers = #tpu.dot_dimension_numbers<[1], [0], [0], [1], [0, 0, 1, 1], [], []>} : vector<32x2xbf16>, vector<2x288xbf16>, vector<32x288xf32> -> vector<32x288xf32>
    %21 = vector.extract_strided_slice %14 {offsets = [0, 1], sizes = [2, 288], strides = [1, 1]} : vector<2x326xbf16> to vector<2x288xbf16>
    %22 = vector.extract_strided_slice %15 {offsets = [1, 0, 0], sizes = [1, 32, 2], strides = [1, 1, 1]} : vector<9x32x2xbf16> to vector<1x32x2xbf16>
    %23 = vector.shape_cast %22 : vector<1x32x2xbf16> to vector<32x2xbf16>
    %cst_29 = arith.constant dense<0.000000e+00> : vector<32x288xf32>
    %24 = tpu.matmul %23, %21, %cst_29 {dimension_numbers = #tpu.dot_dimension_numbers<[1], [0], [0], [1], [0, 0, 1, 1], [], []>} : vector<32x2xbf16>, vector<2x288xbf16>, vector<32x288xf32> -> vector<32x288xf32>
    %25 = arith.addf %20, %24 : vector<32x288xf32>
    %26 = vector.extract_strided_slice %14 {offsets = [0, 2], sizes = [2, 288], strides = [1, 1]} : vector<2x326xbf16> to vector<2x288xbf16>
    %27 = vector.extract_strided_slice %15 {offsets = [2, 0, 0], sizes = [1, 32, 2], strides = [1, 1, 1]} : vector<9x32x2xbf16> to vector<1x32x2xbf16>
    %28 = vector.shape_cast %27 : vector<1x32x2xbf16> to vector<32x2xbf16>
    %cst_30 = arith.constant dense<0.000000e+00> : vector<32x288xf32>
    %29 = tpu.matmul %28, %26, %cst_30 {dimension_numbers = #tpu.dot_dimension_numbers<[1], [0], [0], [1], [0, 0, 1, 1], [], []>} : vector<32x2xbf16>, vector<2x288xbf16>, vector<32x288xf32> -> vector<32x288xf32>
    %30 = arith.addf %25, %29 : vector<32x288xf32>
    %31 = vector.extract_strided_slice %14 {offsets = [0, 18], sizes = [2, 288], strides = [1, 1]} : vector<2x326xbf16> to vector<2x288xbf16>
    %32 = vector.extract_strided_slice %15 {offsets = [3, 0, 0], sizes = [1, 32, 2], strides = [1, 1, 1]} : vector<9x32x2xbf16> to vector<1x32x2xbf16>
    %33 = vector.shape_cast %32 : vector<1x32x2xbf16> to vector<32x2xbf16>
    %cst_31 = arith.constant dense<0.000000e+00> : vector<32x288xf32>
    %34 = tpu.matmul %33, %31, %cst_31 {dimension_numbers = #tpu.dot_dimension_numbers<[1], [0], [0], [1], [0, 0, 1, 1], [], []>} : vector<32x2xbf16>, vector<2x288xbf16>, vector<32x288xf32> -> vector<32x288xf32>
    %35 = arith.addf %30, %34 : vector<32x288xf32>
    %36 = vector.extract_strided_slice %14 {offsets = [0, 19], sizes = [2, 288], strides = [1, 1]} : vector<2x326xbf16> to vector<2x288xbf16>
    %37 = vector.extract_strided_slice %15 {offsets = [4, 0, 0], sizes = [1, 32, 2], strides = [1, 1, 1]} : vector<9x32x2xbf16> to vector<1x32x2xbf16>
    %38 = vector.shape_cast %37 : vector<1x32x2xbf16> to vector<32x2xbf16>
    %cst_32 = arith.constant dense<0.000000e+00> : vector<32x288xf32>
    %39 = tpu.matmul %38, %36, %cst_32 {dimension_numbers = #tpu.dot_dimension_numbers<[1], [0], [0], [1], [0, 0, 1, 1], [], []>} : vector<32x2xbf16>, vector<2x288xbf16>, vector<32x288xf32> -> vector<32x288xf32>
    %40 = arith.addf %35, %39 : vector<32x288xf32>
    %41 = vector.extract_strided_slice %14 {offsets = [0, 20], sizes = [2, 288], strides = [1, 1]} : vector<2x326xbf16> to vector<2x288xbf16>
    %42 = vector.extract_strided_slice %15 {offsets = [5, 0, 0], sizes = [1, 32, 2], strides = [1, 1, 1]} : vector<9x32x2xbf16> to vector<1x32x2xbf16>
    %43 = vector.shape_cast %42 : vector<1x32x2xbf16> to vector<32x2xbf16>
    %cst_33 = arith.constant dense<0.000000e+00> : vector<32x288xf32>
    %44 = tpu.matmul %43, %41, %cst_33 {dimension_numbers = #tpu.dot_dimension_numbers<[1], [0], [0], [1], [0, 0, 1, 1], [], []>} : vector<32x2xbf16>, vector<2x288xbf16>, vector<32x288xf32> -> vector<32x288xf32>
    %45 = arith.addf %40, %44 : vector<32x288xf32>
    %46 = vector.extract_strided_slice %14 {offsets = [0, 36], sizes = [2, 288], strides = [1, 1]} : vector<2x326xbf16> to vector<2x288xbf16>
    %47 = vector.extract_strided_slice %15 {offsets = [6, 0, 0], sizes = [1, 32, 2], strides = [1, 1, 1]} : vector<9x32x2xbf16> to vector<1x32x2xbf16>
    %48 = vector.shape_cast %47 : vector<1x32x2xbf16> to vector<32x2xbf16>
    %cst_34 = arith.constant dense<0.000000e+00> : vector<32x288xf32>
    %49 = tpu.matmul %48, %46, %cst_34 {dimension_numbers = #tpu.dot_dimension_numbers<[1], [0], [0], [1], [0, 0, 1, 1], [], []>} : vector<32x2xbf16>, vector<2x288xbf16>, vector<32x288xf32> -> vector<32x288xf32>
    %50 = arith.addf %45, %49 : vector<32x288xf32>
    %51 = vector.extract_strided_slice %14 {offsets = [0, 37], sizes = [2, 288], strides = [1, 1]} : vector<2x326xbf16> to vector<2x288xbf16>
    %52 = vector.extract_strided_slice %15 {offsets = [7, 0, 0], sizes = [1, 32, 2], strides = [1, 1, 1]} : vector<9x32x2xbf16> to vector<1x32x2xbf16>
    %53 = vector.shape_cast %52 : vector<1x32x2xbf16> to vector<32x2xbf16>
    %cst_35 = arith.constant dense<0.000000e+00> : vector<32x288xf32>
    %54 = tpu.matmul %53, %51, %cst_35 {dimension_numbers = #tpu.dot_dimension_numbers<[1], [0], [0], [1], [0, 0, 1, 1], [], []>} : vector<32x2xbf16>, vector<2x288xbf16>, vector<32x288xf32> -> vector<32x288xf32>
    %55 = arith.addf %50, %54 : vector<32x288xf32>
    %56 = vector.extract_strided_slice %14 {offsets = [0, 38], sizes = [2, 288], strides = [1, 1]} : vector<2x326xbf16> to vector<2x288xbf16>
    %57 = vector.extract_strided_slice %15 {offsets = [8, 0, 0], sizes = [1, 32, 2], strides = [1, 1, 1]} : vector<9x32x2xbf16> to vector<1x32x2xbf16>
    %58 = vector.shape_cast %57 : vector<1x32x2xbf16> to vector<32x2xbf16>
    %cst_36 = arith.constant dense<0.000000e+00> : vector<32x288xf32>
    %59 = tpu.matmul %58, %56, %cst_36 {dimension_numbers = #tpu.dot_dimension_numbers<[1], [0], [0], [1], [0, 0, 1, 1], [], []>} : vector<32x2xbf16>, vector<2x288xbf16>, vector<32x288xf32> -> vector<32x288xf32>
    %60 = arith.addf %55, %59 : vector<32x288xf32>
    %61 = vector.broadcast %16 : vector<32x1xf32> to vector<32x288xf32>
    %62 = arith.addf %60, %61 : vector<32x288xf32>
    %cst_37 = arith.constant 0.000000e+00 : f32
    %63 = vector.broadcast %cst_37 : f32 to vector<32x288xf32>
    %64 = arith.cmpf oge, %62, %63 : vector<32x288xf32>
    %cst_38 = arith.constant 0.00999999977 : f32
    %65 = vector.broadcast %cst_38 : f32 to vector<32x288xf32>
    %66 = arith.mulf %65, %62 : vector<32x288xf32>
    %67 = arith.select %64, %62, %66 : vector<32x288xi1>, vector<32x288xf32>
    %68 = vector.broadcast %0 : vector<1x288xf32> to vector<32x288xf32>
    %69 = arith.mulf %67, %68 : vector<32x288xf32>
    %70 = arith.truncf %69 : vector<32x288xf32> to vector<32x288xbf16>
    %c0_39 = arith.constant 0 : index
    %c19 = arith.constant 19 : index
    %71 = vector.load %arg10[%c0_39, %c19] : memref<32x326xbf16, #tpu.memory_space<vmem>>, vector<32x288xbf16>
    tpu.vector_store %arg10[%c0_39, %c19], %70 {strides = array<i32>} : memref<32x326xbf16, #tpu.memory_space<vmem>>, vector<32x288xbf16>,
    %c0_40 = arith.constant 0 : index
    %c0_41 = arith.constant 0 : index
    %c0_42 = arith.constant 0 : index
    %c0_43 = arith.constant 0 : index
    %72 = vector.load %arg5[%c0_40, %c0_41, %c0_42, %c0_43] : memref<7x9x32x32xbf16, #tpu.memory_space<vmem>>, vector<1x9x32x32xbf16>
    %73 = vector.shape_cast %72 : vector<1x9x32x32xbf16> to vector<9x32x32xbf16>
    %c0_44 = arith.constant 0 : index
    %c0_45 = arith.constant 0 : index
    %c0_46 = arith.constant 0 : index
    %74 = vector.load %arg6[%c0_44, %c0_45, %c0_46] : memref<7x32x1xf32, #tpu.memory_space<vmem>>, vector<1x32x1xf32>
    %75 = vector.shape_cast %74 : vector<1x32x1xf32> to vector<32x1xf32>
    %c0_47 = arith.constant 0 : index
    %c0_48 = arith.constant 0 : index
    %76 = vector.load %arg10[%c0_47, %c0_48] : memref<32x326xbf16, #tpu.memory_space<vmem>>, vector<32x288xbf16>
    %77 = vector.extract_strided_slice %73 {offsets = [0, 0, 0], sizes = [1, 32, 32], strides = [1, 1, 1]} : vector<9x32x32xbf16> to vector<1x32x32xbf16>
    %78 = vector.shape_cast %77 : vector<1x32x32xbf16> to vector<32x32xbf16>
    %cst_49 = arith.constant dense<0.000000e+00> : vector<32x288xf32>
    %79 = tpu.matmul %78, %76, %cst_49 {dimension_numbers = #tpu.dot_dimension_numbers<[1], [0], [0], [1], [0, 0, 1, 1], [], []>} : vector<32x32xbf16>, vector<32x288xbf16>, vector<32x288xf32> -> vector<32x288xf32>
    %c0_50 = arith.constant 0 : index
    %c1 = arith.constant 1 : index
    %80 = vector.load %arg10[%c0_50, %c1] : memref<32x326xbf16, #tpu.memory_space<vmem>>, vector<32x288xbf16>
    %81 = vector.extract_strided_slice %73 {offsets = [1, 0, 0], sizes = [1, 32, 32], strides = [1, 1, 1]} : vector<9x32x32xbf16> to vector<1x32x32xbf16>
    %82 = vector.shape_cast %81 : vector<1x32x32xbf16> to vector<32x32xbf16>
    %cst_51 = arith.constant dense<0.000000e+00> : vector<32x288xf32>
    %83 = tpu.matmul %82, %80, %cst_51 {dimension_numbers = #tpu.dot_dimension_numbers<[1], [0], [0], [1], [0, 0, 1, 1], [], []>} : vector<32x32xbf16>, vector<32x288xbf16>, vector<32x288xf32> -> vector<32x288xf32>
    %84 = arith.addf %79, %83 : vector<32x288xf32>
    %c0_52 = arith.constant 0 : index
    %c2 = arith.constant 2 : index
    %85 = vector.load %arg10[%c0_52, %c2] : memref<32x326xbf16, #tpu.memory_space<vmem>>, vector<32x288xbf16>
    %86 = vector.extract_strided_slice %73 {offsets = [2, 0, 0], sizes = [1, 32, 32], strides = [1, 1, 1]} : vector<9x32x32xbf16> to vector<1x32x32xbf16>
    %87 = vector.shape_cast %86 : vector<1x32x32xbf16> to vector<32x32xbf16>
    %cst_53 = arith.constant dense<0.000000e+00> : vector<32x288xf32>
    %88 = tpu.matmul %87, %85, %cst_53 {dimension_numbers = #tpu.dot_dimension_numbers<[1], [0], [0], [1], [0, 0, 1, 1], [], []>} : vector<32x32xbf16>, vector<32x288xbf16>, vector<32x288xf32> -> vector<32x288xf32>
    %89 = arith.addf %84, %88 : vector<32x288xf32>
    %c0_54 = arith.constant 0 : index
    %c18 = arith.constant 18 : index
    %90 = vector.load %arg10[%c0_54, %c18] : memref<32x326xbf16, #tpu.memory_space<vmem>>, vector<32x288xbf16>
    %91 = vector.extract_strided_slice %73 {offsets = [3, 0, 0], sizes = [1, 32, 32], strides = [1, 1, 1]} : vector<9x32x32xbf16> to vector<1x32x32xbf16>
    %92 = vector.shape_cast %91 : vector<1x32x32xbf16> to vector<32x32xbf16>
    %cst_55 = arith.constant dense<0.000000e+00> : vector<32x288xf32>
    %93 = tpu.matmul %92, %90, %cst_55 {dimension_numbers = #tpu.dot_dimension_numbers<[1], [0], [0], [1], [0, 0, 1, 1], [], []>} : vector<32x32xbf16>, vector<32x288xbf16>, vector<32x288xf32> -> vector<32x288xf32>
    %94 = arith.addf %89, %93 : vector<32x288xf32>
    %c0_56 = arith.constant 0 : index
    %c19_57 = arith.constant 19 : index
    %95 = vector.load %arg10[%c0_56, %c19_57] : memref<32x326xbf16, #tpu.memory_space<vmem>>, vector<32x288xbf16>
    %96 = vector.extract_strided_slice %73 {offsets = [4, 0, 0], sizes = [1, 32, 32], strides = [1, 1, 1]} : vector<9x32x32xbf16> to vector<1x32x32xbf16>
    %97 = vector.shape_cast %96 : vector<1x32x32xbf16> to vector<32x32xbf16>
    %cst_58 = arith.constant dense<0.000000e+00> : vector<32x288xf32>
    %98 = tpu.matmul %97, %95, %cst_58 {dimension_numbers = #tpu.dot_dimension_numbers<[1], [0], [0], [1], [0, 0, 1, 1], [], []>} : vector<32x32xbf16>, vector<32x288xbf16>, vector<32x288xf32> -> vector<32x288xf32>
    %99 = arith.addf %94, %98 : vector<32x288xf32>
    %c0_59 = arith.constant 0 : index
    %c20 = arith.constant 20 : index
    %100 = vector.load %arg10[%c0_59, %c20] : memref<32x326xbf16, #tpu.memory_space<vmem>>, vector<32x288xbf16>
    %101 = vector.extract_strided_slice %73 {offsets = [5, 0, 0], sizes = [1, 32, 32], strides = [1, 1, 1]} : vector<9x32x32xbf16> to vector<1x32x32xbf16>
    %102 = vector.shape_cast %101 : vector<1x32x32xbf16> to vector<32x32xbf16>
    %cst_60 = arith.constant dense<0.000000e+00> : vector<32x288xf32>
    %103 = tpu.matmul %102, %100, %cst_60 {dimension_numbers = #tpu.dot_dimension_numbers<[1], [0], [0], [1], [0, 0, 1, 1], [], []>} : vector<32x32xbf16>, vector<32x288xbf16>, vector<32x288xf32> -> vector<32x288xf32>
    %104 = arith.addf %99, %103 : vector<32x288xf32>
    %c0_61 = arith.constant 0 : index
    %c36 = arith.constant 36 : index
    %105 = vector.load %arg10[%c0_61, %c36] : memref<32x326xbf16, #tpu.memory_space<vmem>>, vector<32x288xbf16>
    %106 = vector.extract_strided_slice %73 {offsets = [6, 0, 0], sizes = [1, 32, 32], strides = [1, 1, 1]} : vector<9x32x32xbf16> to vector<1x32x32xbf16>
    %107 = vector.shape_cast %106 : vector<1x32x32xbf16> to vector<32x32xbf16>
    %cst_62 = arith.constant dense<0.000000e+00> : vector<32x288xf32>
    %108 = tpu.matmul %107, %105, %cst_62 {dimension_numbers = #tpu.dot_dimension_numbers<[1], [0], [0], [1], [0, 0, 1, 1], [], []>} : vector<32x32xbf16>, vector<32x288xbf16>, vector<32x288xf32> -> vector<32x288xf32>
    %109 = arith.addf %104, %108 : vector<32x288xf32>
    %c0_63 = arith.constant 0 : index
    %c37 = arith.constant 37 : index
    %110 = vector.load %arg10[%c0_63, %c37] : memref<32x326xbf16, #tpu.memory_space<vmem>>, vector<32x288xbf16>
    %111 = vector.extract_strided_slice %73 {offsets = [7, 0, 0], sizes = [1, 32, 32], strides = [1, 1, 1]} : vector<9x32x32xbf16> to vector<1x32x32xbf16>
    %112 = vector.shape_cast %111 : vector<1x32x32xbf16> to vector<32x32xbf16>
    %cst_64 = arith.constant dense<0.000000e+00> : vector<32x288xf32>
    %113 = tpu.matmul %112, %110, %cst_64 {dimension_numbers = #tpu.dot_dimension_numbers<[1], [0], [0], [1], [0, 0, 1, 1], [], []>} : vector<32x32xbf16>, vector<32x288xbf16>, vector<32x288xf32> -> vector<32x288xf32>
    %114 = arith.addf %109, %113 : vector<32x288xf32>
    %c0_65 = arith.constant 0 : index
    %c38 = arith.constant 38 : index
    %115 = vector.load %arg10[%c0_65, %c38] : memref<32x326xbf16, #tpu.memory_space<vmem>>, vector<32x288xbf16>
    %116 = vector.extract_strided_slice %73 {offsets = [8, 0, 0], sizes = [1, 32, 32], strides = [1, 1, 1]} : vector<9x32x32xbf16> to vector<1x32x32xbf16>
    %117 = vector.shape_cast %116 : vector<1x32x32xbf16> to vector<32x32xbf16>
    %cst_66 = arith.constant dense<0.000000e+00> : vector<32x288xf32>
    %118 = tpu.matmul %117, %115, %cst_66 {dimension_numbers = #tpu.dot_dimension_numbers<[1], [0], [0], [1], [0, 0, 1, 1], [], []>} : vector<32x32xbf16>, vector<32x288xbf16>, vector<32x288xf32> -> vector<32x288xf32>
    %119 = arith.addf %114, %118 : vector<32x288xf32>
    %120 = vector.broadcast %75 : vector<32x1xf32> to vector<32x288xf32>
    %121 = arith.addf %119, %120 : vector<32x288xf32>
    %cst_67 = arith.constant 0.000000e+00 : f32
    %122 = vector.broadcast %cst_67 : f32 to vector<32x288xf32>
    %123 = arith.cmpf oge, %121, %122 : vector<32x288xf32>
    %cst_68 = arith.constant 0.00999999977 : f32
    %124 = vector.broadcast %cst_68 : f32 to vector<32x288xf32>
    %125 = arith.mulf %124, %121 : vector<32x288xf32>
    %126 = arith.select %123, %121, %125 : vector<32x288xi1>, vector<32x288xf32>
    %127 = vector.broadcast %0 : vector<1x288xf32> to vector<32x288xf32>
    %128 = arith.mulf %126, %127 : vector<32x288xf32>
    %129 = arith.truncf %128 : vector<32x288xf32> to vector<32x288xbf16>
    %c0_69 = arith.constant 0 : index
    %c19_70 = arith.constant 19 : index
    %130 = vector.load %arg11[%c0_69, %c19_70] : memref<32x326xbf16, #tpu.memory_space<vmem>>, vector<32x288xbf16>
    tpu.vector_store %arg11[%c0_69, %c19_70], %129 {strides = array<i32>} : memref<32x326xbf16, #tpu.memory_space<vmem>>, vector<32x288xbf16>,
    %c1_71 = arith.constant 1 : index
    %c0_72 = arith.constant 0 : index
    %c0_73 = arith.constant 0 : index
    %c0_74 = arith.constant 0 : index
    %131 = vector.load %arg5[%c1_71, %c0_72, %c0_73, %c0_74] : memref<7x9x32x32xbf16, #tpu.memory_space<vmem>>, vector<1x9x32x32xbf16>
    %132 = vector.shape_cast %131 : vector<1x9x32x32xbf16> to vector<9x32x32xbf16>
    %c1_75 = arith.constant 1 : index
    %c0_76 = arith.constant 0 : index
    %c0_77 = arith.constant 0 : index
    %133 = vector.load %arg6[%c1_75, %c0_76, %c0_77] : memref<7x32x1xf32, #tpu.memory_space<vmem>>, vector<1x32x1xf32>
    %134 = vector.shape_cast %133 : vector<1x32x1xf32> to vector<32x1xf32>
    %c0_78 = arith.constant 0 : index
    %c0_79 = arith.constant 0 : index
    %135 = vector.load %arg11[%c0_78, %c0_79] : memref<32x326xbf16, #tpu.memory_space<vmem>>, vector<32x288xbf16>
    %136 = vector.extract_strided_slice %132 {offsets = [0, 0, 0], sizes = [1, 32, 32], strides = [1, 1, 1]} : vector<9x32x32xbf16> to vector<1x32x32xbf16>
    %137 = vector.shape_cast %136 : vector<1x32x32xbf16> to vector<32x32xbf16>
    %cst_80 = arith.constant dense<0.000000e+00> : vector<32x288xf32>
    %138 = tpu.matmul %137, %135, %cst_80 {dimension_numbers = #tpu.dot_dimension_numbers<[1], [0], [0], [1], [0, 0, 1, 1], [], []>} : vector<32x32xbf16>, vector<32x288xbf16>, vector<32x288xf32> -> vector<32x288xf32>
    %c0_81 = arith.constant 0 : index
    %c1_82 = arith.constant 1 : index
    %139 = vector.load %arg11[%c0_81, %c1_82] : memref<32x326xbf16, #tpu.memory_space<vmem>>, vector<32x288xbf16>
    %140 = vector.extract_strided_slice %132 {offsets = [1, 0, 0], sizes = [1, 32, 32], strides = [1, 1, 1]} : vector<9x32x32xbf16> to vector<1x32x32xbf16>
    %141 = vector.shape_cast %140 : vector<1x32x32xbf16> to vector<32x32xbf16>
    %cst_83 = arith.constant dense<0.000000e+00> : vector<32x288xf32>
    %142 = tpu.matmul %141, %139, %cst_83 {dimension_numbers = #tpu.dot_dimension_numbers<[1], [0], [0], [1], [0, 0, 1, 1], [], []>} : vector<32x32xbf16>, vector<32x288xbf16>, vector<32x288xf32> -> vector<32x288xf32>
    %143 = arith.addf %138, %142 : vector<32x288xf32>
    %c0_84 = arith.constant 0 : index
    %c2_85 = arith.constant 2 : index
    %144 = vector.load %arg11[%c0_84, %c2_85] : memref<32x326xbf16, #tpu.memory_space<vmem>>, vector<32x288xbf16>
    %145 = vector.extract_strided_slice %132 {offsets = [2, 0, 0], sizes = [1, 32, 32], strides = [1, 1, 1]} : vector<9x32x32xbf16> to vector<1x32x32xbf16>
    %146 = vector.shape_cast %145 : vector<1x32x32xbf16> to vector<32x32xbf16>
    %cst_86 = arith.constant dense<0.000000e+00> : vector<32x288xf32>
    %147 = tpu.matmul %146, %144, %cst_86 {dimension_numbers = #tpu.dot_dimension_numbers<[1], [0], [0], [1], [0, 0, 1, 1], [], []>} : vector<32x32xbf16>, vector<32x288xbf16>, vector<32x288xf32> -> vector<32x288xf32>
    %148 = arith.addf %143, %147 : vector<32x288xf32>
    %c0_87 = arith.constant 0 : index
    %c18_88 = arith.constant 18 : index
    %149 = vector.load %arg11[%c0_87, %c18_88] : memref<32x326xbf16, #tpu.memory_space<vmem>>, vector<32x288xbf16>
    %150 = vector.extract_strided_slice %132 {offsets = [3, 0, 0], sizes = [1, 32, 32], strides = [1, 1, 1]} : vector<9x32x32xbf16> to vector<1x32x32xbf16>
    %151 = vector.shape_cast %150 : vector<1x32x32xbf16> to vector<32x32xbf16>
    %cst_89 = arith.constant dense<0.000000e+00> : vector<32x288xf32>
    %152 = tpu.matmul %151, %149, %cst_89 {dimension_numbers = #tpu.dot_dimension_numbers<[1], [0], [0], [1], [0, 0, 1, 1], [], []>} : vector<32x32xbf16>, vector<32x288xbf16>, vector<32x288xf32> -> vector<32x288xf32>
    %153 = arith.addf %148, %152 : vector<32x288xf32>
    %c0_90 = arith.constant 0 : index
    %c19_91 = arith.constant 19 : index
    %154 = vector.load %arg11[%c0_90, %c19_91] : memref<32x326xbf16, #tpu.memory_space<vmem>>, vector<32x288xbf16>
    %155 = vector.extract_strided_slice %132 {offsets = [4, 0, 0], sizes = [1, 32, 32], strides = [1, 1, 1]} : vector<9x32x32xbf16> to vector<1x32x32xbf16>
    %156 = vector.shape_cast %155 : vector<1x32x32xbf16> to vector<32x32xbf16>
    %cst_92 = arith.constant dense<0.000000e+00> : vector<32x288xf32>
    %157 = tpu.matmul %156, %154, %cst_92 {dimension_numbers = #tpu.dot_dimension_numbers<[1], [0], [0], [1], [0, 0, 1, 1], [], []>} : vector<32x32xbf16>, vector<32x288xbf16>, vector<32x288xf32> -> vector<32x288xf32>
    %158 = arith.addf %153, %157 : vector<32x288xf32>
    %c0_93 = arith.constant 0 : index
    %c20_94 = arith.constant 20 : index
    %159 = vector.load %arg11[%c0_93, %c20_94] : memref<32x326xbf16, #tpu.memory_space<vmem>>, vector<32x288xbf16>
    %160 = vector.extract_strided_slice %132 {offsets = [5, 0, 0], sizes = [1, 32, 32], strides = [1, 1, 1]} : vector<9x32x32xbf16> to vector<1x32x32xbf16>
    %161 = vector.shape_cast %160 : vector<1x32x32xbf16> to vector<32x32xbf16>
    %cst_95 = arith.constant dense<0.000000e+00> : vector<32x288xf32>
    %162 = tpu.matmul %161, %159, %cst_95 {dimension_numbers = #tpu.dot_dimension_numbers<[1], [0], [0], [1], [0, 0, 1, 1], [], []>} : vector<32x32xbf16>, vector<32x288xbf16>, vector<32x288xf32> -> vector<32x288xf32>
    %163 = arith.addf %158, %162 : vector<32x288xf32>
    %c0_96 = arith.constant 0 : index
    %c36_97 = arith.constant 36 : index
    %164 = vector.load %arg11[%c0_96, %c36_97] : memref<32x326xbf16, #tpu.memory_space<vmem>>, vector<32x288xbf16>
    %165 = vector.extract_strided_slice %132 {offsets = [6, 0, 0], sizes = [1, 32, 32], strides = [1, 1, 1]} : vector<9x32x32xbf16> to vector<1x32x32xbf16>
    %166 = vector.shape_cast %165 : vector<1x32x32xbf16> to vector<32x32xbf16>
    %cst_98 = arith.constant dense<0.000000e+00> : vector<32x288xf32>
    %167 = tpu.matmul %166, %164, %cst_98 {dimension_numbers = #tpu.dot_dimension_numbers<[1], [0], [0], [1], [0, 0, 1, 1], [], []>} : vector<32x32xbf16>, vector<32x288xbf16>, vector<32x288xf32> -> vector<32x288xf32>
    %168 = arith.addf %163, %167 : vector<32x288xf32>
    %c0_99 = arith.constant 0 : index
    %c37_100 = arith.constant 37 : index
    %169 = vector.load %arg11[%c0_99, %c37_100] : memref<32x326xbf16, #tpu.memory_space<vmem>>, vector<32x288xbf16>
    %170 = vector.extract_strided_slice %132 {offsets = [7, 0, 0], sizes = [1, 32, 32], strides = [1, 1, 1]} : vector<9x32x32xbf16> to vector<1x32x32xbf16>
    %171 = vector.shape_cast %170 : vector<1x32x32xbf16> to vector<32x32xbf16>
    %cst_101 = arith.constant dense<0.000000e+00> : vector<32x288xf32>
    %172 = tpu.matmul %171, %169, %cst_101 {dimension_numbers = #tpu.dot_dimension_numbers<[1], [0], [0], [1], [0, 0, 1, 1], [], []>} : vector<32x32xbf16>, vector<32x288xbf16>, vector<32x288xf32> -> vector<32x288xf32>
    %173 = arith.addf %168, %172 : vector<32x288xf32>
    %c0_102 = arith.constant 0 : index
    %c38_103 = arith.constant 38 : index
    %174 = vector.load %arg11[%c0_102, %c38_103] : memref<32x326xbf16, #tpu.memory_space<vmem>>, vector<32x288xbf16>
    %175 = vector.extract_strided_slice %132 {offsets = [8, 0, 0], sizes = [1, 32, 32], strides = [1, 1, 1]} : vector<9x32x32xbf16> to vector<1x32x32xbf16>
    %176 = vector.shape_cast %175 : vector<1x32x32xbf16> to vector<32x32xbf16>
    %cst_104 = arith.constant dense<0.000000e+00> : vector<32x288xf32>
    %177 = tpu.matmul %176, %174, %cst_104 {dimension_numbers = #tpu.dot_dimension_numbers<[1], [0], [0], [1], [0, 0, 1, 1], [], []>} : vector<32x32xbf16>, vector<32x288xbf16>, vector<32x288xf32> -> vector<32x288xf32>
    %178 = arith.addf %173, %177 : vector<32x288xf32>
    %179 = vector.broadcast %134 : vector<32x1xf32> to vector<32x288xf32>
    %180 = arith.addf %178, %179 : vector<32x288xf32>
    %cst_105 = arith.constant 0.000000e+00 : f32
    %181 = vector.broadcast %cst_105 : f32 to vector<32x288xf32>
    %182 = arith.cmpf oge, %180, %181 : vector<32x288xf32>
    %cst_106 = arith.constant 0.00999999977 : f32
    %183 = vector.broadcast %cst_106 : f32 to vector<32x288xf32>
    %184 = arith.mulf %183, %180 : vector<32x288xf32>
    %185 = arith.select %182, %180, %184 : vector<32x288xi1>, vector<32x288xf32>
    %186 = vector.broadcast %0 : vector<1x288xf32> to vector<32x288xf32>
    %187 = arith.mulf %185, %186 : vector<32x288xf32>
    %188 = arith.truncf %187 : vector<32x288xf32> to vector<32x288xbf16>
    %c0_107 = arith.constant 0 : index
    %c19_108 = arith.constant 19 : index
    %189 = vector.load %arg12[%c0_107, %c19_108] : memref<32x326xbf16, #tpu.memory_space<vmem>>, vector<32x288xbf16>
    tpu.vector_store %arg12[%c0_107, %c19_108], %188 {strides = array<i32>} : memref<32x326xbf16, #tpu.memory_space<vmem>>, vector<32x288xbf16>,
    %c2_109 = arith.constant 2 : index
    %c0_110 = arith.constant 0 : index
    %c0_111 = arith.constant 0 : index
    %c0_112 = arith.constant 0 : index
    %190 = vector.load %arg5[%c2_109, %c0_110, %c0_111, %c0_112] : memref<7x9x32x32xbf16, #tpu.memory_space<vmem>>, vector<1x9x32x32xbf16>
    %191 = vector.shape_cast %190 : vector<1x9x32x32xbf16> to vector<9x32x32xbf16>
    %c2_113 = arith.constant 2 : index
    %c0_114 = arith.constant 0 : index
    %c0_115 = arith.constant 0 : index
    %192 = vector.load %arg6[%c2_113, %c0_114, %c0_115] : memref<7x32x1xf32, #tpu.memory_space<vmem>>, vector<1x32x1xf32>
    %193 = vector.shape_cast %192 : vector<1x32x1xf32> to vector<32x1xf32>
    %c0_116 = arith.constant 0 : index
    %c0_117 = arith.constant 0 : index
    %194 = vector.load %arg12[%c0_116, %c0_117] : memref<32x326xbf16, #tpu.memory_space<vmem>>, vector<32x288xbf16>
    %195 = vector.extract_strided_slice %191 {offsets = [0, 0, 0], sizes = [1, 32, 32], strides = [1, 1, 1]} : vector<9x32x32xbf16> to vector<1x32x32xbf16>
    %196 = vector.shape_cast %195 : vector<1x32x32xbf16> to vector<32x32xbf16>
    %cst_118 = arith.constant dense<0.000000e+00> : vector<32x288xf32>
    %197 = tpu.matmul %196, %194, %cst_118 {dimension_numbers = #tpu.dot_dimension_numbers<[1], [0], [0], [1], [0, 0, 1, 1], [], []>} : vector<32x32xbf16>, vector<32x288xbf16>, vector<32x288xf32> -> vector<32x288xf32>
    %c0_119 = arith.constant 0 : index
    %c1_120 = arith.constant 1 : index
    %198 = vector.load %arg12[%c0_119, %c1_120] : memref<32x326xbf16, #tpu.memory_space<vmem>>, vector<32x288xbf16>
    %199 = vector.extract_strided_slice %191 {offsets = [1, 0, 0], sizes = [1, 32, 32], strides = [1, 1, 1]} : vector<9x32x32xbf16> to vector<1x32x32xbf16>
    %200 = vector.shape_cast %199 : vector<1x32x32xbf16> to vector<32x32xbf16>
    %cst_121 = arith.constant dense<0.000000e+00> : vector<32x288xf32>
    %201 = tpu.matmul %200, %198, %cst_121 {dimension_numbers = #tpu.dot_dimension_numbers<[1], [0], [0], [1], [0, 0, 1, 1], [], []>} : vector<32x32xbf16>, vector<32x288xbf16>, vector<32x288xf32> -> vector<32x288xf32>
    %202 = arith.addf %197, %201 : vector<32x288xf32>
    %c0_122 = arith.constant 0 : index
    %c2_123 = arith.constant 2 : index
    %203 = vector.load %arg12[%c0_122, %c2_123] : memref<32x326xbf16, #tpu.memory_space<vmem>>, vector<32x288xbf16>
    %204 = vector.extract_strided_slice %191 {offsets = [2, 0, 0], sizes = [1, 32, 32], strides = [1, 1, 1]} : vector<9x32x32xbf16> to vector<1x32x32xbf16>
    %205 = vector.shape_cast %204 : vector<1x32x32xbf16> to vector<32x32xbf16>
    %cst_124 = arith.constant dense<0.000000e+00> : vector<32x288xf32>
    %206 = tpu.matmul %205, %203, %cst_124 {dimension_numbers = #tpu.dot_dimension_numbers<[1], [0], [0], [1], [0, 0, 1, 1], [], []>} : vector<32x32xbf16>, vector<32x288xbf16>, vector<32x288xf32> -> vector<32x288xf32>
    %207 = arith.addf %202, %206 : vector<32x288xf32>
    %c0_125 = arith.constant 0 : index
    %c18_126 = arith.constant 18 : index
    %208 = vector.load %arg12[%c0_125, %c18_126] : memref<32x326xbf16, #tpu.memory_space<vmem>>, vector<32x288xbf16>
    %209 = vector.extract_strided_slice %191 {offsets = [3, 0, 0], sizes = [1, 32, 32], strides = [1, 1, 1]} : vector<9x32x32xbf16> to vector<1x32x32xbf16>
    %210 = vector.shape_cast %209 : vector<1x32x32xbf16> to vector<32x32xbf16>
    %cst_127 = arith.constant dense<0.000000e+00> : vector<32x288xf32>
    %211 = tpu.matmul %210, %208, %cst_127 {dimension_numbers = #tpu.dot_dimension_numbers<[1], [0], [0], [1], [0, 0, 1, 1], [], []>} : vector<32x32xbf16>, vector<32x288xbf16>, vector<32x288xf32> -> vector<32x288xf32>
    %212 = arith.addf %207, %211 : vector<32x288xf32>
    %c0_128 = arith.constant 0 : index
    %c19_129 = arith.constant 19 : index
    %213 = vector.load %arg12[%c0_128, %c19_129] : memref<32x326xbf16, #tpu.memory_space<vmem>>, vector<32x288xbf16>
    %214 = vector.extract_strided_slice %191 {offsets = [4, 0, 0], sizes = [1, 32, 32], strides = [1, 1, 1]} : vector<9x32x32xbf16> to vector<1x32x32xbf16>
    %215 = vector.shape_cast %214 : vector<1x32x32xbf16> to vector<32x32xbf16>
    %cst_130 = arith.constant dense<0.000000e+00> : vector<32x288xf32>
    %216 = tpu.matmul %215, %213, %cst_130 {dimension_numbers = #tpu.dot_dimension_numbers<[1], [0], [0], [1], [0, 0, 1, 1], [], []>} : vector<32x32xbf16>, vector<32x288xbf16>, vector<32x288xf32> -> vector<32x288xf32>
    %217 = arith.addf %212, %216 : vector<32x288xf32>
    %c0_131 = arith.constant 0 : index
    %c20_132 = arith.constant 20 : index
    %218 = vector.load %arg12[%c0_131, %c20_132] : memref<32x326xbf16, #tpu.memory_space<vmem>>, vector<32x288xbf16>
    %219 = vector.extract_strided_slice %191 {offsets = [5, 0, 0], sizes = [1, 32, 32], strides = [1, 1, 1]} : vector<9x32x32xbf16> to vector<1x32x32xbf16>
    %220 = vector.shape_cast %219 : vector<1x32x32xbf16> to vector<32x32xbf16>
    %cst_133 = arith.constant dense<0.000000e+00> : vector<32x288xf32>
    %221 = tpu.matmul %220, %218, %cst_133 {dimension_numbers = #tpu.dot_dimension_numbers<[1], [0], [0], [1], [0, 0, 1, 1], [], []>} : vector<32x32xbf16>, vector<32x288xbf16>, vector<32x288xf32> -> vector<32x288xf32>
    %222 = arith.addf %217, %221 : vector<32x288xf32>
    %c0_134 = arith.constant 0 : index
    %c36_135 = arith.constant 36 : index
    %223 = vector.load %arg12[%c0_134, %c36_135] : memref<32x326xbf16, #tpu.memory_space<vmem>>, vector<32x288xbf16>
    %224 = vector.extract_strided_slice %191 {offsets = [6, 0, 0], sizes = [1, 32, 32], strides = [1, 1, 1]} : vector<9x32x32xbf16> to vector<1x32x32xbf16>
    %225 = vector.shape_cast %224 : vector<1x32x32xbf16> to vector<32x32xbf16>
    %cst_136 = arith.constant dense<0.000000e+00> : vector<32x288xf32>
    %226 = tpu.matmul %225, %223, %cst_136 {dimension_numbers = #tpu.dot_dimension_numbers<[1], [0], [0], [1], [0, 0, 1, 1], [], []>} : vector<32x32xbf16>, vector<32x288xbf16>, vector<32x288xf32> -> vector<32x288xf32>
    %227 = arith.addf %222, %226 : vector<32x288xf32>
    %c0_137 = arith.constant 0 : index
    %c37_138 = arith.constant 37 : index
    %228 = vector.load %arg12[%c0_137, %c37_138] : memref<32x326xbf16, #tpu.memory_space<vmem>>, vector<32x288xbf16>
    %229 = vector.extract_strided_slice %191 {offsets = [7, 0, 0], sizes = [1, 32, 32], strides = [1, 1, 1]} : vector<9x32x32xbf16> to vector<1x32x32xbf16>
    %230 = vector.shape_cast %229 : vector<1x32x32xbf16> to vector<32x32xbf16>
    %cst_139 = arith.constant dense<0.000000e+00> : vector<32x288xf32>
    %231 = tpu.matmul %230, %228, %cst_139 {dimension_numbers = #tpu.dot_dimension_numbers<[1], [0], [0], [1], [0, 0, 1, 1], [], []>} : vector<32x32xbf16>, vector<32x288xbf16>, vector<32x288xf32> -> vector<32x288xf32>
    %232 = arith.addf %227, %231 : vector<32x288xf32>
    %c0_140 = arith.constant 0 : index
    %c38_141 = arith.constant 38 : index
    %233 = vector.load %arg12[%c0_140, %c38_141] : memref<32x326xbf16, #tpu.memory_space<vmem>>, vector<32x288xbf16>
    %234 = vector.extract_strided_slice %191 {offsets = [8, 0, 0], sizes = [1, 32, 32], strides = [1, 1, 1]} : vector<9x32x32xbf16> to vector<1x32x32xbf16>
    %235 = vector.shape_cast %234 : vector<1x32x32xbf16> to vector<32x32xbf16>
    %cst_142 = arith.constant dense<0.000000e+00> : vector<32x288xf32>
    %236 = tpu.matmul %235, %233, %cst_142 {dimension_numbers = #tpu.dot_dimension_numbers<[1], [0], [0], [1], [0, 0, 1, 1], [], []>} : vector<32x32xbf16>, vector<32x288xbf16>, vector<32x288xf32> -> vector<32x288xf32>
    %237 = arith.addf %232, %236 : vector<32x288xf32>
    %238 = vector.broadcast %193 : vector<32x1xf32> to vector<32x288xf32>
    %239 = arith.addf %237, %238 : vector<32x288xf32>
    %cst_143 = arith.constant 0.000000e+00 : f32
    %240 = vector.broadcast %cst_143 : f32 to vector<32x288xf32>
    %241 = arith.cmpf oge, %239, %240 : vector<32x288xf32>
    %cst_144 = arith.constant 0.00999999977 : f32
    %242 = vector.broadcast %cst_144 : f32 to vector<32x288xf32>
    %243 = arith.mulf %242, %239 : vector<32x288xf32>
    %244 = arith.select %241, %239, %243 : vector<32x288xi1>, vector<32x288xf32>
    %245 = vector.broadcast %0 : vector<1x288xf32> to vector<32x288xf32>
    %246 = arith.mulf %244, %245 : vector<32x288xf32>
    %247 = arith.truncf %246 : vector<32x288xf32> to vector<32x288xbf16>
    %c0_145 = arith.constant 0 : index
    %c19_146 = arith.constant 19 : index
    %248 = vector.load %arg13[%c0_145, %c19_146] : memref<32x326xbf16, #tpu.memory_space<vmem>>, vector<32x288xbf16>
    tpu.vector_store %arg13[%c0_145, %c19_146], %247 {strides = array<i32>} : memref<32x326xbf16, #tpu.memory_space<vmem>>, vector<32x288xbf16>,
    %c3 = arith.constant 3 : index
    %c0_147 = arith.constant 0 : index
    %c0_148 = arith.constant 0 : index
    %c0_149 = arith.constant 0 : index
    %249 = vector.load %arg5[%c3, %c0_147, %c0_148, %c0_149] : memref<7x9x32x32xbf16, #tpu.memory_space<vmem>>, vector<1x9x32x32xbf16>
    %250 = vector.shape_cast %249 : vector<1x9x32x32xbf16> to vector<9x32x32xbf16>
    %c3_150 = arith.constant 3 : index
    %c0_151 = arith.constant 0 : index
    %c0_152 = arith.constant 0 : index
    %251 = vector.load %arg6[%c3_150, %c0_151, %c0_152] : memref<7x32x1xf32, #tpu.memory_space<vmem>>, vector<1x32x1xf32>
    %252 = vector.shape_cast %251 : vector<1x32x1xf32> to vector<32x1xf32>
    %c0_153 = arith.constant 0 : index
    %c0_154 = arith.constant 0 : index
    %253 = vector.load %arg13[%c0_153, %c0_154] : memref<32x326xbf16, #tpu.memory_space<vmem>>, vector<32x288xbf16>
    %254 = vector.extract_strided_slice %250 {offsets = [0, 0, 0], sizes = [1, 32, 32], strides = [1, 1, 1]} : vector<9x32x32xbf16> to vector<1x32x32xbf16>
    %255 = vector.shape_cast %254 : vector<1x32x32xbf16> to vector<32x32xbf16>
    %cst_155 = arith.constant dense<0.000000e+00> : vector<32x288xf32>
    %256 = tpu.matmul %255, %253, %cst_155 {dimension_numbers = #tpu.dot_dimension_numbers<[1], [0], [0], [1], [0, 0, 1, 1], [], []>} : vector<32x32xbf16>, vector<32x288xbf16>, vector<32x288xf32> -> vector<32x288xf32>
    %c0_156 = arith.constant 0 : index
    %c1_157 = arith.constant 1 : index
    %257 = vector.load %arg13[%c0_156, %c1_157] : memref<32x326xbf16, #tpu.memory_space<vmem>>, vector<32x288xbf16>
    %258 = vector.extract_strided_slice %250 {offsets = [1, 0, 0], sizes = [1, 32, 32], strides = [1, 1, 1]} : vector<9x32x32xbf16> to vector<1x32x32xbf16>
    %259 = vector.shape_cast %258 : vector<1x32x32xbf16> to vector<32x32xbf16>
    %cst_158 = arith.constant dense<0.000000e+00> : vector<32x288xf32>
    %260 = tpu.matmul %259, %257, %cst_158 {dimension_numbers = #tpu.dot_dimension_numbers<[1], [0], [0], [1], [0, 0, 1, 1], [], []>} : vector<32x32xbf16>, vector<32x288xbf16>, vector<32x288xf32> -> vector<32x288xf32>
    %261 = arith.addf %256, %260 : vector<32x288xf32>
    %c0_159 = arith.constant 0 : index
    %c2_160 = arith.constant 2 : index
    %262 = vector.load %arg13[%c0_159, %c2_160] : memref<32x326xbf16, #tpu.memory_space<vmem>>, vector<32x288xbf16>
    %263 = vector.extract_strided_slice %250 {offsets = [2, 0, 0], sizes = [1, 32, 32], strides = [1, 1, 1]} : vector<9x32x32xbf16> to vector<1x32x32xbf16>
    %264 = vector.shape_cast %263 : vector<1x32x32xbf16> to vector<32x32xbf16>
    %cst_161 = arith.constant dense<0.000000e+00> : vector<32x288xf32>
    %265 = tpu.matmul %264, %262, %cst_161 {dimension_numbers = #tpu.dot_dimension_numbers<[1], [0], [0], [1], [0, 0, 1, 1], [], []>} : vector<32x32xbf16>, vector<32x288xbf16>, vector<32x288xf32> -> vector<32x288xf32>
    %266 = arith.addf %261, %265 : vector<32x288xf32>
    %c0_162 = arith.constant 0 : index
    %c18_163 = arith.constant 18 : index
    %267 = vector.load %arg13[%c0_162, %c18_163] : memref<32x326xbf16, #tpu.memory_space<vmem>>, vector<32x288xbf16>
    %268 = vector.extract_strided_slice %250 {offsets = [3, 0, 0], sizes = [1, 32, 32], strides = [1, 1, 1]} : vector<9x32x32xbf16> to vector<1x32x32xbf16>
    %269 = vector.shape_cast %268 : vector<1x32x32xbf16> to vector<32x32xbf16>
    %cst_164 = arith.constant dense<0.000000e+00> : vector<32x288xf32>
    %270 = tpu.matmul %269, %267, %cst_164 {dimension_numbers = #tpu.dot_dimension_numbers<[1], [0], [0], [1], [0, 0, 1, 1], [], []>} : vector<32x32xbf16>, vector<32x288xbf16>, vector<32x288xf32> -> vector<32x288xf32>
    %271 = arith.addf %266, %270 : vector<32x288xf32>
    %c0_165 = arith.constant 0 : index
    %c19_166 = arith.constant 19 : index
    %272 = vector.load %arg13[%c0_165, %c19_166] : memref<32x326xbf16, #tpu.memory_space<vmem>>, vector<32x288xbf16>
    %273 = vector.extract_strided_slice %250 {offsets = [4, 0, 0], sizes = [1, 32, 32], strides = [1, 1, 1]} : vector<9x32x32xbf16> to vector<1x32x32xbf16>
    %274 = vector.shape_cast %273 : vector<1x32x32xbf16> to vector<32x32xbf16>
    %cst_167 = arith.constant dense<0.000000e+00> : vector<32x288xf32>
    %275 = tpu.matmul %274, %272, %cst_167 {dimension_numbers = #tpu.dot_dimension_numbers<[1], [0], [0], [1], [0, 0, 1, 1], [], []>} : vector<32x32xbf16>, vector<32x288xbf16>, vector<32x288xf32> -> vector<32x288xf32>
    %276 = arith.addf %271, %275 : vector<32x288xf32>
    %c0_168 = arith.constant 0 : index
    %c20_169 = arith.constant 20 : index
    %277 = vector.load %arg13[%c0_168, %c20_169] : memref<32x326xbf16, #tpu.memory_space<vmem>>, vector<32x288xbf16>
    %278 = vector.extract_strided_slice %250 {offsets = [5, 0, 0], sizes = [1, 32, 32], strides = [1, 1, 1]} : vector<9x32x32xbf16> to vector<1x32x32xbf16>
    %279 = vector.shape_cast %278 : vector<1x32x32xbf16> to vector<32x32xbf16>
    %cst_170 = arith.constant dense<0.000000e+00> : vector<32x288xf32>
    %280 = tpu.matmul %279, %277, %cst_170 {dimension_numbers = #tpu.dot_dimension_numbers<[1], [0], [0], [1], [0, 0, 1, 1], [], []>} : vector<32x32xbf16>, vector<32x288xbf16>, vector<32x288xf32> -> vector<32x288xf32>
    %281 = arith.addf %276, %280 : vector<32x288xf32>
    %c0_171 = arith.constant 0 : index
    %c36_172 = arith.constant 36 : index
    %282 = vector.load %arg13[%c0_171, %c36_172] : memref<32x326xbf16, #tpu.memory_space<vmem>>, vector<32x288xbf16>
    %283 = vector.extract_strided_slice %250 {offsets = [6, 0, 0], sizes = [1, 32, 32], strides = [1, 1, 1]} : vector<9x32x32xbf16> to vector<1x32x32xbf16>
    %284 = vector.shape_cast %283 : vector<1x32x32xbf16> to vector<32x32xbf16>
    %cst_173 = arith.constant dense<0.000000e+00> : vector<32x288xf32>
    %285 = tpu.matmul %284, %282, %cst_173 {dimension_numbers = #tpu.dot_dimension_numbers<[1], [0], [0], [1], [0, 0, 1, 1], [], []>} : vector<32x32xbf16>, vector<32x288xbf16>, vector<32x288xf32> -> vector<32x288xf32>
    %286 = arith.addf %281, %285 : vector<32x288xf32>
    %c0_174 = arith.constant 0 : index
    %c37_175 = arith.constant 37 : index
    %287 = vector.load %arg13[%c0_174, %c37_175] : memref<32x326xbf16, #tpu.memory_space<vmem>>, vector<32x288xbf16>
    %288 = vector.extract_strided_slice %250 {offsets = [7, 0, 0], sizes = [1, 32, 32], strides = [1, 1, 1]} : vector<9x32x32xbf16> to vector<1x32x32xbf16>
    %289 = vector.shape_cast %288 : vector<1x32x32xbf16> to vector<32x32xbf16>
    %cst_176 = arith.constant dense<0.000000e+00> : vector<32x288xf32>
    %290 = tpu.matmul %289, %287, %cst_176 {dimension_numbers = #tpu.dot_dimension_numbers<[1], [0], [0], [1], [0, 0, 1, 1], [], []>} : vector<32x32xbf16>, vector<32x288xbf16>, vector<32x288xf32> -> vector<32x288xf32>
    %291 = arith.addf %286, %290 : vector<32x288xf32>
    %c0_177 = arith.constant 0 : index
    %c38_178 = arith.constant 38 : index
    %292 = vector.load %arg13[%c0_177, %c38_178] : memref<32x326xbf16, #tpu.memory_space<vmem>>, vector<32x288xbf16>
    %293 = vector.extract_strided_slice %250 {offsets = [8, 0, 0], sizes = [1, 32, 32], strides = [1, 1, 1]} : vector<9x32x32xbf16> to vector<1x32x32xbf16>
    %294 = vector.shape_cast %293 : vector<1x32x32xbf16> to vector<32x32xbf16>
    %cst_179 = arith.constant dense<0.000000e+00> : vector<32x288xf32>
    %295 = tpu.matmul %294, %292, %cst_179 {dimension_numbers = #tpu.dot_dimension_numbers<[1], [0], [0], [1], [0, 0, 1, 1], [], []>} : vector<32x32xbf16>, vector<32x288xbf16>, vector<32x288xf32> -> vector<32x288xf32>
    %296 = arith.addf %291, %295 : vector<32x288xf32>
    %297 = vector.broadcast %252 : vector<32x1xf32> to vector<32x288xf32>
    %298 = arith.addf %296, %297 : vector<32x288xf32>
    %cst_180 = arith.constant 0.000000e+00 : f32
    %299 = vector.broadcast %cst_180 : f32 to vector<32x288xf32>
    %300 = arith.cmpf oge, %298, %299 : vector<32x288xf32>
    %cst_181 = arith.constant 0.00999999977 : f32
    %301 = vector.broadcast %cst_181 : f32 to vector<32x288xf32>
    %302 = arith.mulf %301, %298 : vector<32x288xf32>
    %303 = arith.select %300, %298, %302 : vector<32x288xi1>, vector<32x288xf32>
    %304 = vector.broadcast %0 : vector<1x288xf32> to vector<32x288xf32>
    %305 = arith.mulf %303, %304 : vector<32x288xf32>
    %306 = arith.truncf %305 : vector<32x288xf32> to vector<32x288xbf16>
    %c0_182 = arith.constant 0 : index
    %c19_183 = arith.constant 19 : index
    %307 = vector.load %arg14[%c0_182, %c19_183] : memref<32x326xbf16, #tpu.memory_space<vmem>>, vector<32x288xbf16>
    tpu.vector_store %arg14[%c0_182, %c19_183], %306 {strides = array<i32>} : memref<32x326xbf16, #tpu.memory_space<vmem>>, vector<32x288xbf16>,
    %c4 = arith.constant 4 : index
    %c0_184 = arith.constant 0 : index
    %c0_185 = arith.constant 0 : index
    %c0_186 = arith.constant 0 : index
    %308 = vector.load %arg5[%c4, %c0_184, %c0_185, %c0_186] : memref<7x9x32x32xbf16, #tpu.memory_space<vmem>>, vector<1x9x32x32xbf16>
    %309 = vector.shape_cast %308 : vector<1x9x32x32xbf16> to vector<9x32x32xbf16>
    %c4_187 = arith.constant 4 : index
    %c0_188 = arith.constant 0 : index
    %c0_189 = arith.constant 0 : index
    %310 = vector.load %arg6[%c4_187, %c0_188, %c0_189] : memref<7x32x1xf32, #tpu.memory_space<vmem>>, vector<1x32x1xf32>
    %311 = vector.shape_cast %310 : vector<1x32x1xf32> to vector<32x1xf32>
    %c0_190 = arith.constant 0 : index
    %c0_191 = arith.constant 0 : index
    %312 = vector.load %arg14[%c0_190, %c0_191] : memref<32x326xbf16, #tpu.memory_space<vmem>>, vector<32x288xbf16>
    %313 = vector.extract_strided_slice %309 {offsets = [0, 0, 0], sizes = [1, 32, 32], strides = [1, 1, 1]} : vector<9x32x32xbf16> to vector<1x32x32xbf16>
    %314 = vector.shape_cast %313 : vector<1x32x32xbf16> to vector<32x32xbf16>
    %cst_192 = arith.constant dense<0.000000e+00> : vector<32x288xf32>
    %315 = tpu.matmul %314, %312, %cst_192 {dimension_numbers = #tpu.dot_dimension_numbers<[1], [0], [0], [1], [0, 0, 1, 1], [], []>} : vector<32x32xbf16>, vector<32x288xbf16>, vector<32x288xf32> -> vector<32x288xf32>
    %c0_193 = arith.constant 0 : index
    %c1_194 = arith.constant 1 : index
    %316 = vector.load %arg14[%c0_193, %c1_194] : memref<32x326xbf16, #tpu.memory_space<vmem>>, vector<32x288xbf16>
    %317 = vector.extract_strided_slice %309 {offsets = [1, 0, 0], sizes = [1, 32, 32], strides = [1, 1, 1]} : vector<9x32x32xbf16> to vector<1x32x32xbf16>
    %318 = vector.shape_cast %317 : vector<1x32x32xbf16> to vector<32x32xbf16>
    %cst_195 = arith.constant dense<0.000000e+00> : vector<32x288xf32>
    %319 = tpu.matmul %318, %316, %cst_195 {dimension_numbers = #tpu.dot_dimension_numbers<[1], [0], [0], [1], [0, 0, 1, 1], [], []>} : vector<32x32xbf16>, vector<32x288xbf16>, vector<32x288xf32> -> vector<32x288xf32>
    %320 = arith.addf %315, %319 : vector<32x288xf32>
    %c0_196 = arith.constant 0 : index
    %c2_197 = arith.constant 2 : index
    %321 = vector.load %arg14[%c0_196, %c2_197] : memref<32x326xbf16, #tpu.memory_space<vmem>>, vector<32x288xbf16>
    %322 = vector.extract_strided_slice %309 {offsets = [2, 0, 0], sizes = [1, 32, 32], strides = [1, 1, 1]} : vector<9x32x32xbf16> to vector<1x32x32xbf16>
    %323 = vector.shape_cast %322 : vector<1x32x32xbf16> to vector<32x32xbf16>
    %cst_198 = arith.constant dense<0.000000e+00> : vector<32x288xf32>
    %324 = tpu.matmul %323, %321, %cst_198 {dimension_numbers = #tpu.dot_dimension_numbers<[1], [0], [0], [1], [0, 0, 1, 1], [], []>} : vector<32x32xbf16>, vector<32x288xbf16>, vector<32x288xf32> -> vector<32x288xf32>
    %325 = arith.addf %320, %324 : vector<32x288xf32>
    %c0_199 = arith.constant 0 : index
    %c18_200 = arith.constant 18 : index
    %326 = vector.load %arg14[%c0_199, %c18_200] : memref<32x326xbf16, #tpu.memory_space<vmem>>, vector<32x288xbf16>
    %327 = vector.extract_strided_slice %309 {offsets = [3, 0, 0], sizes = [1, 32, 32], strides = [1, 1, 1]} : vector<9x32x32xbf16> to vector<1x32x32xbf16>
    %328 = vector.shape_cast %327 : vector<1x32x32xbf16> to vector<32x32xbf16>
    %cst_201 = arith.constant dense<0.000000e+00> : vector<32x288xf32>
    %329 = tpu.matmul %328, %326, %cst_201 {dimension_numbers = #tpu.dot_dimension_numbers<[1], [0], [0], [1], [0, 0, 1, 1], [], []>} : vector<32x32xbf16>, vector<32x288xbf16>, vector<32x288xf32> -> vector<32x288xf32>
    %330 = arith.addf %325, %329 : vector<32x288xf32>
    %c0_202 = arith.constant 0 : index
    %c19_203 = arith.constant 19 : index
    %331 = vector.load %arg14[%c0_202, %c19_203] : memref<32x326xbf16, #tpu.memory_space<vmem>>, vector<32x288xbf16>
    %332 = vector.extract_strided_slice %309 {offsets = [4, 0, 0], sizes = [1, 32, 32], strides = [1, 1, 1]} : vector<9x32x32xbf16> to vector<1x32x32xbf16>
    %333 = vector.shape_cast %332 : vector<1x32x32xbf16> to vector<32x32xbf16>
    %cst_204 = arith.constant dense<0.000000e+00> : vector<32x288xf32>
    %334 = tpu.matmul %333, %331, %cst_204 {dimension_numbers = #tpu.dot_dimension_numbers<[1], [0], [0], [1], [0, 0, 1, 1], [], []>} : vector<32x32xbf16>, vector<32x288xbf16>, vector<32x288xf32> -> vector<32x288xf32>
    %335 = arith.addf %330, %334 : vector<32x288xf32>
    %c0_205 = arith.constant 0 : index
    %c20_206 = arith.constant 20 : index
    %336 = vector.load %arg14[%c0_205, %c20_206] : memref<32x326xbf16, #tpu.memory_space<vmem>>, vector<32x288xbf16>
    %337 = vector.extract_strided_slice %309 {offsets = [5, 0, 0], sizes = [1, 32, 32], strides = [1, 1, 1]} : vector<9x32x32xbf16> to vector<1x32x32xbf16>
    %338 = vector.shape_cast %337 : vector<1x32x32xbf16> to vector<32x32xbf16>
    %cst_207 = arith.constant dense<0.000000e+00> : vector<32x288xf32>
    %339 = tpu.matmul %338, %336, %cst_207 {dimension_numbers = #tpu.dot_dimension_numbers<[1], [0], [0], [1], [0, 0, 1, 1], [], []>} : vector<32x32xbf16>, vector<32x288xbf16>, vector<32x288xf32> -> vector<32x288xf32>
    %340 = arith.addf %335, %339 : vector<32x288xf32>
    %c0_208 = arith.constant 0 : index
    %c36_209 = arith.constant 36 : index
    %341 = vector.load %arg14[%c0_208, %c36_209] : memref<32x326xbf16, #tpu.memory_space<vmem>>, vector<32x288xbf16>
    %342 = vector.extract_strided_slice %309 {offsets = [6, 0, 0], sizes = [1, 32, 32], strides = [1, 1, 1]} : vector<9x32x32xbf16> to vector<1x32x32xbf16>
    %343 = vector.shape_cast %342 : vector<1x32x32xbf16> to vector<32x32xbf16>
    %cst_210 = arith.constant dense<0.000000e+00> : vector<32x288xf32>
    %344 = tpu.matmul %343, %341, %cst_210 {dimension_numbers = #tpu.dot_dimension_numbers<[1], [0], [0], [1], [0, 0, 1, 1], [], []>} : vector<32x32xbf16>, vector<32x288xbf16>, vector<32x288xf32> -> vector<32x288xf32>
    %345 = arith.addf %340, %344 : vector<32x288xf32>
    %c0_211 = arith.constant 0 : index
    %c37_212 = arith.constant 37 : index
    %346 = vector.load %arg14[%c0_211, %c37_212] : memref<32x326xbf16, #tpu.memory_space<vmem>>, vector<32x288xbf16>
    %347 = vector.extract_strided_slice %309 {offsets = [7, 0, 0], sizes = [1, 32, 32], strides = [1, 1, 1]} : vector<9x32x32xbf16> to vector<1x32x32xbf16>
    %348 = vector.shape_cast %347 : vector<1x32x32xbf16> to vector<32x32xbf16>
    %cst_213 = arith.constant dense<0.000000e+00> : vector<32x288xf32>
    %349 = tpu.matmul %348, %346, %cst_213 {dimension_numbers = #tpu.dot_dimension_numbers<[1], [0], [0], [1], [0, 0, 1, 1], [], []>} : vector<32x32xbf16>, vector<32x288xbf16>, vector<32x288xf32> -> vector<32x288xf32>
    %350 = arith.addf %345, %349 : vector<32x288xf32>
    %c0_214 = arith.constant 0 : index
    %c38_215 = arith.constant 38 : index
    %351 = vector.load %arg14[%c0_214, %c38_215] : memref<32x326xbf16, #tpu.memory_space<vmem>>, vector<32x288xbf16>
    %352 = vector.extract_strided_slice %309 {offsets = [8, 0, 0], sizes = [1, 32, 32], strides = [1, 1, 1]} : vector<9x32x32xbf16> to vector<1x32x32xbf16>
    %353 = vector.shape_cast %352 : vector<1x32x32xbf16> to vector<32x32xbf16>
    %cst_216 = arith.constant dense<0.000000e+00> : vector<32x288xf32>
    %354 = tpu.matmul %353, %351, %cst_216 {dimension_numbers = #tpu.dot_dimension_numbers<[1], [0], [0], [1], [0, 0, 1, 1], [], []>} : vector<32x32xbf16>, vector<32x288xbf16>, vector<32x288xf32> -> vector<32x288xf32>
    %355 = arith.addf %350, %354 : vector<32x288xf32>
    %356 = vector.broadcast %311 : vector<32x1xf32> to vector<32x288xf32>
    %357 = arith.addf %355, %356 : vector<32x288xf32>
    %c0_217 = arith.constant 0 : index
    %c19_218 = arith.constant 19 : index
    %358 = vector.load %arg12[%c0_217, %c19_218] : memref<32x326xbf16, #tpu.memory_space<vmem>>, vector<32x288xbf16>
    %359 = arith.extf %358 : vector<32x288xbf16> to vector<32x288xf32>
    %360 = arith.addf %357, %359 : vector<32x288xf32>
    %cst_219 = arith.constant 0.000000e+00 : f32
    %361 = vector.broadcast %cst_219 : f32 to vector<32x288xf32>
    %362 = arith.cmpf oge, %360, %361 : vector<32x288xf32>
    %cst_220 = arith.constant 0.00999999977 : f32
    %363 = vector.broadcast %cst_220 : f32 to vector<32x288xf32>
    %364 = arith.mulf %363, %360 : vector<32x288xf32>
    %365 = arith.select %362, %360, %364 : vector<32x288xi1>, vector<32x288xf32>
    %366 = vector.broadcast %0 : vector<1x288xf32> to vector<32x288xf32>
    %367 = arith.mulf %365, %366 : vector<32x288xf32>
    %368 = arith.truncf %367 : vector<32x288xf32> to vector<32x288xbf16>
    %c0_221 = arith.constant 0 : index
    %c19_222 = arith.constant 19 : index
    %369 = vector.load %arg13[%c0_221, %c19_222] : memref<32x326xbf16, #tpu.memory_space<vmem>>, vector<32x288xbf16>
    tpu.vector_store %arg13[%c0_221, %c19_222], %368 {strides = array<i32>} : memref<32x326xbf16, #tpu.memory_space<vmem>>, vector<32x288xbf16>,
    %c5 = arith.constant 5 : index
    %c0_223 = arith.constant 0 : index
    %c0_224 = arith.constant 0 : index
    %c0_225 = arith.constant 0 : index
    %370 = vector.load %arg5[%c5, %c0_223, %c0_224, %c0_225] : memref<7x9x32x32xbf16, #tpu.memory_space<vmem>>, vector<1x9x32x32xbf16>
    %371 = vector.shape_cast %370 : vector<1x9x32x32xbf16> to vector<9x32x32xbf16>
    %c5_226 = arith.constant 5 : index
    %c0_227 = arith.constant 0 : index
    %c0_228 = arith.constant 0 : index
    %372 = vector.load %arg6[%c5_226, %c0_227, %c0_228] : memref<7x32x1xf32, #tpu.memory_space<vmem>>, vector<1x32x1xf32>
    %373 = vector.shape_cast %372 : vector<1x32x1xf32> to vector<32x1xf32>
    %c0_229 = arith.constant 0 : index
    %c0_230 = arith.constant 0 : index
    %374 = vector.load %arg13[%c0_229, %c0_230] : memref<32x326xbf16, #tpu.memory_space<vmem>>, vector<32x288xbf16>
    %375 = vector.extract_strided_slice %371 {offsets = [0, 0, 0], sizes = [1, 32, 32], strides = [1, 1, 1]} : vector<9x32x32xbf16> to vector<1x32x32xbf16>
    %376 = vector.shape_cast %375 : vector<1x32x32xbf16> to vector<32x32xbf16>
    %cst_231 = arith.constant dense<0.000000e+00> : vector<32x288xf32>
    %377 = tpu.matmul %376, %374, %cst_231 {dimension_numbers = #tpu.dot_dimension_numbers<[1], [0], [0], [1], [0, 0, 1, 1], [], []>} : vector<32x32xbf16>, vector<32x288xbf16>, vector<32x288xf32> -> vector<32x288xf32>
    %c0_232 = arith.constant 0 : index
    %c1_233 = arith.constant 1 : index
    %378 = vector.load %arg13[%c0_232, %c1_233] : memref<32x326xbf16, #tpu.memory_space<vmem>>, vector<32x288xbf16>
    %379 = vector.extract_strided_slice %371 {offsets = [1, 0, 0], sizes = [1, 32, 32], strides = [1, 1, 1]} : vector<9x32x32xbf16> to vector<1x32x32xbf16>
    %380 = vector.shape_cast %379 : vector<1x32x32xbf16> to vector<32x32xbf16>
    %cst_234 = arith.constant dense<0.000000e+00> : vector<32x288xf32>
    %381 = tpu.matmul %380, %378, %cst_234 {dimension_numbers = #tpu.dot_dimension_numbers<[1], [0], [0], [1], [0, 0, 1, 1], [], []>} : vector<32x32xbf16>, vector<32x288xbf16>, vector<32x288xf32> -> vector<32x288xf32>
    %382 = arith.addf %377, %381 : vector<32x288xf32>
    %c0_235 = arith.constant 0 : index
    %c2_236 = arith.constant 2 : index
    %383 = vector.load %arg13[%c0_235, %c2_236] : memref<32x326xbf16, #tpu.memory_space<vmem>>, vector<32x288xbf16>
    %384 = vector.extract_strided_slice %371 {offsets = [2, 0, 0], sizes = [1, 32, 32], strides = [1, 1, 1]} : vector<9x32x32xbf16> to vector<1x32x32xbf16>
    %385 = vector.shape_cast %384 : vector<1x32x32xbf16> to vector<32x32xbf16>
    %cst_237 = arith.constant dense<0.000000e+00> : vector<32x288xf32>
    %386 = tpu.matmul %385, %383, %cst_237 {dimension_numbers = #tpu.dot_dimension_numbers<[1], [0], [0], [1], [0, 0, 1, 1], [], []>} : vector<32x32xbf16>, vector<32x288xbf16>, vector<32x288xf32> -> vector<32x288xf32>
    %387 = arith.addf %382, %386 : vector<32x288xf32>
    %c0_238 = arith.constant 0 : index
    %c18_239 = arith.constant 18 : index
    %388 = vector.load %arg13[%c0_238, %c18_239] : memref<32x326xbf16, #tpu.memory_space<vmem>>, vector<32x288xbf16>
    %389 = vector.extract_strided_slice %371 {offsets = [3, 0, 0], sizes = [1, 32, 32], strides = [1, 1, 1]} : vector<9x32x32xbf16> to vector<1x32x32xbf16>
    %390 = vector.shape_cast %389 : vector<1x32x32xbf16> to vector<32x32xbf16>
    %cst_240 = arith.constant dense<0.000000e+00> : vector<32x288xf32>
    %391 = tpu.matmul %390, %388, %cst_240 {dimension_numbers = #tpu.dot_dimension_numbers<[1], [0], [0], [1], [0, 0, 1, 1], [], []>} : vector<32x32xbf16>, vector<32x288xbf16>, vector<32x288xf32> -> vector<32x288xf32>
    %392 = arith.addf %387, %391 : vector<32x288xf32>
    %c0_241 = arith.constant 0 : index
    %c19_242 = arith.constant 19 : index
    %393 = vector.load %arg13[%c0_241, %c19_242] : memref<32x326xbf16, #tpu.memory_space<vmem>>, vector<32x288xbf16>
    %394 = vector.extract_strided_slice %371 {offsets = [4, 0, 0], sizes = [1, 32, 32], strides = [1, 1, 1]} : vector<9x32x32xbf16> to vector<1x32x32xbf16>
    %395 = vector.shape_cast %394 : vector<1x32x32xbf16> to vector<32x32xbf16>
    %cst_243 = arith.constant dense<0.000000e+00> : vector<32x288xf32>
    %396 = tpu.matmul %395, %393, %cst_243 {dimension_numbers = #tpu.dot_dimension_numbers<[1], [0], [0], [1], [0, 0, 1, 1], [], []>} : vector<32x32xbf16>, vector<32x288xbf16>, vector<32x288xf32> -> vector<32x288xf32>
    %397 = arith.addf %392, %396 : vector<32x288xf32>
    %c0_244 = arith.constant 0 : index
    %c20_245 = arith.constant 20 : index
    %398 = vector.load %arg13[%c0_244, %c20_245] : memref<32x326xbf16, #tpu.memory_space<vmem>>, vector<32x288xbf16>
    %399 = vector.extract_strided_slice %371 {offsets = [5, 0, 0], sizes = [1, 32, 32], strides = [1, 1, 1]} : vector<9x32x32xbf16> to vector<1x32x32xbf16>
    %400 = vector.shape_cast %399 : vector<1x32x32xbf16> to vector<32x32xbf16>
    %cst_246 = arith.constant dense<0.000000e+00> : vector<32x288xf32>
    %401 = tpu.matmul %400, %398, %cst_246 {dimension_numbers = #tpu.dot_dimension_numbers<[1], [0], [0], [1], [0, 0, 1, 1], [], []>} : vector<32x32xbf16>, vector<32x288xbf16>, vector<32x288xf32> -> vector<32x288xf32>
    %402 = arith.addf %397, %401 : vector<32x288xf32>
    %c0_247 = arith.constant 0 : index
    %c36_248 = arith.constant 36 : index
    %403 = vector.load %arg13[%c0_247, %c36_248] : memref<32x326xbf16, #tpu.memory_space<vmem>>, vector<32x288xbf16>
    %404 = vector.extract_strided_slice %371 {offsets = [6, 0, 0], sizes = [1, 32, 32], strides = [1, 1, 1]} : vector<9x32x32xbf16> to vector<1x32x32xbf16>
    %405 = vector.shape_cast %404 : vector<1x32x32xbf16> to vector<32x32xbf16>
    %cst_249 = arith.constant dense<0.000000e+00> : vector<32x288xf32>
    %406 = tpu.matmul %405, %403, %cst_249 {dimension_numbers = #tpu.dot_dimension_numbers<[1], [0], [0], [1], [0, 0, 1, 1], [], []>} : vector<32x32xbf16>, vector<32x288xbf16>, vector<32x288xf32> -> vector<32x288xf32>
    %407 = arith.addf %402, %406 : vector<32x288xf32>
    %c0_250 = arith.constant 0 : index
    %c37_251 = arith.constant 37 : index
    %408 = vector.load %arg13[%c0_250, %c37_251] : memref<32x326xbf16, #tpu.memory_space<vmem>>, vector<32x288xbf16>
    %409 = vector.extract_strided_slice %371 {offsets = [7, 0, 0], sizes = [1, 32, 32], strides = [1, 1, 1]} : vector<9x32x32xbf16> to vector<1x32x32xbf16>
    %410 = vector.shape_cast %409 : vector<1x32x32xbf16> to vector<32x32xbf16>
    %cst_252 = arith.constant dense<0.000000e+00> : vector<32x288xf32>
    %411 = tpu.matmul %410, %408, %cst_252 {dimension_numbers = #tpu.dot_dimension_numbers<[1], [0], [0], [1], [0, 0, 1, 1], [], []>} : vector<32x32xbf16>, vector<32x288xbf16>, vector<32x288xf32> -> vector<32x288xf32>
    %412 = arith.addf %407, %411 : vector<32x288xf32>
    %c0_253 = arith.constant 0 : index
    %c38_254 = arith.constant 38 : index
    %413 = vector.load %arg13[%c0_253, %c38_254] : memref<32x326xbf16, #tpu.memory_space<vmem>>, vector<32x288xbf16>
    %414 = vector.extract_strided_slice %371 {offsets = [8, 0, 0], sizes = [1, 32, 32], strides = [1, 1, 1]} : vector<9x32x32xbf16> to vector<1x32x32xbf16>
    %415 = vector.shape_cast %414 : vector<1x32x32xbf16> to vector<32x32xbf16>
    %cst_255 = arith.constant dense<0.000000e+00> : vector<32x288xf32>
    %416 = tpu.matmul %415, %413, %cst_255 {dimension_numbers = #tpu.dot_dimension_numbers<[1], [0], [0], [1], [0, 0, 1, 1], [], []>} : vector<32x32xbf16>, vector<32x288xbf16>, vector<32x288xf32> -> vector<32x288xf32>
    %417 = arith.addf %412, %416 : vector<32x288xf32>
    %418 = vector.broadcast %373 : vector<32x1xf32> to vector<32x288xf32>
    %419 = arith.addf %417, %418 : vector<32x288xf32>
    %c0_256 = arith.constant 0 : index
    %c19_257 = arith.constant 19 : index
    %420 = vector.load %arg11[%c0_256, %c19_257] : memref<32x326xbf16, #tpu.memory_space<vmem>>, vector<32x288xbf16>
    %421 = arith.extf %420 : vector<32x288xbf16> to vector<32x288xf32>
    %422 = arith.addf %419, %421 : vector<32x288xf32>
    %cst_258 = arith.constant 0.000000e+00 : f32
    %423 = vector.broadcast %cst_258 : f32 to vector<32x288xf32>
    %424 = arith.cmpf oge, %422, %423 : vector<32x288xf32>
    %cst_259 = arith.constant 0.00999999977 : f32
    %425 = vector.broadcast %cst_259 : f32 to vector<32x288xf32>
    %426 = arith.mulf %425, %422 : vector<32x288xf32>
    %427 = arith.select %424, %422, %426 : vector<32x288xi1>, vector<32x288xf32>
    %428 = vector.broadcast %0 : vector<1x288xf32> to vector<32x288xf32>
    %429 = arith.mulf %427, %428 : vector<32x288xf32>
    %430 = arith.truncf %429 : vector<32x288xf32> to vector<32x288xbf16>
    %c0_260 = arith.constant 0 : index
    %c19_261 = arith.constant 19 : index
    %431 = vector.load %arg14[%c0_260, %c19_261] : memref<32x326xbf16, #tpu.memory_space<vmem>>, vector<32x288xbf16>
    tpu.vector_store %arg14[%c0_260, %c19_261], %430 {strides = array<i32>} : memref<32x326xbf16, #tpu.memory_space<vmem>>, vector<32x288xbf16>,
    %c6 = arith.constant 6 : index
    %c0_262 = arith.constant 0 : index
    %c0_263 = arith.constant 0 : index
    %c0_264 = arith.constant 0 : index
    %432 = vector.load %arg5[%c6, %c0_262, %c0_263, %c0_264] : memref<7x9x32x32xbf16, #tpu.memory_space<vmem>>, vector<1x9x32x32xbf16>
    %433 = vector.shape_cast %432 : vector<1x9x32x32xbf16> to vector<9x32x32xbf16>
    %c6_265 = arith.constant 6 : index
    %c0_266 = arith.constant 0 : index
    %c0_267 = arith.constant 0 : index
    %434 = vector.load %arg6[%c6_265, %c0_266, %c0_267] : memref<7x32x1xf32, #tpu.memory_space<vmem>>, vector<1x32x1xf32>
    %435 = vector.shape_cast %434 : vector<1x32x1xf32> to vector<32x1xf32>
    %c0_268 = arith.constant 0 : index
    %c0_269 = arith.constant 0 : index
    %436 = vector.load %arg14[%c0_268, %c0_269] : memref<32x326xbf16, #tpu.memory_space<vmem>>, vector<32x288xbf16>
    %437 = vector.extract_strided_slice %433 {offsets = [0, 0, 0], sizes = [1, 32, 32], strides = [1, 1, 1]} : vector<9x32x32xbf16> to vector<1x32x32xbf16>
    %438 = vector.shape_cast %437 : vector<1x32x32xbf16> to vector<32x32xbf16>
    %cst_270 = arith.constant dense<0.000000e+00> : vector<32x288xf32>
    %439 = tpu.matmul %438, %436, %cst_270 {dimension_numbers = #tpu.dot_dimension_numbers<[1], [0], [0], [1], [0, 0, 1, 1], [], []>} : vector<32x32xbf16>, vector<32x288xbf16>, vector<32x288xf32> -> vector<32x288xf32>
    %c0_271 = arith.constant 0 : index
    %c1_272 = arith.constant 1 : index
    %440 = vector.load %arg14[%c0_271, %c1_272] : memref<32x326xbf16, #tpu.memory_space<vmem>>, vector<32x288xbf16>
    %441 = vector.extract_strided_slice %433 {offsets = [1, 0, 0], sizes = [1, 32, 32], strides = [1, 1, 1]} : vector<9x32x32xbf16> to vector<1x32x32xbf16>
    %442 = vector.shape_cast %441 : vector<1x32x32xbf16> to vector<32x32xbf16>
    %cst_273 = arith.constant dense<0.000000e+00> : vector<32x288xf32>
    %443 = tpu.matmul %442, %440, %cst_273 {dimension_numbers = #tpu.dot_dimension_numbers<[1], [0], [0], [1], [0, 0, 1, 1], [], []>} : vector<32x32xbf16>, vector<32x288xbf16>, vector<32x288xf32> -> vector<32x288xf32>
    %444 = arith.addf %439, %443 : vector<32x288xf32>
    %c0_274 = arith.constant 0 : index
    %c2_275 = arith.constant 2 : index
    %445 = vector.load %arg14[%c0_274, %c2_275] : memref<32x326xbf16, #tpu.memory_space<vmem>>, vector<32x288xbf16>
    %446 = vector.extract_strided_slice %433 {offsets = [2, 0, 0], sizes = [1, 32, 32], strides = [1, 1, 1]} : vector<9x32x32xbf16> to vector<1x32x32xbf16>
    %447 = vector.shape_cast %446 : vector<1x32x32xbf16> to vector<32x32xbf16>
    %cst_276 = arith.constant dense<0.000000e+00> : vector<32x288xf32>
    %448 = tpu.matmul %447, %445, %cst_276 {dimension_numbers = #tpu.dot_dimension_numbers<[1], [0], [0], [1], [0, 0, 1, 1], [], []>} : vector<32x32xbf16>, vector<32x288xbf16>, vector<32x288xf32> -> vector<32x288xf32>
    %449 = arith.addf %444, %448 : vector<32x288xf32>
    %c0_277 = arith.constant 0 : index
    %c18_278 = arith.constant 18 : index
    %450 = vector.load %arg14[%c0_277, %c18_278] : memref<32x326xbf16, #tpu.memory_space<vmem>>, vector<32x288xbf16>
    %451 = vector.extract_strided_slice %433 {offsets = [3, 0, 0], sizes = [1, 32, 32], strides = [1, 1, 1]} : vector<9x32x32xbf16> to vector<1x32x32xbf16>
    %452 = vector.shape_cast %451 : vector<1x32x32xbf16> to vector<32x32xbf16>
    %cst_279 = arith.constant dense<0.000000e+00> : vector<32x288xf32>
    %453 = tpu.matmul %452, %450, %cst_279 {dimension_numbers = #tpu.dot_dimension_numbers<[1], [0], [0], [1], [0, 0, 1, 1], [], []>} : vector<32x32xbf16>, vector<32x288xbf16>, vector<32x288xf32> -> vector<32x288xf32>
    %454 = arith.addf %449, %453 : vector<32x288xf32>
    %c0_280 = arith.constant 0 : index
    %c19_281 = arith.constant 19 : index
    %455 = vector.load %arg14[%c0_280, %c19_281] : memref<32x326xbf16, #tpu.memory_space<vmem>>, vector<32x288xbf16>
    %456 = vector.extract_strided_slice %433 {offsets = [4, 0, 0], sizes = [1, 32, 32], strides = [1, 1, 1]} : vector<9x32x32xbf16> to vector<1x32x32xbf16>
    %457 = vector.shape_cast %456 : vector<1x32x32xbf16> to vector<32x32xbf16>
    %cst_282 = arith.constant dense<0.000000e+00> : vector<32x288xf32>
    %458 = tpu.matmul %457, %455, %cst_282 {dimension_numbers = #tpu.dot_dimension_numbers<[1], [0], [0], [1], [0, 0, 1, 1], [], []>} : vector<32x32xbf16>, vector<32x288xbf16>, vector<32x288xf32> -> vector<32x288xf32>
    %459 = arith.addf %454, %458 : vector<32x288xf32>
    %c0_283 = arith.constant 0 : index
    %c20_284 = arith.constant 20 : index
    %460 = vector.load %arg14[%c0_283, %c20_284] : memref<32x326xbf16, #tpu.memory_space<vmem>>, vector<32x288xbf16>
    %461 = vector.extract_strided_slice %433 {offsets = [5, 0, 0], sizes = [1, 32, 32], strides = [1, 1, 1]} : vector<9x32x32xbf16> to vector<1x32x32xbf16>
    %462 = vector.shape_cast %461 : vector<1x32x32xbf16> to vector<32x32xbf16>
    %cst_285 = arith.constant dense<0.000000e+00> : vector<32x288xf32>
    %463 = tpu.matmul %462, %460, %cst_285 {dimension_numbers = #tpu.dot_dimension_numbers<[1], [0], [0], [1], [0, 0, 1, 1], [], []>} : vector<32x32xbf16>, vector<32x288xbf16>, vector<32x288xf32> -> vector<32x288xf32>
    %464 = arith.addf %459, %463 : vector<32x288xf32>
    %c0_286 = arith.constant 0 : index
    %c36_287 = arith.constant 36 : index
    %465 = vector.load %arg14[%c0_286, %c36_287] : memref<32x326xbf16, #tpu.memory_space<vmem>>, vector<32x288xbf16>
    %466 = vector.extract_strided_slice %433 {offsets = [6, 0, 0], sizes = [1, 32, 32], strides = [1, 1, 1]} : vector<9x32x32xbf16> to vector<1x32x32xbf16>
    %467 = vector.shape_cast %466 : vector<1x32x32xbf16> to vector<32x32xbf16>
    %cst_288 = arith.constant dense<0.000000e+00> : vector<32x288xf32>
    %468 = tpu.matmul %467, %465, %cst_288 {dimension_numbers = #tpu.dot_dimension_numbers<[1], [0], [0], [1], [0, 0, 1, 1], [], []>} : vector<32x32xbf16>, vector<32x288xbf16>, vector<32x288xf32> -> vector<32x288xf32>
    %469 = arith.addf %464, %468 : vector<32x288xf32>
    %c0_289 = arith.constant 0 : index
    %c37_290 = arith.constant 37 : index
    %470 = vector.load %arg14[%c0_289, %c37_290] : memref<32x326xbf16, #tpu.memory_space<vmem>>, vector<32x288xbf16>
    %471 = vector.extract_strided_slice %433 {offsets = [7, 0, 0], sizes = [1, 32, 32], strides = [1, 1, 1]} : vector<9x32x32xbf16> to vector<1x32x32xbf16>
    %472 = vector.shape_cast %471 : vector<1x32x32xbf16> to vector<32x32xbf16>
    %cst_291 = arith.constant dense<0.000000e+00> : vector<32x288xf32>
    %473 = tpu.matmul %472, %470, %cst_291 {dimension_numbers = #tpu.dot_dimension_numbers<[1], [0], [0], [1], [0, 0, 1, 1], [], []>} : vector<32x32xbf16>, vector<32x288xbf16>, vector<32x288xf32> -> vector<32x288xf32>
    %474 = arith.addf %469, %473 : vector<32x288xf32>
    %c0_292 = arith.constant 0 : index
    %c38_293 = arith.constant 38 : index
    %475 = vector.load %arg14[%c0_292, %c38_293] : memref<32x326xbf16, #tpu.memory_space<vmem>>, vector<32x288xbf16>
    %476 = vector.extract_strided_slice %433 {offsets = [8, 0, 0], sizes = [1, 32, 32], strides = [1, 1, 1]} : vector<9x32x32xbf16> to vector<1x32x32xbf16>
    %477 = vector.shape_cast %476 : vector<1x32x32xbf16> to vector<32x32xbf16>
    %cst_294 = arith.constant dense<0.000000e+00> : vector<32x288xf32>
    %478 = tpu.matmul %477, %475, %cst_294 {dimension_numbers = #tpu.dot_dimension_numbers<[1], [0], [0], [1], [0, 0, 1, 1], [], []>} : vector<32x32xbf16>, vector<32x288xbf16>, vector<32x288xf32> -> vector<32x288xf32>
    %479 = arith.addf %474, %478 : vector<32x288xf32>
    %480 = vector.broadcast %435 : vector<32x1xf32> to vector<32x288xf32>
    %481 = arith.addf %479, %480 : vector<32x288xf32>
    %c0_295 = arith.constant 0 : index
    %c19_296 = arith.constant 19 : index
    %482 = vector.load %arg10[%c0_295, %c19_296] : memref<32x326xbf16, #tpu.memory_space<vmem>>, vector<32x288xbf16>
    %483 = arith.extf %482 : vector<32x288xbf16> to vector<32x288xf32>
    %484 = arith.addf %481, %483 : vector<32x288xf32>
    %cst_297 = arith.constant 0.000000e+00 : f32
    %485 = vector.broadcast %cst_297 : f32 to vector<32x288xf32>
    %486 = arith.cmpf oge, %484, %485 : vector<32x288xf32>
    %cst_298 = arith.constant 0.00999999977 : f32
    %487 = vector.broadcast %cst_298 : f32 to vector<32x288xf32>
    %488 = arith.mulf %487, %484 : vector<32x288xf32>
    %489 = arith.select %486, %484, %488 : vector<32x288xi1>, vector<32x288xf32>
    %490 = vector.broadcast %0 : vector<1x288xf32> to vector<32x288xf32>
    %491 = arith.mulf %489, %490 : vector<32x288xf32>
    %492 = arith.truncf %491 : vector<32x288xf32> to vector<32x288xbf16>
    %c0_299 = arith.constant 0 : index
    %c19_300 = arith.constant 19 : index
    %493 = vector.load %arg13[%c0_299, %c19_300] : memref<32x326xbf16, #tpu.memory_space<vmem>>, vector<32x288xbf16>
    tpu.vector_store %arg13[%c0_299, %c19_300], %492 {strides = array<i32>} : memref<32x326xbf16, #tpu.memory_space<vmem>>, vector<32x288xbf16>,
    %c0_301 = arith.constant 0 : index
    %c0_302 = arith.constant 0 : index
    %c0_303 = arith.constant 0 : index
    %494 = vector.load %arg7[%c0_301, %c0_302, %c0_303] : memref<9x2x32xbf16, #tpu.memory_space<vmem>>, vector<9x2x32xbf16>
    %c0_304 = arith.constant 0 : index
    %c0_305 = arith.constant 0 : index
    %495 = vector.load %arg8[%c0_304, %c0_305] : memref<2x1xf32, #tpu.memory_space<vmem>>, vector<2x1xf32>
    %c0_306 = arith.constant 0 : index
    %c0_307 = arith.constant 0 : index
    %496 = vector.load %arg13[%c0_306, %c0_307] : memref<32x326xbf16, #tpu.memory_space<vmem>>, vector<32x288xbf16>
    %497 = vector.extract_strided_slice %494 {offsets = [0, 0, 0], sizes = [1, 2, 32], strides = [1, 1, 1]} : vector<9x2x32xbf16> to vector<1x2x32xbf16>
    %498 = vector.shape_cast %497 : vector<1x2x32xbf16> to vector<2x32xbf16>
    %cst_308 = arith.constant dense<0.000000e+00> : vector<2x288xf32>
    %499 = tpu.matmul %498, %496, %cst_308 {dimension_numbers = #tpu.dot_dimension_numbers<[1], [0], [0], [1], [0, 0, 1, 1], [], []>} : vector<2x32xbf16>, vector<32x288xbf16>, vector<2x288xf32> -> vector<2x288xf32>
    %c0_309 = arith.constant 0 : index
    %c1_310 = arith.constant 1 : index
    %500 = vector.load %arg13[%c0_309, %c1_310] : memref<32x326xbf16, #tpu.memory_space<vmem>>, vector<32x288xbf16>
    %501 = vector.extract_strided_slice %494 {offsets = [1, 0, 0], sizes = [1, 2, 32], strides = [1, 1, 1]} : vector<9x2x32xbf16> to vector<1x2x32xbf16>
    %502 = vector.shape_cast %501 : vector<1x2x32xbf16> to vector<2x32xbf16>
    %cst_311 = arith.constant dense<0.000000e+00> : vector<2x288xf32>
    %503 = tpu.matmul %502, %500, %cst_311 {dimension_numbers = #tpu.dot_dimension_numbers<[1], [0], [0], [1], [0, 0, 1, 1], [], []>} : vector<2x32xbf16>, vector<32x288xbf16>, vector<2x288xf32> -> vector<2x288xf32>
    %504 = arith.addf %499, %503 : vector<2x288xf32>
    %c0_312 = arith.constant 0 : index
    %c2_313 = arith.constant 2 : index
    %505 = vector.load %arg13[%c0_312, %c2_313] : memref<32x326xbf16, #tpu.memory_space<vmem>>, vector<32x288xbf16>
    %506 = vector.extract_strided_slice %494 {offsets = [2, 0, 0], sizes = [1, 2, 32], strides = [1, 1, 1]} : vector<9x2x32xbf16> to vector<1x2x32xbf16>
    %507 = vector.shape_cast %506 : vector<1x2x32xbf16> to vector<2x32xbf16>
    %cst_314 = arith.constant dense<0.000000e+00> : vector<2x288xf32>
    %508 = tpu.matmul %507, %505, %cst_314 {dimension_numbers = #tpu.dot_dimension_numbers<[1], [0], [0], [1], [0, 0, 1, 1], [], []>} : vector<2x32xbf16>, vector<32x288xbf16>, vector<2x288xf32> -> vector<2x288xf32>
    %509 = arith.addf %504, %508 : vector<2x288xf32>
    %c0_315 = arith.constant 0 : index
    %c18_316 = arith.constant 18 : index
    %510 = vector.load %arg13[%c0_315, %c18_316] : memref<32x326xbf16, #tpu.memory_space<vmem>>, vector<32x288xbf16>
    %511 = vector.extract_strided_slice %494 {offsets = [3, 0, 0], sizes = [1, 2, 32], strides = [1, 1, 1]} : vector<9x2x32xbf16> to vector<1x2x32xbf16>
    %512 = vector.shape_cast %511 : vector<1x2x32xbf16> to vector<2x32xbf16>
    %cst_317 = arith.constant dense<0.000000e+00> : vector<2x288xf32>
    %513 = tpu.matmul %512, %510, %cst_317 {dimension_numbers = #tpu.dot_dimension_numbers<[1], [0], [0], [1], [0, 0, 1, 1], [], []>} : vector<2x32xbf16>, vector<32x288xbf16>, vector<2x288xf32> -> vector<2x288xf32>
    %514 = arith.addf %509, %513 : vector<2x288xf32>
    %c0_318 = arith.constant 0 : index
    %c19_319 = arith.constant 19 : index
    %515 = vector.load %arg13[%c0_318, %c19_319] : memref<32x326xbf16, #tpu.memory_space<vmem>>, vector<32x288xbf16>
    %516 = vector.extract_strided_slice %494 {offsets = [4, 0, 0], sizes = [1, 2, 32], strides = [1, 1, 1]} : vector<9x2x32xbf16> to vector<1x2x32xbf16>
    %517 = vector.shape_cast %516 : vector<1x2x32xbf16> to vector<2x32xbf16>
    %cst_320 = arith.constant dense<0.000000e+00> : vector<2x288xf32>
    %518 = tpu.matmul %517, %515, %cst_320 {dimension_numbers = #tpu.dot_dimension_numbers<[1], [0], [0], [1], [0, 0, 1, 1], [], []>} : vector<2x32xbf16>, vector<32x288xbf16>, vector<2x288xf32> -> vector<2x288xf32>
    %519 = arith.addf %514, %518 : vector<2x288xf32>
    %c0_321 = arith.constant 0 : index
    %c20_322 = arith.constant 20 : index
    %520 = vector.load %arg13[%c0_321, %c20_322] : memref<32x326xbf16, #tpu.memory_space<vmem>>, vector<32x288xbf16>
    %521 = vector.extract_strided_slice %494 {offsets = [5, 0, 0], sizes = [1, 2, 32], strides = [1, 1, 1]} : vector<9x2x32xbf16> to vector<1x2x32xbf16>
    %522 = vector.shape_cast %521 : vector<1x2x32xbf16> to vector<2x32xbf16>
    %cst_323 = arith.constant dense<0.000000e+00> : vector<2x288xf32>
    %523 = tpu.matmul %522, %520, %cst_323 {dimension_numbers = #tpu.dot_dimension_numbers<[1], [0], [0], [1], [0, 0, 1, 1], [], []>} : vector<2x32xbf16>, vector<32x288xbf16>, vector<2x288xf32> -> vector<2x288xf32>
    %524 = arith.addf %519, %523 : vector<2x288xf32>
    %c0_324 = arith.constant 0 : index
    %c36_325 = arith.constant 36 : index
    %525 = vector.load %arg13[%c0_324, %c36_325] : memref<32x326xbf16, #tpu.memory_space<vmem>>, vector<32x288xbf16>
    %526 = vector.extract_strided_slice %494 {offsets = [6, 0, 0], sizes = [1, 2, 32], strides = [1, 1, 1]} : vector<9x2x32xbf16> to vector<1x2x32xbf16>
    %527 = vector.shape_cast %526 : vector<1x2x32xbf16> to vector<2x32xbf16>
    %cst_326 = arith.constant dense<0.000000e+00> : vector<2x288xf32>
    %528 = tpu.matmul %527, %525, %cst_326 {dimension_numbers = #tpu.dot_dimension_numbers<[1], [0], [0], [1], [0, 0, 1, 1], [], []>} : vector<2x32xbf16>, vector<32x288xbf16>, vector<2x288xf32> -> vector<2x288xf32>
    %529 = arith.addf %524, %528 : vector<2x288xf32>
    %c0_327 = arith.constant 0 : index
    %c37_328 = arith.constant 37 : index
    %530 = vector.load %arg13[%c0_327, %c37_328] : memref<32x326xbf16, #tpu.memory_space<vmem>>, vector<32x288xbf16>
    %531 = vector.extract_strided_slice %494 {offsets = [7, 0, 0], sizes = [1, 2, 32], strides = [1, 1, 1]} : vector<9x2x32xbf16> to vector<1x2x32xbf16>
    %532 = vector.shape_cast %531 : vector<1x2x32xbf16> to vector<2x32xbf16>
    %cst_329 = arith.constant dense<0.000000e+00> : vector<2x288xf32>
    %533 = tpu.matmul %532, %530, %cst_329 {dimension_numbers = #tpu.dot_dimension_numbers<[1], [0], [0], [1], [0, 0, 1, 1], [], []>} : vector<2x32xbf16>, vector<32x288xbf16>, vector<2x288xf32> -> vector<2x288xf32>
    %534 = arith.addf %529, %533 : vector<2x288xf32>
    %c0_330 = arith.constant 0 : index
    %c38_331 = arith.constant 38 : index
    %535 = vector.load %arg13[%c0_330, %c38_331] : memref<32x326xbf16, #tpu.memory_space<vmem>>, vector<32x288xbf16>
    %536 = vector.extract_strided_slice %494 {offsets = [8, 0, 0], sizes = [1, 2, 32], strides = [1, 1, 1]} : vector<9x2x32xbf16> to vector<1x2x32xbf16>
    %537 = vector.shape_cast %536 : vector<1x2x32xbf16> to vector<2x32xbf16>
    %cst_332 = arith.constant dense<0.000000e+00> : vector<2x288xf32>
    %538 = tpu.matmul %537, %535, %cst_332 {dimension_numbers = #tpu.dot_dimension_numbers<[1], [0], [0], [1], [0, 0, 1, 1], [], []>} : vector<2x32xbf16>, vector<32x288xbf16>, vector<2x288xf32> -> vector<2x288xf32>
    %539 = arith.addf %534, %538 : vector<2x288xf32>
    %540 = vector.broadcast %495 : vector<2x1xf32> to vector<2x288xf32>
    %541 = arith.addf %539, %540 : vector<2x288xf32>
    %542 = vector.extract_strided_slice %13 {offsets = [0, 19], sizes = [2, 288], strides = [1, 1]} : vector<2x326xf32> to vector<2x288xf32>
    %543 = arith.addf %541, %542 : vector<2x288xf32>
    %cst_333 = arith.constant 0.000000e+00 : f32
    %544 = vector.broadcast %cst_333 : f32 to vector<2x288xf32>
    %545 = arith.cmpf oge, %543, %544 : vector<2x288xf32>
    %cst_334 = arith.constant 0.00999999977 : f32
    %546 = vector.broadcast %cst_334 : f32 to vector<2x288xf32>
    %547 = arith.mulf %546, %543 : vector<2x288xf32>
    %548 = arith.select %545, %543, %547 : vector<2x288xi1>, vector<2x288xf32>
    %c0_335 = arith.constant 0 : index
    %c0_336 = arith.constant 0 : index
    %c0_337 = arith.constant 0 : index
    %549 = vector.load %arg9[%c0_335, %c0_336, %c0_337] : memref<1x2x288xf32, #tpu.memory_space<vmem>>, vector<1x2x288xf32>
    %550 = vector.shape_cast %549 : vector<1x2x288xf32> to vector<2x288xf32>
    %551 = vector.shape_cast %548 : vector<2x288xf32> to vector<1x2x288xf32>
    tpu.vector_store %arg9[%c0_335, %c0_336, %c0_337], %551 {strides = array<i32>} : memref<1x2x288xf32, #tpu.memory_space<vmem>>, vector<1x2x288xf32>,
    return
  }
  func.func @transform_0(%arg0: i32) -> (i32, i32, i32) {
    %c0_i32 = arith.constant 0 : i32
    %c0_i32_0 = arith.constant 0 : i32
    %c0_i32_1 = arith.constant 0 : i32
    return %arg0, %c0_i32, %c0_i32_0 : i32, i32, i32
  }
  func.func @transform_1(%arg0: i32) -> (i32, i32) {
    %c0_i32 = arith.constant 0 : i32
    %c0_i32_0 = arith.constant 0 : i32
    %c0_i32_1 = arith.constant 0 : i32
    return %c0_i32, %c0_i32_0 : i32, i32
  }
  func.func @transform_2(%arg0: i32) -> (i32, i32, i32) {
    %c0_i32 = arith.constant 0 : i32
    %c0_i32_0 = arith.constant 0 : i32
    %c0_i32_1 = arith.constant 0 : i32
    %c0_i32_2 = arith.constant 0 : i32
    return %c0_i32, %c0_i32_0, %c0_i32_1 : i32, i32, i32
  }
  func.func @transform_3(%arg0: i32) -> (i32, i32) {
    %c0_i32 = arith.constant 0 : i32
    %c0_i32_0 = arith.constant 0 : i32
    %c0_i32_1 = arith.constant 0 : i32
    return %c0_i32, %c0_i32_0 : i32, i32
  }
  func.func @transform_4(%arg0: i32) -> (i32, i32, i32, i32) {
    %c0_i32 = arith.constant 0 : i32
    %c0_i32_0 = arith.constant 0 : i32
    %c0_i32_1 = arith.constant 0 : i32
    %c0_i32_2 = arith.constant 0 : i32
    %c0_i32_3 = arith.constant 0 : i32
    return %c0_i32, %c0_i32_0, %c0_i32_1, %c0_i32_2 : i32, i32, i32, i32
  }
  func.func @transform_5(%arg0: i32) -> (i32, i32, i32) {
    %c0_i32 = arith.constant 0 : i32
    %c0_i32_0 = arith.constant 0 : i32
    %c0_i32_1 = arith.constant 0 : i32
    %c0_i32_2 = arith.constant 0 : i32
    return %c0_i32, %c0_i32_0, %c0_i32_1 : i32, i32, i32
  }
  func.func @transform_6(%arg0: i32) -> (i32, i32, i32) {
    %c0_i32 = arith.constant 0 : i32
    %c0_i32_0 = arith.constant 0 : i32
    %c0_i32_1 = arith.constant 0 : i32
    %c0_i32_2 = arith.constant 0 : i32
    return %c0_i32, %c0_i32_0, %c0_i32_1 : i32, i32, i32
  }
  func.func @transform_7(%arg0: i32) -> (i32, i32) {
    %c0_i32 = arith.constant 0 : i32
    %c0_i32_0 = arith.constant 0 : i32
    %c0_i32_1 = arith.constant 0 : i32
    return %c0_i32, %c0_i32_0 : i32, i32
  }
  func.func @transform_8(%arg0: i32) -> (i32, i32, i32) {
    %c0_i32 = arith.constant 0 : i32
    %c0_i32_0 = arith.constant 0 : i32
    %c0_i32_1 = arith.constant 0 : i32
    return %arg0, %c0_i32, %c0_i32_0 : i32, i32, i32
  }
}

</mosaic_0001>

<bundles_post_ra>
// kernel: feature_residual_unit.1
= control target key start
LH: loop header
LB: loop body
LE: loop exit
PB: predicated region body
PF: predicated region fallthrough
CT: control target
= control target key end

     0   :  { %s12267_s27 = smov 0   ;;  %s16791_s0 = inlined_call_operand.vmem [shape: f32[2,2,326], index: 0, kind: input, shape index: {}]   ;;  %s16792_s1 = inlined_call_operand.vmem [shape: f32[1,288], index: 1, kind: input, shape index: {}]   ;;  %s16793_s2 = inlined_call_operand.vmem [shape: bf16[9,32,2], index: 2, kind: input, shape index: {}]   ;;  %s16794_s3 = inlined_call_operand.vmem [shape: f32[32,1], index: 3, kind: input, shape index: {}]   ;;  %s16795_s4 = inlined_call_operand.vmem [shape: bf16[7,9,32,32], index: 4, kind: input, shape index: {}]   ;;  %s16796_s5 = inlined_call_operand.vmem [shape: f32[7,32,1], index: 5, kind: input, shape index: {}]   ;;  %s16797_s6 = inlined_call_operand.vmem [shape: bf16[9,2,32], index: 6, kind: input, shape index: {}]   ;;  %s16798_s7 = inlined_call_operand.vmem [shape: f32[2,1], index: 7, kind: input, shape index: {}]   ;;  %s16799_s8 = inlined_call_operand.vmem [shape: f32[2,2,288], index: 8, kind: output, shape index: {}]  }
   0x1 LB: > { %s10424_s28 = sadd.s32 4294967295, %s12210_s27   ;;  %p10428_p0 = scmp.ge.s32.totalorder %s12210_s27, 1  ;;  %s12210_s27 = sphi %s12267_s27, %s18_s27  }
   0x2   : > { %p262_p1 = scmp.lt.s32.totalorder %s12210_s27, 3 }
   0x4   : > { %p263_p2 = pnand %p10428_p0, %p262_p1 }
   0x6   : > { %266 = sbr.rel (%p263_p2) target bundleno = 5331 (0x14d3), region = 52 }
   0xb   : > { %p296_p3 = scmp.lt.s32.totalorder %s10424_s28, 1  ;;  %s12212_s11 = smov 127   ;;  %vm435_vm0 = vcmask 1040384   ;;  %v11900_v13 = vld [vmem:[%s16793_s2] sm:$0xff]  ;;  %vm428_vm1 = vcmask 15360   ;;  %v12325_v14 = vld [vmem:[%s16793_s2 + $0x8] sm:$0xff] }
   0xc   : > { %s12213_s12 = smov 126   ;;  %s12214_s13 = smov 110   ;;  %v11902_v19 = vld [vmem:[%s16793_s2 + $0x10] sm:$0xff]  ;;  %vm600_vm2 = vcmask 1031168   ;;  %vm425_vm3 = vcmask 1039360   ;;  %v12339_v24 = vld [vmem:[%s16793_s2 + $0x20] sm:$0xff] }
   0xd   : > { %s17179_s28 = smov (!%p296_p3, %s10424_s28), 1  ;;  %s12215_s14 = smov 109   ;;  %v11903_v34 = vld [vmem:[%s16793_s2 + $0x18] sm:$0xff]  ;;  %v11905_v35 = vld [vmem:[%s16793_s2 + $0x28] sm:$0xff]  ;;  %vm703_vm4 = vcmask 900096   ;;  %v11906_v45 = vld [vmem:[%s16793_s2 + $0x30] sm:$0xff] }
   0xe   : > { %s12092_s29 = smul.u32 6, %s17179_s28  ;;  %s12216_s15 = smov 108   ;;  %vm806_vm5 = vcmask 891904   ;;  %v11907_v50 = vld [vmem:[%s16793_s2 + $0x38] sm:$0xff]  ;;  %vm909_vm6 = vcmask 883712   ;;  %v11910_v59 = vld [vmem:[%s16793_s2 + $0x50] sm:$0xff] }
   0xf   : > { %s12217_s16 = smov 92   ;;  %s12218_s17 = smov 91   ;;  %v12406_v60 = vld [vmem:[%s16793_s2 + $0x58] sm:$0xff]  ;;  %vm1012_vm7 = vcmask 752640   ;;  %vm1115_vm8 = vcmask 744448   ;;  %vm16806_vm9 = vcmask 736256  }
  0x10   : > { %s300_s10 = scalar_lea.vmem %s16791_s0, %s12092_s29  ;;  %s12219_s18 = smov 90   ;;  %vm308_vm14 = vcmask 150528  }
  0x11   : > { %v350_v0 = vld [vmem:[%s300_s10] sm:$0x3f]  ;;  %s12221_s21 = smov 19  }
  0x12   : > { %352 = vst [vmem:[#allocation1] ss:$4 sm:$0xff] %v350_v0 }
  0x19   : > { %v355_v1 = vld.sshfl [vmem:[#allocation1 + $0x10] sm:$0xff pattern:$0x73625140]  ;;  %v353_v2 = vld.sshfl [vmem:[#allocation1] sm:$0xff pattern:$0x73625140] }
  0x1a   : > { %v360_v3 = vpack.c.bf16 %v355_v1, %v355_v1  ;;  %v354_v4 = vld.sshfl [vmem:[#allocation1 + $0x8] sm:$0xff pattern:$0x73625140] }
  0x1b   : > { %v359_v5 = vpack.c.bf16 %v354_v4, %v353_v2  ;;  %10327 = vst [vmem:[#allocation1] ss:$4 sm:$0xff] %v350_v0 }
  0x1c   : > { %v415_v6 = vunpack.c.l.b16 %v360_v3 }
  0x1d   : > { %v413_v7 = vunpack.c.l.b16 %v359_v5  ;;  %v414_v8 = vunpack.c.h.b16 %v359_v5  ;;  %v11908_v5 = vld [vmem:[%s16793_s2 + $0x40] sm:$0xff] }
  0x1e   : > { %v12283_v9 = vpack.c.b16 %v415_v6, %v415_v6 }
  0x1f   : > { %v416_v10 = vpack.c.b16 %v413_v7, %v413_v7  ;;  %v417_v11 = vpack.c.b16 %v414_v8, %v414_v8 }
  0x20   : > { %423 = vrot.lane.b32.xlu1 %v12283_v9, %s12212_s11  ;;  %v525_v31 = vsel %vm435_vm0, %v12283_v9, 0 }
  0x21   : > { %419 = vrot.lane.b32.xlu0 %v416_v10, %s12212_s11  ;;  %596 = vrot.lane.b32.xlu2 %v417_v11, %s12213_s12  ;;  %v519_v12 = vsel %vm435_vm0, %v416_v10, 0  ;;  %v522_v27 = vsel %vm435_vm0, %v417_v11, 0 }
  0x22   : > { %534 = vmatpush.bf16.msra.mxu3 %v519_v12 }
  0x25   : > { %10453 = vmatmul.msk.bf16.vlgmr.msra.gmra.mxu3 %vm428_vm1, %v11900_v13 }
  0x28   : > { %594 = vrot.lane.b32.xlu1 %v416_v10, %s12213_s12 }
  0x29   : > { %421 = vrot.lane.b32.xlu0 %v417_v11, %s12212_s11  ;;  %598 = vrot.lane.b32.xlu2 %v12283_v9, %s12213_s12 }
  0x30   : > { %699 = vrot.lane.b32.xlu1 %v417_v11, %s12214_s13 }
  0x31   : > { %697 = vrot.lane.b32.xlu0 %v416_v10, %s12214_s13  ;;  %701 = vrot.lane.b32.xlu2 %v12283_v9, %s12214_s13 }
  0x35   : > { %10454 = vmatmul.msk.bf16.gmra.mxu3 %vm428_vm1, %v12325_v14 }
  0x38   : > { %802 = vrot.lane.b32.xlu1 %v417_v11, %s12215_s14 }
  0x39   : > { %800 = vrot.lane.b32.xlu0 %v416_v10, %s12215_s14  ;;  %804 = vrot.lane.b32.xlu2 %v12283_v9, %s12215_s14 }
  0x40   : > { %905 = vrot.lane.b32.xlu1 %v417_v11, %s12216_s15 }
  0x41   : > { %903 = vrot.lane.b32.xlu0 %v416_v10, %s12216_s15  ;;  %907 = vrot.lane.b32.xlu2 %v12283_v9, %s12216_s15 }
  0x48   : > { %1008 = vrot.lane.b32.xlu1 %v417_v11, %s12217_s16 }
  0x49   : > { %1006 = vrot.lane.b32.xlu0 %v416_v10, %s12217_s16  ;;  %1010 = vrot.lane.b32.xlu2 %v12283_v9, %s12217_s16 }
  0x50   : > { %1111 = vrot.lane.b32.xlu1 %v417_v11, %s12218_s17 }
  0x51   : > { %1109 = vrot.lane.b32.xlu0 %v416_v10, %s12218_s17  ;;  %1113 = vrot.lane.b32.xlu2 %v12283_v9, %s12218_s17 }
  0x58   : > { %1214 = vrot.lane.b32.xlu1 %v417_v11, %s12219_s18  ;;  %v12439_v11 = vld [vmem:[%s16793_s2 + $0x68] sm:$0xff] }
  0x59   : > { %1212 = vrot.lane.b32.xlu0 %v416_v10, %s12219_s18  ;;  %1216 = vrot.lane.b32.xlu2 %v12283_v9, %s12219_s18  ;;  %v12426_v9 = vld [vmem:[%s16793_s2 + $0x60] sm:$0xff]  ;;  %v11909_v10 = vld [vmem:[%s16793_s2 + $0x48] sm:$0xff] }
  0x7b   : > { %v597_v15 = vpop.permute.xlu2 %596 }
  0x83   : > { %v599_v20 = vpop.permute.xlu2 %598 }
  0x84   : > { %v602_v21 = vsel %vm600_vm2, %v597_v15, %v599_v20  ;;  %v616_v38 = vsel %vm435_vm0, %v599_v20, 0 }
  0x85   : > { %v613_v22 = vsel %vm435_vm0, %v602_v21, 0 }
  0x86   : > { %644 = vmatpush.bf16.msrb.mxu3 %v613_v22 }
  0x89   : > { %10469 = vmatmul.msk.bf16.vlgmr.msrb.gmra.mxu3 %vm428_vm1, %v12339_v24 }
  0x8b   : > { %v702_v36 = vpop.permute.xlu2 %701 }
  0x8c   : > { %v719_v44 = vsel %vm435_vm0, %v702_v36, 0 }
  0x8d   : > { %766 = vmatpush.bf16.msra.mxu3 %v719_v44 }
  0x92   : > { %v424_v16 = vpop.permute.xlu1 %423 }
  0x93   : > { %v420_v17 = vpop.permute.xlu0 %419  ;;  %v443_v18 = vsel %vm435_vm0, %v424_v16, 0  ;;  %v805_v51 = vpop.permute.xlu2 %804 }
  0x94   : > { %490 = vmatpush.bf16.msra.mxu2 %v443_v18  ;;  %v822_v54 = vsel %vm435_vm0, %v805_v51, 0 }
  0x97   : > { %10443 = vmatmul.msk.bf16.vlgmr.msra.gmra.mxu2 %vm428_vm1, %v11902_v19 }
  0x99   : > { %10470 = vmatmul.msk.bf16.gmra.mxu3 %vm428_vm1, %v11905_v35 }
  0x9a   : > { %v595_v23 = vpop.permute.xlu1 %594 }
  0x9b   : > { %v422_v25 = vpop.permute.xlu0 %421  ;;  %v601_v26 = vsel %vm600_vm2, %v595_v23, %v597_v15  ;;  %v908_v61 = vpop.permute.xlu2 %907 }
  0x9c   : > { %v426_v28 = vsel %vm425_vm3, %v420_v17, %v422_v25  ;;  %v427_v29 = vsel %vm425_vm3, %v422_v25, %v424_v16  ;;  %v610_v30 = vsel %vm435_vm0, %v601_v26, 0  ;;  %v925_v1 = vsel %vm435_vm0, %v908_v61, 0 }
  0x9d   : > { %v437_v32 = vsel %vm435_vm0, %v426_v28, 0  ;;  %v440_v33 = vsel %vm435_vm0, %v427_v29, 0  ;;  %625 = vmatpush.bf16.msrb.mxu2 %v610_v30 }
  0x9e   : > { %452 = vmatpush.bf16.msra.mxu0 %v437_v32  ;;  %471 = vmatpush.bf16.msra.mxu1 %v440_v33 }
  0xa1   : > { %10439 = vmatmul.msk.bf16.vlgmr.msra.gmra.mxu0 %vm428_vm1, %v11902_v19  ;;  %10441 = vmatmul.msk.bf16.vlgmr.msra.gmra.mxu1 %vm428_vm1, %v11902_v19 }
  0xa2   : > { %553 = vmatpush.bf16.msrb.mxu0 %v522_v27  ;;  %572 = vmatpush.bf16.msrb.mxu1 %v525_v31  ;;  %v700_v37 = vpop.permute.xlu1 %699 }
  0xa3   : > { %v705_v39 = vsel %vm703_vm4, %v700_v37, %v702_v36  ;;  %v698_v40 = vpop.permute.xlu0 %697  ;;  %v1011_v4 = vpop.permute.xlu2 %1010 }
  0xa4   : > { %v704_v41 = vsel %vm703_vm4, %v698_v40, %v700_v37  ;;  %v716_v42 = vsel %vm435_vm0, %v705_v39, 0  ;;  %v1028_v21 = vsel %vm435_vm0, %v1011_v4, 0 }
  0xa5   : > { %v713_v43 = vsel %vm435_vm0, %v704_v41, 0  ;;  %747 = vmatpush.bf16.msra.mxu2 %v716_v42 }
  0xa6   : > { %663 = vmatpush.bf16.msra.mxu0 %v616_v38  ;;  %728 = vmatpush.bf16.msra.mxu1 %v713_v43 }
  0xa7   : > { %10444 = vmatmul.msk.bf16.gmra.mxu2 %vm428_vm1, %v11903_v34 }
  0xa8   : > { %v536_v12 = vpop.f32.mrf.mxu3 }
  0xa9   : > { %10485 = vmatmul.msk.bf16.vlgmr.msra.gmra.mxu3 %vm428_vm1, %v11906_v45 }
  0xaa   : > { %v803_v46 = vpop.permute.xlu1 %802 }
  0xab   : > { %v801_v47 = vpop.permute.xlu0 %800  ;;  %v808_v53 = vsel %vm806_vm5, %v803_v46, %v805_v51 }
  0xac   : > { %v807_v48 = vsel %vm806_vm5, %v801_v47, %v803_v46  ;;  %v819_v56 = vsel %vm435_vm0, %v808_v53, 0 }
  0xad   : > { %v816_v49 = vsel %vm435_vm0, %v807_v48, 0 }
  0xb0   : > { %v12449_v20 = vpop.f32.mrf.mxu3 }
  0xb1   : > { %10440 = vmatmul.msk.bf16.gmra.mxu0 %vm428_vm1, %v11903_v34  ;;  %10442 = vmatmul.msk.bf16.gmra.mxu1 %vm428_vm1, %v11903_v34  ;;  %v11915_v34 = vld [vmem:[%s16793_s2 + $0x78] sm:$0xff] }
  0xb2   : > { %v906_v52 = vpop.permute.xlu1 %905 }
  0xb3   : > { %v904_v55 = vpop.permute.xlu0 %903  ;;  %v911_v62 = vsel %vm909_vm6, %v906_v52, %v908_v61 }
  0xb4   : > { %v910_v57 = vsel %vm909_vm6, %v904_v55, %v906_v52  ;;  %v922_v2 = vsel %vm435_vm0, %v911_v62, 0  ;;  %v400_v62 = vld [vmem:[%s16794_s3 + $0x18] sm:$0xff] }
  0xb5   : > { %v919_v58 = vsel %vm435_vm0, %v910_v57, 0 }
  0xb6   : > { %934 = vmatpush.bf16.msrb.mxu3 %v919_v58 }
  0xb7   : > { %10467 = vmatmul.msk.bf16.vlgmr.msrb.gmra.mxu2 %vm428_vm1, %v12339_v24 }
  0xb8   : > { %869 = vmatpush.bf16.msrb.mxu2 %v822_v54  ;;  %v541_v28 = vpop.f32.mrf.mxu3 }
  0xb9   : > { %10486 = vmatmul.msk.bf16.gmra.mxu3 %vm428_vm1, %v11907_v50 }
  0xba   : > { %v1009_v63 = vpop.permute.xlu1 %1008 }
  0xbb   : > { %v1007_v0 = vpop.permute.xlu0 %1006  ;;  %v1014_v7 = vsel %vm1012_vm7, %v1009_v63, %v1011_v4 }
  0xbc   : > { %v1013_v3 = vsel %vm1012_vm7, %v1007_v0, %v1009_v63  ;;  %v1025_v8 = vsel %vm435_vm0, %v1014_v7, 0  ;;  %v16800_v0 = vmov 0  }
  0xbd   : > { %v1022_v6 = vsel %vm435_vm0, %v1013_v3, 0  ;;  %1056 = vmatpush.bf16.msra.mxu3 %v1025_v8  ;;  %12112 = vset.pattern.permute.xlu1 %v16800_v0  ;;  %v398_v8 = vld [vmem:[%s16794_s3 + $0x8] sm:$0xff] }
  0xbe   : > { %12111 = vset.pattern.permute.xlu0 %v16800_v0  ;;  %1322 = vperm.xlu1 %12112, %v400_v62  }
  0xbf   : > { %12113 = vset.pattern.permute.xlu2 %v16800_v0 }
  0xc0   : > { %v12469_v32 = vpop.f32.mrf.mxu3 }
  0xc1   : > { %10455 = vmatmul.msk.bf16.vlgmr.msrb.gmra.mxu0 %vm428_vm1, %v11900_v13  ;;  %10457 = vmatmul.msk.bf16.vlgmr.msrb.gmra.mxu1 %vm428_vm1, %v11900_v13  ;;  %v1114_v13 = vpop.permute.xlu2 %1113 }
  0xc2   : > { %831 = vmatpush.bf16.msrb.mxu0 %v816_v49  ;;  %850 = vmatpush.bf16.msrb.mxu1 %v819_v56  ;;  %v1131_v22 = vsel %vm435_vm0, %v1114_v13, 0 }
  0xc3   : > { %v1110_v16 = vpop.permute.xlu0 %1109 }
  0xc6   : > { %1312 = vperm.xlu1 %12112, %v398_v8  }
  0xc7   : > { %10468 = vmatmul.msk.bf16.gmra.mxu2 %vm428_vm1, %v11905_v35 }
  0xc9   : > { %10509 = vmatmul.msk.bf16.vlgmr.msrb.gmra.mxu3 %vm428_vm1, %v11910_v59  ;;  %v1217_v39 = vpop.permute.xlu2 %1216 }
  0xca   : > { %1178 = vmatpush.bf16.msrb.mxu3 %v1131_v22  ;;  %v1234_v43 = vsel %vm435_vm0, %v1217_v39, 0 }
  0xcb   : > { %v1213_v42 = vpop.permute.xlu0 %1212 }
  0xd1   : > { %10456 = vmatmul.msk.bf16.gmra.mxu0 %vm428_vm1, %v12325_v14  ;;  %10458 = vmatmul.msk.bf16.gmra.mxu1 %vm428_vm1, %v12325_v14  ;;  %v1112_v14 = vpop.permute.xlu1 %1111 }
  0xd2   : > { %v1117_v15 = vsel %vm1115_vm8, %v1112_v14, %v1114_v13  ;;  %v1116_v17 = vsel %vm1115_vm8, %v1110_v16, %v1112_v14 }
  0xd3   : > { %v1128_v18 = vsel %vm435_vm0, %v1117_v15, 0  ;;  %v1125_v19 = vsel %vm435_vm0, %v1116_v17, 0  ;;  %v399_v15 = vld [vmem:[%s16794_s3 + $0x10] sm:$0xff] }
  0xd4   : > { %1317 = vperm.xlu0 %12111, %v399_v15  }
  0xd7   : > { %10483 = vmatmul.msk.bf16.vlgmr.msra.gmra.mxu2 %vm428_vm1, %v11906_v45 }
  0xd8   : > { %1037 = vmatpush.bf16.msra.mxu2 %v1022_v6 }
  0xd9   : > { %10510 = vmatmul.msk.bf16.gmra.mxu3 %vm428_vm1, %v12406_v60  ;;  %v1215_v41 = vpop.permute.xlu1 %1214 }
  0xda   : > { %v1220_v44 = vsel %vm16806_vm9, %v1215_v41, %v1217_v39 }
  0xdb   : > { %v1231_v49 = vsel %vm435_vm0, %v1220_v44, 0 }
  0xe1   : > { %10471 = vmatmul.msk.bf16.vlgmr.msra.gmra.mxu0 %vm428_vm1, %v12339_v24  ;;  %10481 = vmatmul.msk.bf16.vlgmr.msra.gmra.mxu1 %vm428_vm1, %v11906_v45  ;;  %v11914_v24 = vld [vmem:[%s16793_s2 + $0x70] sm:$0xff]  ;;  %v1219_v45 = vsel %vm16806_vm9, %v1213_v42, %v1215_v41 }
  0xe2   : > { %972 = vmatpush.bf16.msra.mxu1 %v925_v1  ;;  %953 = vmatpush.bf16.msra.mxu0 %v922_v2  ;;  %v1228_v46 = vsel %vm435_vm0, %v1219_v45, 0 }
  0xe7   : > { %10484 = vmatmul.msk.bf16.gmra.mxu2 %vm428_vm1, %v11907_v50 }
  0xe9   : > { %10525 = vmatmul.msk.bf16.vlgmr.msra.gmra.mxu3 %vm428_vm1, %v12426_v9 }
  0xf1   : > { %10472 = vmatmul.msk.bf16.gmra.mxu0 %vm428_vm1, %v11905_v35  ;;  %10482 = vmatmul.msk.bf16.gmra.mxu1 %vm428_vm1, %v11907_v50 }
  0xf7   : > { %10499 = vmatmul.msk.bf16.vlgmr.msrb.gmra.mxu2 %vm428_vm1, %v11908_v5 }
  0xf8   : > { %1159 = vmatpush.bf16.msrb.mxu2 %v1128_v18 }
  0xf9   : > { %10526 = vmatmul.msk.bf16.gmra.mxu3 %vm428_vm1, %v12439_v11 }
 0x101   : > { %10495 = vmatmul.msk.bf16.vlgmr.msrb.gmra.mxu0 %vm428_vm1, %v11908_v5  ;;  %10497 = vmatmul.msk.bf16.vlgmr.msrb.gmra.mxu1 %vm428_vm1, %v11908_v5 }
 0x102   : > { %1140 = vmatpush.bf16.msrb.mxu1 %v1125_v19  ;;  %1075 = vmatpush.bf16.msrb.mxu0 %v1028_v21 }
 0x107   : > { %10500 = vmatmul.msk.bf16.gmra.mxu2 %vm428_vm1, %v11909_v10 }
 0x109   : > { %10541 = vmatmul.msk.bf16.vlgmr.msrb.gmra.mxu3 %vm428_vm1, %v11914_v24 }
 0x10c   : > { %v646_v38 = vpop.f32.mrf.mxu3 }
 0x111   : > { %10496 = vmatmul.msk.bf16.gmra.mxu0 %vm428_vm1, %v11909_v10  ;;  %10498 = vmatmul.msk.bf16.gmra.mxu1 %vm428_vm1, %v11909_v10  ;;  %v11916_v10 = vld [vmem:[%s16793_s2 + $0x80] sm:$0xff] }
 0x114   : > { %v12491_v52 = vpop.f32.mrf.mxu3 }
 0x117   : > { %10523 = vmatmul.msk.bf16.vlgmr.msra.gmra.mxu2 %vm428_vm1, %v12426_v9 }
 0x118   : > { %1281 = vmatpush.bf16.msra.mxu2 %v1234_v43 }
 0x119   : > { %10542 = vmatmul.msk.bf16.gmra.mxu3 %vm428_vm1, %v11915_v34 }
 0x11a   : > { %v492_v23 = vpop.f32.mrf.mxu2 }
 0x11e   : > { %v454_v25 = vpop.f32.mrf.mxu0  ;;  %v473_v26 = vpop.f32.mrf.mxu1 }
 0x11f   : > { %v537_v27 = vadd.f32 %v536_v12, %v454_v25 }
 0x121   : > { %10511 = vmatmul.msk.bf16.vlgmr.msra.gmra.mxu0 %vm428_vm1, %v11910_v59  ;;  %10513 = vmatmul.msk.bf16.vlgmr.msra.gmra.mxu1 %vm428_vm1, %v11910_v59  ;;  %v651_v59 = vpop.f32.mrf.mxu3 }
 0x122   : > { %v12461_v29 = vpop.f32.mrf.mxu2  ;;  %1243 = vmatpush.bf16.msra.mxu0 %v1228_v46  ;;  %1262 = vmatpush.bf16.msra.mxu1 %v1231_v49 }
 0x126   : > { %v12463_v30 = vpop.f32.mrf.mxu0  ;;  %v12465_v31 = vpop.f32.mrf.mxu1 }
 0x127   : > { %10524 = vmatmul.msk.bf16.gmra.mxu2 %vm428_vm1, %v12439_v11 }
 0x129   : > { %v12509_v6 = vpop.f32.mrf.mxu3 }
 0x12a   : > { %v497_v33 = vpop.f32.mrf.mxu2 }
 0x12e   : > { %v459_v35 = vpop.f32.mrf.mxu0  ;;  %v478_v36 = vpop.f32.mrf.mxu1 }
 0x12f   : > { %v542_v37 = vadd.f32 %v541_v28, %v459_v35 }
 0x131   : > { %10512 = vmatmul.msk.bf16.gmra.mxu0 %vm428_vm1, %v12406_v60  ;;  %10514 = vmatmul.msk.bf16.gmra.mxu1 %vm428_vm1, %v12406_v60 }
 0x132   : > { %v12479_v40 = vpop.f32.mrf.mxu2 }
 0x136   : > { %v12485_v47 = vpop.f32.mrf.mxu0  ;;  %v12487_v48 = vpop.f32.mrf.mxu1 }
 0x137   : > { %10539 = vmatmul.msk.bf16.vlgmr.msrb.gmra.mxu2 %vm428_vm1, %v11914_v24 }
 0x13a   : > { %v627_v50 = vpop.f32.mrf.mxu2 }
 0x13b   : > { %v675_v51 = vadd.f32 %v627_v50, %v537_v27 }
 0x13e   : > { %v555_v53 = vpop.f32.mrf.mxu0  ;;  %v574_v54 = vpop.f32.mrf.mxu1 }
 0x13f   : > { %v556_v55 = vadd.f32 %v555_v53, %v473_v26  ;;  %v575_v56 = vadd.f32 %v574_v54, %v492_v23  ;;  %v397_v23 = vld [vmem:[%s16794_s3] sm:$0xff]  ;;  %v11917_v26 = vld [vmem:[%s16793_s2 + $0x88] sm:$0xff] }
 0x140   : > { %1307 = vperm.xlu2 %12113, %v397_v23  }
 0x141   : > { %v676_v57 = vadd.f32 %v646_v38, %v556_v55  ;;  %10527 = vmatmul.msk.bf16.vlgmr.msrb.gmra.mxu0 %vm428_vm1, %v12426_v9  ;;  %10537 = vmatmul.msk.bf16.vlgmr.msrb.gmra.mxu1 %vm428_vm1, %v11914_v24 }
 0x142   : > { %v12496_v58 = vpop.f32.mrf.mxu2 }
 0x146   : > { %v12498_v60 = vpop.f32.mrf.mxu0  ;;  %v12500_v61 = vpop.f32.mrf.mxu1 }
 0x147   : > { %10540 = vmatmul.msk.bf16.gmra.mxu2 %vm428_vm1, %v11915_v34 }
 0x14a   : > { %v632_v63 = vpop.f32.mrf.mxu2 }
 0x14b   : > { %v681_v1 = vadd.f32 %v632_v63, %v542_v37 }
 0x14e   : > { %v560_v2 = vpop.f32.mrf.mxu0  ;;  %v579_v3 = vpop.f32.mrf.mxu1 }
 0x14f   : > { %v561_v4 = vadd.f32 %v560_v2, %v478_v36  ;;  %v580_v5 = vadd.f32 %v579_v3, %v497_v33 }
 0x151   : > { %v682_v7 = vadd.f32 %v651_v59, %v561_v4  ;;  %10528 = vmatmul.msk.bf16.gmra.mxu0 %vm428_vm1, %v12439_v11  ;;  %10538 = vmatmul.msk.bf16.gmra.mxu1 %vm428_vm1, %v11915_v34  ;;  %v768_v11 = vpop.f32.mrf.mxu3 }
 0x152   : > { %v12517_v9 = vpop.f32.mrf.mxu2 }
 0x156   : > { %v12522_v12 = vpop.f32.mrf.mxu0  ;;  %v12524_v13 = vpop.f32.mrf.mxu1 }
 0x157   : > { %10555 = vmatmul.msk.bf16.vlgmr.msra.gmra.mxu2 %vm428_vm1, %v11916_v10 }
 0x159   : > { %v12537_v25 = vpop.f32.mrf.mxu3 }
 0x15a   : > { %v749_v14 = vpop.f32.mrf.mxu2 }
 0x15b   : > { %v779_v16 = vadd.f32 %v749_v14, %v676_v57 }
 0x15e   : > { %v665_v17 = vpop.f32.mrf.mxu0  ;;  %v730_v18 = vpop.f32.mrf.mxu1 }
 0x15f   : > { %v677_v19 = vadd.f32 %v665_v17, %v575_v56  ;;  %v778_v21 = vadd.f32 %v730_v18, %v675_v51 }
 0x161   : > { %v780_v22 = vadd.f32 %v768_v11, %v677_v19  ;;  %10551 = vmatmul.msk.bf16.vlgmr.msra.gmra.mxu0 %vm428_vm1, %v11916_v10  ;;  %10553 = vmatmul.msk.bf16.vlgmr.msra.gmra.mxu1 %vm428_vm1, %v11916_v10  ;;  %v773_v35 = vpop.f32.mrf.mxu3 }
 0x162   : > { %v12535_v24 = vpop.f32.mrf.mxu2 }
 0x166   : > { %v12542_v27 = vpop.f32.mrf.mxu0  ;;  %v12544_v28 = vpop.f32.mrf.mxu1 }
 0x167   : > { %10556 = vmatmul.msk.bf16.gmra.mxu2 %vm428_vm1, %v11917_v26 }
 0x169   : > { %v12555_v45 = vpop.f32.mrf.mxu3 }
 0x16a   : > { %v754_v33 = vpop.f32.mrf.mxu2 }
 0x16b   : > { %v785_v34 = vadd.f32 %v754_v33, %v682_v7 }
 0x16e   : > { %v670_v36 = vpop.f32.mrf.mxu0  ;;  %v735_v37 = vpop.f32.mrf.mxu1 }
 0x16f   : > { %v683_v38 = vadd.f32 %v670_v36, %v580_v5  ;;  %v784_v39 = vadd.f32 %v735_v37, %v681_v1 }
 0x171   : > { %v786_v41 = vadd.f32 %v773_v35, %v683_v38  ;;  %10552 = vmatmul.msk.bf16.gmra.mxu0 %vm428_vm1, %v11917_v26  ;;  %10554 = vmatmul.msk.bf16.gmra.mxu1 %vm428_vm1, %v11917_v26  ;;  %v936_v55 = vpop.f32.mrf.mxu3 }
 0x172   : > { %v12549_v42 = vpop.f32.mrf.mxu2 }
 0x176   : > { %v12551_v43 = vpop.f32.mrf.mxu0  ;;  %v12553_v44 = vpop.f32.mrf.mxu1 }
 0x179   : > { %v12559_v63 = vpop.f32.mrf.mxu3 }
 0x17a   : > { %v871_v46 = vpop.f32.mrf.mxu2 }
 0x17b   : > { %v883_v49 = vadd.f32 %v871_v46, %v780_v22 }
 0x17e   : > { %v833_v50 = vpop.f32.mrf.mxu0  ;;  %v852_v51 = vpop.f32.mrf.mxu1 }
 0x17f   : > { %v881_v53 = vadd.f32 %v833_v50, %v778_v21  ;;  %v882_v54 = vadd.f32 %v852_v51, %v779_v16 }
 0x181   : > { %v12567_v8 = vpop.f32.mrf.mxu3 }
 0x182   : > { %v12557_v56 = vpop.f32.mrf.mxu2 }
 0x183   : > { %16835 = vst [vmem:[#allocation7_spill] sm:$0xff] %v12557_v56  ;;  %v539_v56 = vadd.f32 %v12449_v20, %v12463_v30 }
 0x186   : > { %v835_v57 = vpop.f32.mrf.mxu0  ;;  %v854_v59 = vpop.f32.mrf.mxu1 }
 0x189   : > { %v12573_v17 = vpop.f32.mrf.mxu3 }
 0x18a   : > { %v876_v62 = vpop.f32.mrf.mxu2  ;;  %16836 = vst [vmem:[#allocation8_spill] sm:$0xff] %v12573_v17 }
 0x18b   : > { %v889_v1 = vadd.f32 %v876_v62, %v786_v41 }
 0x18e   : > { %v838_v2 = vpop.f32.mrf.mxu0  ;;  %v857_v3 = vpop.f32.mrf.mxu1 }
 0x18f   : > { %v12561_v4 = vadd.f32 %v838_v2, %v784_v39  ;;  %v12563_v5 = vadd.f32 %v857_v3, %v785_v34 }
 0x191   : > { %v1058_v23 = vpop.f32.mrf.mxu3 }
 0x192   : > { %v12565_v7 = vpop.f32.mrf.mxu2 }
 0x196   : > { %v12569_v10 = vpop.f32.mrf.mxu0  ;;  %v12571_v11 = vpop.f32.mrf.mxu1 }
 0x199   : > { %v1060_v37 = vpop.f32.mrf.mxu3 }
 0x19a   : > { %v1039_v14 = vpop.f32.mrf.mxu2 }
 0x19e   : > { %v955_v15 = vpop.f32.mrf.mxu0  ;;  %v974_v16 = vpop.f32.mrf.mxu1 }
 0x19f   : > { %v12575_v18 = vadd.f32 %v974_v16, %v883_v49 }
 0x1a1   : > { %v12591_v46 = vpop.f32.mrf.mxu3 }
 0x1a2   : > { %v1041_v19 = vpop.f32.mrf.mxu2 }
 0x1a6   : > { %v957_v21 = vpop.f32.mrf.mxu0  ;;  %v12577_v22 = vpop.f32.mrf.mxu1 }
 0x1a7   : > { %16837 = vst [vmem:[#allocation9_spill] sm:$0xff] %v12577_v22 }
 0x1a9   : > { %v12597_v3 = vpop.f32.mrf.mxu3 }
 0x1aa   : > { %v12579_v26 = vpop.f32.mrf.mxu2  ;;  %16842 = vst [vmem:[#allocation14_spill] sm:$0xff] %v12597_v3  ;;  %v985_v3 = vadd.f32 %v955_v15, %v882_v54  ;;  %v12625_v54 = vpop.permute.xlu1 %1322 }
 0x1ab   : > { %v12632_v15 = vpop.permute.xlu2 %1307 }
 0x1ae   : > { %v12581_v33 = vpop.f32.mrf.mxu0  ;;  %v979_v34 = vpop.f32.mrf.mxu1 }
 0x1af   : > { %v12583_v35 = vadd.f32 %v979_v34, %v889_v1 }
 0x1b1   : > { %16838 = vst [vmem:[#allocation10_spill] sm:$0xff] %v12583_v35  ;;  %v12605_v0 = vpop.f32.mrf.mxu3  ;;  %v678_v35 = vadd.f32 %v12496_v58, %v539_v56 }
 0x1b2   : > { %v12585_v36 = vpop.f32.mrf.mxu2  ;;  %16846 = vst [vmem:[#allocation18_spill] sm:$0xff] %v12605_v0 }
 0x1b3   : > { %16839 = vst [vmem:[#allocation11_spill] sm:$0xff] %v12585_v36  ;;  %v558_v36 = vadd.f32 %v12498_v60, %v12465_v31  ;;  %v1088_v60 = vadd.f32 %v1058_v23, %v985_v3 }
 0x1b6   : > { %v12587_v38 = vpop.f32.mrf.mxu0  ;;  %v12589_v39 = vpop.f32.mrf.mxu1 }
 0x1ba   : > { %v1161_v41 = vpop.f32.mrf.mxu2 }
 0x1be   : > { %v12593_v49 = vpop.f32.mrf.mxu0  ;;  %v1142_v50 = vpop.f32.mrf.mxu1 }
 0x1bf   : > { %16840 = vst [vmem:[#allocation12_spill] sm:$0xff] %v12593_v49  ;;  %v12623_v49 = vpop.f32.mrf.mxu3 }
 0x1c2   : > { %v1163_v51 = vpop.f32.mrf.mxu2 }
 0x1c6   : > { %v12595_v62 = vpop.f32.mrf.mxu0  ;;  %v1144_v2 = vpop.f32.mrf.mxu1 }
 0x1c7   : > { %16841 = vst [vmem:[#allocation13_spill] sm:$0xff] %v12595_v62 }
 0x1ca   : > { %v12599_v1 = vpop.f32.mrf.mxu2 }
 0x1cb   : > { %16843 = vst [vmem:[#allocation15_spill] sm:$0xff] %v12599_v1 }
 0x1ce   : > { %v12601_v16 = vpop.f32.mrf.mxu0  ;;  %v12603_v34 = vpop.f32.mrf.mxu1 }
 0x1cf   : > { %16844 = vst [vmem:[#allocation16_spill] sm:$0xff] %v12601_v16  ;;  %v679_v16 = vadd.f32 %v12491_v52, %v558_v36 }
 0x1d0   : > { %16845 = vst [vmem:[#allocation17_spill] sm:$0xff] %v12603_v34  ;;  %v984_v34 = vadd.f32 %v936_v55, %v881_v53  ;;  %v544_v55 = vadd.f32 %v12469_v32, %v12485_v47 }
 0x1d1   : > { %v782_v0 = vadd.f32 %v12535_v24, %v679_v16  ;;  %v582_v24 = vadd.f32 %v12524_v13, %v12479_v40  ;;  %v12642_v40 = vld [vmem:[%s16792_s1] sm:$0x7] }
 0x1d2   : > { %v12607_v22 = vpop.f32.mrf.mxu2  ;;  %v1087_v31 = vadd.f32 %v1039_v14, %v984_v34 }
 0x1d3   : > { %16847 = vst [vmem:[#allocation19_spill] sm:$0xff] %v12607_v22  ;;  %v781_v22 = vadd.f32 %v12544_v28, %v678_v35  ;;  %v885_v30 = vadd.f32 %v854_v59, %v782_v0  ;;  %v563_v0 = vadd.f32 %v12522_v12, %v12487_v48  ;;  %v12650_v48 = vperm.slane %v12642_v40, 1  ;;  %v1185_v35 = vpop.f32.mrf.mxu3 }
 0x1d5   : > { %v884_v20 = vadd.f32 %v835_v57, %v781_v22  ;;  %v988_v58 = vadd.f32 %v957_v21, %v885_v30  ;;  %v686_v57 = vadd.f32 %v12551_v43, %v582_v24  ;;  %16851 = vst [vmem:[#allocation23_spill] sm:$0xff] %v12650_v48  ;;  %v684_v22 = vadd.f32 %v12517_v9, %v544_v55 }
 0x1d6   : > { %v12613_v62 = vpop.f32.mrf.mxu0  ;;  %v12615_v17 = vpop.f32.mrf.mxu1 }
 0x1d7   : > { %16848 = vst [vmem:[#allocation20_spill] sm:$0xff] %v12613_v62  ;;  %v1191_v62 = vadd.f32 %v1161_v41, %v1088_v60  ;;  %v987_v14 = vadd.f32 %v12559_v63, %v884_v20  ;;  %v1091_v32 = vadd.f32 %v1060_v37, %v988_v58  ;;  %v12647_v63 = vperm.slane %v12642_v40, 0 }
 0x1d8   : > { %16849 = vst [vmem:[#allocation21_spill] sm:$0xff] %v12615_v17  ;;  %v1190_v17 = vadd.f32 %v1142_v50, %v1087_v31  ;;  %v685_v41 = vadd.f32 %v12509_v6, %v563_v0  ;;  %v991_v50 = vadd.f32 %v12581_v33, %v12563_v5  ;;  %v787_v31 = vadd.f32 %v12553_v44, %v684_v22  ;;  %v12666_v5 = vpop.permute.xlu1 %1312  ;;  %v16856_v0 = vld [vmem:[#allocation16_spill] sm:$0xff]  ;;  %v16859_v22 = vld [vmem:[#allocation7_spill] sm:$0xff] }
 0x1d9   : > { %v1090_v13 = vadd.f32 %v1041_v19, %v987_v14  ;;  %16850 = vst [vmem:[#allocation22_spill] sm:$0xff] %v12647_v63  ;;  %v1194_v23 = vadd.f32 %v1163_v51, %v1091_v32  ;;  %v990_v6 = vadd.f32 %v12567_v8, %v12561_v4  ;;  %v16855_v14 = vld [vmem:[#allocation10_spill] sm:$0xff] }
 0x1da   : > { %v12621_v1 = vpop.f32.mrf.mxu2  ;;  %v1094_v44 = vadd.f32 %v12591_v46, %v991_v50  ;;  %v16854_v46 = vld [vmem:[#allocation17_spill] sm:$0xff]  ;;  %v16861_v50 = vld [vmem:[#allocation14_spill] sm:$0xff] }
 0x1db   : > { %v1193_v19 = vadd.f32 %v1144_v2, %v1090_v13  ;;  %v788_v2 = vadd.f32 %v12549_v42, %v685_v41  ;;  %v1093_v42 = vadd.f32 %v12579_v26, %v990_v6  ;;  %v16853_v26 = vld [vmem:[#allocation15_spill] sm:$0xff]  ;;  %v16863_v6 = vld [vmem:[#allocation9_spill] sm:$0xff] }
 0x1dc   : > { %v1197_v24 = vadd.f32 %v16853_v26, %v1094_v44 }
 0x1dd   : > { %v891_v30 = vadd.f32 %v12571_v11, %v788_v2  ;;  %v16852_v11 = vld [vmem:[#allocation12_spill] sm:$0xff] }
 0x1de   : > { %v1245_v56 = vpop.f32.mrf.mxu0  ;;  %v1264_v52 = vpop.f32.mrf.mxu1 }
 0x1df   : > { %v1293_v53 = vadd.f32 %v1245_v56, %v1190_v17  ;;  %v1294_v28 = vadd.f32 %v1264_v52, %v1191_v62  ;;  %v577_v17 = vadd.f32 %v12500_v61, %v12461_v29  ;;  %v789_v61 = vadd.f32 %v12555_v45, %v686_v57 }
 0x1e0   : > { %v890_v45 = vadd.f32 %v12569_v10, %v787_v31  ;;  %v994_v56 = vadd.f32 %v12587_v38, %v891_v30  ;;  %v1089_v52 = vadd.f32 %v16852_v11, %v12575_v18  ;;  %v1095_v57 = vadd.f32 %v16856_v0, %v16855_v14  ;;  %v16858_v18 = vld [vmem:[#allocation8_spill] sm:$0xff] }
 0x1e1   : > { %v1325_v59 = vadd.f32 %v12632_v15, %v1293_v53  ;;  %v1326_v21 = vadd.f32 %v12632_v15, %v1294_v28  ;;  %v680_v29 = vadd.f32 %v12542_v27, %v577_v17  ;;  %v892_v60 = vadd.f32 %v12565_v7, %v789_v61 }
 0x1e2   : > { %v12644_v47 = vpop.f32.mrf.mxu2  ;;  %v1196_v53 = vadd.f32 %v16854_v46, %v1093_v42  ;;  %v993_v32 = vadd.f32 %v16858_v18, %v890_v45  ;;  %v1198_v61 = vadd.f32 %v1185_v35, %v1095_v57  ;;  %v16865_v30 = vmov 0   ;;  %v16866_v42 = vld [vmem:[#allocation21_spill] sm:$0xff] }
 0x1e3   : > { %vm1337_vm10 = vcmp.ge.f32.partialorder %v1325_v59, 0.0  ;;  %v1349_v12 = vmul.f32 0.01, %v1325_v59  ;;  %vm1338_vm11 = vcmp.ge.f32.partialorder %v1326_v21, 0.0  ;;  %v1350_v43 = vmul.f32 0.01, %v1326_v21 }
 0x1e4   : > { %v783_v58 = vadd.f32 %v12537_v25, %v680_v29  ;;  %v995_v10 = vadd.f32 %v12589_v39, %v892_v60  ;;  %v16864_v60 = vld [vmem:[#allocation19_spill] sm:$0xff]  ;;  %311 = vst.msk [vmem:[#allocation2 + $0x18] sm:$0xf] %vm308_vm14, %v16865_v30 }
 0x1e5   : > { %v1361_v36 = vsel %vm1337_vm10, %v1325_v59, %v1349_v12  ;;  %v1362_v37 = vsel %vm1338_vm11, %v1326_v21, %v1350_v43  ;;  %v16857_v59 = vld [vmem:[#allocation20_spill] sm:$0xff]  ;;  %v1187_v12 = vpop.f32.mrf.mxu3  ;;  %309 = vst.msk [vmem:[#allocation2] sm:$0xf] %vm308_vm14, %v16865_v30 }
 0x1e6   : > { %v1247_v62 = vpop.f32.mrf.mxu0  ;;  %v1266_v3 = vpop.f32.mrf.mxu1  ;;  %v1380_v16 = vmul.f32 %v12647_v63, %v1361_v36  ;;  %v1381_v34 = vmul.f32 %v12650_v48, %v1362_v37  ;;  %v1098_v21 = vadd.f32 %v16857_v59, %v995_v10  ;;  %v16860_v37 = vld [vmem:[#allocation11_spill] sm:$0xff]  ;;  %310 = vst.msk [vmem:[#allocation2 + $0xc] sm:$0xf] %vm308_vm14, %v16865_v30 }
 0x1e7   : > { %v1296_v9 = vadd.f32 %v1247_v62, %v1193_v19  ;;  %v1297_v51 = vadd.f32 %v1266_v3, %v1194_v23  ;;  %v886_v23 = vadd.f32 %v16859_v22, %v783_v58  ;;  %v1318_v19 = vpop.permute.xlu0 %1317  ;;  %v1096_v41 = vadd.f32 %v16860_v37, %v993_v32  ;;  %v16867_v58 = vld [vmem:[#allocation13_spill] sm:$0xff]  ;;  %312 = vst.msk [vmem:[#allocation2 + $0x24] sm:$0xf] %vm308_vm14, %v16865_v30 }
 0x1e8   : > { %v1392_v33 = vpack.c.bf16 %v1381_v34, %v1380_v16  ;;  %v1097_v62 = vadd.f32 %v16861_v50, %v994_v56  ;;  %v16862_v34 = vld [vmem:[#allocation18_spill] sm:$0xff]  ;;  %318 = vst.msk [vmem:[#allocation3] sm:$0xf] %vm308_vm14, %v16865_v30 }
 0x1e9   : > { %v1328_v20 = vadd.f32 %v12666_v5, %v1296_v9  ;;  %v1329_v27 = vadd.f32 %v12666_v5, %v1297_v51  ;;  %v1192_v29 = vadd.f32 %v16862_v34, %v1089_v52  ;;  %v1201_v9 = vadd.f32 %v1187_v12, %v1098_v21  ;;  %319 = vst.msk [vmem:[#allocation3 + $0xc] sm:$0xf] %vm308_vm14, %v16865_v30 }
 0x1ea   : > { %1408 = vrot.lane.b32.xlu1 %v1392_v33, %s12221_s21  ;;  %v1288_v4 = vpop.f32.mrf.mxu2  ;;  %v989_v33 = vadd.f32 %v16863_v6, %v886_v23  ;;  %v1199_v44 = vadd.f32 %v16866_v42, %v1096_v41  ;;  %320 = vst.msk [vmem:[#allocation3 + $0x18] sm:$0xf] %vm308_vm14, %v16865_v30 }
 0x1eb   : > { %vm1340_vm12 = vcmp.ge.f32.partialorder %v1328_v20, 0.0  ;;  %v1352_v8 = vmul.f32 0.01, %v1328_v20  ;;  %vm1341_vm13 = vcmp.ge.f32.partialorder %v1329_v27, 0.0  ;;  %v1353_v7 = vmul.f32 0.01, %v1329_v27 }
 0x1ec   : > { %v1301_v35 = vadd.f32 %v1288_v4, %v1198_v61  ;;  %v1092_v56 = vadd.f32 %v16867_v58, %v989_v33  ;;  %321 = vst.msk [vmem:[#allocation3 + $0x24] sm:$0xf] %vm308_vm14, %v16865_v30 }
 0x1ed   : > { %v1364_v28 = vsel %vm1340_vm12, %v1328_v20, %v1352_v8  ;;  %v1365_v55 = vsel %vm1341_vm13, %v1329_v27, %v1353_v7  ;;  %v1200_v20 = vadd.f32 %v16864_v60, %v1097_v62  ;;  %v1295_v27 = vadd.f32 %v12621_v1, %v1192_v29  ;;  %326 = vst.msk [vmem:[#allocation4] sm:$0xf] %vm308_vm14, %v16865_v30 }
 0x1ee   : > { %v1250_v13 = vpop.f32.mrf.mxu0  ;;  %v1269_v25 = vpop.f32.mrf.mxu1  ;;  %v12687_v38 = vmul.f32 %v12647_v63, %v1364_v28  ;;  %v12690_v39 = vmul.f32 %v12650_v48, %v1365_v55  ;;  %v1333_v55 = vadd.f32 %v1318_v19, %v1301_v35  ;;  %v1195_v57 = vadd.f32 %v12623_v49, %v1092_v56  ;;  %327 = vst.msk [vmem:[#allocation4 + $0xc] sm:$0xf] %vm308_vm14, %v16865_v30 }
 0x1ef   : > { %v1299_v43 = vadd.f32 %v1250_v13, %v1196_v53  ;;  %v1300_v17 = vadd.f32 %v1269_v25, %v1197_v24  ;;  %v1327_v46 = vadd.f32 %v12632_v15, %v1295_v27  ;;  %v12725_v15 = vperm.slane %v12642_v40, 2  ;;  %328 = vst.msk [vmem:[#allocation4 + $0x18] sm:$0xf] %vm308_vm14, %v16865_v30 }
 0x1f0   : > { %v1394_v36 = vpack.c.bf16 %v12690_v39, %v12687_v38  ;;  %v1298_v49 = vadd.f32 %v12644_v47, %v1195_v57  ;;  %v1357_v40 = vmul.f32 0.01, %v1333_v55  ;;  %vm1345_vm13 = vcmp.ge.f32.partialorder %v1333_v55, 0.0  ;;  %329 = vst.msk [vmem:[#allocation4 + $0x24] sm:$0xf] %vm308_vm14, %v16865_v30 }
 0x1f1   : > { %v1331_v3 = vadd.f32 %v1318_v19, %v1299_v43  ;;  %v1332_v16 = vadd.f32 %v1318_v19, %v1300_v17  ;;  %16868 = vst [vmem:[#allocation12_spill] sm:$0xff] %v12725_v15  ;;  %vm1339_vm12 = vcmp.ge.f32.partialorder %v1327_v46, 0.0  ;;  %v1351_v25 = vmul.f32 0.01, %v1327_v46 }
 0x1f2   : > { %v1290_v51 = vpop.f32.mrf.mxu2  ;;  %v1330_v22 = vadd.f32 %v12666_v5, %v1298_v49  ;;  %v1369_v23 = vsel %vm1345_vm13, %v1333_v55, %v1357_v40  ;;  %334 = vst.msk [vmem:[#allocation5] sm:$0xf] %vm308_vm14, %v16865_v30  ;;  %vm1563_vm13 = vcmask 261120  }
 0x1f3   : > { %vm1343_vm15 = vcmp.ge.f32.partialorder %v1331_v3, 0.0  ;;  %v1355_v2 = vmul.f32 0.01, %v1331_v3  ;;  %vm1344_vm0 = vcmp.ge.f32.partialorder %v1332_v16, 0.0  ;;  %v1356_v31 = vmul.f32 0.01, %v1332_v16 }
 0x1f4   : > { %v1304_v45 = vadd.f32 %v1290_v51, %v1201_v9  ;;  %v1363_v19 = vsel %vm1339_vm12, %v1327_v46, %v1351_v25  ;;  %335 = vst.msk [vmem:[#allocation5 + $0xc] sm:$0xf] %vm308_vm14, %v16865_v30  ;;  %v1388_v5 = vmul.f32 %v12725_v15, %v1369_v23  ;;  %v1354_v41 = vmul.f32 0.01, %v1330_v22 }
 0x1f5   : > { %v1367_v8 = vsel %vm1343_vm15, %v1331_v3, %v1355_v2  ;;  %v1368_v7 = vsel %vm1344_vm0, %v1332_v16, %v1356_v31  ;;  %336 = vst.msk [vmem:[#allocation5 + $0x18] sm:$0xf] %vm308_vm14, %v16865_v30  ;;  %v1382_v37 = vmul.f32 %v12725_v15, %v1363_v19  ;;  %vm1342_vm15 = vcmp.ge.f32.partialorder %v1330_v22, 0.0 }
 0x1f6   : > { %v1336_v10 = vadd.f32 %v12625_v54, %v1304_v45  ;;  %v1252_v11 = vpop.f32.mrf.mxu0  ;;  %v1271_v52 = vpop.f32.mrf.mxu1  ;;  %v1386_v1 = vmul.f32 %v12647_v63, %v1367_v8  ;;  %v1387_v26 = vmul.f32 %v12650_v48, %v1368_v7  ;;  %337 = vst.msk [vmem:[#allocation5 + $0x24] sm:$0xf] %vm308_vm14, %v16865_v30  ;;  %v1397_v38 = vpack.c.bf16 %v1388_v5, %v1388_v5  ;;  %v11920_v5 = vld [vmem:[%s16795_s4 + $0x10] sm:$0xff] }
 0x1f7   : > { %v1302_v24 = vadd.f32 %v1252_v11, %v1199_v44  ;;  %v1303_v4 = vadd.f32 %v1271_v52, %v1200_v20  ;;  %342 = vst.msk [vmem:[#allocation6] sm:$0xf] %vm308_vm14, %v16865_v30  ;;  %v1393_v39 = vpack.c.bf16 %v1382_v37, %v1382_v37  ;;  %vm313_vm0 = vcmask 568728   ;;  %v1496_v37 = vld [vmem:[%s16796_s5 + $0x18] sm:$0xff] }
 0x1f8   : > { %v1360_v53 = vmul.f32 0.01, %v1336_v10  ;;  %v1396_v28 = vpack.c.bf16 %v1387_v26, %v1386_v1  ;;  %vm1348_vm1 = vcmp.ge.f32.partialorder %v1336_v10, 0.0  ;;  %343 = vst.msk [vmem:[#allocation6 + $0xc] sm:$0xf] %vm308_vm14, %v16865_v30  ;;  %v16869_v16 = vmov 0 }
 0x1f9   : > { %v1334_v14 = vadd.f32 %v12625_v54, %v1302_v24  ;;  %v1335_v0 = vadd.f32 %v12625_v54, %v1303_v4  ;;  %344 = vst.msk [vmem:[#allocation6 + $0x18] sm:$0xf] %vm308_vm14, %v16865_v30  ;;  %vm1449_vm12 = vcmask 412672  }
 0x1fa   : > { %1416 = vrot.lane.b32.xlu2 %v1396_v28, %s12221_s21  ;;  %v1372_v59 = vsel %vm1348_vm1, %v1336_v10, %v1360_v53  ;;  %345 = vst.msk [vmem:[#allocation6 + $0x24] sm:$0xf] %vm308_vm14, %v16865_v30  ;;  %vm1445_vm14 = vcmask 1043608   ;;  %vm1446_vm1 = vcmask 1047556  }
 0x1fb   : > { %vm1346_vm10 = vcmp.ge.f32.partialorder %v1334_v14, 0.0  ;;  %v1358_v21 = vmul.f32 0.01, %v1334_v14  ;;  %vm1347_vm11 = vcmp.ge.f32.partialorder %v1335_v0, 0.0  ;;  %v1359_v13 = vmul.f32 0.01, %v1335_v0 }
 0x1fc   : > { %v1391_v54 = vmul.f32 %v12725_v15, %v1372_v59  ;;  %314 = vst.msk [vmem:[#allocation2 + $0x8] sm:$0xf] %vm313_vm0, %v16865_v30 }
 0x1fd   : > { %v1370_v18 = vsel %vm1346_vm10, %v1334_v14, %v1358_v21  ;;  %v1371_v32 = vsel %vm1347_vm11, %v1335_v0, %v1359_v13  ;;  %315 = vst.msk [vmem:[#allocation2 + $0x14] sm:$0xf] %vm313_vm0, %v16865_v30  ;;  %vm1428_vm10 = vcmask 154624   ;;  %vm12803_vm11 = vmor %vm1446_vm1, %vm1445_vm14  ;;  %v12922_v13 = vld [vmem:[%s16795_s4] sm:$0xff] }
 0x1fe   : > { %v1399_v12 = vpack.c.bf16 %v1391_v54, %v1391_v54  ;;  %v1389_v43 = vmul.f32 %v12647_v63, %v1370_v18  ;;  %v1390_v17 = vmul.f32 %v12650_v48, %v1371_v32  ;;  %316 = vst.msk [vmem:[#allocation2 + $0x20] sm:$0xf] %vm313_vm0, %v16865_v30  ;;  %v16870_v16 = vsel %vm12803_vm11, 4294967295, %v16869_v16  ;;  %v12942_v18 = vld [vmem:[%s16795_s4 + $0x8] sm:$0xff] }
 0x1ff   : > { %317 = vst.msk [vmem:[#allocation2 + $0x2c] sm:$0xf] %vm313_vm0, %v16865_v30 }
 0x200   : > { %1422 = vrot.lane.b32.xlu1 %v1399_v12, %s12221_s21  ;;  %v1398_v47 = vpack.c.bf16 %v1390_v17, %v1389_v43  ;;  %322 = vst.msk [vmem:[#allocation3 + $0x8] sm:$0xf] %vm313_vm0, %v16865_v30 }
 0x201   : > { %323 = vst.msk [vmem:[#allocation3 + $0x14] sm:$0xf] %vm313_vm0, %v16865_v30 }
 0x202   : > { %1420 = vrot.lane.b32.xlu0 %v1398_v47, %s12221_s21  ;;  %1412 = vrot.lane.b32.xlu2 %v1394_v36, %s12221_s21  ;;  %v1366_v36 = vsel %vm1342_vm15, %v1330_v22, %v1354_v41  ;;  %324 = vst.msk [vmem:[#allocation3 + $0x20] sm:$0xf] %vm313_vm0, %v16865_v30  ;;  %v1495_v41 = vld [vmem:[%s16796_s5 + $0x10] sm:$0xff] }
 0x203   : > { %v1385_v50 = vmul.f32 %v12725_v15, %v1366_v36  ;;  %325 = vst.msk [vmem:[#allocation3 + $0x2c] sm:$0xf] %vm313_vm0, %v16865_v30 }
 0x204   : > { %330 = vst.msk [vmem:[#allocation4 + $0x8] sm:$0xf] %vm313_vm0, %v16865_v30 }
 0x205   : > { %v1395_v62 = vpack.c.bf16 %v1385_v50, %v1385_v50  ;;  %331 = vst.msk [vmem:[#allocation4 + $0x14] sm:$0xf] %vm313_vm0, %v16865_v30 }
 0x206   : > { %332 = vst.msk [vmem:[#allocation4 + $0x20] sm:$0xf] %vm313_vm0, %v16865_v30 }
 0x207   : > { %333 = vst.msk [vmem:[#allocation4 + $0x2c] sm:$0xf] %vm313_vm0, %v16865_v30 }
 0x208   : > { %338 = vst.msk [vmem:[#allocation5 + $0x8] sm:$0xf] %vm313_vm0, %v16865_v30 }
 0x209   : > { %339 = vst.msk [vmem:[#allocation5 + $0x14] sm:$0xf] %vm313_vm0, %v16865_v30 }
 0x20a   : > { %1418 = vrot.lane.b32.xlu0 %v1397_v38, %s12221_s21  ;;  %1410 = vrot.lane.b32.xlu2 %v1393_v39, %s12221_s21  ;;  %340 = vst.msk [vmem:[#allocation5 + $0x20] sm:$0xf] %vm313_vm0, %v16865_v30 }
 0x20b   : > { %16871 = vst [vmem:[#allocation15_spill] sm:$0xff] %v16870_v16 }
 0x20c   : > { %341 = vst.msk [vmem:[#allocation5 + $0x2c] sm:$0xf] %vm313_vm0, %v16865_v30 }
 0x20d   : > { %346 = vst.msk [vmem:[#allocation6 + $0x8] sm:$0xf] %vm313_vm0, %v16865_v30 }
 0x20e   : > { %347 = vst.msk [vmem:[#allocation6 + $0x14] sm:$0xf] %vm313_vm0, %v16865_v30 }
 0x20f   : > { %348 = vst.msk [vmem:[#allocation6 + $0x20] sm:$0xf] %vm313_vm0, %v16865_v30 }
 0x210   : > { %349 = vst.msk [vmem:[#allocation6 + $0x2c] sm:$0xf] %vm313_vm0, %v16865_v30 }
 0x212   : > { %1414 = vrot.lane.b32.xlu0 %v1395_v62, %s12221_s21  ;;  %v1493_v62 = vld [vmem:[%s16796_s5] sm:$0xff] }
 0x254   : > { %v1417_v3 = vpop.permute.xlu2 %1416 }
 0x255   : > { %v1426_v34 = vrot.slane %v1417_v3, 4 }
 0x257   : > { %v1433_v29 = vsel %vm1428_vm10, %v1426_v34, %v1417_v3 }
 0x258   : > { %1453 = vst.msk [vmem:[#allocation2 + $0x18] sm:$0xff] %vm12803_vm11, %v1433_v29 }
 0x25c   : > { %v1413_v61 = vpop.permute.xlu2 %1412  ;;  %v1409_v9 = vpop.permute.xlu1 %1408 }
 0x25d   : > { %v1425_v51 = vrot.slane %v1413_v61, 4  ;;  %v1424_v2 = vrot.slane %v1409_v9, 4 }
 0x25f   : > { %v1431_v31 = vsel %vm1428_vm10, %v1425_v51, %v1413_v61  ;;  %v1429_v6 = vsel %vm1428_vm10, %v1424_v2, %v1409_v9  ;;  %v11939_v56 = vld [vmem:[#allocation2 + $0x1c] sm:$0xf]  ;;  %v10579_v10 = vld [vmem:[#allocation2 + $0x18] sm:$0xf] }
 0x260   : > { %1451 = vst.msk [vmem:[#allocation2 + $0xc] sm:$0xff] %vm12803_vm11, %v1431_v31 }
 0x261   : > { %1448 = vst.msk [vmem:[#allocation2] sm:$0xff] %vm12803_vm11, %v1429_v6 }
 0x264   : > { %v1411_v33 = vpop.permute.xlu2 %1410 }
 0x265   : > { %v1430_v60 = vsel %vm1428_vm10, %v1424_v2, %v1411_v33  ;;  %v11921_v2 = vld [vmem:[%s16795_s4 + $0x18] sm:$0xff]  ;;  %v11922_v33 = vld [vmem:[%s16795_s4 + $0x20] sm:$0xff] }
 0x266   : > { %1450 = vst.msk [vmem:[#allocation2 + $0x8] sm:$0xf] %vm1449_vm12, %v1430_v60 }
 0x267   : > { %v11937_v20 = vld [vmem:[#allocation2 + $0x8] sm:$0xf0]  ;;  %v10569_v53 = vld [vmem:[#allocation2 + $0xc] sm:$0xf0] }
 0x268   : > { %v10567_v27 = vld [vmem:[#allocation2] sm:$0xf]  ;;  %v11936_v28 = vld [vmem:[#allocation2 + $0x4] sm:$0xf] }
 0x269   : > { %v12828_v45 = vor.u32 %v11937_v20, %v10567_v27  ;;  %v12853_v0 = vor.u32 %v11936_v28, %v10569_v53  ;;  %v11924_v28 = vld [vmem:[%s16795_s4 + $0x30] sm:$0xff] }
 0x26b   : > { %1541 = vrot.lane.b32.xlu0 %v12828_v45, %s12212_s11 }
 0x26d   : > { %v10575_v57 = vld [vmem:[#allocation2 + $0x8] sm:$0xf] }
 0x272   : > { %v1423_v44 = vpop.permute.xlu1 %1422 }
 0x274   : > { %v1421_v30 = vpop.permute.xlu0 %1420 }
 0x275   : > { %v1427_v42 = vrot.slane %v1421_v30, 4 }
 0x277   : > { %v1435_v35 = vsel %vm1428_vm10, %v1427_v42, %v1421_v30  ;;  %v1436_v8 = vsel %vm1428_vm10, %v1427_v42, %v1423_v44 }
 0x278   : > { %1455 = vst.msk [vmem:[#allocation2 + $0x24] sm:$0xff] %vm12803_vm11, %v1435_v35 }
 0x279   : > { %1456 = vst.msk [vmem:[#allocation2 + $0x2c] sm:$0xf] %vm1449_vm12, %v1436_v8 }
 0x27c   : > { %v1419_v7 = vpop.permute.xlu0 %1418 }
 0x27d   : > { %v1434_v58 = vsel %vm1428_vm10, %v1426_v34, %v1419_v7  ;;  %v1494_v34 = vld [vmem:[%s16796_s5 + $0x8] sm:$0xff] }
 0x27e   : > { %1454 = vst.msk [vmem:[#allocation2 + $0x20] sm:$0xf] %vm1449_vm12, %v1434_v58  ;;  %v11923_v58 = vld [vmem:[%s16795_s4 + $0x28] sm:$0xff] }
 0x27f   : > { %v10581_v11 = vld [vmem:[#allocation2 + $0x24] sm:$0xf0]  ;;  %v11940_v52 = vld [vmem:[#allocation2 + $0x20] sm:$0xf0] }
 0x280   : > { %v12839_v1 = vor.u32 %v11940_v52, %v10579_v10  ;;  %v12841_v26 = vor.u32 %v11939_v56, %v10581_v11  ;;  %v11941_v55 = vld [vmem:[#allocation2 + $0x28] sm:$0xf0] }
 0x282   : > { %1655 = vmatpush.bf16.msrb.mxu2 %v12839_v1  ;;  %1549 = vrot.lane.b32.xlu2 %v12841_v26, %s12212_s11 }
 0x283   : > { %1547 = vrot.lane.b32.xlu1 %v12839_v1, %s12212_s11 }
 0x284   : > { %v1415_v24 = vpop.permute.xlu0 %1414 }
 0x285   : > { %v10587_v4 = vld [vmem:[#allocation2 + $0x20] sm:$0xf]  ;;  %v1432_v46 = vsel %vm1428_vm10, %v1425_v51, %v1415_v24 }
 0x286   : > { %1452 = vst.msk [vmem:[#allocation2 + $0x14] sm:$0xf] %vm1449_vm12, %v1432_v46  ;;  %1656 = vmatpush.bf16.msrb.mxu2 %v12828_v45  ;;  %v12851_v14 = vor.u32 %v11941_v55, %v10587_v4 }
 0x289   : > { %10603 = vmatmul.msk.bf16.vlgmr.msrb.gmra.mxu2 %vm1563_vm13, %v12922_v13 }
 0x28a   : > { %1551 = vrot.lane.b32.xlu2 %v12851_v14, %s12212_s11 }
 0x28b   : > { %1543 = vrot.lane.b32.xlu1 %v12853_v0, %s12212_s11 }
 0x28d   : > { %v11938_v59 = vld [vmem:[#allocation2 + $0x10] sm:$0xf0] }
 0x28e   : > { %v12859_v21 = vor.u32 %v11938_v59, %v10575_v57 }
 0x290   : > { %1545 = vrot.lane.b32.xlu0 %v12859_v21, %s12212_s11 }
 0x292   : > { %1724 = vrot.lane.b32.xlu2 %v12841_v26, %s12213_s12 }
 0x293   : > { %1722 = vrot.lane.b32.xlu1 %v12839_v1, %s12213_s12 }
 0x298   : > { %1716 = vrot.lane.b32.xlu0 %v12828_v45, %s12213_s12 }
 0x299   : > { %10604 = vmatmul.msk.bf16.gmra.mxu2 %vm1563_vm13, %v12942_v18 }
 0x29a   : > { %1726 = vrot.lane.b32.xlu2 %v12851_v14, %s12213_s12 }
 0x29b   : > { %1718 = vrot.lane.b32.xlu1 %v12853_v0, %s12213_s12 }
 0x2a0   : > { %1720 = vrot.lane.b32.xlu0 %v12859_v21, %s12213_s12 }
 0x2a2   : > { %1831 = vrot.lane.b32.xlu2 %v12841_v26, %s12214_s13 }
 0x2a3   : > { %1829 = vrot.lane.b32.xlu1 %v12839_v1, %s12214_s13 }
 0x2a8   : > { %1833 = vrot.lane.b32.xlu0 %v12851_v14, %s12214_s13 }
 0x2aa   : > { %1825 = vrot.lane.b32.xlu2 %v12853_v0, %s12214_s13 }
 0x2ab   : > { %1823 = vrot.lane.b32.xlu1 %v12828_v45, %s12214_s13 }
 0x2b0   : > { %1827 = vrot.lane.b32.xlu0 %v12859_v21, %s12214_s13 }
 0x2b2   : > { %1938 = vrot.lane.b32.xlu2 %v12841_v26, %s12215_s14 }
 0x2b3   : > { %1936 = vrot.lane.b32.xlu1 %v12839_v1, %s12215_s14 }
 0x2b8   : > { %1930 = vrot.lane.b32.xlu0 %v12828_v45, %s12215_s14 }
 0x2ba   : > { %1940 = vrot.lane.b32.xlu2 %v12851_v14, %s12215_s14 }
 0x2bb   : > { %1932 = vrot.lane.b32.xlu1 %v12853_v0, %s12215_s14 }
 0x2c0   : > { %1934 = vrot.lane.b32.xlu0 %v12859_v21, %s12215_s14 }
 0x2c2   : > { %2045 = vrot.lane.b32.xlu2 %v12841_v26, %s12216_s15 }
 0x2c3   : > { %2043 = vrot.lane.b32.xlu1 %v12839_v1, %s12216_s15 }
 0x2c8   : > { %2047 = vrot.lane.b32.xlu0 %v12851_v14, %s12216_s15 }
 0x2ca   : > { %2039 = vrot.lane.b32.xlu2 %v12853_v0, %s12216_s15 }
 0x2cb   : > { %2037 = vrot.lane.b32.xlu1 %v12828_v45, %s12216_s15 }
 0x2d0   : > { %2041 = vrot.lane.b32.xlu0 %v12859_v21, %s12216_s15 }
 0x2d2   : > { %2152 = vrot.lane.b32.xlu2 %v12841_v26, %s12217_s16 }
 0x2d3   : > { %2150 = vrot.lane.b32.xlu1 %v12839_v1, %s12217_s16 }
 0x2d8   : > { %2144 = vrot.lane.b32.xlu0 %v12828_v45, %s12217_s16 }
 0x2da   : > { %2154 = vrot.lane.b32.xlu2 %v12851_v14, %s12217_s16 }
 0x2db   : > { %2146 = vrot.lane.b32.xlu1 %v12853_v0, %s12217_s16 }
 0x2dc   : > { %v1550_v54 = vpop.permute.xlu2 %1549 }
 0x2dd   : > { %v1542_v47 = vpop.permute.xlu0 %1541 }
 0x2e0   : > { %2148 = vrot.lane.b32.xlu0 %v12859_v21, %s12217_s16 }
 0x2e2   : > { %2259 = vrot.lane.b32.xlu2 %v12841_v26, %s12218_s17 }
 0x2e3   : > { %2257 = vrot.lane.b32.xlu1 %v12839_v1, %s12218_s17 }
 0x2e4   : > { %v1552_v25 = vpop.permute.xlu2 %1551 }
 0x2e5   : > { %1614 = vmatpush.bf16.msrb.mxu1 %v1552_v25  ;;  %v1556_v49 = vsel %vm425_vm3, %v1550_v54, %v1552_v25 }
 0x2e6   : > { %1595 = vmatpush.bf16.msrb.mxu0 %v1556_v49 }
 0x2e8   : > { %2261 = vrot.lane.b32.xlu0 %v12851_v14, %s12218_s17 }
 0x2ea   : > { %2253 = vrot.lane.b32.xlu2 %v12853_v0, %s12218_s17 }
 0x2eb   : > { %2251 = vrot.lane.b32.xlu1 %v12828_v45, %s12218_s17 }
 0x2ec   : > { %v1725_v32 = vpop.permute.xlu2 %1724 }
 0x2f0   : > { %2255 = vrot.lane.b32.xlu0 %v12859_v21, %s12218_s17 }
 0x2f2   : > { %2366 = vrot.lane.b32.xlu2 %v12841_v26, %s12219_s18 }
 0x2f3   : > { %2364 = vrot.lane.b32.xlu1 %v12839_v1, %s12219_s18 }
 0x2f4   : > { %v1727_v40 = vpop.permute.xlu2 %1726 }
 0x2f5   : > { %v1548_v12 = vpop.permute.xlu1 %1547  ;;  %v1731_v43 = vsel %vm600_vm2, %v1725_v32, %v1727_v40 }
 0x2f6   : > { %v1555_v17 = vsel %vm425_vm3, %v1548_v12, %v1550_v54  ;;  %1769 = vmatpush.bf16.msra.mxu2 %v1731_v43 }
 0x2f7   : > { %1576 = vmatpush.bf16.msra.mxu3 %v1555_v17 }
 0x2f8   : > { %2358 = vrot.lane.b32.xlu0 %v12828_v45, %s12219_s18 }
 0x2fa   : > { %2368 = vrot.lane.b32.xlu2 %v12851_v14, %s12219_s18 }
 0x2fb   : > { %2360 = vrot.lane.b32.xlu1 %v12853_v0, %s12219_s18 }
 0x2fc   : > { %v1832_v22 = vpop.permute.xlu2 %1831 }
 0x2fd   : > { %v1544_v23 = vpop.permute.xlu1 %1543 }
 0x2fe   : > { %v1553_v19 = vsel %vm425_vm3, %v1542_v47, %v1544_v23 }
 0x2ff   : > { %1577 = vmatpush.bf16.msra.mxu3 %v1553_v19 }
 0x300   : > { %2362 = vrot.lane.b32.xlu0 %v12859_v21, %s12219_s18 }
 0x302   : > { %10589 = vmatmul.msk.bf16.vlgmr.msra.gmra.mxu3 %vm1563_vm13, %v11920_v5  ;;  %v1546_v38 = vpop.permute.xlu0 %1545  ;;  %2472 = vperm.xlu2 %12113, %v1496_v37  }
 0x303   : > { %1674 = vmatpush.bf16.msrb.mxu3 %v12841_v26  ;;  %2467 = vperm.xlu1 %12112, %v1495_v41   ;;  %v1554_v39 = vsel %vm425_vm3, %v1544_v23, %v1546_v38  ;;  %v11928_v23 = vld [vmem:[%s16795_s4 + $0x50] sm:$0xff] }
 0x304   : > { %1615 = vmatpush.bf16.msrb.mxu1 %v1546_v38  ;;  %v1826_v36 = vpop.permute.xlu2 %1825  ;;  %1596 = vmatpush.bf16.msrb.mxu0 %v1554_v39  ;;  %v11929_v39 = vld [vmem:[%s16795_s4 + $0x58] sm:$0xff] }
 0x305   : > { %v1723_v50 = vpop.permute.xlu1 %1722 }
 0x306   : > { %v1730_v3 = vsel %vm600_vm2, %v1723_v50, %v1725_v32 }
 0x307   : > { %1675 = vmatpush.bf16.msrb.mxu3 %v12853_v0  ;;  %10593 = vmatmul.msk.bf16.vlgmr.msrb.gmra.mxu1 %vm1563_vm13, %v11920_v5 }
 0x308   : > { %1693 = vmatpush.bf16.msra.mxu0 %v12851_v14  ;;  %1750 = vmatpush.bf16.msra.mxu1 %v1730_v3 }
 0x309   : > { %10591 = vmatmul.msk.bf16.vlgmr.msrb.gmra.mxu0 %vm1563_vm13, %v11920_v5  ;;  %2457 = vperm.xlu0 %12111, %v1493_v62   ;;  %v11926_v5 = vld [vmem:[%s16795_s4 + $0x40] sm:$0xff] }
 0x30a   : > { %v1717_v29 = vpop.permute.xlu0 %1716 }
 0x30b   : > { %1788 = vmatpush.bf16.msra.mxu3 %v1727_v40  ;;  %2462 = vperm.xlu1 %12112, %v1494_v34  }
 0x30c   : > { %1694 = vmatpush.bf16.msra.mxu0 %v12859_v21  ;;  %v1939_v61 = vpop.permute.xlu2 %1938 }
 0x30d   : > { %v1719_v9 = vpop.permute.xlu1 %1718 }
 0x30e   : > { %v1728_v51 = vsel %vm600_vm2, %v1717_v29, %v1719_v9 }
 0x30f   : > { %1751 = vmatpush.bf16.msra.mxu1 %v1728_v51  ;;  %v1658_v51 = vpop.f32.mrf.mxu2 }
 0x312   : > { %10590 = vmatmul.msk.bf16.gmra.mxu3 %vm1563_vm13, %v11921_v2  ;;  %v1721_v31 = vpop.permute.xlu0 %1720 }
 0x313   : > { %1789 = vmatpush.bf16.msra.mxu3 %v1721_v31  ;;  %v1729_v6 = vsel %vm600_vm2, %v1719_v9, %v1721_v31  ;;  %v11930_v9 = vld [vmem:[%s16795_s4 + $0x60] sm:$0xff] }
 0x314   : > { %v1941_v60 = vpop.permute.xlu2 %1940  ;;  %1770 = vmatpush.bf16.msra.mxu2 %v1729_v6 }
 0x315   : > { %v1830_v20 = vpop.permute.xlu1 %1829  ;;  %v1945_v52 = vsel %vm806_vm5, %v1939_v61, %v1941_v60 }
 0x316   : > { %v1837_v27 = vsel %vm703_vm4, %v1830_v20, %v1832_v22 }
 0x317   : > { %10594 = vmatmul.msk.bf16.gmra.mxu1 %vm1563_vm13, %v11921_v2  ;;  %1857 = vmatpush.bf16.msrb.mxu0 %v1837_v27  ;;  %v13073_v6 = vpop.f32.mrf.mxu2 }
 0x318   : > { %10619 = vmatmul.msk.bf16.vlgmr.msra.gmra.mxu2 %vm1563_vm13, %v11922_v33 }
 0x319   : > { %10592 = vmatmul.msk.bf16.gmra.mxu0 %vm1563_vm13, %v11921_v2 }
 0x31a   : > { %v1834_v45 = vpop.permute.xlu0 %1833 }
 0x31b   : > { %1895 = vmatpush.bf16.msrb.mxu2 %v1834_v45  ;;  %v1838_v30 = vsel %vm703_vm4, %v1832_v22, %v1834_v45 }
 0x31c   : > { %1876 = vmatpush.bf16.msrb.mxu1 %v1838_v30  ;;  %v2046_v44 = vpop.permute.xlu2 %2045  ;;  %v11931_v30 = vld [vmem:[%s16795_s4 + $0x68] sm:$0xff] }
 0x31d   : > { %v1824_v42 = vpop.permute.xlu1 %1823 }
 0x31e   : > { %v1835_v35 = vsel %vm703_vm4, %v1824_v42, %v1826_v36 }
 0x31f   : > { %1858 = vmatpush.bf16.msrb.mxu0 %v1835_v35 }
 0x322   : > { %10605 = vmatmul.msk.bf16.vlgmr.msrb.gmra.mxu3 %vm1563_vm13, %v12922_v13  ;;  %v1828_v8 = vpop.permute.xlu0 %1827 }
 0x323   : > { %1896 = vmatpush.bf16.msrb.mxu2 %v1828_v8  ;;  %v1836_v7 = vsel %vm703_vm4, %v1826_v36, %v1828_v8 }
 0x324   : > { %1877 = vmatpush.bf16.msrb.mxu1 %v1836_v7  ;;  %v2040_v11 = vpop.permute.xlu2 %2039 }
 0x325   : > { %v1937_v56 = vpop.permute.xlu1 %1936 }
 0x326   : > { %v1944_v10 = vsel %vm806_vm5, %v1937_v56, %v1939_v61  ;;  %v11927_v61 = vld [vmem:[%s16795_s4 + $0x48] sm:$0xff] }
 0x327   : > { %10617 = vmatmul.msk.bf16.vlgmr.msra.gmra.mxu1 %vm1563_vm13, %v11922_v33  ;;  %1964 = vmatpush.bf16.msrb.mxu3 %v1944_v10 }
 0x328   : > { %2002 = vmatpush.bf16.msra.mxu1 %v1941_v60  ;;  %10620 = vmatmul.msk.bf16.gmra.mxu2 %vm1563_vm13, %v11923_v58 }
 0x329   : > { %10607 = vmatmul.msk.bf16.vlgmr.msra.gmra.mxu0 %vm1563_vm13, %v12922_v13 }
 0x32a   : > { %1983 = vmatpush.bf16.msra.mxu0 %v1945_v52  ;;  %v1931_v1 = vpop.permute.xlu0 %1930 }
 0x32c   : > { %v2153_v4 = vpop.permute.xlu2 %2152 }
 0x32d   : > { %v1933_v26 = vpop.permute.xlu1 %1932 }
 0x32e   : > { %v1942_v24 = vsel %vm806_vm5, %v1931_v1, %v1933_v26 }
 0x32f   : > { %1965 = vmatpush.bf16.msrb.mxu3 %v1942_v24 }
 0x332   : > { %10606 = vmatmul.msk.bf16.gmra.mxu3 %vm1563_vm13, %v12942_v18  ;;  %v1935_v46 = vpop.permute.xlu0 %1934 }
 0x333   : > { %2003 = vmatpush.bf16.msra.mxu1 %v1935_v46  ;;  %v1943_v53 = vsel %vm806_vm5, %v1933_v26, %v1935_v46 }
 0x334   : > { %1984 = vmatpush.bf16.msra.mxu0 %v1943_v53  ;;  %v2155_v57 = vpop.permute.xlu2 %2154 }
 0x335   : > { %v2044_v55 = vpop.permute.xlu1 %2043  ;;  %v2159_v13 = vsel %vm1012_vm7, %v2153_v4, %v2155_v57 }
 0x336   : > { %v2051_v14 = vsel %vm909_vm6, %v2044_v55, %v2046_v44 }
 0x337   : > { %10618 = vmatmul.msk.bf16.gmra.mxu1 %vm1563_vm13, %v11923_v58  ;;  %2071 = vmatpush.bf16.msra.mxu2 %v2051_v14 }
 0x338   : > { %10635 = vmatmul.msk.bf16.vlgmr.msrb.gmra.mxu2 %vm1563_vm13, %v11924_v28 }
 0x339   : > { %10608 = vmatmul.msk.bf16.gmra.mxu0 %vm1563_vm13, %v12942_v18  ;;  %v11925_v18 = vld [vmem:[%s16795_s4 + $0x38] sm:$0xff] }
 0x33a   : > { %v2048_v0 = vpop.permute.xlu0 %2047 }
 0x33b   : > { %v2052_v54 = vsel %vm909_vm6, %v2046_v44, %v2048_v0 }
 0x33c   : > { %v2260_v37 = vpop.permute.xlu2 %2259 }
 0x33d   : > { %v2038_v59 = vpop.permute.xlu1 %2037 }
 0x33e   : > { %v2049_v21 = vsel %vm909_vm6, %v2038_v59, %v2040_v11 }
 0x33f   : > { %2072 = vmatpush.bf16.msra.mxu2 %v2049_v21 }
 0x342   : > { %10621 = vmatmul.msk.bf16.vlgmr.msra.gmra.mxu3 %vm1563_vm13, %v11922_v33  ;;  %v2042_v25 = vpop.permute.xlu0 %2041 }
 0x343   : > { %2197 = vmatpush.bf16.msrb.mxu2 %v2159_v13  ;;  %2090 = vmatpush.bf16.msra.mxu3 %v2052_v54  ;;  %v2050_v49 = vsel %vm909_vm6, %v2040_v11, %v2042_v25  ;;  %v11933_v54 = vld [vmem:[%s16795_s4 + $0x78] sm:$0xff] }
 0x344   : > { %v2254_v62 = vpop.permute.xlu2 %2253 }
 0x345   : > { %v2151_v32 = vpop.permute.xlu1 %2150 }
 0x346   : > { %v2158_v40 = vsel %vm1012_vm7, %v2151_v32, %v2153_v4  ;;  %v11932_v4 = vld [vmem:[%s16795_s4 + $0x70] sm:$0xff] }
 0x347   : > { %10633 = vmatmul.msk.bf16.vlgmr.msrb.gmra.mxu1 %vm1563_vm13, %v11924_v28  ;;  %2091 = vmatpush.bf16.msra.mxu3 %v2050_v49 }
 0x348   : > { %2178 = vmatpush.bf16.msrb.mxu1 %v2158_v40  ;;  %10636 = vmatmul.msk.bf16.gmra.mxu2 %vm1563_vm13, %v11925_v18 }
 0x349   : > { %10631 = vmatmul.msk.bf16.vlgmr.msrb.gmra.mxu0 %vm1563_vm13, %v11924_v28 }
 0x34a   : > { %2109 = vmatpush.bf16.msrb.mxu0 %v2048_v0  ;;  %v2145_v12 = vpop.permute.xlu0 %2144 }
 0x34c   : > { %v2367_v31 = vpop.permute.xlu2 %2366 }
 0x34d   : > { %v2147_v43 = vpop.permute.xlu1 %2146 }
 0x34e   : > { %2110 = vmatpush.bf16.msrb.mxu0 %v2042_v25  ;;  %v2156_v17 = vsel %vm1012_vm7, %v2145_v12, %v2147_v43 }
 0x34f   : > { %2179 = vmatpush.bf16.msrb.mxu1 %v2156_v17 }
 0x352   : > { %10622 = vmatmul.msk.bf16.gmra.mxu3 %vm1563_vm13, %v11923_v58  ;;  %v2149_v47 = vpop.permute.xlu0 %2148  ;;  %v1663_v58 = vpop.f32.mrf.mxu2 }
 0x353   : > { %v2157_v22 = vsel %vm1012_vm7, %v2147_v43, %v2149_v47 }
 0x354   : > { %2198 = vmatpush.bf16.msrb.mxu2 %v2157_v22  ;;  %v2369_v42 = vpop.permute.xlu2 %2368 }
 0x355   : > { %v2258_v41 = vpop.permute.xlu1 %2257  ;;  %v2373_v7 = vsel %vm16806_vm9, %v2367_v31, %v2369_v42 }
 0x356   : > { %v2265_v50 = vsel %vm1115_vm8, %v2258_v41, %v2260_v37 }
 0x357   : > { %10634 = vmatmul.msk.bf16.gmra.mxu1 %vm1563_vm13, %v11925_v18 }
 0x358   : > { %10659 = vmatmul.msk.bf16.vlgmr.msra.gmra.mxu2 %vm1563_vm13, %v11928_v23 }
 0x359   : > { %10632 = vmatmul.msk.bf16.gmra.mxu0 %vm1563_vm13, %v11925_v18 }
 0x35a   : > { %v2262_v19 = vpop.permute.xlu0 %2261  ;;  %v13093_v26 = vpop.f32.mrf.mxu2 }
 0x35b   : > { %2323 = vmatpush.bf16.msra.mxu2 %v2262_v19  ;;  %v2266_v36 = vsel %vm1115_vm8, %v2260_v37, %v2262_v19 }
 0x35d   : > { %v2252_v3 = vpop.permute.xlu1 %2251 }
 0x35e   : > { %v2263_v29 = vsel %vm1115_vm8, %v2252_v3, %v2254_v62  ;;  %v11934_v3 = vld [vmem:[%s16795_s4 + $0x80] sm:$0xff] }
 0x362   : > { %10645 = vmatmul.msk.bf16.vlgmr.msrb.gmra.mxu3 %vm1563_vm13, %v11926_v5  ;;  %v2256_v38 = vpop.permute.xlu0 %2255 }
 0x363   : > { %2216 = vmatpush.bf16.msrb.mxu3 %v2155_v57  ;;  %2324 = vmatpush.bf16.msra.mxu2 %v2256_v38  ;;  %v2264_v34 = vsel %vm1115_vm8, %v2254_v62, %v2256_v38 }
 0x365   : > { %v2365_v2 = vpop.permute.xlu1 %2364 }
 0x366   : > { %v2372_v60 = vsel %vm16806_vm9, %v2365_v2, %v2367_v31 }
 0x367   : > { %10649 = vmatmul.msk.bf16.vlgmr.msra.gmra.mxu1 %vm1563_vm13, %v11926_v5  ;;  %2217 = vmatpush.bf16.msrb.mxu3 %v2149_v47 }
 0x368   : > { %2304 = vmatpush.bf16.msra.mxu1 %v2266_v36  ;;  %10660 = vmatmul.msk.bf16.gmra.mxu2 %vm1563_vm13, %v11929_v39 }
 0x369   : > { %10647 = vmatmul.msk.bf16.vlgmr.msra.gmra.mxu0 %vm1563_vm13, %v11926_v5 }
 0x36a   : > { %2285 = vmatpush.bf16.msra.mxu0 %v2265_v50  ;;  %v2359_v33 = vpop.permute.xlu0 %2358 }
 0x36c   : > { %2305 = vmatpush.bf16.msra.mxu1 %v2264_v34 }
 0x36d   : > { %v2361_v20 = vpop.permute.xlu1 %2360 }
 0x36e   : > { %2286 = vmatpush.bf16.msra.mxu0 %v2263_v29  ;;  %v2370_v8 = vsel %vm16806_vm9, %v2359_v33, %v2361_v20 }
 0x372   : > { %10646 = vmatmul.msk.bf16.gmra.mxu3 %vm1563_vm13, %v11927_v61  ;;  %v2363_v56 = vpop.permute.xlu0 %2362 }
 0x373   : > { %v2371_v11 = vsel %vm16806_vm9, %v2361_v20, %v2363_v56 }
 0x377   : > { %10650 = vmatmul.msk.bf16.gmra.mxu1 %vm1563_vm13, %v11927_v61 }
 0x378   : > { %10675 = vmatmul.msk.bf16.vlgmr.msrb.gmra.mxu2 %vm1563_vm13, %v11930_v9 }
 0x379   : > { %10648 = vmatmul.msk.bf16.gmra.mxu0 %vm1563_vm13, %v11927_v61 }
 0x382   : > { %10661 = vmatmul.msk.bf16.vlgmr.msra.gmra.mxu3 %vm1563_vm13, %v11928_v23 }
 0x383   : > { %2392 = vmatpush.bf16.msra.mxu3 %v2372_v60 }
 0x384   : > { %v1617_v27 = vpop.f32.mrf.mxu1 }
 0x385   : > { %v1579_v44 = vpop.f32.mrf.mxu3 }
 0x386   : > { %v1598_v45 = vpop.f32.mrf.mxu0  ;;  %v1659_v35 = vadd.f32 %v1658_v51, %v1579_v44 }
 0x387   : > { %10673 = vmatmul.msk.bf16.vlgmr.msrb.gmra.mxu1 %vm1563_vm13, %v11930_v9  ;;  %2393 = vmatpush.bf16.msra.mxu3 %v2370_v8 }
 0x388   : > { %2430 = vmatpush.bf16.msrb.mxu1 %v2369_v42  ;;  %10676 = vmatmul.msk.bf16.gmra.mxu2 %vm1563_vm13, %v11931_v30 }
 0x389   : > { %10663 = vmatmul.msk.bf16.vlgmr.msrb.gmra.mxu0 %vm1563_vm13, %v11928_v23 }
 0x38a   : > { %2411 = vmatpush.bf16.msrb.mxu0 %v2373_v7 }
 0x38c   : > { %2431 = vmatpush.bf16.msrb.mxu1 %v2363_v56  ;;  %v13085_v10 = vpop.f32.mrf.mxu1 }
 0x38d   : > { %v13090_v1 = vpop.f32.mrf.mxu3 }
 0x38e   : > { %v13088_v52 = vpop.f32.mrf.mxu0  ;;  %2412 = vmatpush.bf16.msrb.mxu0 %v2371_v11 }
 0x392   : > { %10662 = vmatmul.msk.bf16.gmra.mxu3 %vm1563_vm13, %v11929_v39 }
 0x394   : > { %v1622_v24 = vpop.f32.mrf.mxu1 }
 0x395   : > { %v1584_v46 = vpop.f32.mrf.mxu3 }
 0x396   : > { %v1603_v53 = vpop.f32.mrf.mxu0  ;;  %v1664_v28 = vadd.f32 %v1663_v58, %v1584_v46 }
 0x397   : > { %10674 = vmatmul.msk.bf16.gmra.mxu1 %vm1563_vm13, %v11931_v30 }
 0x398   : > { %10691 = vmatmul.msk.bf16.vlgmr.msra.gmra.mxu2 %vm1563_vm13, %v11932_v4 }
 0x399   : > { %10664 = vmatmul.msk.bf16.gmra.mxu0 %vm1563_vm13, %v11929_v39 }
 0x39b   : > { %v1772_v55 = vpop.f32.mrf.mxu2 }
 0x39c   : > { %v13101_v14 = vpop.f32.mrf.mxu1 }
 0x39d   : > { %v13103_v0 = vpop.f32.mrf.mxu3 }
 0x39e   : > { %v13105_v57 = vpop.f32.mrf.mxu0 }
 0x3a2   : > { %10677 = vmatmul.msk.bf16.vlgmr.msrb.gmra.mxu3 %vm1563_vm13, %v11930_v9 }
 0x3a3   : > { %v13108_v59 = vpop.f32.mrf.mxu2 }
 0x3a4   : > { %v1753_v21 = vpop.f32.mrf.mxu1 }
 0x3a5   : > { %v1801_v13 = vadd.f32 %v1753_v21, %v1659_v35  ;;  %v1677_v25 = vpop.f32.mrf.mxu3 }
 0x3a6   : > { %v1696_v49 = vpop.f32.mrf.mxu0  ;;  %v1678_v18 = vadd.f32 %v1677_v25, %v1598_v45 }
 0x3a7   : > { %v1697_v32 = vadd.f32 %v1696_v49, %v1617_v27  ;;  %10689 = vmatmul.msk.bf16.vlgmr.msra.gmra.mxu1 %vm1563_vm13, %v11932_v4 }
 0x3a8   : > { %v1802_v40 = vadd.f32 %v1772_v55, %v1678_v18  ;;  %10692 = vmatmul.msk.bf16.gmra.mxu2 %vm1563_vm13, %v11933_v54 }
 0x3a9   : > { %10687 = vmatmul.msk.bf16.vlgmr.msra.gmra.mxu0 %vm1563_vm13, %v11932_v4 }
 0x3ab   : > { %v1777_v43 = vpop.f32.mrf.mxu2 }
 0x3ac   : > { %v13116_v12 = vpop.f32.mrf.mxu1 }
 0x3ad   : > { %v13118_v17 = vpop.f32.mrf.mxu3 }
 0x3ae   : > { %v13120_v47 = vpop.f32.mrf.mxu0 }
 0x3b2   : > { %10678 = vmatmul.msk.bf16.gmra.mxu3 %vm1563_vm13, %v11931_v30  ;;  %v11935_v30 = vld [vmem:[%s16795_s4 + $0x88] sm:$0xff] }
 0x3b3   : > { %v13124_v38 = vpop.f32.mrf.mxu2 }
 0x3b4   : > { %v1758_v22 = vpop.f32.mrf.mxu1 }
 0x3b5   : > { %v1807_v23 = vadd.f32 %v1758_v22, %v1664_v28  ;;  %v1682_v19 = vpop.f32.mrf.mxu3 }
 0x3b6   : > { %v1701_v5 = vpop.f32.mrf.mxu0  ;;  %v1683_v37 = vadd.f32 %v1682_v19, %v1603_v53 }
 0x3b7   : > { %v1702_v41 = vadd.f32 %v1701_v5, %v1622_v24  ;;  %10690 = vmatmul.msk.bf16.gmra.mxu1 %vm1563_vm13, %v11933_v54 }
 0x3b8   : > { %v1808_v39 = vadd.f32 %v1777_v43, %v1683_v37 }
 0x3b9   : > { %10688 = vmatmul.msk.bf16.gmra.mxu0 %vm1563_vm13, %v11933_v54 }
 0x3bb   : > { %v1898_v34 = vpop.f32.mrf.mxu2 }
 0x3bc   : > { %v13127_v36 = vpop.f32.mrf.mxu1 }
 0x3bd   : > { %v13129_v50 = vpop.f32.mrf.mxu3 }
 0x3be   : > { %v13131_v62 = vpop.f32.mrf.mxu0 }
 0x3c2   : > { %10701 = vmatmul.msk.bf16.vlgmr.msra.gmra.mxu3 %vm1563_vm13, %v11934_v3 }
 0x3c3   : > { %v13139_v60 = vpop.f32.mrf.mxu2 }
 0x3c4   : > { %v1879_v29 = vpop.f32.mrf.mxu1 }
 0x3c5   : > { %v1909_v61 = vadd.f32 %v1879_v29, %v1802_v40  ;;  %v1791_v9 = vpop.f32.mrf.mxu3 }
 0x3c6   : > { %v1860_v51 = vpop.f32.mrf.mxu0  ;;  %v1803_v2 = vadd.f32 %v1791_v9, %v1697_v32 }
 0x3c7   : > { %v1908_v31 = vadd.f32 %v1860_v51, %v1801_v13  ;;  %10705 = vmatmul.msk.bf16.vlgmr.msrb.gmra.mxu1 %vm1563_vm13, %v11934_v3 }
 0x3c8   : > { %v1910_v33 = vadd.f32 %v1898_v34, %v1803_v2 }
 0x3c9   : > { %10703 = vmatmul.msk.bf16.vlgmr.msrb.gmra.mxu0 %vm1563_vm13, %v11934_v3 }
 0x3cb   : > { %v1903_v35 = vpop.f32.mrf.mxu2 }
 0x3cc   : > { %v13141_v20 = vpop.f32.mrf.mxu1 }
 0x3cd   : > { %v13143_v27 = vpop.f32.mrf.mxu3 }
 0x3ce   : > { %v13145_v45 = vpop.f32.mrf.mxu0 }
 0x3d2   : > { %10702 = vmatmul.msk.bf16.gmra.mxu3 %vm1563_vm13, %v11935_v30 }
 0x3d3   : > { %v13159_v53 = vpop.f32.mrf.mxu2 }
 0x3d4   : > { %v1884_v42 = vpop.f32.mrf.mxu1 }
 0x3d5   : > { %v1915_v44 = vadd.f32 %v1884_v42, %v1808_v39  ;;  %v1796_v8 = vpop.f32.mrf.mxu3 }
 0x3d6   : > { %v1865_v7 = vpop.f32.mrf.mxu0  ;;  %v1809_v58 = vadd.f32 %v1796_v8, %v1702_v41 }
 0x3d7   : > { %v1914_v56 = vadd.f32 %v1865_v7, %v1807_v23  ;;  %10706 = vmatmul.msk.bf16.gmra.mxu1 %vm1563_vm13, %v11935_v30 }
 0x3d8   : > { %v1916_v11 = vadd.f32 %v1903_v35, %v1809_v58 }
 0x3d9   : > { %10704 = vmatmul.msk.bf16.gmra.mxu0 %vm1563_vm13, %v11935_v30 }
 0x3db   : > { %v2074_v49 = vpop.f32.mrf.mxu2 }
 0x3dc   : > { %v13153_v24 = vpop.f32.mrf.mxu1 }
 0x3dd   : > { %v13155_v4 = vpop.f32.mrf.mxu3 }
 0x3de   : > { %v13157_v46 = vpop.f32.mrf.mxu0 }
 0x3e3   : > { %v13163_v43 = vpop.f32.mrf.mxu2 }
 0x3e4   : > { %v2005_v28 = vpop.f32.mrf.mxu1 }
 0x3e5   : > { %v2017_v55 = vadd.f32 %v2005_v28, %v1910_v33  ;;  %v1967_v21 = vpop.f32.mrf.mxu3 }
 0x3e6   : > { %v1986_v13 = vpop.f32.mrf.mxu0  ;;  %v2015_v54 = vadd.f32 %v1967_v21, %v1908_v31 }
 0x3e7   : > { %v2016_v25 = vadd.f32 %v1986_v13, %v1909_v61 }
 0x3eb   : > { %v13173_v3 = vpop.f32.mrf.mxu2 }
 0x3ec   : > { %v13161_v18 = vpop.f32.mrf.mxu1 }
 0x3ed   : > { %v1969_v32 = vpop.f32.mrf.mxu3 }
 0x3ee   : > { %v1988_v40 = vpop.f32.mrf.mxu0 }
 0x3f3   : > { %v13179_v2 = vpop.f32.mrf.mxu2 }
 0x3f4   : > { %v2010_v22 = vpop.f32.mrf.mxu1  ;;  %16873 = vst [vmem:[#allocation10_spill] sm:$0xff] %v13179_v2 }
 0x3f5   : > { %v13165_v23 = vadd.f32 %v2010_v22, %v1916_v11  ;;  %v1972_v19 = vpop.f32.mrf.mxu3 }
 0x3f6   : > { %v1991_v5 = vpop.f32.mrf.mxu0  ;;  %v13167_v37 = vadd.f32 %v1972_v19, %v1914_v56 }
 0x3f7   : > { %v13169_v41 = vadd.f32 %v1991_v5, %v1915_v44 }
 0x3fb   : > { %v2200_v44 = vpop.f32.mrf.mxu2 }
 0x3fc   : > { %v13171_v39 = vpop.f32.mrf.mxu1 }
 0x3fd   : > { %v13175_v34 = vpop.f32.mrf.mxu3 }
 0x3fe   : > { %v13177_v29 = vpop.f32.mrf.mxu0 }
 0x3ff   : > { %16872 = vst [vmem:[#allocation17_spill] sm:$0xff] %v13177_v29 }
 0x403   : > { %v2202_v58 = vpop.f32.mrf.mxu2 }
 0x404   : > { %v2181_v61 = vpop.f32.mrf.mxu1 }
 0x405   : > { %v2093_v9 = vpop.f32.mrf.mxu3 }
 0x406   : > { %v2112_v51 = vpop.f32.mrf.mxu0 }
 0x407   : > { %v13181_v31 = vadd.f32 %v2112_v51, %v2017_v55 }
 0x409   : > { %16874 = vst [vmem:[#allocation16_spill] sm:$0xff] %v13181_v31 }
 0x40b   : > { %v13197_v21 = vpop.f32.mrf.mxu2 }
 0x40c   : > { %v2183_v33 = vpop.f32.mrf.mxu1  ;;  %16880 = vst [vmem:[#allocation18_spill] sm:$0xff] %v13197_v21 }
 0x40d   : > { %v2095_v30 = vpop.f32.mrf.mxu3 }
 0x40e   : > { %v13183_v42 = vpop.f32.mrf.mxu0 }
 0x40f   : > { %16875 = vst [vmem:[#allocation20_spill] sm:$0xff] %v13183_v42 }
 0x413   : > { %v13203_v16 = vpop.f32.mrf.mxu2 }
 0x414   : > { %v13185_v35 = vpop.f32.mrf.mxu1  ;;  %16883 = vst [vmem:[#allocation21_spill] sm:$0xff] %v13203_v16  ;;  %v2123_v16 = vadd.f32 %v2093_v9, %v2016_v25 }
 0x415   : > { %16876 = vst [vmem:[#allocation8_spill] sm:$0xff] %v13185_v35  ;;  %v13187_v8 = vpop.f32.mrf.mxu3 }
 0x416   : > { %v13189_v7 = vpop.f32.mrf.mxu0 }
 0x41c   : > { %v13191_v56 = vpop.f32.mrf.mxu1 }
 0x41d   : > { %16877 = vst [vmem:[#allocation7_spill] sm:$0xff] %v13191_v56  ;;  %v13193_v11 = vpop.f32.mrf.mxu3 }
 0x41e   : > { %16878 = vst [vmem:[#allocation11_spill] sm:$0xff] %v13193_v11  ;;  %v13195_v28 = vpop.f32.mrf.mxu0  ;;  %v13209_v11 = vpop.f32.mrf.mxu2 }
 0x41f   : > { %16879 = vst [vmem:[#allocation14_spill] sm:$0xff] %v13195_v28  ;;  %v1680_v28 = vadd.f32 %v13118_v17, %v13088_v52  ;;  %v2230_v17 = vadd.f32 %v2200_v44, %v2123_v16  ;;  %v1704_v16 = vadd.f32 %v13131_v62, %v13101_v14 }
 0x420   : > { %16886 = vst [vmem:[#allocation25_spill] sm:$0xff] %v13209_v11 }
 0x421   : > { %v1805_v42 = vadd.f32 %v13108_v59, %v1680_v28  ;;  %v1812_v9 = vadd.f32 %v13155_v4, %v1704_v16 }
 0x423   : > { %v1912_v11 = vadd.f32 %v13141_v20, %v1805_v42  ;;  %v1699_v20 = vadd.f32 %v13120_v47, %v13085_v10  ;;  %v1919_v4 = vadd.f32 %v13159_v53, %v1812_v9 }
 0x424   : > { %v2307_v55 = vpop.f32.mrf.mxu1 }
 0x425   : > { %v13199_v13 = vpop.f32.mrf.mxu3  ;;  %v2337_v25 = vadd.f32 %v2307_v55, %v2230_v17 }
 0x426   : > { %16881 = vst [vmem:[#allocation9_spill] sm:$0xff] %v13199_v13  ;;  %v2288_v22 = vpop.f32.mrf.mxu0  ;;  %v1661_v13 = vadd.f32 %v13073_v6, %v13090_v1  ;;  %v2019_v6 = vadd.f32 %v1988_v40, %v1912_v11 }
 0x42c   : > { %v2309_v19 = vpop.f32.mrf.mxu1 }
 0x42d   : > { %v13201_v5 = vpop.f32.mrf.mxu3 }
 0x42e   : > { %16882 = vst [vmem:[#allocation19_spill] sm:$0xff] %v13201_v5  ;;  %v2290_v51 = vpop.f32.mrf.mxu0 }
 0x434   : > { %v13205_v15 = vpop.f32.mrf.mxu1 }
 0x435   : > { %16884 = vst [vmem:[#allocation13_spill] sm:$0xff] %v13205_v15  ;;  %v2224_v31 = vpop.f32.mrf.mxu3  ;;  %v1804_v15 = vadd.f32 %v13116_v12, %v1661_v13  ;;  %v1666_v12 = vadd.f32 %v13093_v26, %v13103_v0  ;;  %v1806_v0 = vadd.f32 %v13143_v27, %v1699_v20 }
 0x436   : > { %v13207_v56 = vpop.f32.mrf.mxu0 }
 0x437   : > { %16885 = vst [vmem:[#allocation24_spill] sm:$0xff] %v13207_v56  ;;  %v2122_v56 = vadd.f32 %v2074_v49, %v2015_v54  ;;  %v1911_v2 = vadd.f32 %v13145_v45, %v1804_v15  ;;  %v1685_v15 = vadd.f32 %v13129_v50, %v13105_v57  ;;  %v2126_v45 = vadd.f32 %v2095_v30, %v2019_v6 }
 0x438   : > { %v1810_v26 = vadd.f32 %v13127_v36, %v1666_v12  ;;  %v1913_v27 = vadd.f32 %v13139_v60, %v1806_v0  ;;  %v16891_v12 = vld [vmem:[#allocation20_spill] sm:$0xff] }
 0x439   : > { %v2229_v52 = vadd.f32 %v2181_v61, %v2122_v56  ;;  %v2018_v29 = vadd.f32 %v1969_v32, %v1911_v2  ;;  %v13239_v61 = vpop.permute.xlu0 %2457  ;;  %v1811_v14 = vadd.f32 %v13124_v38, %v1685_v15  ;;  %v2233_v2 = vadd.f32 %v2202_v58, %v2126_v45  ;;  %v16893_v15 = vld [vmem:[#allocation18_spill] sm:$0xff] }
 0x43a   : > { %v1917_v50 = vadd.f32 %v13157_v46, %v1810_v26  ;;  %v2129_v56 = vadd.f32 %v13187_v8, %v13169_v41  ;;  %v2026_v41 = vadd.f32 %v13171_v39, %v1919_v4  ;;  %v16889_v8 = vld [vmem:[#allocation17_spill] sm:$0xff] }
 0x43b   : > { %v2336_v59 = vadd.f32 %v2288_v22, %v2229_v52  ;;  %v2125_v10 = vadd.f32 %v13163_v43, %v2018_v29  ;;  %v2130_v29 = vadd.f32 %v13189_v7, %v13165_v23  ;;  %v2340_v38 = vadd.f32 %v2309_v19, %v2233_v2  ;;  %v16890_v52 = vld [vmem:[#allocation10_spill] sm:$0xff]  ;;  %v16900_v2 = vld [vmem:[#allocation19_spill] sm:$0xff] }
 0x43c   : > { %v13213_v21 = vpop.f32.mrf.mxu1  ;;  %v2024_v43 = vadd.f32 %v13175_v34, %v1917_v50  ;;  %v1918_v55 = vadd.f32 %v13153_v24, %v1811_v14  ;;  %v2020_v22 = vadd.f32 %v13161_v18, %v1913_v27  ;;  %v2128_v19 = vadd.f32 %v13173_v3, %v13167_v37  ;;  %v16894_v3 = vld [vmem:[#allocation11_spill] sm:$0xff]  ;;  %v16898_v0 = vld [vmem:[#allocation13_spill] sm:$0xff] }
 0x43d   : > { %16887 = vst [vmem:[#allocation26_spill] sm:$0xff] %v13213_v21  ;;  %v13217_v35 = vpop.f32.mrf.mxu3  ;;  %v13225_v21 = vpop.f32.mrf.mxu2  ;;  %v2232_v62 = vadd.f32 %v2183_v33, %v2125_v10  ;;  %v2237_v11 = vadd.f32 %v2224_v31, %v2130_v29  ;;  %v2236_v18 = vadd.f32 %v16893_v15, %v2129_v56  ;;  %v16902_v56 = vld [vmem:[#allocation7_spill] sm:$0xff] }
 0x43e   : > { %16888 = vst [vmem:[#allocation27_spill] sm:$0xff] %v13217_v35  ;;  %v13219_v5 = vpop.f32.mrf.mxu0  ;;  %v13229_v35 = vpop.permute.xlu1 %2467  ;;  %v2131_v17 = vadd.f32 %v16890_v52, %v2024_v43 }
 0x43f   : > { %v2339_v44 = vadd.f32 %v2290_v51, %v2232_v62  ;;  %v2025_v51 = vadd.f32 %v16889_v8, %v1918_v55  ;;  %v2343_v9 = vadd.f32 %v16898_v0, %v2236_v18 }
 0x441   : > { %v2132_v45 = vadd.f32 %v16894_v3, %v2025_v51 }
 0x444   : > { %v13227_v1 = vpop.f32.mrf.mxu1 }
 0x445   : > { %v2395_v54 = vpop.f32.mrf.mxu3  ;;  %v2331_v46 = vpop.f32.mrf.mxu2 }
 0x446   : > { %v2414_v49 = vpop.f32.mrf.mxu0  ;;  %v2443_v32 = vadd.f32 %v2395_v54, %v2336_v59  ;;  %v13261_v13 = vpop.permute.xlu1 %2462  ;;  %v16892_v59 = vld [vmem:[#allocation8_spill] sm:$0xff]  ;;  %v2344_v16 = vadd.f32 %v2331_v46, %v2237_v11  ;;  %v16895_v54 = vld [vmem:[#allocation14_spill] sm:$0xff]  ;;  %v2238_v11 = vadd.f32 %v16902_v56, %v2131_v17 }
 0x447   : > { %v2444_v40 = vadd.f32 %v2414_v49, %v2337_v25  ;;  %v2127_v25 = vadd.f32 %v16891_v12, %v2020_v22  ;;  %v2235_v20 = vadd.f32 %v16892_v59, %v2128_v19  ;;  %v2133_v49 = vadd.f32 %v16895_v54, %v2026_v41  ;;  %v16905_v41 = vld [vmem:[#allocation26_spill] sm:$0xff] }
 0x448   : > { %v2475_v57 = vadd.f32 %v13239_v61, %v2443_v32  ;;  %v16896_v32 = vld [vmem:[#allocation16_spill] sm:$0xff]  ;;  %v2345_v17 = vadd.f32 %v13219_v5, %v2238_v11 }
 0x449   : > { %v2476_v47 = vadd.f32 %v13239_v61, %v2444_v40  ;;  %v16897_v40 = vld [vmem:[#allocation9_spill] sm:$0xff] }
 0x44a   : > { %vm2487_vm15 = vcmp.ge.f32.partialorder %v2475_v57, 0.0  ;;  %v2499_v30 = vmul.f32 0.01, %v2475_v57  ;;  %v2231_v26 = vadd.f32 %v16897_v40, %v16896_v32 }
 0x44b   : > { %vm2488_vm0 = vcmp.ge.f32.partialorder %v2476_v47, 0.0  ;;  %v2500_v36 = vmul.f32 0.01, %v2476_v47 }
 0x44c   : > { %v13254_v42 = vpop.f32.mrf.mxu1  ;;  %v2511_v33 = vsel %vm2487_vm15, %v2475_v57, %v2499_v30  ;;  %v16899_v57 = vld [vmem:[#allocation24_spill] sm:$0xff]  ;;  %v2234_v30 = vadd.f32 %v16900_v2, %v2127_v25  ;;  %v2473_v25 = vpop.permute.xlu2 %2472 }
 0x44d   : > { %v2512_v58 = vsel %vm2488_vm0, %v2476_v47, %v2500_v36  ;;  %v2397_v28 = vpop.f32.mrf.mxu3  ;;  %v2523_v53 = vmul.f32 %v2511_v33, %v12647_v63  ;;  %v2342_v47 = vadd.f32 %v16899_v57, %v2235_v20  ;;  %v16901_v36 = vld [vmem:[#allocation27_spill] sm:$0xff]  ;;  %v16906_v20 = vld [vmem:[#allocation12_spill] sm:$0xff] }
 0x44e   : > { %v2416_v60 = vpop.f32.mrf.mxu0  ;;  %v2524_v34 = vmul.f32 %v2512_v58, %v12650_v48  ;;  %v2446_v23 = vadd.f32 %v2397_v28, %v2339_v44  ;;  %v2240_v27 = vadd.f32 %v16901_v36, %v2133_v49  ;;  %v2333_v44 = vpop.f32.mrf.mxu2  ;;  %v16903_v28 = vld [vmem:[#allocation21_spill] sm:$0xff]  ;;  %v2341_v19 = vadd.f32 %v13225_v21, %v2234_v30 }
 0x44f   : > { %v2447_v7 = vadd.f32 %v2416_v60, %v2340_v38  ;;  %v2239_v60 = vadd.f32 %v16903_v28, %v2132_v45 }
 0x450   : > { %v2535_v31 = vpack.c.bf16 %v2524_v34, %v2523_v53  ;;  %v2478_v6 = vadd.f32 %v13261_v13, %v2446_v23  ;;  %v2347_v8 = vadd.f32 %v2333_v44, %v2240_v27 }
 0x451   : > { %v2479_v24 = vadd.f32 %v13261_v13, %v2447_v7  ;;  %v16904_v7 = vld [vmem:[#allocation25_spill] sm:$0xff] }
 0x452   : > { %2551 = vrot.lane.b32.xlu0 %v2535_v31, %s12221_s21  ;;  %vm2490_vm14 = vcmp.ge.f32.partialorder %v2478_v6, 0.0  ;;  %v2502_v37 = vmul.f32 0.01, %v2478_v6  ;;  %v2338_v22 = vadd.f32 %v16904_v7, %v2231_v26  ;;  %v2346_v31 = vadd.f32 %v16905_v41, %v2239_v60 }
 0x453   : > { %vm2491_vm1 = vcmp.ge.f32.partialorder %v2479_v24, 0.0  ;;  %v2503_v39 = vmul.f32 0.01, %v2479_v24 }
 0x454   : > { %v2438_v10 = vpop.f32.mrf.mxu1  ;;  %v2514_v50 = vsel %vm2490_vm14, %v2478_v6, %v2502_v37  ;;  %v2445_v6 = vadd.f32 %v13227_v1, %v2338_v22 }
 0x455   : > { %v2451_v14 = vadd.f32 %v2438_v10, %v2344_v16  ;;  %v2515_v62 = vsel %vm2491_vm1, %v2479_v24, %v2503_v39  ;;  %v2400_v4 = vpop.f32.mrf.mxu3  ;;  %v13284_v29 = vmul.f32 %v2514_v50, %v12647_v63  ;;  %v2448_v24 = vadd.f32 %v13254_v42, %v2341_v19 }
 0x456   : > { %v2419_v43 = vpop.f32.mrf.mxu0  ;;  %v13287_v38 = vmul.f32 %v2515_v62, %v12650_v48  ;;  %v2449_v33 = vadd.f32 %v2400_v4, %v2342_v47  ;;  %v2477_v42 = vadd.f32 %v13239_v61, %v2445_v6 }
 0x457   : > { %v2483_v46 = vadd.f32 %v13229_v35, %v2451_v14  ;;  %v2450_v58 = vadd.f32 %v2419_v43, %v2343_v9  ;;  %v2480_v49 = vadd.f32 %v13261_v13, %v2448_v24 }
 0x458   : > { %v2537_v53 = vpack.c.bf16 %v13287_v38, %v13284_v29  ;;  %v2481_v55 = vadd.f32 %v13229_v35, %v2449_v33  ;;  %v2501_v57 = vmul.f32 0.01, %v2477_v42 }
 0x459   : > { %vm2495_vm15 = vcmp.ge.f32.partialorder %v2483_v46, 0.0  ;;  %v2507_v34 = vmul.f32 0.01, %v2483_v46  ;;  %v2482_v23 = vadd.f32 %v13229_v35, %v2450_v58  ;;  %v2504_v14 = vmul.f32 0.01, %v2480_v49 }
 0x45a   : > { %vm2493_vm0 = vcmp.ge.f32.partialorder %v2481_v55, 0.0  ;;  %v2505_v51 = vmul.f32 0.01, %v2481_v55  ;;  %vm2492_vm9 = vcmp.ge.f32.partialorder %v2480_v49, 0.0 }
 0x45b   : > { %vm2494_vm14 = vcmp.ge.f32.partialorder %v2482_v23, 0.0  ;;  %v2506_v52 = vmul.f32 0.01, %v2482_v23  ;;  %v2519_v35 = vsel %vm2495_vm15, %v2483_v46, %v2507_v34  ;;  %v2516_v4 = vsel %vm2492_vm9, %v2480_v49, %v2504_v14 }
 0x45c   : > { %v2440_v12 = vpop.f32.mrf.mxu1  ;;  %v2531_v21 = vmul.f32 %v2519_v35, %v16906_v20  ;;  %v2517_v15 = vsel %vm2493_vm0, %v2481_v55, %v2505_v51  ;;  %v2528_v29 = vmul.f32 %v2516_v4, %v16906_v20  ;;  %v10746_v4 = vld [vmem:[%s16796_s5 + $0x38] sm:$0xff]  ;;  %vm16908_vm9 = vcmask 736256  }
 0x45d   : > { %v2454_v59 = vadd.f32 %v2440_v12, %v2347_v8  ;;  %v2518_v18 = vsel %vm2494_vm14, %v2482_v23, %v2506_v52  ;;  %v2402_v16 = vpop.f32.mrf.mxu3  ;;  %v2529_v39 = vmul.f32 %v2517_v15, %v12647_v63  ;;  %vm2489_vm14 = vcmp.ge.f32.partialorder %v2477_v42, 0.0 }
 0x45e   : > { %v2421_v37 = vpop.f32.mrf.mxu0  ;;  %v2530_v3 = vmul.f32 %v2518_v18, %v12650_v48  ;;  %v2452_v45 = vadd.f32 %v2402_v16, %v2345_v17  ;;  %v2540_v54 = vpack.c.bf16 %v2531_v21, %v2531_v21  ;;  %v2513_v27 = vsel %vm2489_vm14, %v2477_v42, %v2501_v57 }
 0x45f   : > { %v2486_v5 = vadd.f32 %v2473_v25, %v2454_v59  ;;  %v2453_v1 = vadd.f32 %v2421_v37, %v2346_v31  ;;  %v2525_v43 = vmul.f32 %v2513_v27, %v16906_v20  ;;  %v2538_v44 = vpack.c.bf16 %v2528_v29, %v2528_v29  ;;  %v10745_v27 = vld [vmem:[%s16796_s5 + $0x30] sm:$0xff] }
 0x460   : > { %v2539_v32 = vpack.c.bf16 %v2530_v3, %v2529_v39  ;;  %v2484_v26 = vadd.f32 %v2473_v25, %v2452_v45  ;;  %2561 = vrot.lane.b32.xlu1 %v2540_v54, %s12221_s21 }
 0x461   : > { %v2510_v40 = vmul.f32 0.01, %v2486_v5  ;;  %v2485_v0 = vadd.f32 %v2473_v25, %v2453_v1  ;;  %vm2498_vm1 = vcmp.ge.f32.partialorder %v2486_v5, 0.0  ;;  %v2536_v38 = vpack.c.bf16 %v2525_v43, %v2525_v43 }
 0x462   : > { %2559 = vrot.lane.b32.xlu2 %v2539_v32, %s12221_s21  ;;  %vm2496_vm15 = vcmp.ge.f32.partialorder %v2484_v26, 0.0  ;;  %v2508_v9 = vmul.f32 0.01, %v2484_v26 }
 0x463   : > { %vm2497_vm0 = vcmp.ge.f32.partialorder %v2485_v0, 0.0  ;;  %v2509_v10 = vmul.f32 0.01, %v2485_v0  ;;  %v2522_v47 = vsel %vm2498_vm1, %v2486_v5, %v2510_v40  ;;  %v13429_v40 = vld [vmem:[%s16795_s4 + $0x90] sm:$0xff]  ;;  %vm16909_vm1 = vmmov %vm16908_vm9 }
 0x464   : > { %v2520_v50 = vsel %vm2496_vm15, %v2484_v26, %v2508_v9  ;;  %v2534_v13 = vmul.f32 %v2522_v47, %v16906_v20  ;;  %v13448_v9 = vld [vmem:[%s16795_s4 + $0x98] sm:$0xff]  ;;  %vm16910_vm15 = vmmov %vm16909_vm1 }
 0x465   : > { %v2521_v61 = vsel %vm2497_vm0, %v2485_v0, %v2509_v10  ;;  %v2532_v62 = vmul.f32 %v2520_v50, %v12647_v63  ;;  %vm16911_vm0 = vmmov %vm16909_vm1 }
 0x466   : > { %v2533_v2 = vmul.f32 %v2521_v61, %v12650_v48  ;;  %v2542_v30 = vpack.c.bf16 %v2534_v13, %v2534_v13 }
 0x468   : > { %v2541_v36 = vpack.c.bf16 %v2533_v2, %v2532_v62  ;;  %2555 = vrot.lane.b32.xlu1 %v2537_v53, %s12221_s21  ;;  %v11944_v62 = vld [vmem:[%s16795_s4 + $0xa0] sm:$0xff] }
 0x46a   : > { %2563 = vrot.lane.b32.xlu0 %v2541_v36, %s12221_s21  ;;  %2565 = vrot.lane.b32.xlu2 %v2542_v30, %s12221_s21  ;;  %v10743_v36 = vld [vmem:[%s16796_s5 + $0x20] sm:$0xff] }
 0x472   : > { %2553 = vrot.lane.b32.xlu2 %v2536_v38, %s12221_s21  ;;  %2557 = vrot.lane.b32.xlu0 %v2538_v44, %s12221_s21 }
 0x4bc   : > { %v2560_v46 = vpop.permute.xlu2 %2559 }
 0x4bd   : > { %v2569_v33 = vrot.slane %v2560_v46, 4 }
 0x4bf   : > { %v2575_v58 = vsel %vm1428_vm10, %v2569_v33, %v2560_v46  ;;  %v10744_v46 = vld [vmem:[%s16796_s5 + $0x28] sm:$0xff] }
 0x4c0   : > { %2591 = vst.msk [vmem:[#allocation3 + $0x18] sm:$0xff] %vm12803_vm11, %v2575_v58 }
 0x4c4   : > { %v2552_v11 = vpop.permute.xlu0 %2551  ;;  %v2566_v28 = vpop.permute.xlu2 %2565 }
 0x4c5   : > { %v2567_v60 = vrot.slane %v2552_v11, 4 }
 0x4c7   : > { %v2571_v53 = vsel %vm1428_vm10, %v2567_v60, %v2552_v11  ;;  %v11963_v24 = vld [vmem:[#allocation3 + $0x1c] sm:$0xf]  ;;  %v10769_v12 = vld [vmem:[#allocation3 + $0x18] sm:$0xf] }
 0x4c8   : > { %2587 = vst.msk [vmem:[#allocation3] sm:$0xff] %vm12803_vm11, %v2571_v53 }
 0x4cc   : > { %v2554_v34 = vpop.permute.xlu2 %2553 }
 0x4cd   : > { %v2572_v55 = vsel %vm1428_vm10, %v2567_v60, %v2554_v34 }
 0x4ce   : > { %2588 = vst.msk [vmem:[#allocation3 + $0x8] sm:$0xf] %vm1449_vm12, %v2572_v55 }
 0x4cf   : > { %v10757_v39 = vld [vmem:[#allocation3] sm:$0xf]  ;;  %v11960_v1 = vld [vmem:[#allocation3 + $0x4] sm:$0xf] }
 0x4d2   : > { %v2562_v23 = vpop.permute.xlu1 %2561 }
 0x4d3   : > { %v2576_v7 = vsel %vm1428_vm10, %v2569_v33, %v2562_v23 }
 0x4d4   : > { %2592 = vst.msk [vmem:[#allocation3 + $0x20] sm:$0xf] %vm1449_vm12, %v2576_v7 }
 0x4d5   : > { %v10765_v54 = vld [vmem:[#allocation3 + $0x8] sm:$0xf] }
 0x4da   : > { %v2556_v22 = vpop.permute.xlu1 %2555 }
 0x4db   : > { %v2568_v19 = vrot.slane %v2556_v22, 4  ;;  %v10777_v59 = vld [vmem:[#allocation3 + $0x20] sm:$0xf] }
 0x4dc   : > { %v2564_v41 = vpop.permute.xlu0 %2563 }
 0x4dd   : > { %v2570_v31 = vrot.slane %v2564_v41, 4  ;;  %v2573_v8 = vsel %vm1428_vm10, %v2568_v19, %v2556_v22 }
 0x4de   : > { %2589 = vst.msk [vmem:[#allocation3 + $0xc] sm:$0xff] %vm12803_vm11, %v2573_v8  ;;  %v11946_v8 = vld [vmem:[%s16795_s4 + $0xb0] sm:$0xff] }
 0x4df   : > { %v2577_v51 = vsel %vm1428_vm10, %v2570_v31, %v2564_v41  ;;  %v2578_v52 = vsel %vm1428_vm10, %v2570_v31, %v2566_v28  ;;  %v11945_v28 = vld [vmem:[%s16795_s4 + $0xa8] sm:$0xff] }
 0x4e0   : > { %2593 = vst.msk [vmem:[#allocation3 + $0x24] sm:$0xff] %vm12803_vm11, %v2577_v51 }
 0x4e1   : > { %2594 = vst.msk [vmem:[#allocation3 + $0x2c] sm:$0xf] %vm1449_vm12, %v2578_v52 }
 0x4e4   : > { %v2558_v17 = vpop.permute.xlu0 %2557 }
 0x4e5   : > { %v2574_v6 = vsel %vm1428_vm10, %v2568_v19, %v2558_v17  ;;  %v11961_v16 = vld [vmem:[#allocation3 + $0x8] sm:$0xf0]  ;;  %v10759_v5 = vld [vmem:[#allocation3 + $0xc] sm:$0xf0] }
 0x4e6   : > { %2590 = vst.msk [vmem:[#allocation3 + $0x14] sm:$0xf] %vm1449_vm12, %v2574_v6  ;;  %v13353_v3 = vor.u32 %v11961_v16, %v10757_v39  ;;  %v13356_v42 = vor.u32 %v11960_v1, %v10759_v5  ;;  %v11948_v1 = vld [vmem:[%s16795_s4 + $0xc0] sm:$0xff] }
 0x4e7   : > { %v10771_v35 = vld [vmem:[#allocation3 + $0x24] sm:$0xf0]  ;;  %v11964_v25 = vld [vmem:[#allocation3 + $0x20] sm:$0xf0] }
 0x4e8   : > { %v13340_v21 = vor.u32 %v11964_v25, %v10769_v12  ;;  %v13342_v15 = vor.u32 %v11963_v24, %v10771_v35  ;;  %v11965_v18 = vld [vmem:[#allocation3 + $0x28] sm:$0xf0] }
 0x4e9   : > { %v13344_v37 = vor.u32 %v11965_v18, %v10777_v59 }
 0x4ea   : > { %2794 = vmatpush.bf16.msra.mxu1 %v13340_v21  ;;  %2689 = vrot.lane.b32.xlu2 %v13342_v15, %s12212_s11 }
 0x4eb   : > { %2687 = vrot.lane.b32.xlu1 %v13340_v21, %s12212_s11  ;;  %2691 = vrot.lane.b32.xlu0 %v13344_v37, %s12212_s11 }
 0x4ed   : > { %v11962_v45 = vld [vmem:[#allocation3 + $0x10] sm:$0xf0] }
 0x4ee   : > { %2795 = vmatpush.bf16.msra.mxu1 %v13353_v3  ;;  %v13358_v49 = vor.u32 %v11962_v45, %v10765_v54 }
 0x4f1   : > { %10793 = vmatmul.msk.bf16.vlgmr.msra.gmra.mxu1 %vm1563_vm13, %v13429_v40 }
 0x4f2   : > { %2683 = vrot.lane.b32.xlu2 %v13356_v42, %s12212_s11 }
 0x4f3   : > { %2685 = vrot.lane.b32.xlu0 %v13358_v49, %s12212_s11  ;;  %2681 = vrot.lane.b32.xlu1 %v13353_v3, %s12212_s11 }
 0x4fa   : > { %2863 = vrot.lane.b32.xlu2 %v13342_v15, %s12213_s12 }
 0x4fb   : > { %2855 = vrot.lane.b32.xlu0 %v13353_v3, %s12213_s12  ;;  %2861 = vrot.lane.b32.xlu1 %v13340_v21, %s12213_s12 }
 0x501   : > { %10794 = vmatmul.msk.bf16.gmra.mxu1 %vm1563_vm13, %v13448_v9 }
 0x502   : > { %2962 = vrot.lane.b32.xlu2 %v13353_v3, %s12214_s13 }
 0x503   : > { %2970 = vrot.lane.b32.xlu0 %v13342_v15, %s12214_s13  ;;  %2857 = vrot.lane.b32.xlu1 %v13356_v42, %s12213_s12 }
 0x50a   : > { %2968 = vrot.lane.b32.xlu2 %v13340_v21, %s12214_s13 }
 0x50b   : > { %2964 = vrot.lane.b32.xlu0 %v13356_v42, %s12214_s13  ;;  %2865 = vrot.lane.b32.xlu1 %v13344_v37, %s12213_s12 }
 0x512   : > { %2972 = vrot.lane.b32.xlu2 %v13344_v37, %s12214_s13 }
 0x513   : > { %2966 = vrot.lane.b32.xlu0 %v13358_v49, %s12214_s13  ;;  %2859 = vrot.lane.b32.xlu1 %v13358_v49, %s12213_s12 }
 0x51a   : > { %3077 = vrot.lane.b32.xlu2 %v13342_v15, %s12215_s14 }
 0x51b   : > { %3079 = vrot.lane.b32.xlu0 %v13344_v37, %s12215_s14  ;;  %3075 = vrot.lane.b32.xlu1 %v13340_v21, %s12215_s14 }
 0x522   : > { %3071 = vrot.lane.b32.xlu2 %v13356_v42, %s12215_s14 }
 0x523   : > { %3073 = vrot.lane.b32.xlu0 %v13358_v49, %s12215_s14  ;;  %3069 = vrot.lane.b32.xlu1 %v13353_v3, %s12215_s14 }
 0x52a   : > { %3186 = vrot.lane.b32.xlu2 %v13344_v37, %s12216_s15 }
 0x52b   : > { %3178 = vrot.lane.b32.xlu0 %v13356_v42, %s12216_s15  ;;  %3180 = vrot.lane.b32.xlu1 %v13358_v49, %s12216_s15 }
 0x532   : > { %3182 = vrot.lane.b32.xlu2 %v13340_v21, %s12216_s15 }
 0x533   : > { %3289 = vrot.lane.b32.xlu0 %v13340_v21, %s12217_s16  ;;  %3184 = vrot.lane.b32.xlu1 %v13342_v15, %s12216_s15 }
 0x53a   : > { %3176 = vrot.lane.b32.xlu2 %v13353_v3, %s12216_s15 }
 0x53b   : > { %3283 = vrot.lane.b32.xlu0 %v13353_v3, %s12217_s16  ;;  %3291 = vrot.lane.b32.xlu1 %v13342_v15, %s12217_s16 }
 0x542   : > { %3390 = vrot.lane.b32.xlu2 %v13353_v3, %s12218_s17 }
 0x543   : > { %3398 = vrot.lane.b32.xlu0 %v13342_v15, %s12218_s17  ;;  %3285 = vrot.lane.b32.xlu1 %v13356_v42, %s12217_s16 }
 0x544   : > { %v2690_v32 = vpop.permute.xlu2 %2689 }
 0x54a   : > { %3396 = vrot.lane.b32.xlu2 %v13340_v21, %s12218_s17 }
 0x54b   : > { %3392 = vrot.lane.b32.xlu0 %v13356_v42, %s12218_s17  ;;  %3293 = vrot.lane.b32.xlu1 %v13344_v37, %s12217_s16 }
 0x54c   : > { %v2684_v26 = vpop.permute.xlu2 %2683 }
 0x552   : > { %3400 = vrot.lane.b32.xlu2 %v13344_v37, %s12218_s17 }
 0x553   : > { %3394 = vrot.lane.b32.xlu0 %v13358_v49, %s12218_s17  ;;  %3287 = vrot.lane.b32.xlu1 %v13358_v49, %s12217_s16 }
 0x554   : > { %v2864_v0 = vpop.permute.xlu2 %2863 }
 0x55a   : > { %3505 = vrot.lane.b32.xlu2 %v13342_v15, %s12219_s18 }
 0x55b   : > { %3507 = vrot.lane.b32.xlu0 %v13344_v37, %s12219_s18  ;;  %3503 = vrot.lane.b32.xlu1 %v13340_v21, %s12219_s18  ;;  %v11947_v21 = vld [vmem:[%s16795_s4 + $0xb8] sm:$0xff] }
 0x55c   : > { %v2963_v50 = vpop.permute.xlu2 %2962 }
 0x55d   : > { %v2692_v10 = vpop.permute.xlu0 %2691  ;;  %v2688_v57 = vpop.permute.xlu1 %2687 }
 0x55e   : > { %v2695_v47 = vsel %vm425_vm3, %v2688_v57, %v2690_v32  ;;  %2753 = vmatpush.bf16.msra.mxu0 %v2692_v10  ;;  %v2696_v14 = vsel %vm425_vm3, %v2690_v32, %v2692_v10 }
 0x55f   : > { %2715 = vmatpush.bf16.msrb.mxu2 %v2695_v47  ;;  %2734 = vmatpush.bf16.msrb.mxu3 %v2696_v14  ;;  %v11949_v47 = vld [vmem:[%s16795_s4 + $0xc8] sm:$0xff] }
 0x562   : > { %3499 = vrot.lane.b32.xlu2 %v13356_v42, %s12219_s18 }
 0x563   : > { %3501 = vrot.lane.b32.xlu0 %v13358_v49, %s12219_s18  ;;  %3497 = vrot.lane.b32.xlu1 %v13353_v3, %s12219_s18 }
 0x564   : > { %v2969_v43 = vpop.permute.xlu2 %2968 }
 0x565   : > { %v2686_v61 = vpop.permute.xlu0 %2685  ;;  %v2682_v13 = vpop.permute.xlu1 %2681 }
 0x566   : > { %2754 = vmatpush.bf16.msra.mxu0 %v2686_v61  ;;  %v2693_v2 = vsel %vm425_vm3, %v2682_v13, %v2684_v26  ;;  %v2694_v30 = vsel %vm425_vm3, %v2684_v26, %v2686_v61 }
 0x567   : > { %2716 = vmatpush.bf16.msrb.mxu2 %v2693_v2  ;;  %2735 = vmatpush.bf16.msrb.mxu3 %v2694_v30 }
 0x569   : > { %10783 = vmatmul.msk.bf16.vlgmr.msra.gmra.mxu0 %vm1563_vm13, %v11944_v62 }
 0x56a   : > { %10779 = vmatmul.msk.bf16.vlgmr.msrb.gmra.mxu2 %vm1563_vm13, %v11944_v62  ;;  %10781 = vmatmul.msk.bf16.vlgmr.msrb.gmra.mxu3 %vm1563_vm13, %v11944_v62 }
 0x56b   : > { %2813 = vmatpush.bf16.msra.mxu2 %v13342_v15  ;;  %2832 = vmatpush.bf16.msra.mxu3 %v13344_v37 }
 0x56c   : > { %3596 = vperm.xlu0 %12111, %v10743_v36   ;;  %3606 = vperm.xlu1 %12112, %v10745_v27   ;;  %v2973_v33 = vpop.permute.xlu2 %2972  ;;  %v11950_v36 = vld [vmem:[%s16795_s4 + $0xd0] sm:$0xff] }
 0x56d   : > { %3611 = vperm.xlu2 %12113, %v10746_v4   ;;  %v2856_v29 = vpop.permute.xlu0 %2855  ;;  %v2862_v38 = vpop.permute.xlu1 %2861  ;;  %v11952_v4 = vld [vmem:[%s16795_s4 + $0xe0] sm:$0xff] }
 0x56e   : > { %v2869_v44 = vsel %vm600_vm2, %v2862_v38, %v2864_v0 }
 0x56f   : > { %2814 = vmatpush.bf16.msra.mxu2 %v13356_v42  ;;  %2833 = vmatpush.bf16.msra.mxu3 %v13358_v49 }
 0x570   : > { %2889 = vmatpush.bf16.msrb.mxu0 %v2869_v44 }
 0x574   : > { %3601 = vperm.xlu1 %12112, %v10744_v46   ;;  %v3078_v19 = vpop.permute.xlu2 %3077 }
 0x575   : > { %v2971_v58 = vpop.permute.xlu0 %2970  ;;  %v2858_v11 = vpop.permute.xlu1 %2857 }
 0x576   : > { %v2867_v60 = vsel %vm600_vm2, %v2856_v29, %v2858_v11  ;;  %v2976_v53 = vsel %vm703_vm4, %v2969_v43, %v2971_v58  ;;  %v2977_v34 = vsel %vm703_vm4, %v2971_v58, %v2973_v33  ;;  %v11951_v58 = vld [vmem:[%s16795_s4 + $0xd8] sm:$0xff] }
 0x577   : > { %2890 = vmatpush.bf16.msrb.mxu0 %v2867_v60  ;;  %2996 = vmatpush.bf16.msrb.mxu3 %v2976_v53 }
 0x579   : > { %10784 = vmatmul.msk.bf16.gmra.mxu0 %vm1563_vm13, %v11945_v28 }
 0x57a   : > { %10780 = vmatmul.msk.bf16.gmra.mxu2 %vm1563_vm13, %v11945_v28  ;;  %10782 = vmatmul.msk.bf16.gmra.mxu3 %vm1563_vm13, %v11945_v28 }
 0x57b   : > { %3015 = vmatpush.bf16.msra.mxu0 %v2977_v34  ;;  %v2797_v34 = vpop.f32.mrf.mxu1 }
 0x57c   : > { %v3072_v17 = vpop.permute.xlu2 %3071 }
 0x57d   : > { %v2965_v55 = vpop.permute.xlu0 %2964  ;;  %v2866_v23 = vpop.permute.xlu1 %2865 }
 0x57e   : > { %2927 = vmatpush.bf16.msrb.mxu2 %v2866_v23  ;;  %v2870_v7 = vsel %vm600_vm2, %v2864_v0, %v2866_v23  ;;  %v2974_v22 = vsel %vm703_vm4, %v2963_v50, %v2965_v55 }
 0x57f   : > { %2908 = vmatpush.bf16.msrb.mxu1 %v2870_v7  ;;  %2997 = vmatpush.bf16.msrb.mxu3 %v2974_v22 }
 0x584   : > { %v3187_v15 = vpop.permute.xlu2 %3186 }
 0x585   : > { %v2967_v41 = vpop.permute.xlu0 %2966  ;;  %v2860_v31 = vpop.permute.xlu1 %2859 }
 0x586   : > { %2928 = vmatpush.bf16.msrb.mxu2 %v2860_v31  ;;  %v2868_v51 = vsel %vm600_vm2, %v2858_v11, %v2860_v31  ;;  %v2975_v52 = vsel %vm703_vm4, %v2965_v55, %v2967_v41  ;;  %v11953_v11 = vld [vmem:[%s16795_s4 + $0xe8] sm:$0xff]  ;;  %v11954_v55 = vld [vmem:[%s16795_s4 + $0xf0] sm:$0xff] }
 0x587   : > { %2909 = vmatpush.bf16.msrb.mxu1 %v2868_v51  ;;  %3016 = vmatpush.bf16.msra.mxu0 %v2975_v52 }
 0x589   : > { %10807 = vmatmul.msk.bf16.vlgmr.msrb.gmra.mxu0 %vm1563_vm13, %v11946_v8 }
 0x58a   : > { %10795 = vmatmul.msk.bf16.vlgmr.msra.gmra.mxu2 %vm1563_vm13, %v13429_v40  ;;  %10797 = vmatmul.msk.bf16.vlgmr.msra.gmra.mxu3 %vm1563_vm13, %v13429_v40 }
 0x58b   : > { %3034 = vmatpush.bf16.msra.mxu1 %v2973_v33 }
 0x58c   : > { %10809 = vmatmul.msk.bf16.vlgmr.msrb.gmra.mxu1 %vm1563_vm13, %v11946_v8  ;;  %v3183_v3 = vpop.permute.xlu2 %3182 }
 0x58d   : > { %v3080_v6 = vpop.permute.xlu0 %3079  ;;  %v3076_v24 = vpop.permute.xlu1 %3075 }
 0x58e   : > { %v3083_v12 = vsel %vm806_vm5, %v3076_v24, %v3078_v19  ;;  %3141 = vmatpush.bf16.msrb.mxu0 %v3080_v6  ;;  %v3084_v35 = vsel %vm806_vm5, %v3078_v19, %v3080_v6 }
 0x58f   : > { %3035 = vmatpush.bf16.msra.mxu1 %v2967_v41  ;;  %3103 = vmatpush.bf16.msra.mxu2 %v3083_v12 }
 0x590   : > { %3122 = vmatpush.bf16.msra.mxu3 %v3084_v35 }
 0x594   : > { %v3177_v42 = vpop.permute.xlu2 %3176 }
 0x595   : > { %v3074_v25 = vpop.permute.xlu0 %3073  ;;  %v3070_v59 = vpop.permute.xlu1 %3069 }
 0x596   : > { %3142 = vmatpush.bf16.msrb.mxu0 %v3074_v25  ;;  %v3081_v18 = vsel %vm806_vm5, %v3070_v59, %v3072_v17  ;;  %v3082_v16 = vsel %vm806_vm5, %v3072_v17, %v3074_v25  ;;  %v11955_v59 = vld [vmem:[%s16795_s4 + $0xf8] sm:$0xff] }
 0x597   : > { %3104 = vmatpush.bf16.msra.mxu2 %v3081_v18  ;;  %3123 = vmatpush.bf16.msra.mxu3 %v3082_v16 }
 0x599   : > { %10808 = vmatmul.msk.bf16.gmra.mxu0 %vm1563_vm13, %v11947_v21 }
 0x59a   : > { %10796 = vmatmul.msk.bf16.gmra.mxu2 %vm1563_vm13, %v13448_v9  ;;  %10798 = vmatmul.msk.bf16.gmra.mxu3 %vm1563_vm13, %v13448_v9 }
 0x59c   : > { %10810 = vmatmul.msk.bf16.gmra.mxu1 %vm1563_vm13, %v11947_v21  ;;  %v3391_v10 = vpop.permute.xlu2 %3390 }
 0x59d   : > { %v3179_v37 = vpop.permute.xlu0 %3178  ;;  %v3181_v39 = vpop.permute.xlu1 %3180 }
 0x59e   : > { %v3188_v32 = vsel %vm909_vm6, %v3177_v42, %v3179_v37  ;;  %v3189_v0 = vsel %vm909_vm6, %v3179_v37, %v3181_v39 }
 0x5a4   : > { %v3397_v13 = vpop.permute.xlu2 %3396 }
 0x5a5   : > { %v3290_v5 = vpop.permute.xlu0 %3289  ;;  %v3185_v45 = vpop.permute.xlu1 %3184 }
 0x5a6   : > { %v3190_v54 = vsel %vm909_vm6, %v3183_v3, %v3185_v45  ;;  %v3191_v49 = vsel %vm909_vm6, %v3185_v45, %v3187_v15 }
 0x5a7   : > { %3210 = vmatpush.bf16.msrb.mxu1 %v3190_v54 }
 0x5a9   : > { %10823 = vmatmul.msk.bf16.vlgmr.msra.gmra.mxu0 %vm1563_vm13, %v11948_v1 }
 0x5aa   : > { %10811 = vmatmul.msk.bf16.vlgmr.msrb.gmra.mxu2 %vm1563_vm13, %v11946_v8  ;;  %10821 = vmatmul.msk.bf16.vlgmr.msrb.gmra.mxu3 %vm1563_vm13, %v11948_v1  ;;  %v13581_v8 = vpop.f32.mrf.mxu1 }
 0x5ab   : > { %3229 = vmatpush.bf16.msrb.mxu2 %v3191_v49  ;;  %3248 = vmatpush.bf16.msrb.mxu3 %v3187_v15 }
 0x5ac   : > { %10825 = vmatmul.msk.bf16.vlgmr.msra.gmra.mxu1 %vm1563_vm13, %v11948_v1  ;;  %v3401_v43 = vpop.permute.xlu2 %3400  ;;  %v11956_v1 = vld [vmem:[%s16795_s4 + $0x100] sm:$0xff] }
 0x5ad   : > { %3211 = vmatpush.bf16.msrb.mxu1 %v3188_v32  ;;  %v3284_v40 = vpop.permute.xlu0 %3283  ;;  %v3292_v26 = vpop.permute.xlu1 %3291 }
 0x5ae   : > { %v3297_v9 = vsel %vm1012_vm7, %v3290_v5, %v3292_v26 }
 0x5af   : > { %3230 = vmatpush.bf16.msrb.mxu2 %v3189_v0  ;;  %3317 = vmatpush.bf16.msra.mxu0 %v3297_v9 }
 0x5b0   : > { %3249 = vmatpush.bf16.msrb.mxu3 %v3181_v39 }
 0x5b2   : > { %v2802_v15 = vpop.f32.mrf.mxu1 }
 0x5b4   : > { %v3506_v28 = vpop.permute.xlu2 %3505 }
 0x5b5   : > { %v3286_v57 = vpop.permute.xlu1 %3285  ;;  %v3399_v14 = vpop.permute.xlu0 %3398 }
 0x5b6   : > { %v3295_v50 = vsel %vm1012_vm7, %v3284_v40, %v3286_v57  ;;  %v3405_v29 = vsel %vm1115_vm8, %v3399_v14, %v3401_v43  ;;  %v3404_v44 = vsel %vm1115_vm8, %v3397_v13, %v3399_v14 }
 0x5b7   : > { %3318 = vmatpush.bf16.msra.mxu0 %v3295_v50  ;;  %v11957_v50 = vld [vmem:[%s16795_s4 + $0x108] sm:$0xff] }
 0x5b9   : > { %10824 = vmatmul.msk.bf16.gmra.mxu0 %vm1563_vm13, %v11949_v47 }
 0x5ba   : > { %10812 = vmatmul.msk.bf16.gmra.mxu2 %vm1563_vm13, %v11947_v21  ;;  %10822 = vmatmul.msk.bf16.gmra.mxu3 %vm1563_vm13, %v11949_v47  ;;  %v13600_v3 = vpop.f32.mrf.mxu1 }
 0x5bc   : > { %10826 = vmatmul.msk.bf16.gmra.mxu1 %vm1563_vm13, %v11949_v47  ;;  %v3500_v22 = vpop.permute.xlu2 %3499 }
 0x5bd   : > { %v3294_v61 = vpop.permute.xlu1 %3293  ;;  %v3393_v2 = vpop.permute.xlu0 %3392 }
 0x5be   : > { %v3298_v62 = vsel %vm1012_vm7, %v3292_v26, %v3294_v61  ;;  %v3402_v33 = vsel %vm1115_vm8, %v3391_v10, %v3393_v2 }
 0x5bf   : > { %3336 = vmatpush.bf16.msra.mxu1 %v3298_v62 }
 0x5c5   : > { %v3288_v30 = vpop.permute.xlu1 %3287  ;;  %v3395_v38 = vpop.permute.xlu0 %3394 }
 0x5c6   : > { %v3296_v27 = vsel %vm1012_vm7, %v3286_v57, %v3288_v30  ;;  %v3403_v46 = vsel %vm1115_vm8, %v3393_v2, %v3395_v38 }
 0x5c7   : > { %3337 = vmatpush.bf16.msra.mxu1 %v3296_v27 }
 0x5c9   : > { %10839 = vmatmul.msk.bf16.vlgmr.msrb.gmra.mxu0 %vm1563_vm13, %v11950_v36 }
 0x5ca   : > { %3443 = vmatpush.bf16.msrb.mxu0 %v3405_v29  ;;  %10835 = vmatmul.msk.bf16.vlgmr.msra.gmra.mxu2 %vm1563_vm13, %v11950_v36 }
 0x5cb   : > { %10837 = vmatmul.msk.bf16.vlgmr.msra.gmra.mxu3 %vm1563_vm13, %v11950_v36  ;;  %3355 = vmatpush.bf16.msra.mxu2 %v3294_v61 }
 0x5cc   : > { %10849 = vmatmul.msk.bf16.vlgmr.msrb.gmra.mxu1 %vm1563_vm13, %v11952_v4  ;;  %3424 = vmatpush.bf16.msra.mxu3 %v3404_v44 }
 0x5cd   : > { %3462 = vmatpush.bf16.msrb.mxu1 %v3401_v43  ;;  %v3504_v60 = vpop.permute.xlu1 %3503  ;;  %v3508_v53 = vpop.permute.xlu0 %3507 }
 0x5ce   : > { %3444 = vmatpush.bf16.msrb.mxu0 %v3403_v46  ;;  %v3511_v7 = vsel %vm16908_vm9, %v3504_v60, %v3506_v28  ;;  %v3512_v41 = vsel %vm16909_vm1, %v3506_v28, %v3508_v53  ;;  %v11958_v46 = vld [vmem:[%s16795_s4 + $0x110] sm:$0xff] }
 0x5cf   : > { %3356 = vmatpush.bf16.msra.mxu2 %v3288_v30 }
 0x5d0   : > { %3425 = vmatpush.bf16.msra.mxu3 %v3402_v33 }
 0x5d1   : > { %3463 = vmatpush.bf16.msrb.mxu1 %v3395_v38 }
 0x5d5   : > { %v3498_v19 = vpop.permute.xlu1 %3497  ;;  %v3502_v31 = vpop.permute.xlu0 %3501 }
 0x5d6   : > { %v3509_v24 = vsel %vm16910_vm15, %v3498_v19, %v3500_v22  ;;  %v3510_v12 = vsel %vm16911_vm0, %v3500_v22, %v3502_v31 }
 0x5d9   : > { %10840 = vmatmul.msk.bf16.gmra.mxu0 %vm1563_vm13, %v11951_v58 }
 0x5da   : > { %10836 = vmatmul.msk.bf16.gmra.mxu2 %vm1563_vm13, %v11951_v58 }
 0x5db   : > { %10838 = vmatmul.msk.bf16.gmra.mxu3 %vm1563_vm13, %v11951_v58 }
 0x5dc   : > { %10850 = vmatmul.msk.bf16.gmra.mxu1 %vm1563_vm13, %v11953_v11 }
 0x5e6   : > { %v2756_v23 = vpop.f32.mrf.mxu0 }
 0x5e9   : > { %10863 = vmatmul.msk.bf16.vlgmr.msra.gmra.mxu0 %vm1563_vm13, %v11954_v55 }
 0x5ea   : > { %3569 = vmatpush.bf16.msra.mxu0 %v3508_v53  ;;  %10851 = vmatmul.msk.bf16.vlgmr.msrb.gmra.mxu2 %vm1563_vm13, %v11952_v4 }
 0x5eb   : > { %10853 = vmatmul.msk.bf16.vlgmr.msrb.gmra.mxu3 %vm1563_vm13, %v11952_v4  ;;  %3531 = vmatpush.bf16.msrb.mxu2 %v3511_v7 }
 0x5ec   : > { %3550 = vmatpush.bf16.msrb.mxu3 %v3512_v41  ;;  %10865 = vmatmul.msk.bf16.vlgmr.msra.gmra.mxu1 %vm1563_vm13, %v11954_v55  ;;  %v11959_v41 = vld [vmem:[%s16795_s4 + $0x118] sm:$0xff] }
 0x5ed   : > { %v2718_v51 = vpop.f32.mrf.mxu2  ;;  %v2737_v52 = vpop.f32.mrf.mxu3 }
 0x5ee   : > { %v2798_v17 = vadd.f32 %v2797_v34, %v2718_v51  ;;  %3570 = vmatpush.bf16.msra.mxu0 %v3502_v31  ;;  %v13583_v6 = vpop.f32.mrf.mxu0 }
 0x5ef   : > { %3532 = vmatpush.bf16.msrb.mxu2 %v3509_v24 }
 0x5f0   : > { %3551 = vmatpush.bf16.msrb.mxu3 %v3510_v12 }
 0x5f5   : > { %v13587_v35 = vpop.f32.mrf.mxu2  ;;  %v13589_v25 = vpop.f32.mrf.mxu3 }
 0x5f6   : > { %v2761_v21 = vpop.f32.mrf.mxu0 }
 0x5f9   : > { %10864 = vmatmul.msk.bf16.gmra.mxu0 %vm1563_vm13, %v11955_v59 }
 0x5fa   : > { %10852 = vmatmul.msk.bf16.gmra.mxu2 %vm1563_vm13, %v11953_v11 }
 0x5fb   : > { %10854 = vmatmul.msk.bf16.gmra.mxu3 %vm1563_vm13, %v11953_v11 }
 0x5fc   : > { %10866 = vmatmul.msk.bf16.gmra.mxu1 %vm1563_vm13, %v11955_v59 }
 0x5fd   : > { %v2723_v18 = vpop.f32.mrf.mxu2  ;;  %v2742_v16 = vpop.f32.mrf.mxu3 }
 0x5fe   : > { %v2803_v37 = vadd.f32 %v2802_v15, %v2723_v18  ;;  %v13598_v39 = vpop.f32.mrf.mxu0 }
 0x605   : > { %v13602_v5 = vpop.f32.mrf.mxu2  ;;  %v13604_v45 = vpop.f32.mrf.mxu3 }
 0x606   : > { %v2892_v54 = vpop.f32.mrf.mxu0 }
 0x607   : > { %v2940_v42 = vadd.f32 %v2892_v54, %v2798_v17 }
 0x609   : > { %v2911_v49 = vpop.f32.mrf.mxu1  ;;  %10879 = vmatmul.msk.bf16.vlgmr.msrb.gmra.mxu0 %vm1563_vm13, %v11956_v1 }
 0x60a   : > { %10867 = vmatmul.msk.bf16.vlgmr.msra.gmra.mxu2 %vm1563_vm13, %v11954_v55 }
 0x60b   : > { %10877 = vmatmul.msk.bf16.vlgmr.msra.gmra.mxu3 %vm1563_vm13, %v11956_v1 }
 0x60c   : > { %10881 = vmatmul.msk.bf16.vlgmr.msrb.gmra.mxu1 %vm1563_vm13, %v11956_v1 }
 0x60d   : > { %v2816_v32 = vpop.f32.mrf.mxu2  ;;  %v2835_v40 = vpop.f32.mrf.mxu3 }
 0x60e   : > { %v2817_v26 = vadd.f32 %v2816_v32, %v2737_v52  ;;  %v2836_v0 = vadd.f32 %v2835_v40, %v2756_v23  ;;  %v13613_v9 = vpop.f32.mrf.mxu0 }
 0x610   : > { %v2941_v10 = vadd.f32 %v2911_v49, %v2817_v26 }
 0x611   : > { %v13615_v57 = vpop.f32.mrf.mxu1 }
 0x615   : > { %v13617_v47 = vpop.f32.mrf.mxu2  ;;  %v13619_v14 = vpop.f32.mrf.mxu3 }
 0x616   : > { %v2897_v61 = vpop.f32.mrf.mxu0 }
 0x617   : > { %v2946_v13 = vadd.f32 %v2897_v61, %v2803_v37 }
 0x619   : > { %v2916_v62 = vpop.f32.mrf.mxu1  ;;  %10880 = vmatmul.msk.bf16.gmra.mxu0 %vm1563_vm13, %v11957_v50 }
 0x61a   : > { %10868 = vmatmul.msk.bf16.gmra.mxu2 %vm1563_vm13, %v11955_v59 }
 0x61b   : > { %10878 = vmatmul.msk.bf16.gmra.mxu3 %vm1563_vm13, %v11957_v50 }
 0x61c   : > { %10882 = vmatmul.msk.bf16.gmra.mxu1 %vm1563_vm13, %v11957_v50 }
 0x61d   : > { %v2821_v2 = vpop.f32.mrf.mxu2  ;;  %v2840_v30 = vpop.f32.mrf.mxu3 }
 0x61e   : > { %v2822_v36 = vadd.f32 %v2821_v2, %v2742_v16  ;;  %v2841_v27 = vadd.f32 %v2840_v30, %v2761_v21  ;;  %v13628_v4 = vpop.f32.mrf.mxu0 }
 0x620   : > { %v2947_v43 = vadd.f32 %v2916_v62, %v2822_v36 }
 0x621   : > { %v13630_v29 = vpop.f32.mrf.mxu1 }
 0x625   : > { %v13632_v38 = vpop.f32.mrf.mxu2  ;;  %v13634_v44 = vpop.f32.mrf.mxu3 }
 0x626   : > { %v3018_v33 = vpop.f32.mrf.mxu0 }
 0x627   : > { %v3048_v58 = vadd.f32 %v3018_v33, %v2941_v10 }
 0x629   : > { %v3037_v11 = vpop.f32.mrf.mxu1  ;;  %10895 = vmatmul.msk.bf16.vlgmr.msra.gmra.mxu0 %vm1563_vm13, %v11958_v46 }
 0x62a   : > { %10891 = vmatmul.msk.bf16.vlgmr.msrb.gmra.mxu2 %vm1563_vm13, %v11958_v46 }
 0x62b   : > { %10893 = vmatmul.msk.bf16.vlgmr.msrb.gmra.mxu3 %vm1563_vm13, %v11958_v46 }
 0x62d   : > { %v2930_v28 = vpop.f32.mrf.mxu2  ;;  %v2999_v60 = vpop.f32.mrf.mxu3 }
 0x62e   : > { %v2942_v53 = vadd.f32 %v2930_v28, %v2836_v0  ;;  %v3047_v34 = vadd.f32 %v2999_v60, %v2940_v42  ;;  %v13642_v55 = vpop.f32.mrf.mxu0 }
 0x630   : > { %v3049_v23 = vadd.f32 %v3037_v11, %v2942_v53 }
 0x631   : > { %v13644_v7 = vpop.f32.mrf.mxu1 }
 0x635   : > { %v13646_v22 = vpop.f32.mrf.mxu2  ;;  %v13648_v19 = vpop.f32.mrf.mxu3 }
 0x636   : > { %v3023_v31 = vpop.f32.mrf.mxu0 }
 0x637   : > { %v3054_v51 = vadd.f32 %v3023_v31, %v2947_v43 }
 0x639   : > { %v3042_v52 = vpop.f32.mrf.mxu1  ;;  %10896 = vmatmul.msk.bf16.gmra.mxu0 %vm1563_vm13, %v11959_v41 }
 0x63a   : > { %10892 = vmatmul.msk.bf16.gmra.mxu2 %vm1563_vm13, %v11959_v41 }
 0x63b   : > { %10894 = vmatmul.msk.bf16.gmra.mxu3 %vm1563_vm13, %v11959_v41 }
 0x63d   : > { %v2935_v17 = vpop.f32.mrf.mxu2  ;;  %v3004_v24 = vpop.f32.mrf.mxu3 }
 0x63e   : > { %v2948_v12 = vadd.f32 %v2935_v17, %v2841_v27  ;;  %v3053_v59 = vadd.f32 %v3004_v24, %v2946_v13  ;;  %v13656_v21 = vpop.f32.mrf.mxu0 }
 0x640   : > { %v3055_v15 = vadd.f32 %v3042_v52, %v2948_v12 }
 0x641   : > { %v13658_v18 = vpop.f32.mrf.mxu1 }
 0x645   : > { %v13660_v16 = vpop.f32.mrf.mxu2  ;;  %v13662_v37 = vpop.f32.mrf.mxu3 }
 0x646   : > { %v3144_v1 = vpop.f32.mrf.mxu0 }
 0x647   : > { %v3156_v54 = vadd.f32 %v3144_v1, %v3049_v23 }
 0x649   : > { %v3213_v42 = vpop.f32.mrf.mxu1 }
 0x64d   : > { %v3106_v49 = vpop.f32.mrf.mxu2 }
 0x64e   : > { %v3154_v32 = vadd.f32 %v3106_v49, %v3047_v34  ;;  %v3125_v40 = vpop.f32.mrf.mxu3  ;;  %v13664_v26 = vpop.f32.mrf.mxu0 }
 0x64f   : > { %v3155_v0 = vadd.f32 %v3125_v40, %v3048_v58 }
 0x650   : > { %v3261_v10 = vadd.f32 %v3213_v42, %v3154_v32 }
 0x651   : > { %v13666_v50 = vpop.f32.mrf.mxu1 }
 0x655   : > { %v3108_v61 = vpop.f32.mrf.mxu2 }
 0x656   : > { %v3127_v13 = vpop.f32.mrf.mxu3  ;;  %v3149_v62 = vpop.f32.mrf.mxu0 }
 0x657   : > { %v13668_v2 = vadd.f32 %v3149_v62, %v3055_v15 }
 0x659   : > { %v3218_v36 = vpop.f32.mrf.mxu1 }
 0x65d   : > { %v3111_v30 = vpop.f32.mrf.mxu2 }
 0x65e   : > { %v3160_v27 = vadd.f32 %v3111_v30, %v3053_v59  ;;  %v3130_v43 = vpop.f32.mrf.mxu3  ;;  %v13670_v46 = vpop.f32.mrf.mxu0 }
 0x65f   : > { %v13672_v33 = vadd.f32 %v3130_v43, %v3054_v51 }
 0x660   : > { %v3267_v11 = vadd.f32 %v3218_v36, %v3160_v27 }
 0x661   : > { %v13678_v34 = vpop.f32.mrf.mxu1 }
 0x662   : > { %16912 = vst [vmem:[#allocation17_spill] sm:$0xff] %v13678_v34  ;;  %v2819_v34 = vadd.f32 %v13617_v47, %v13589_v25 }
 0x665   : > { %v13674_v28 = vpop.f32.mrf.mxu2 }
 0x666   : > { %v13676_v58 = vpop.f32.mrf.mxu3  ;;  %v3320_v60 = vpop.f32.mrf.mxu0 }
 0x667   : > { %v3368_v53 = vadd.f32 %v3320_v60, %v3261_v10 }
 0x669   : > { %v3339_v17 = vpop.f32.mrf.mxu1 }
 0x66d   : > { %v3232_v23 = vpop.f32.mrf.mxu2 }
 0x66e   : > { %v3251_v41 = vpop.f32.mrf.mxu3  ;;  %v13680_v31 = vpop.f32.mrf.mxu0 }
 0x66f   : > { %v13682_v52 = vadd.f32 %v3251_v41, %v3156_v54 }
 0x671   : > { %16913 = vst [vmem:[#allocation10_spill] sm:$0xff] %v13682_v52  ;;  %v3341_v15 = vpop.f32.mrf.mxu1 }
 0x675   : > { %v3234_v24 = vpop.f32.mrf.mxu2 }
 0x676   : > { %v13684_v12 = vpop.f32.mrf.mxu3  ;;  %v3325_v51 = vpop.f32.mrf.mxu0 }
 0x677   : > { %v13686_v59 = vadd.f32 %v3325_v51, %v3267_v11 }
 0x679   : > { %16914 = vst [vmem:[#allocation20_spill] sm:$0xff] %v13686_v59  ;;  %v13696_v54 = vpop.f32.mrf.mxu1 }
 0x67d   : > { %v13688_v1 = vpop.f32.mrf.mxu2 }
 0x67e   : > { %v3256_v42 = vpop.f32.mrf.mxu3  ;;  %v13690_v49 = vpop.f32.mrf.mxu0 }
 0x67f   : > { %16915 = vst [vmem:[#allocation8_spill] sm:$0xff] %v13690_v49 }
 0x681   : > { %v13700_v27 = vpop.f32.mrf.mxu1 }
 0x682   : > { %16918 = vst [vmem:[#allocation14_spill] sm:$0xff] %v13700_v27  ;;  %v2800_v27 = vadd.f32 %v13581_v8, %v13587_v35  ;;  %v13730_v8 = vpop.permute.xlu1 %3606 }
 0x684   : > { %v2943_v59 = vadd.f32 %v13613_v9, %v2800_v27  ;;  %v2805_v9 = vadd.f32 %v13600_v3, %v13602_v5 }
 0x685   : > { %v13692_v32 = vpop.f32.mrf.mxu2 }
 0x686   : > { %16916 = vst [vmem:[#allocation18_spill] sm:$0xff] %v13692_v32  ;;  %v13694_v40 = vpop.f32.mrf.mxu3  ;;  %v3446_v10 = vpop.f32.mrf.mxu0 }
 0x689   : > { %v13706_v41 = vpop.f32.mrf.mxu1 }
 0x68a   : > { %16921 = vst [vmem:[#allocation13_spill] sm:$0xff] %v13706_v41  ;;  %v3262_v41 = vadd.f32 %v3232_v23, %v3155_v0  ;;  %v13759_v27 = vpop.permute.xlu1 %3601 }
 0x68c   : > { %v3369_v47 = vadd.f32 %v3339_v17, %v3262_v41 }
 0x68d   : > { %v13698_v62 = vpop.f32.mrf.mxu2 }
 0x68e   : > { %16917 = vst [vmem:[#allocation11_spill] sm:$0xff] %v13698_v62  ;;  %v3427_v30 = vpop.f32.mrf.mxu3  ;;  %v3448_v36 = vpop.f32.mrf.mxu0 }
 0x68f   : > { %v3475_v32 = vadd.f32 %v3427_v30, %v3368_v53 }
 0x691   : > { %v13714_v20 = vpop.f32.mrf.mxu1 }
 0x692   : > { %16924 = vst [vmem:[#allocation27_spill] sm:$0xff] %v13714_v20  ;;  %v2843_v20 = vadd.f32 %v13634_v44, %v13598_v39  ;;  %v13739_v39 = vpop.permute.xlu0 %3596  ;;  %v2824_v44 = vadd.f32 %v13632_v38, %v13604_v45 }
 0x695   : > { %v13702_v43 = vpop.f32.mrf.mxu2 }
 0x696   : > { %16919 = vst [vmem:[#allocation16_spill] sm:$0xff] %v13702_v43  ;;  %v3429_v11 = vpop.f32.mrf.mxu3  ;;  %v13704_v60 = vpop.f32.mrf.mxu0 }
 0x697   : > { %16920 = vst [vmem:[#allocation9_spill] sm:$0xff] %v13704_v60 }
 0x69d   : > { %v3363_v51 = vpop.f32.mrf.mxu2 }
 0x69e   : > { %v13708_v56 = vpop.f32.mrf.mxu3  ;;  %v13710_v49 = vpop.f32.mrf.mxu0 }
 0x69f   : > { %16922 = vst [vmem:[#allocation24_spill] sm:$0xff] %v13708_v56  ;;  %v2944_v56 = vadd.f32 %v13615_v57, %v2819_v34  ;;  %v2838_v57 = vadd.f32 %v13619_v14, %v13583_v6  ;;  %v3470_v6 = vpop.f32.mrf.mxu1  ;;  %v2949_v14 = vadd.f32 %v13628_v4, %v2805_v9 }
 0x6a0   : > { %16923 = vst [vmem:[#allocation19_spill] sm:$0xff] %v13710_v49  ;;  %v3050_v49 = vadd.f32 %v13648_v19, %v2943_v59  ;;  %v2951_v19 = vadd.f32 %v13660_v16, %v2843_v20 }
 0x6a1   : > { %v3051_v25 = vadd.f32 %v13642_v55, %v2944_v56  ;;  %v2945_v3 = vadd.f32 %v13646_v22, %v2838_v57 }
 0x6a2   : > { %v3157_v60 = vadd.f32 %v3108_v61, %v3050_v49  ;;  %v3058_v23 = vadd.f32 %v13658_v18, %v2951_v19 }
 0x6a3   : > { %v3158_v35 = vadd.f32 %v3127_v13, %v3051_v25  ;;  %v3269_v13 = vadd.f32 %v3256_v42, %v13668_v2  ;;  %v2950_v2 = vadd.f32 %v13630_v29, %v2824_v44  ;;  %v3268_v29 = vadd.f32 %v13688_v1, %v13672_v33 }
 0x6a4   : > { %v3264_v5 = vadd.f32 %v13666_v50, %v3157_v60  ;;  %v3052_v50 = vadd.f32 %v13644_v7, %v2945_v3  ;;  %v3165_v17 = vadd.f32 %v13670_v46, %v3058_v23 }
 0x6a5   : > { %v13716_v62 = vpop.f32.mrf.mxu2  ;;  %v3265_v61 = vadd.f32 %v3234_v24, %v3158_v35  ;;  %v3376_v16 = vadd.f32 %v3363_v51, %v3269_v13  ;;  %v3057_v46 = vadd.f32 %v13656_v21, %v2950_v2  ;;  %v16934_v2 = vld [vmem:[#allocation17_spill] sm:$0xff] }
 0x6a6   : > { %v13720_v43 = vpop.f32.mrf.mxu3  ;;  %v13722_v52 = vpop.f32.mrf.mxu0  ;;  %v3371_v45 = vadd.f32 %v13680_v31, %v3264_v5  ;;  %v3056_v31 = vadd.f32 %v13662_v37, %v2949_v14  ;;  %v3159_v60 = vadd.f32 %v13664_v26, %v3052_v50  ;;  %v16931_v5 = vld [vmem:[#allocation10_spill] sm:$0xff] }
 0x6a7   : > { %16925 = vst [vmem:[#allocation7_spill] sm:$0xff] %v13720_v43  ;;  %v3476_v43 = vadd.f32 %v3446_v10, %v3369_v47  ;;  %v3483_v42 = vadd.f32 %v3470_v6, %v3376_v16  ;;  %v3164_v1 = vadd.f32 %v13676_v58, %v3057_v46  ;;  %v3472_v35 = vpop.f32.mrf.mxu1  ;;  %v16927_v58 = vld [vmem:[#allocation18_spill] sm:$0xff]  ;;  %v16932_v6 = vld [vmem:[#allocation11_spill] sm:$0xff] }
 0x6a8   : > { %16926 = vst [vmem:[#allocation21_spill] sm:$0xff] %v13722_v52  ;;  %v3478_v24 = vadd.f32 %v3429_v11, %v3371_v45  ;;  %v3163_v37 = vadd.f32 %v13674_v28, %v3056_v31  ;;  %v3266_v21 = vadd.f32 %v13684_v12, %v3159_v60  ;;  %v16933_v45 = vld [vmem:[#allocation12_spill] sm:$0xff]  ;;  %v16940_v60 = vld [vmem:[#allocation19_spill] sm:$0xff] }
 0x6a9   : > { %v3271_v57 = vadd.f32 %v16927_v58, %v3164_v1 }
 0x6ad   : > { %v3534_v52 = vpop.f32.mrf.mxu2 }
 0x6ae   : > { %v3582_v56 = vadd.f32 %v3534_v52, %v3475_v32  ;;  %v3553_v55 = vpop.f32.mrf.mxu3  ;;  %v13737_v0 = vpop.f32.mrf.mxu0  ;;  %v3372_v52 = vadd.f32 %v3341_v15, %v3265_v61 }
 0x6af   : > { %v3583_v53 = vadd.f32 %v3553_v55, %v3476_v43  ;;  %v16930_v55 = vld [vmem:[#allocation24_spill] sm:$0xff]  ;;  %v16942_v1 = vld [vmem:[#allocation21_spill] sm:$0xff] }
 0x6b0   : > { %v3614_v20 = vadd.f32 %v13739_v39, %v3582_v56  ;;  %v3479_v59 = vadd.f32 %v3448_v36, %v3372_v52  ;;  %v3272_v36 = vadd.f32 %v13694_v40, %v3165_v17  ;;  %v3375_v40 = vadd.f32 %v13696_v54, %v3268_v29  ;;  %v16929_v56 = vld [vmem:[#allocation20_spill] sm:$0xff] }
 0x6b1   : > { %v3615_v34 = vadd.f32 %v13739_v39, %v3583_v53  ;;  %v3481_v44 = vadd.f32 %v16930_v55, %v16929_v56  ;;  %v3270_v52 = vadd.f32 %v16934_v2, %v3163_v37 }
 0x6b2   : > { %vm3626_vm14 = vcmp.ge.f32.partialorder %v3614_v20, 0.0  ;;  %v3638_v38 = vmul.f32 0.01, %v3614_v20  ;;  %v3379_v51 = vadd.f32 %v13716_v62, %v3272_v36  ;;  %v16928_v62 = vld [vmem:[#allocation9_spill] sm:$0xff]  ;;  %v16939_v36 = vld [vmem:[#allocation27_spill] sm:$0xff] }
 0x6b3   : > { %vm3627_vm9 = vcmp.ge.f32.partialorder %v3615_v34, 0.0  ;;  %v3639_v22 = vmul.f32 0.01, %v3615_v34  ;;  %v3482_v19 = vadd.f32 %v16928_v62, %v3375_v40 }
 0x6b4   : > { %v3650_v4 = vsel %vm3626_vm14, %v3614_v20, %v3638_v38  ;;  %v3486_v12 = vadd.f32 %v3472_v35, %v3379_v51  ;;  %v3370_v20 = vadd.f32 %v16932_v6, %v16931_v5 }
 0x6b5   : > { %v3662_v49 = vmul.f32 %v3650_v4, %v12647_v63  ;;  %v3651_v18 = vsel %vm3627_vm9, %v3615_v34, %v3639_v22  ;;  %v3536_v32 = vpop.f32.mrf.mxu2  ;;  %v16935_v22 = vld [vmem:[#allocation16_spill] sm:$0xff]  ;;  %v3612_v4 = vpop.permute.xlu2 %3611 }
 0x6b6   : > { %v3663_v15 = vmul.f32 %v3651_v18, %v12650_v48  ;;  %v3585_v10 = vadd.f32 %v3536_v32, %v3478_v24  ;;  %v3555_v30 = vpop.f32.mrf.mxu3  ;;  %v3577_v7 = vpop.f32.mrf.mxu0  ;;  %v3373_v50 = vadd.f32 %v16935_v22, %v3266_v21  ;;  %v16936_v18 = vld [vmem:[#allocation8_spill] sm:$0xff] }
 0x6b7   : > { %v3586_v43 = vadd.f32 %v3555_v30, %v3479_v59  ;;  %v3590_v11 = vadd.f32 %v3577_v7, %v3483_v42  ;;  %v3377_v32 = vadd.f32 %v16936_v18, %v3270_v52  ;;  %v16938_v30 = vld [vmem:[#allocation13_spill] sm:$0xff] }
 0x6b8   : > { %v3617_v41 = vadd.f32 %v13759_v27, %v3585_v10  ;;  %v3674_v33 = vpack.c.bf16 %v3663_v15, %v3662_v49  ;;  %v16937_v15 = vld [vmem:[#allocation14_spill] sm:$0xff]  ;;  %v3477_v7 = vadd.f32 %v16938_v30, %v3370_v20 }
 0x6b9   : > { %v3618_v25 = vadd.f32 %v13759_v27, %v3586_v43  ;;  %v3622_v47 = vadd.f32 %v13730_v8, %v3590_v11  ;;  %v3378_v10 = vadd.f32 %v16937_v15, %v3271_v57  ;;  %v3480_v43 = vadd.f32 %v16939_v36, %v3373_v50 }
 0x6ba   : > { %vm3629_vm1 = vcmp.ge.f32.partialorder %v3617_v41, 0.0  ;;  %v3641_v26 = vmul.f32 0.01, %v3617_v41  ;;  %3690 = vrot.lane.b32.xlu0 %v3674_v33, %s12221_s21  ;;  %v3584_v51 = vadd.f32 %v16942_v1, %v3477_v7 }
 0x6bb   : > { %vm3630_vm15 = vcmp.ge.f32.partialorder %v3618_v25, 0.0  ;;  %v3642_v28 = vmul.f32 0.01, %v3618_v25  ;;  %vm3634_vm0 = vcmp.ge.f32.partialorder %v3622_v47, 0.0  ;;  %v3646_v9 = vmul.f32 0.01, %v3622_v47 }
 0x6bc   : > { %v3653_v61 = vsel %vm3629_vm1, %v3617_v41, %v3641_v26  ;;  %v3485_v37 = vadd.f32 %v16940_v60, %v3378_v10  ;;  %v16941_v41 = vld [vmem:[#allocation7_spill] sm:$0xff] }
 0x6bd   : > { %v3665_v54 = vmul.f32 %v3653_v61, %v12647_v63  ;;  %v3654_v13 = vsel %vm3630_vm15, %v3618_v25, %v3642_v28  ;;  %v3658_v53 = vsel %vm3634_vm0, %v3622_v47, %v3646_v9  ;;  %v3539_v3 = vpop.f32.mrf.mxu2  ;;  %v3484_v33 = vadd.f32 %v16941_v41, %v3377_v32 }
 0x6be   : > { %v3666_v14 = vmul.f32 %v3654_v13, %v12650_v48  ;;  %v3588_v16 = vadd.f32 %v3539_v3, %v3481_v44  ;;  %v3558_v34 = vpop.f32.mrf.mxu3  ;;  %v3579_v23 = vpop.f32.mrf.mxu0  ;;  %v3670_v38 = vmul.f32 %v3658_v53, %v16933_v45  ;;  %v3587_v25 = vadd.f32 %v13737_v0, %v3480_v43 }
 0x6bf   : > { %v3589_v17 = vadd.f32 %v3558_v34, %v3482_v19  ;;  %v3593_v24 = vadd.f32 %v3579_v23, %v3486_v12  ;;  %v3616_v19 = vadd.f32 %v13739_v39, %v3584_v51 }
 0x6c0   : > { %v3620_v59 = vadd.f32 %v13730_v8, %v3588_v16  ;;  %v3679_v42 = vpack.c.bf16 %v3670_v38, %v3670_v38  ;;  %v3676_v49 = vpack.c.bf16 %v3666_v14, %v3665_v54  ;;  %v3619_v56 = vadd.f32 %v13759_v27, %v3587_v25 }
 0x6c1   : > { %v3621_v31 = vadd.f32 %v13730_v8, %v3589_v17  ;;  %v3625_v29 = vadd.f32 %v3612_v4, %v3593_v24  ;;  %v3640_v13 = vmul.f32 0.01, %v3616_v19 }
 0x6c2   : > { %vm3632_vm14 = vcmp.ge.f32.partialorder %v3620_v59, 0.0  ;;  %v3644_v46 = vmul.f32 0.01, %v3620_v59  ;;  %3700 = vrot.lane.b32.xlu1 %v3679_v42, %s12221_s21  ;;  %v3643_v53 = vmul.f32 0.01, %v3619_v56 }
 0x6c3   : > { %vm3633_vm9 = vcmp.ge.f32.partialorder %v3621_v31, 0.0  ;;  %v3645_v11 = vmul.f32 0.01, %v3621_v31  ;;  %v3649_v40 = vmul.f32 0.01, %v3625_v29  ;;  %vm3637_vm1 = vcmp.ge.f32.partialorder %v3625_v29, 0.0 }
 0x6c4   : > { %v3656_v8 = vsel %vm3632_vm14, %v3620_v59, %v3644_v46  ;;  %vm3628_vm14 = vcmp.ge.f32.partialorder %v3616_v19, 0.0 }
 0x6c5   : > { %v3668_v47 = vmul.f32 %v3656_v8, %v12647_v63  ;;  %v3657_v21 = vsel %vm3633_vm9, %v3621_v31, %v3645_v11  ;;  %v3541_v35 = vpop.f32.mrf.mxu2  ;;  %v3661_v55 = vsel %vm3637_vm1, %v3625_v29, %v3649_v40  ;;  %vm3631_vm9 = vcmp.ge.f32.partialorder %v3619_v56, 0.0 }
 0x6c6   : > { %v3669_v26 = vmul.f32 %v3657_v21, %v12650_v48  ;;  %v3591_v28 = vadd.f32 %v3541_v35, %v3484_v33  ;;  %v3560_v9 = vpop.f32.mrf.mxu3  ;;  %v3673_v54 = vmul.f32 %v3661_v55, %v16933_v45  ;;  %v3652_v20 = vsel %vm3628_vm14, %v3616_v19, %v3640_v13  ;;  %v13911_v19 = vld [vmem:[%s16795_s4 + $0x120] sm:$0xff] }
 0x6c7   : > { %v3592_v58 = vadd.f32 %v3560_v9, %v3485_v37  ;;  %v3655_v14 = vsel %vm3631_vm9, %v3619_v56, %v3643_v53  ;;  %v3664_v16 = vmul.f32 %v3652_v20, %v16933_v45  ;;  %v10933_v53 = vld [vmem:[%s16796_s5 + $0x40] sm:$0xff]  ;;  %vm16944_vm1 = vcmask 736256  }
 0x6c8   : > { %v3623_v57 = vadd.f32 %v3612_v4, %v3591_v28  ;;  %v3678_v62 = vpack.c.bf16 %v3669_v26, %v3668_v47  ;;  %v3681_v6 = vpack.c.bf16 %v3673_v54, %v3673_v54  ;;  %v3667_v34 = vmul.f32 %v3655_v14, %v16933_v45  ;;  %v10935_v14 = vld [vmem:[%s16796_s5 + $0x50] sm:$0xff] }
 0x6c9   : > { %v3624_v44 = vadd.f32 %v3612_v4, %v3592_v58  ;;  %v3675_v23 = vpack.c.bf16 %v3664_v16, %v3664_v16  ;;  %v10936_v16 = vld [vmem:[%s16796_s5 + $0x58] sm:$0xff] }
 0x6ca   : > { %vm3635_vm15 = vcmp.ge.f32.partialorder %v3623_v57, 0.0  ;;  %v3647_v0 = vmul.f32 0.01, %v3623_v57  ;;  %3698 = vrot.lane.b32.xlu2 %v3678_v62, %s12221_s21  ;;  %3694 = vrot.lane.b32.xlu1 %v3676_v49, %s12221_s21  ;;  %v3677_v38 = vpack.c.bf16 %v3667_v34, %v3667_v34 }
 0x6cb   : > { %vm3636_vm0 = vcmp.ge.f32.partialorder %v3624_v44, 0.0  ;;  %v3648_v61 = vmul.f32 0.01, %v3624_v44 }
 0x6cc   : > { %v3659_v12 = vsel %vm3635_vm15, %v3623_v57, %v3647_v0  ;;  %vm16945_vm15 = vmmov %vm16944_vm1 }
 0x6cd   : > { %v3671_v3 = vmul.f32 %v3659_v12, %v12647_v63  ;;  %v3660_v39 = vsel %vm3636_vm0, %v3624_v44, %v3648_v61  ;;  %v13930_v44 = vld [vmem:[%s16795_s4 + $0x128] sm:$0xff]  ;;  %vm16946_vm0 = vmmov %vm16944_vm1 }
 0x6ce   : > { %v3672_v27 = vmul.f32 %v3660_v39, %v12650_v48  ;;  %vm16947_vm14 = vmmov %vm16946_vm0 }
 0x6d0   : > { %v3680_v5 = vpack.c.bf16 %v3672_v27, %v3671_v3  ;;  %v11968_v27 = vld [vmem:[%s16795_s4 + $0x130] sm:$0xff] }
 0x6d2   : > { %3702 = vrot.lane.b32.xlu0 %v3680_v5, %s12221_s21  ;;  %3704 = vrot.lane.b32.xlu2 %v3681_v6, %s12221_s21 }
 0x6da   : > { %3692 = vrot.lane.b32.xlu2 %v3675_v23, %s12221_s21  ;;  %3696 = vrot.lane.b32.xlu0 %v3677_v38, %s12221_s21 }
 0x724   : > { %v3699_v2 = vpop.permute.xlu2 %3698 }
 0x725   : > { %v3708_v52 = vrot.slane %v3699_v2, 4 }
 0x727   : > { %v3714_v22 = vsel %vm1428_vm10, %v3708_v52, %v3699_v2 }
 0x728   : > { %3730 = vst.msk [vmem:[#allocation4 + $0x18] sm:$0xff] %vm12803_vm11, %v3714_v22  ;;  %v10934_v22 = vld [vmem:[%s16796_s5 + $0x48] sm:$0xff] }
 0x72c   : > { %v3691_v17 = vpop.permute.xlu0 %3690  ;;  %v3705_v24 = vpop.permute.xlu2 %3704 }
 0x72d   : > { %v3706_v4 = vrot.slane %v3691_v17, 4 }
 0x72f   : > { %v3710_v59 = vsel %vm1428_vm10, %v3706_v4, %v3691_v17  ;;  %v11987_v41 = vld [vmem:[#allocation4 + $0x1c] sm:$0xf]  ;;  %v10959_v1 = vld [vmem:[#allocation4 + $0x18] sm:$0xf]  ;;  %v11969_v17 = vld [vmem:[%s16795_s4 + $0x138] sm:$0xff] }
 0x730   : > { %3726 = vst.msk [vmem:[#allocation4] sm:$0xff] %vm12803_vm11, %v3710_v59 }
 0x734   : > { %v3693_v42 = vpop.permute.xlu2 %3692  ;;  %v3701_v49 = vpop.permute.xlu1 %3700 }
 0x735   : > { %v3711_v18 = vsel %vm1428_vm10, %v3706_v4, %v3693_v42  ;;  %v3715_v32 = vsel %vm1428_vm10, %v3708_v52, %v3701_v49 }
 0x736   : > { %3727 = vst.msk [vmem:[#allocation4 + $0x8] sm:$0xf] %vm1449_vm12, %v3711_v18 }
 0x737   : > { %3731 = vst.msk [vmem:[#allocation4 + $0x20] sm:$0xf] %vm1449_vm12, %v3715_v32  ;;  %v11984_v7 = vld [vmem:[#allocation4 + $0x4] sm:$0xf]  ;;  %v10947_v25 = vld [vmem:[#allocation4] sm:$0xf] }
 0x73c   : > { %v3695_v31 = vpop.permute.xlu1 %3694 }
 0x73d   : > { %v3707_v29 = vrot.slane %v3695_v31, 4  ;;  %v10955_v58 = vld [vmem:[#allocation4 + $0x8] sm:$0xf] }
 0x73e   : > { %v10967_v47 = vld [vmem:[#allocation4 + $0x20] sm:$0xf] }
 0x73f   : > { %v3712_v15 = vsel %vm1428_vm10, %v3707_v29, %v3695_v31 }
 0x740   : > { %3728 = vst.msk [vmem:[#allocation4 + $0xc] sm:$0xff] %vm12803_vm11, %v3712_v15 }
 0x744   : > { %v3703_v10 = vpop.permute.xlu0 %3702 }
 0x745   : > { %v3709_v30 = vrot.slane %v3703_v10, 4 }
 0x747   : > { %v10949_v46 = vld [vmem:[#allocation4 + $0xc] sm:$0xf0]  ;;  %v3716_v36 = vsel %vm1428_vm10, %v3709_v30, %v3703_v10  ;;  %v3717_v43 = vsel %vm1428_vm10, %v3709_v30, %v3705_v24  ;;  %v11985_v33 = vld [vmem:[#allocation4 + $0x8] sm:$0xf0]  ;;  %v11970_v30 = vld [vmem:[%s16795_s4 + $0x140] sm:$0xff] }
 0x748   : > { %v13825_v11 = vor.u32 %v11984_v7, %v10949_v46  ;;  %3732 = vst.msk [vmem:[#allocation4 + $0x24] sm:$0xff] %vm12803_vm11, %v3716_v36  ;;  %v10948_v26 = vor.u32 %v11985_v33, %v10947_v25 }
 0x749   : > { %3733 = vst.msk [vmem:[#allocation4 + $0x2c] sm:$0xf] %vm1449_vm12, %v3717_v43 }
 0x74a   : > { %3822 = vrot.lane.b32.xlu0 %v13825_v11, %s12212_s11 }
 0x74c   : > { %v3697_v60 = vpop.permute.xlu0 %3696 }
 0x74d   : > { %v3713_v37 = vsel %vm1428_vm10, %v3707_v29, %v3697_v60 }
 0x74e   : > { %3729 = vst.msk [vmem:[#allocation4 + $0x14] sm:$0xf] %vm1449_vm12, %v3713_v37 }
 0x74f   : > { %v10961_v51 = vld [vmem:[#allocation4 + $0x24] sm:$0xf0]  ;;  %v11988_v8 = vld [vmem:[#allocation4 + $0x20] sm:$0xf0] }
 0x750   : > { %v13834_v21 = vor.u32 %v11988_v8, %v10959_v1  ;;  %v13836_v40 = vor.u32 %v11987_v41, %v10961_v51  ;;  %v11989_v35 = vld [vmem:[#allocation4 + $0x28] sm:$0xf0]  ;;  %v11971_v8 = vld [vmem:[%s16795_s4 + $0x148] sm:$0xff] }
 0x751   : > { %v13838_v28 = vor.u32 %v11989_v35, %v10967_v47 }
 0x752   : > { %3933 = vmatpush.bf16.msrb.mxu0 %v13834_v21  ;;  %3828 = vrot.lane.b32.xlu1 %v13836_v40, %s12212_s11 }
 0x753   : > { %3830 = vrot.lane.b32.xlu2 %v13838_v28, %s12212_s11  ;;  %3820 = vrot.lane.b32.xlu0 %v10948_v26, %s12212_s11 }
 0x755   : > { %v11986_v9 = vld [vmem:[#allocation4 + $0x10] sm:$0xf0] }
 0x756   : > { %3934 = vmatpush.bf16.msrb.mxu0 %v10948_v26  ;;  %v13846_v57 = vor.u32 %v11986_v9, %v10955_v58  ;;  %v11972_v9 = vld [vmem:[%s16795_s4 + $0x150] sm:$0xff] }
 0x759   : > { %10983 = vmatmul.msk.bf16.vlgmr.msrb.gmra.mxu0 %vm1563_vm13, %v13911_v19 }
 0x75a   : > { %3824 = vrot.lane.b32.xlu1 %v13846_v57, %s12212_s11 }
 0x75b   : > { %3826 = vrot.lane.b32.xlu2 %v13834_v21, %s12212_s11  ;;  %3994 = vrot.lane.b32.xlu0 %v10948_v26, %s12213_s12 }
 0x762   : > { %4000 = vrot.lane.b32.xlu1 %v13834_v21, %s12213_s12 }
 0x763   : > { %4002 = vrot.lane.b32.xlu2 %v13836_v40, %s12213_s12  ;;  %4109 = vrot.lane.b32.xlu0 %v13836_v40, %s12214_s13 }
 0x769   : > { %10984 = vmatmul.msk.bf16.gmra.mxu0 %vm1563_vm13, %v13930_v44 }
 0x76a   : > { %3996 = vrot.lane.b32.xlu1 %v13825_v11, %s12213_s12 }
 0x76b   : > { %4101 = vrot.lane.b32.xlu2 %v10948_v26, %s12214_s13  ;;  %4103 = vrot.lane.b32.xlu0 %v13825_v11, %s12214_s13 }
 0x772   : > { %4111 = vrot.lane.b32.xlu1 %v13838_v28, %s12214_s13 }
 0x773   : > { %4107 = vrot.lane.b32.xlu2 %v13834_v21, %s12214_s13  ;;  %3998 = vrot.lane.b32.xlu0 %v13846_v57, %s12213_s12 }
 0x77a   : > { %4004 = vrot.lane.b32.xlu1 %v13838_v28, %s12213_s12 }
 0x77b   : > { %4105 = vrot.lane.b32.xlu2 %v13846_v57, %s12214_s13  ;;  %4210 = vrot.lane.b32.xlu0 %v13825_v11, %s12215_s14 }
 0x782   : > { %4216 = vrot.lane.b32.xlu1 %v13836_v40, %s12215_s14 }
 0x783   : > { %4218 = vrot.lane.b32.xlu2 %v13838_v28, %s12215_s14  ;;  %4208 = vrot.lane.b32.xlu0 %v10948_v26, %s12215_s14 }
 0x78a   : > { %4212 = vrot.lane.b32.xlu1 %v13846_v57, %s12215_s14 }
 0x78b   : > { %4214 = vrot.lane.b32.xlu2 %v13834_v21, %s12215_s14  ;;  %4430 = vrot.lane.b32.xlu0 %v13836_v40, %s12217_s16 }
 0x792   : > { %4319 = vrot.lane.b32.xlu1 %v13846_v57, %s12216_s15 }
 0x793   : > { %4428 = vrot.lane.b32.xlu2 %v13834_v21, %s12217_s16  ;;  %4323 = vrot.lane.b32.xlu0 %v13836_v40, %s12216_s15 }
 0x79a   : > { %4325 = vrot.lane.b32.xlu1 %v13838_v28, %s12216_s15 }
 0x79b   : > { %4321 = vrot.lane.b32.xlu2 %v13834_v21, %s12216_s15  ;;  %4315 = vrot.lane.b32.xlu0 %v10948_v26, %s12216_s15 }
 0x7a2   : > { %4422 = vrot.lane.b32.xlu1 %v10948_v26, %s12217_s16 }
 0x7a3   : > { %4424 = vrot.lane.b32.xlu2 %v13825_v11, %s12217_s16  ;;  %4537 = vrot.lane.b32.xlu0 %v13836_v40, %s12218_s17 }
 0x7aa   : > { %4317 = vrot.lane.b32.xlu1 %v13825_v11, %s12216_s15 }
 0x7ab   : > { %4529 = vrot.lane.b32.xlu2 %v10948_v26, %s12218_s17  ;;  %4531 = vrot.lane.b32.xlu0 %v13825_v11, %s12218_s17 }
 0x7ad   : > { %v3831_v62 = vpop.permute.xlu2 %3830 }
 0x7ae   : > { %3892 = vmatpush.bf16.msra.mxu3 %v3831_v62 }
 0x7b2   : > { %4539 = vrot.lane.b32.xlu1 %v13838_v28, %s12218_s17 }
 0x7b3   : > { %4535 = vrot.lane.b32.xlu2 %v13834_v21, %s12218_s17  ;;  %4426 = vrot.lane.b32.xlu0 %v13846_v57, %s12217_s16 }
 0x7b5   : > { %v3827_v56 = vpop.permute.xlu2 %3826 }
 0x7ba   : > { %4432 = vrot.lane.b32.xlu1 %v13838_v28, %s12217_s16 }
 0x7bb   : > { %4533 = vrot.lane.b32.xlu2 %v13846_v57, %s12218_s17  ;;  %4638 = vrot.lane.b32.xlu0 %v13825_v11, %s12219_s18 }
 0x7bc   : > { %v3823_v55 = vpop.permute.xlu0 %3822 }
 0x7bd   : > { %v13932_v0 = vpop.permute.xlu2 %4002 }
 0x7c2   : > { %4644 = vrot.lane.b32.xlu1 %v13836_v40, %s12219_s18 }
 0x7c3   : > { %4646 = vrot.lane.b32.xlu2 %v13838_v28, %s12219_s18  ;;  %4636 = vrot.lane.b32.xlu0 %v10948_v26, %s12219_s18 }
 0x7c4   : > { %v3829_v61 = vpop.permute.xlu1 %3828 }
 0x7c5   : > { %v3821_v12 = vpop.permute.xlu0 %3820  ;;  %v3834_v54 = vsel %vm425_vm3, %v3827_v56, %v3829_v61  ;;  %v3835_v13 = vsel %vm425_vm3, %v3829_v61, %v3831_v62  ;;  %v4102_v3 = vpop.permute.xlu2 %4101  ;;  %v11973_v61 = vld [vmem:[%s16795_s4 + $0x158] sm:$0xff] }
 0x7c6   : > { %3854 = vmatpush.bf16.msra.mxu1 %v3834_v54  ;;  %3873 = vmatpush.bf16.msra.mxu2 %v3835_v13  ;;  %v3832_v39 = vsel %vm425_vm3, %v3821_v12, %v3823_v55 }
 0x7ca   : > { %4640 = vrot.lane.b32.xlu1 %v13846_v57, %s12219_s18  ;;  %3855 = vmatpush.bf16.msra.mxu1 %v3832_v39 }
 0x7cb   : > { %4642 = vrot.lane.b32.xlu2 %v13834_v21, %s12219_s18  ;;  %4735 = vperm.xlu0 %12111, %v10933_v53  }
 0x7cc   : > { %v3825_v5 = vpop.permute.xlu1 %3824 }
 0x7cd   : > { %v3995_v6 = vpop.permute.xlu0 %3994  ;;  %10969 = vmatmul.msk.bf16.vlgmr.msra.gmra.mxu1 %vm1563_vm13, %v11968_v27  ;;  %3893 = vmatpush.bf16.msra.mxu3 %v3825_v5  ;;  %v3833_v20 = vsel %vm425_vm3, %v3823_v55, %v3825_v5  ;;  %v4108_v34 = vpop.permute.xlu2 %4107 }
 0x7ce   : > { %3952 = vmatpush.bf16.msrb.mxu1 %v13836_v40  ;;  %3874 = vmatpush.bf16.msra.mxu2 %v3833_v20 }
 0x7d0   : > { %10973 = vmatmul.msk.bf16.vlgmr.msra.gmra.mxu3 %vm1563_vm13, %v11968_v27 }
 0x7d1   : > { %10971 = vmatmul.msk.bf16.vlgmr.msra.gmra.mxu2 %vm1563_vm13, %v11968_v27  ;;  %v11974_v27 = vld [vmem:[%s16795_s4 + $0x160] sm:$0xff] }
 0x7d2   : > { %3971 = vmatpush.bf16.msrb.mxu2 %v13838_v28  ;;  %3953 = vmatpush.bf16.msrb.mxu1 %v13825_v11 }
 0x7d3   : > { %4745 = vperm.xlu1 %12112, %v10935_v14   ;;  %4750 = vperm.xlu2 %12113, %v10936_v16  }
 0x7d4   : > { %v4001_v23 = vpop.permute.xlu1 %4000 }
 0x7d5   : > { %v4008_v38 = vsel %vm600_vm2, %v4001_v23, %v13932_v0  ;;  %v4110_v2 = vpop.permute.xlu0 %4109  ;;  %v4106_v4 = vpop.permute.xlu2 %4105 }
 0x7d6   : > { %3972 = vmatpush.bf16.msrb.mxu2 %v13846_v57  ;;  %4028 = vmatpush.bf16.msrb.mxu3 %v4008_v38  ;;  %v4115_v52 = vsel %vm703_vm4, %v4108_v34, %v4110_v2  ;;  %v11976_v34 = vld [vmem:[%s16795_s4 + $0x170] sm:$0xff] }
 0x7da   : > { %4135 = vmatpush.bf16.msra.mxu2 %v4115_v52 }
 0x7db   : > { %4740 = vperm.xlu1 %12112, %v10934_v22   ;;  %v11975_v22 = vld [vmem:[%s16795_s4 + $0x168] sm:$0xff] }
 0x7dc   : > { %v3997_v24 = vpop.permute.xlu1 %3996 }
 0x7dd   : > { %v4104_v59 = vpop.permute.xlu0 %4103  ;;  %10970 = vmatmul.msk.bf16.gmra.mxu1 %vm1563_vm13, %v11969_v17  ;;  %v4006_v42 = vsel %vm600_vm2, %v3995_v6, %v3997_v24  ;;  %v4219_v29 = vpop.permute.xlu2 %4218 }
 0x7de   : > { %4029 = vmatpush.bf16.msrb.mxu3 %v4006_v42  ;;  %v4113_v49 = vsel %vm703_vm4, %v4102_v3, %v4104_v59  ;;  %v4114_v15 = vsel %vm703_vm4, %v4104_v59, %v4106_v4  ;;  %v3936_v59 = vpop.f32.mrf.mxu0 }
 0x7df   : > { %4136 = vmatpush.bf16.msra.mxu2 %v4113_v49 }
 0x7e0   : > { %10974 = vmatmul.msk.bf16.gmra.mxu3 %vm1563_vm13, %v11969_v17 }
 0x7e1   : > { %10972 = vmatmul.msk.bf16.gmra.mxu2 %vm1563_vm13, %v11969_v17  ;;  %v11977_v17 = vld [vmem:[%s16795_s4 + $0x178] sm:$0xff] }
 0x7e4   : > { %v4112_v18 = vpop.permute.xlu1 %4111 }
 0x7e5   : > { %v3999_v32 = vpop.permute.xlu0 %3998  ;;  %v4116_v31 = vsel %vm703_vm4, %v4110_v2, %v4112_v18  ;;  %v4215_v36 = vpop.permute.xlu2 %4214 }
 0x7e6   : > { %4154 = vmatpush.bf16.msra.mxu3 %v4116_v31  ;;  %v4007_v43 = vsel %vm600_vm2, %v3997_v24, %v3999_v32  ;;  %v11978_v31 = vld [vmem:[%s16795_s4 + $0x180] sm:$0xff] }
 0x7ea   : > { %4155 = vmatpush.bf16.msra.mxu3 %v4114_v15 }
 0x7ec   : > { %v4005_v10 = vpop.permute.xlu1 %4004 }
 0x7ed   : > { %v4211_v7 = vpop.permute.xlu0 %4210  ;;  %10985 = vmatmul.msk.bf16.vlgmr.msrb.gmra.mxu1 %vm1563_vm13, %v13911_v19  ;;  %v4009_v46 = vsel %vm600_vm2, %v13932_v0, %v4005_v10  ;;  %v4429_v1 = vpop.permute.xlu2 %4428 }
 0x7ee   : > { %4066 = vmatpush.bf16.msra.mxu1 %v4005_v10  ;;  %4047 = vmatpush.bf16.msra.mxu0 %v4009_v46  ;;  %v14061_v10 = vpop.f32.mrf.mxu0 }
 0x7f0   : > { %10997 = vmatmul.msk.bf16.vlgmr.msrb.gmra.mxu3 %vm1563_vm13, %v11970_v30 }
 0x7f1   : > { %4280 = vmatpush.bf16.msrb.mxu3 %v4219_v29  ;;  %10987 = vmatmul.msk.bf16.vlgmr.msrb.gmra.mxu2 %vm1563_vm13, %v13911_v19 }
 0x7f2   : > { %4067 = vmatpush.bf16.msra.mxu1 %v3999_v32  ;;  %4048 = vmatpush.bf16.msra.mxu0 %v4007_v43 }
 0x7f4   : > { %v4217_v11 = vpop.permute.xlu1 %4216 }
 0x7f5   : > { %v4209_v60 = vpop.permute.xlu0 %4208  ;;  %10999 = vmatmul.msk.bf16.vlgmr.msra.gmra.mxu0 %vm1563_vm13, %v11970_v30  ;;  %v4222_v37 = vsel %vm806_vm5, %v4215_v36, %v4217_v11  ;;  %v4223_v41 = vsel %vm806_vm5, %v4217_v11, %v4219_v29  ;;  %v4322_v40 = vpop.permute.xlu2 %4321 }
 0x7f6   : > { %4173 = vmatpush.bf16.msrb.mxu0 %v4112_v18  ;;  %4242 = vmatpush.bf16.msrb.mxu1 %v4222_v37  ;;  %v4220_v33 = vsel %vm806_vm5, %v4209_v60, %v4211_v7 }
 0x7f7   : > { %4261 = vmatpush.bf16.msrb.mxu2 %v4223_v41  ;;  %v3941_v41 = vpop.f32.mrf.mxu0 }
 0x7fa   : > { %4174 = vmatpush.bf16.msrb.mxu0 %v4106_v4  ;;  %4243 = vmatpush.bf16.msrb.mxu1 %v4220_v33 }
 0x7fc   : > { %v4213_v51 = vpop.permute.xlu1 %4212 }
 0x7fd   : > { %v4431_v25 = vpop.permute.xlu0 %4430  ;;  %10986 = vmatmul.msk.bf16.gmra.mxu1 %vm1563_vm13, %v13930_v44  ;;  %4281 = vmatpush.bf16.msrb.mxu3 %v4213_v51  ;;  %v4221_v47 = vsel %vm806_vm5, %v4211_v7, %v4213_v51  ;;  %v4425_v19 = vpop.permute.xlu2 %4424 }
 0x7fe   : > { %4262 = vmatpush.bf16.msrb.mxu2 %v4221_v47  ;;  %v4436_v57 = vsel %vm1012_vm7, %v4429_v1, %v4431_v25 }
 0x800   : > { %10998 = vmatmul.msk.bf16.gmra.mxu3 %vm1563_vm13, %v11971_v8 }
 0x801   : > { %10988 = vmatmul.msk.bf16.gmra.mxu2 %vm1563_vm13, %v13930_v44 }
 0x804   : > { %v4320_v21 = vpop.permute.xlu1 %4319 }
 0x805   : > { %v4324_v35 = vpop.permute.xlu0 %4323  ;;  %11000 = vmatmul.msk.bf16.gmra.mxu0 %vm1563_vm13, %v11971_v8  ;;  %v4530_v13 = vpop.permute.xlu2 %4529 }
 0x806   : > { %v4329_v26 = vsel %vm909_vm6, %v4322_v40, %v4324_v35  ;;  %v14083_v40 = vpop.f32.mrf.mxu0 }
 0x807   : > { %4349 = vmatpush.bf16.msra.mxu0 %v4329_v26 }
 0x80c   : > { %v4326_v28 = vpop.permute.xlu1 %4325 }
 0x80d   : > { %11001 = vmatmul.msk.bf16.vlgmr.msra.gmra.mxu1 %vm1563_vm13, %v11970_v30  ;;  %v4330_v58 = vsel %vm909_vm6, %v4324_v35, %v4326_v28  ;;  %v4316_v62 = vpop.permute.xlu0 %4315  ;;  %v4536_v39 = vpop.permute.xlu2 %4535 }
 0x80e   : > { %4368 = vmatpush.bf16.msra.mxu1 %v4330_v58  ;;  %v11980_v58 = vld [vmem:[%s16795_s4 + $0x190] sm:$0xff] }
 0x810   : > { %11013 = vmatmul.msk.bf16.vlgmr.msra.gmra.mxu3 %vm1563_vm13, %v11972_v9 }
 0x811   : > { %4456 = vmatpush.bf16.msra.mxu3 %v4436_v57  ;;  %11011 = vmatmul.msk.bf16.vlgmr.msra.gmra.mxu2 %vm1563_vm13, %v11972_v9 }
 0x812   : > { %4387 = vmatpush.bf16.msra.mxu2 %v4326_v28 }
 0x814   : > { %v4423_v56 = vpop.permute.xlu1 %4422 }
 0x815   : > { %11015 = vmatmul.msk.bf16.vlgmr.msrb.gmra.mxu0 %vm1563_vm13, %v11972_v9  ;;  %v4434_v55 = vsel %vm1012_vm7, %v4423_v56, %v4425_v19  ;;  %v4538_v44 = vpop.permute.xlu0 %4537  ;;  %v4534_v38 = vpop.permute.xlu2 %4533 }
 0x816   : > { %4388 = vmatpush.bf16.msra.mxu2 %v4320_v21  ;;  %4457 = vmatpush.bf16.msra.mxu3 %v4434_v55  ;;  %v4543_v16 = vsel %vm1115_vm8, %v4536_v39, %v4538_v44 }
 0x81c   : > { %v4318_v0 = vpop.permute.xlu1 %4317 }
 0x81d   : > { %11002 = vmatmul.msk.bf16.gmra.mxu1 %vm1563_vm13, %v11971_v8  ;;  %v4327_v12 = vsel %vm909_vm6, %v4316_v62, %v4318_v0  ;;  %v4328_v54 = vsel %vm909_vm6, %v4318_v0, %v4320_v21  ;;  %v4532_v3 = vpop.permute.xlu0 %4531  ;;  %v4647_v24 = vpop.permute.xlu2 %4646  ;;  %v11979_v8 = vld [vmem:[%s16795_s4 + $0x188] sm:$0xff] }
 0x81e   : > { %4350 = vmatpush.bf16.msra.mxu0 %v4327_v12  ;;  %4369 = vmatpush.bf16.msra.mxu1 %v4328_v54  ;;  %v4542_v2 = vsel %vm1115_vm8, %v4532_v3, %v4534_v38  ;;  %v4541_v52 = vsel %vm1115_vm8, %v4530_v13, %v4532_v3  ;;  %v11981_v3 = vld [vmem:[%s16795_s4 + $0x198] sm:$0xff] }
 0x820   : > { %11014 = vmatmul.msk.bf16.gmra.mxu3 %vm1563_vm13, %v11973_v61 }
 0x821   : > { %11012 = vmatmul.msk.bf16.gmra.mxu2 %vm1563_vm13, %v11973_v61 }
 0x824   : > { %v4540_v53 = vpop.permute.xlu1 %4539 }
 0x825   : > { %11016 = vmatmul.msk.bf16.gmra.mxu0 %vm1563_vm13, %v11973_v61  ;;  %v4427_v20 = vpop.permute.xlu0 %4426  ;;  %v4544_v14 = vsel %vm1115_vm8, %v4538_v44, %v4540_v53  ;;  %v4643_v32 = vpop.permute.xlu2 %4642 }
 0x826   : > { %v4435_v23 = vsel %vm1012_vm7, %v4425_v19, %v4427_v20 }
 0x82c   : > { %v4433_v5 = vpop.permute.xlu1 %4432 }
 0x82d   : > { %11025 = vmatmul.msk.bf16.vlgmr.msrb.gmra.mxu1 %vm1563_vm13, %v11974_v27  ;;  %v4437_v6 = vsel %vm1012_vm7, %v4431_v25, %v4433_v5  ;;  %v4639_v4 = vpop.permute.xlu0 %4638 }
 0x82e   : > { %4494 = vmatpush.bf16.msrb.mxu1 %v4433_v5  ;;  %4475 = vmatpush.bf16.msrb.mxu0 %v4437_v6 }
 0x830   : > { %11029 = vmatmul.msk.bf16.vlgmr.msrb.gmra.mxu3 %vm1563_vm13, %v11974_v27 }
 0x831   : > { %4582 = vmatpush.bf16.msrb.mxu3 %v4544_v14  ;;  %11027 = vmatmul.msk.bf16.vlgmr.msrb.gmra.mxu2 %vm1563_vm13, %v11974_v27 }
 0x832   : > { %4495 = vmatpush.bf16.msrb.mxu1 %v4427_v20  ;;  %4563 = vmatpush.bf16.msrb.mxu2 %v4543_v16 }
 0x833   : > { %4476 = vmatpush.bf16.msrb.mxu0 %v4435_v23 }
 0x834   : > { %v4645_v42 = vpop.permute.xlu1 %4644 }
 0x835   : > { %4583 = vmatpush.bf16.msrb.mxu3 %v4542_v2  ;;  %11039 = vmatmul.msk.bf16.vlgmr.msra.gmra.mxu0 %vm1563_vm13, %v11976_v34  ;;  %v4650_v29 = vsel %vm16944_vm1, %v4643_v32, %v4645_v42  ;;  %v4637_v15 = vpop.permute.xlu0 %4636  ;;  %v4651_v7 = vsel %vm16946_vm0, %v4645_v42, %v4647_v24  ;;  %v11983_v32 = vld [vmem:[%s16795_s4 + $0x1a8] sm:$0xff] }
 0x836   : > { %4564 = vmatpush.bf16.msrb.mxu2 %v4541_v52  ;;  %v4648_v30 = vsel %vm16945_vm15, %v4637_v15, %v4639_v4 }
 0x837   : > { %4601 = vmatpush.bf16.msra.mxu0 %v4540_v53 }
 0x83b   : > { %4602 = vmatpush.bf16.msra.mxu0 %v4534_v38 }
 0x83c   : > { %v4641_v46 = vpop.permute.xlu1 %4640 }
 0x83d   : > { %11026 = vmatmul.msk.bf16.gmra.mxu1 %vm1563_vm13, %v11975_v22  ;;  %v4649_v60 = vsel %vm16947_vm14, %v4639_v4, %v4641_v46 }
 0x840   : > { %11030 = vmatmul.msk.bf16.gmra.mxu3 %vm1563_vm13, %v11975_v22 }
 0x841   : > { %11028 = vmatmul.msk.bf16.gmra.mxu2 %vm1563_vm13, %v11975_v22 }
 0x845   : > { %11040 = vmatmul.msk.bf16.gmra.mxu0 %vm1563_vm13, %v11977_v17 }
 0x84a   : > { %v3857_v49 = vpop.f32.mrf.mxu1 }
 0x84b   : > { %v3937_v18 = vadd.f32 %v3936_v59, %v3857_v49 }
 0x84d   : > { %11041 = vmatmul.msk.bf16.vlgmr.msra.gmra.mxu1 %vm1563_vm13, %v11976_v34 }
 0x84e   : > { %4670 = vmatpush.bf16.msra.mxu1 %v4650_v29 }
 0x850   : > { %11053 = vmatmul.msk.bf16.vlgmr.msra.gmra.mxu3 %vm1563_vm13, %v11978_v31 }
 0x851   : > { %4708 = vmatpush.bf16.msra.mxu3 %v4647_v24  ;;  %11043 = vmatmul.msk.bf16.vlgmr.msra.gmra.mxu2 %vm1563_vm13, %v11976_v34  ;;  %v11982_v34 = vld [vmem:[%s16795_s4 + $0x1a0] sm:$0xff] }
 0x852   : > { %4671 = vmatpush.bf16.msra.mxu1 %v4648_v30  ;;  %4689 = vmatpush.bf16.msra.mxu2 %v4651_v7  ;;  %v14066_v36 = vpop.f32.mrf.mxu1 }
 0x853   : > { %v3895_v43 = vpop.f32.mrf.mxu3 }
 0x854   : > { %v3876_v11 = vpop.f32.mrf.mxu2 }
 0x855   : > { %4709 = vmatpush.bf16.msra.mxu3 %v4641_v46  ;;  %11055 = vmatmul.msk.bf16.vlgmr.msrb.gmra.mxu0 %vm1563_vm13, %v11978_v31 }
 0x856   : > { %4690 = vmatpush.bf16.msra.mxu2 %v4649_v60 }
 0x85a   : > { %v3862_v37 = vpop.f32.mrf.mxu1 }
 0x85b   : > { %v14070_v33 = vpop.f32.mrf.mxu3  ;;  %v3942_v1 = vadd.f32 %v3941_v41, %v3862_v37 }
 0x85c   : > { %v14072_v51 = vpop.f32.mrf.mxu2 }
 0x85d   : > { %11042 = vmatmul.msk.bf16.gmra.mxu1 %vm1563_vm13, %v11977_v17 }
 0x860   : > { %11054 = vmatmul.msk.bf16.gmra.mxu3 %vm1563_vm13, %v11979_v8 }
 0x861   : > { %11044 = vmatmul.msk.bf16.gmra.mxu2 %vm1563_vm13, %v11977_v17 }
 0x862   : > { %v14080_v25 = vpop.f32.mrf.mxu1 }
 0x863   : > { %v3900_v47 = vpop.f32.mrf.mxu3 }
 0x864   : > { %v3881_v21 = vpop.f32.mrf.mxu2 }
 0x865   : > { %11056 = vmatmul.msk.bf16.gmra.mxu0 %vm1563_vm13, %v11979_v8 }
 0x86a   : > { %v3955_v35 = vpop.f32.mrf.mxu1 }
 0x86b   : > { %v3956_v26 = vadd.f32 %v3955_v35, %v3876_v11  ;;  %v14085_v28 = vpop.f32.mrf.mxu3 }
 0x86c   : > { %v14087_v9 = vpop.f32.mrf.mxu2 }
 0x86d   : > { %11057 = vmatmul.msk.bf16.vlgmr.msrb.gmra.mxu1 %vm1563_vm13, %v11978_v31 }
 0x870   : > { %11069 = vmatmul.msk.bf16.vlgmr.msrb.gmra.mxu3 %vm1563_vm13, %v11980_v58 }
 0x871   : > { %11067 = vmatmul.msk.bf16.vlgmr.msrb.gmra.mxu2 %vm1563_vm13, %v11980_v58 }
 0x872   : > { %v14095_v57 = vpop.f32.mrf.mxu1  ;;  %v4050_v62 = vpop.f32.mrf.mxu0 }
 0x873   : > { %v4080_v19 = vadd.f32 %v4050_v62, %v3956_v26  ;;  %v4031_v56 = vpop.f32.mrf.mxu3 }
 0x874   : > { %v4079_v55 = vadd.f32 %v4031_v56, %v3937_v18  ;;  %v3974_v44 = vpop.f32.mrf.mxu2 }
 0x875   : > { %v3975_v0 = vadd.f32 %v3974_v44, %v3895_v43  ;;  %11071 = vmatmul.msk.bf16.vlgmr.msra.gmra.mxu0 %vm1563_vm13, %v11980_v58 }
 0x87a   : > { %v3960_v61 = vpop.f32.mrf.mxu1  ;;  %v14098_v12 = vpop.f32.mrf.mxu0 }
 0x87b   : > { %v3961_v54 = vadd.f32 %v3960_v61, %v3881_v21  ;;  %v14100_v13 = vpop.f32.mrf.mxu3 }
 0x87c   : > { %v14102_v53 = vpop.f32.mrf.mxu2 }
 0x87d   : > { %11058 = vmatmul.msk.bf16.gmra.mxu1 %vm1563_vm13, %v11979_v8 }
 0x880   : > { %11070 = vmatmul.msk.bf16.gmra.mxu3 %vm1563_vm13, %v11981_v3 }
 0x881   : > { %11068 = vmatmul.msk.bf16.gmra.mxu2 %vm1563_vm13, %v11981_v3 }
 0x882   : > { %v14110_v39 = vpop.f32.mrf.mxu1  ;;  %v4055_v27 = vpop.f32.mrf.mxu0 }
 0x883   : > { %v4086_v5 = vadd.f32 %v4055_v27, %v3961_v54  ;;  %v4036_v6 = vpop.f32.mrf.mxu3 }
 0x884   : > { %v4085_v20 = vadd.f32 %v4036_v6, %v3942_v1  ;;  %v3979_v14 = vpop.f32.mrf.mxu2 }
 0x885   : > { %v3980_v16 = vadd.f32 %v3979_v14, %v3900_v47  ;;  %11072 = vmatmul.msk.bf16.gmra.mxu0 %vm1563_vm13, %v11981_v3 }
 0x88a   : > { %v14116_v23 = vpop.f32.mrf.mxu0  ;;  %v4069_v38 = vpop.f32.mrf.mxu1 }
 0x88b   : > { %v4081_v2 = vadd.f32 %v4069_v38, %v3975_v0  ;;  %v14118_v52 = vpop.f32.mrf.mxu3 }
 0x88c   : > { %v14120_v22 = vpop.f32.mrf.mxu2 }
 0x88d   : > { %11081 = vmatmul.msk.bf16.vlgmr.msra.gmra.mxu1 %vm1563_vm13, %v11982_v34 }
 0x890   : > { %11085 = vmatmul.msk.bf16.vlgmr.msra.gmra.mxu3 %vm1563_vm13, %v11982_v34 }
 0x891   : > { %11083 = vmatmul.msk.bf16.vlgmr.msra.gmra.mxu2 %vm1563_vm13, %v11982_v34 }
 0x892   : > { %v14125_v17 = vpop.f32.mrf.mxu1  ;;  %v4176_v24 = vpop.f32.mrf.mxu0 }
 0x893   : > { %v4188_v4 = vadd.f32 %v4176_v24, %v4081_v2  ;;  %v4157_v59 = vpop.f32.mrf.mxu3 }
 0x894   : > { %v4187_v42 = vadd.f32 %v4157_v59, %v4080_v19  ;;  %v4138_v49 = vpop.f32.mrf.mxu2 }
 0x895   : > { %v4186_v18 = vadd.f32 %v4138_v49, %v4079_v55 }
 0x89a   : > { %v4074_v31 = vpop.f32.mrf.mxu1  ;;  %v14130_v29 = vpop.f32.mrf.mxu0 }
 0x89b   : > { %v4087_v15 = vadd.f32 %v4074_v31, %v3980_v16  ;;  %v14132_v30 = vpop.f32.mrf.mxu3 }
 0x89c   : > { %v14134_v7 = vpop.f32.mrf.mxu2 }
 0x89d   : > { %11082 = vmatmul.msk.bf16.gmra.mxu1 %vm1563_vm13, %v11983_v32 }
 0x8a0   : > { %11086 = vmatmul.msk.bf16.gmra.mxu3 %vm1563_vm13, %v11983_v32 }
 0x8a1   : > { %11084 = vmatmul.msk.bf16.gmra.mxu2 %vm1563_vm13, %v11983_v32 }
 0x8a2   : > { %v14139_v46 = vpop.f32.mrf.mxu1  ;;  %v4181_v43 = vpop.f32.mrf.mxu0 }
 0x8a3   : > { %v4194_v11 = vadd.f32 %v4181_v43, %v4087_v15  ;;  %v4162_v60 = vpop.f32.mrf.mxu3 }
 0x8a4   : > { %v4193_v37 = vadd.f32 %v4162_v60, %v4086_v5  ;;  %v4143_v41 = vpop.f32.mrf.mxu2 }
 0x8a5   : > { %v4192_v1 = vadd.f32 %v4143_v41, %v4085_v20 }
 0x8aa   : > { %v4245_v8 = vpop.f32.mrf.mxu1  ;;  %v14145_v26 = vpop.f32.mrf.mxu0 }
 0x8ab   : > { %v4293_v47 = vadd.f32 %v4245_v8, %v4186_v18  ;;  %v14141_v21 = vpop.f32.mrf.mxu3  ;;  %16948 = vst [vmem:[#allocation25_spill] sm:$0xff] %v14145_v26  ;;  %v14207_v26 = vpop.permute.xlu1 %4745 }
 0x8ac   : > { %v14143_v35 = vpop.f32.mrf.mxu2 }
 0x8b2   : > { %v4247_v58 = vpop.f32.mrf.mxu1  ;;  %v4352_v44 = vpop.f32.mrf.mxu0 }
 0x8b3   : > { %v4283_v62 = vpop.f32.mrf.mxu3 }
 0x8b4   : > { %v4295_v19 = vadd.f32 %v4283_v62, %v4188_v4  ;;  %v4264_v56 = vpop.f32.mrf.mxu2 }
 0x8b5   : > { %v4294_v55 = vadd.f32 %v4264_v56, %v4187_v42 }
 0x8ba   : > { %v4250_v0 = vpop.f32.mrf.mxu1  ;;  %v4354_v5 = vpop.f32.mrf.mxu0 }
 0x8bb   : > { %v14147_v61 = vadd.f32 %v4250_v0, %v4192_v1  ;;  %v14149_v54 = vpop.f32.mrf.mxu3 }
 0x8bc   : > { %16949 = vst [vmem:[#allocation26_spill] sm:$0xff] %v14149_v54  ;;  %v14151_v3 = vpop.f32.mrf.mxu2 }
 0x8c2   : > { %v14153_v27 = vpop.f32.mrf.mxu1  ;;  %v14163_v24 = vpop.f32.mrf.mxu0 }
 0x8c3   : > { %v4288_v6 = vpop.f32.mrf.mxu3 }
 0x8c4   : > { %v14155_v20 = vadd.f32 %v4288_v6, %v4194_v11  ;;  %v4269_v14 = vpop.f32.mrf.mxu2 }
 0x8c5   : > { %v14157_v16 = vadd.f32 %v4269_v14, %v4193_v37 }
 0x8ca   : > { %v4371_v34 = vpop.f32.mrf.mxu1  ;;  %v14169_v18 = vpop.f32.mrf.mxu0 }
 0x8cb   : > { %v14159_v38 = vpop.f32.mrf.mxu3 }
 0x8cc   : > { %16950 = vst [vmem:[#allocation18_spill] sm:$0xff] %v14159_v38  ;;  %v14161_v2 = vpop.f32.mrf.mxu2 }
 0x8cd   : > { %16951 = vst [vmem:[#allocation9_spill] sm:$0xff] %v14161_v2 }
 0x8d2   : > { %v14165_v4 = vpop.f32.mrf.mxu1  ;;  %v4478_v43 = vpop.f32.mrf.mxu0 }
 0x8d3   : > { %v4459_v59 = vpop.f32.mrf.mxu3 }
 0x8d4   : > { %v4390_v42 = vpop.f32.mrf.mxu2 }
 0x8d5   : > { %v14167_v49 = vadd.f32 %v4390_v42, %v4295_v19 }
 0x8d7   : > { %16952 = vst [vmem:[#allocation20_spill] sm:$0xff] %v14167_v49 }
 0x8da   : > { %v14171_v32 = vpop.f32.mrf.mxu1  ;;  %v4480_v1 = vpop.f32.mrf.mxu0 }
 0x8db   : > { %v4461_v31 = vpop.f32.mrf.mxu3 }
 0x8dc   : > { %v14173_v15 = vpop.f32.mrf.mxu2 }
 0x8dd   : > { %16953 = vst [vmem:[#allocation24_spill] sm:$0xff] %v14173_v15  ;;  %v4400_v15 = vadd.f32 %v4352_v44, %v4293_v47  ;;  %v14211_v47 = vpop.permute.xlu0 %4735 }
 0x8df   : > { %v4507_v38 = vadd.f32 %v4459_v59, %v4400_v15 }
 0x8e2   : > { %v14175_v11 = vpop.f32.mrf.mxu1  ;;  %v14187_v6 = vpop.f32.mrf.mxu0 }
 0x8e3   : > { %16954 = vst [vmem:[#allocation10_spill] sm:$0xff] %v14175_v11  ;;  %v4464_v60 = vpop.f32.mrf.mxu3 }
 0x8e4   : > { %v14177_v37 = vpop.f32.mrf.mxu2  ;;  %16959 = vst [vmem:[#allocation14_spill] sm:$0xff] %v14187_v6 }
 0x8ea   : > { %v14179_v41 = vpop.f32.mrf.mxu1  ;;  %v14191_v45 = vpop.f32.mrf.mxu0 }
 0x8eb   : > { %16955 = vst [vmem:[#allocation11_spill] sm:$0xff] %v14179_v41  ;;  %v14181_v8 = vpop.f32.mrf.mxu3 }
 0x8ec   : > { %16956 = vst [vmem:[#allocation17_spill] sm:$0xff] %v14181_v8  ;;  %v14183_v62 = vpop.f32.mrf.mxu2 }
 0x8ed   : > { %16957 = vst [vmem:[#allocation16_spill] sm:$0xff] %v14183_v62  ;;  %v3939_v62 = vadd.f32 %v14061_v10, %v14066_v36  ;;  %v3958_v10 = vadd.f32 %v14095_v57, %v14072_v51  ;;  %v3944_v51 = vadd.f32 %v14083_v40, %v14080_v25  ;;  %v3963_v25 = vadd.f32 %v14110_v39, %v14087_v9 }
 0x8ee   : > { %16961 = vst [vmem:[#allocation27_spill] sm:$0xff] %v14191_v45  ;;  %v3982_v9 = vadd.f32 %v14120_v22, %v14085_v28 }
 0x8ef   : > { %v4083_v44 = vadd.f32 %v14098_v12, %v3958_v10  ;;  %v3977_v12 = vadd.f32 %v14102_v53, %v14070_v33 }
 0x8f1   : > { %v4190_v15 = vadd.f32 %v14132_v30, %v4083_v44  ;;  %v4088_v30 = vadd.f32 %v14118_v52, %v3944_v51  ;;  %v4084_v33 = vadd.f32 %v14125_v17, %v3977_v12 }
 0x8f2   : > { %v14185_v19 = vpop.f32.mrf.mxu1  ;;  %v14200_v8 = vpop.f32.mrf.mxu0 }
 0x8f3   : > { %16958 = vst [vmem:[#allocation8_spill] sm:$0xff] %v14185_v19  ;;  %v4585_v56 = vpop.f32.mrf.mxu3  ;;  %v4082_v19 = vadd.f32 %v14100_v13, %v3939_v62  ;;  %v4401_v13 = vadd.f32 %v4371_v34, %v4294_v55  ;;  %v4297_v57 = vadd.f32 %v14151_v3, %v4190_v15  ;;  %v14232_v3 = vpop.permute.xlu1 %4740  ;;  %v4195_v53 = vadd.f32 %v14143_v35, %v4088_v30  ;;  %v16968_v51 = vld [vmem:[#allocation17_spill] sm:$0xff] }
 0x8f4   : > { %v4566_v0 = vpop.f32.mrf.mxu2  ;;  %v4191_v39 = vadd.f32 %v14130_v29, %v4084_v33 }
 0x8f5   : > { %v4614_v2 = vadd.f32 %v4566_v0, %v4507_v38  ;;  %v4508_v59 = vadd.f32 %v4478_v43, %v4401_v13 }
 0x8fa   : > { %v14189_v14 = vpop.f32.mrf.mxu1 }
 0x8fb   : > { %16960 = vst [vmem:[#allocation13_spill] sm:$0xff] %v14189_v14  ;;  %v4587_v42 = vpop.f32.mrf.mxu3  ;;  %v4189_v14 = vadd.f32 %v14134_v7, %v4082_v19 }
 0x8fc   : > { %v4568_v50 = vpop.f32.mrf.mxu2 }
 0x902   : > { %v14193_v49 = vpop.f32.mrf.mxu1 }
 0x903   : > { %16962 = vst [vmem:[#allocation19_spill] sm:$0xff] %v14193_v49  ;;  %v14195_v41 = vpop.f32.mrf.mxu3  ;;  %v4296_v49 = vadd.f32 %v4247_v58, %v4189_v14  ;;  %v4615_v58 = vadd.f32 %v4585_v56, %v4508_v59 }
 0x904   : > { %16963 = vst [vmem:[#allocation7_spill] sm:$0xff] %v14195_v41  ;;  %v4571_v11 = vpop.f32.mrf.mxu2 }
 0x905   : > { %v4403_v36 = vadd.f32 %v4354_v5, %v4296_v49 }
 0x907   : > { %v4510_v7 = vadd.f32 %v4461_v31, %v4403_v36  ;;  %v4406_v31 = vadd.f32 %v14163_v24, %v14147_v61  ;;  %v4089_v24 = vadd.f32 %v14116_v23, %v3963_v25 }
 0x909   : > { %v4617_v19 = vadd.f32 %v4568_v50, %v4510_v7  ;;  %v4404_v50 = vadd.f32 %v14165_v4, %v4297_v57  ;;  %v4196_v10 = vadd.f32 %v14141_v21, %v4089_v24  ;;  %v16964_v21 = vld [vmem:[#allocation25_spill] sm:$0xff]  ;;  %v16965_v7 = vld [vmem:[#allocation26_spill] sm:$0xff] }
 0x90a   : > { %v4673_v6 = vpop.f32.mrf.mxu1 }
 0x90b   : > { %v14203_v54 = vpop.f32.mrf.mxu3  ;;  %v4721_v41 = vadd.f32 %v4673_v6, %v4614_v2  ;;  %v14216_v2 = vpop.f32.mrf.mxu0  ;;  %v4511_v43 = vadd.f32 %v4480_v1, %v4404_v50  ;;  %v4302_v6 = vadd.f32 %v14153_v27, %v4195_v53  ;;  %v16972_v50 = vld [vmem:[#allocation10_spill] sm:$0xff] }
 0x90c   : > { %v14205_v45 = vpop.f32.mrf.mxu2 }
 0x90d   : > { %v4753_v38 = vadd.f32 %v14211_v47, %v4721_v41  ;;  %v4513_v41 = vadd.f32 %v4464_v60, %v4406_v31  ;;  %v4618_v17 = vadd.f32 %v4587_v42, %v4511_v43  ;;  %v4090_v60 = vadd.f32 %v14139_v46, %v3982_v9 }
 0x90e   : > { %v4409_v28 = vadd.f32 %v14169_v18, %v4302_v6  ;;  %v4408_v42 = vadd.f32 %v14177_v37, %v14155_v20  ;;  %v16970_v37 = vld [vmem:[#allocation18_spill] sm:$0xff]  ;;  %v16976_v6 = vld [vmem:[#allocation16_spill] sm:$0xff] }
 0x90f   : > { %v4777_v5 = vmul.f32 0.01, %v4753_v38  ;;  %vm4765_vm9 = vcmp.ge.f32.partialorder %v4753_v38, 0.0  ;;  %v4620_v14 = vadd.f32 %v4571_v11, %v4513_v41  ;;  %v4407_v11 = vadd.f32 %v14171_v32, %v14157_v16 }
 0x910   : > { %v4197_v59 = vadd.f32 %v16964_v21, %v4090_v60  ;;  %v4516_v57 = vadd.f32 %v16968_v51, %v4409_v28  ;;  %v16980_v51 = vld [vmem:[#allocation12_spill] sm:$0xff] }
 0x911   : > { %v4789_v52 = vsel %vm4765_vm9, %v4753_v38, %v4777_v5  ;;  %v4298_v38 = vadd.f32 %v16965_v7, %v4191_v39 }
 0x912   : > { %v4675_v62 = vpop.f32.mrf.mxu1  ;;  %v4801_v36 = vmul.f32 %v4789_v52, %v12647_v63  ;;  %v4304_v5 = vadd.f32 %v16970_v37, %v4197_v59  ;;  %v4623_v53 = vadd.f32 %v14205_v45, %v4516_v57  ;;  %v16974_v52 = vld [vmem:[#allocation20_spill] sm:$0xff] }
 0x913   : > { %v14218_v0 = vpop.f32.mrf.mxu3  ;;  %v4724_v34 = vadd.f32 %v4675_v62, %v4617_v19  ;;  %v4609_v22 = vpop.f32.mrf.mxu0  ;;  %v16966_v62 = vld [vmem:[#allocation9_spill] sm:$0xff] }
 0x914   : > { %v4692_v55 = vpop.f32.mrf.mxu2  ;;  %v4303_v18 = vadd.f32 %v16966_v62, %v4196_v10  ;;  %v16977_v10 = vld [vmem:[#allocation8_spill] sm:$0xff] }
 0x915   : > { %v4722_v49 = vadd.f32 %v4692_v55, %v4615_v58  ;;  %v4756_v56 = vadd.f32 %v14232_v3, %v4724_v34  ;;  %v16967_v58 = vld [vmem:[#allocation14_spill] sm:$0xff]  ;;  %v16969_v55 = vld [vmem:[#allocation13_spill] sm:$0xff]  ;;  %v16971_v34 = vld [vmem:[#allocation24_spill] sm:$0xff] }
 0x916   : > { %v4514_v19 = vadd.f32 %v16967_v58, %v4407_v11  ;;  %v4515_v12 = vadd.f32 %v16969_v55, %v4408_v42  ;;  %v4410_v25 = vadd.f32 %v16972_v50, %v4303_v18  ;;  %v16979_v42 = vld [vmem:[#allocation19_spill] sm:$0xff] }
 0x917   : > { %v4754_v40 = vadd.f32 %v14211_v47, %v4722_v49  ;;  %v4780_v29 = vmul.f32 0.01, %v4756_v56  ;;  %vm4768_vm15 = vcmp.ge.f32.partialorder %v4756_v56, 0.0  ;;  %v4405_v49 = vadd.f32 %v16971_v34, %v4298_v38 }
 0x918   : > { %v4622_v30 = vadd.f32 %v4609_v22, %v4515_v12 }
 0x919   : > { %vm4766_vm1 = vcmp.ge.f32.partialorder %v4754_v40, 0.0  ;;  %v4778_v61 = vmul.f32 0.01, %v4754_v40  ;;  %v4792_v16 = vsel %vm4768_vm15, %v4756_v56, %v4780_v29  ;;  %v16975_v56 = vld [vmem:[#allocation11_spill] sm:$0xff]  ;;  %v4512_v45 = vadd.f32 %v16977_v10, %v4405_v49 }
 0x91a   : > { %v4678_v4 = vpop.f32.mrf.mxu1  ;;  %v14270_v24 = vmul.f32 %v4792_v16, %v12647_v63 }
 0x91b   : > { %v4790_v35 = vsel %vm4766_vm1, %v4754_v40, %v4778_v61  ;;  %v14242_v1 = vpop.f32.mrf.mxu3  ;;  %v4727_v44 = vadd.f32 %v4678_v4, %v4620_v14  ;;  %v16973_v40 = vld [vmem:[#allocation7_spill] sm:$0xff]  ;;  %v4509_v61 = vadd.f32 %v16975_v56, %v16974_v52  ;;  %v4611_v29 = vpop.f32.mrf.mxu0  ;;  %v4619_v11 = vadd.f32 %v14216_v2, %v4512_v45 }
 0x91c   : > { %v4802_v23 = vmul.f32 %v4790_v35, %v12650_v48  ;;  %v4694_v13 = vpop.f32.mrf.mxu2  ;;  %v4621_v33 = vadd.f32 %v16973_v40, %v4514_v19 }
 0x91d   : > { %v4725_v27 = vadd.f32 %v4694_v13, %v4618_v17  ;;  %v4759_v20 = vadd.f32 %v14207_v26, %v4727_v44  ;;  %v4411_v17 = vadd.f32 %v16976_v6, %v4304_v5  ;;  %v16978_v13 = vld [vmem:[#allocation27_spill] sm:$0xff]  ;;  %v4616_v22 = vadd.f32 %v14200_v8, %v4509_v61 }
 0x91e   : > { %v4813_v46 = vpack.c.bf16 %v4802_v23, %v4801_v36  ;;  %v4517_v28 = vadd.f32 %v16978_v13, %v4410_v25  ;;  %v4726_v58 = vadd.f32 %v14242_v1, %v4619_v11 }
 0x91f   : > { %v4757_v15 = vadd.f32 %v14232_v3, %v4725_v27  ;;  %v4783_v14 = vmul.f32 0.01, %v4759_v20  ;;  %vm4771_vm14 = vcmp.ge.f32.partialorder %v4759_v20, 0.0  ;;  %v4751_v27 = vpop.permute.xlu2 %4750  ;;  %v4723_v8 = vadd.f32 %v14218_v0, %v4616_v22 }
 0x920   : > { %4829 = vrot.lane.b32.xlu0 %v4813_v46, %s12221_s21  ;;  %v4518_v46 = vadd.f32 %v16979_v42, %v4411_v17  ;;  %v4624_v62 = vadd.f32 %v14203_v54, %v4517_v28  ;;  %v4758_v1 = vadd.f32 %v14232_v3, %v4726_v58 }
 0x921   : > { %vm4769_vm0 = vcmp.ge.f32.partialorder %v4757_v15, 0.0  ;;  %v4781_v32 = vmul.f32 0.01, %v4757_v15  ;;  %v4795_v59 = vsel %vm4771_vm14, %v4759_v20, %v4783_v14  ;;  %v4755_v0 = vadd.f32 %v14211_v47, %v4723_v8 }
 0x922   : > { %v4680_v31 = vpop.f32.mrf.mxu1  ;;  %v4807_v57 = vmul.f32 %v4795_v59, %v12647_v63  ;;  %v4782_v40 = vmul.f32 0.01, %v4758_v1 }
 0x923   : > { %v4793_v43 = vsel %vm4769_vm0, %v4757_v15, %v4781_v32  ;;  %v4716_v41 = vpop.f32.mrf.mxu3  ;;  %v4730_v35 = vadd.f32 %v4680_v31, %v4623_v53  ;;  %v4625_v15 = vadd.f32 %v4611_v29, %v4518_v46  ;;  %v4779_v25 = vmul.f32 0.01, %v4755_v0 }
 0x924   : > { %v14273_v9 = vmul.f32 %v4793_v43, %v12650_v48  ;;  %v4729_v39 = vadd.f32 %v4716_v41, %v4622_v30  ;;  %v4697_v4 = vpop.f32.mrf.mxu2 }
 0x925   : > { %v4728_v60 = vadd.f32 %v4697_v4, %v4621_v33  ;;  %v4762_v7 = vadd.f32 %v4751_v27, %v4730_v35 }
 0x926   : > { %v4761_v36 = vadd.f32 %v14207_v26, %v4729_v39  ;;  %v4815_v23 = vpack.c.bf16 %v14273_v9, %v14270_v24 }
 0x927   : > { %v4760_v44 = vadd.f32 %v14207_v26, %v4728_v60  ;;  %v4786_v20 = vmul.f32 0.01, %v4762_v7  ;;  %vm4774_vm15 = vcmp.ge.f32.partialorder %v4762_v7, 0.0 }
 0x928   : > { %vm4773_vm9 = vcmp.ge.f32.partialorder %v4761_v36, 0.0  ;;  %v4785_v21 = vmul.f32 0.01, %v4761_v36 }
 0x929   : > { %vm4772_vm1 = vcmp.ge.f32.partialorder %v4760_v44, 0.0  ;;  %v4784_v38 = vmul.f32 0.01, %v4760_v44  ;;  %v4798_v30 = vsel %vm4774_vm15, %v4762_v7, %v4786_v20  ;;  %vm16982_vm15 = vcmask 736256  }
 0x92a   : > { %v4797_v18 = vsel %vm4773_vm9, %v4761_v36, %v4785_v21  ;;  %vm4767_vm9 = vcmp.ge.f32.partialorder %v4755_v0, 0.0  ;;  %v4810_v47 = vmul.f32 %v4798_v30, %v12647_v63 }
 0x92b   : > { %v4796_v26 = vsel %vm4772_vm1, %v4760_v44, %v4784_v38  ;;  %v4718_v19 = vpop.f32.mrf.mxu3  ;;  %v4809_v2 = vmul.f32 %v4797_v18, %v16980_v51  ;;  %vm4770_vm1 = vcmp.ge.f32.partialorder %v4758_v1, 0.0  ;;  %v4791_v52 = vsel %vm4767_vm9, %v4755_v0, %v4779_v25 }
 0x92c   : > { %v4808_v55 = vmul.f32 %v4796_v26, %v12650_v48  ;;  %v4732_v12 = vadd.f32 %v4718_v19, %v4625_v15  ;;  %v4699_v16 = vpop.f32.mrf.mxu2  ;;  %v4794_v56 = vsel %vm4770_vm1, %v4758_v1, %v4782_v40  ;;  %v4803_v61 = vmul.f32 %v4791_v52, %v16980_v51  ;;  %v14421_v1 = vld [vmem:[%s16795_s4 + $0x1b8] sm:$0xff] }
 0x92d   : > { %v4731_v32 = vadd.f32 %v4699_v16, %v4624_v62  ;;  %v4818_v37 = vpack.c.bf16 %v4809_v2, %v4809_v2  ;;  %v4806_v24 = vmul.f32 %v4794_v56, %v16980_v51  ;;  %v11123_v56 = vld [vmem:[%s16796_s5 + $0x60] sm:$0xff] }
 0x92e   : > { %v4764_v54 = vadd.f32 %v4751_v27, %v4732_v12  ;;  %v4817_v5 = vpack.c.bf16 %v4808_v55, %v4807_v57  ;;  %v4814_v9 = vpack.c.bf16 %v4803_v61, %v4803_v61  ;;  %v11125_v61 = vld [vmem:[%s16796_s5 + $0x70] sm:$0xff] }
 0x92f   : > { %v4763_v34 = vadd.f32 %v4751_v27, %v4731_v32  ;;  %4839 = vrot.lane.b32.xlu1 %v4818_v37, %s12221_s21  ;;  %v4816_v39 = vpack.c.bf16 %v4806_v24, %v4806_v24  ;;  %v11126_v24 = vld [vmem:[%s16796_s5 + $0x78] sm:$0xff] }
 0x930   : > { %vm4776_vm0 = vcmp.ge.f32.partialorder %v4764_v54, 0.0  ;;  %v4788_v49 = vmul.f32 0.01, %v4764_v54  ;;  %4837 = vrot.lane.b32.xlu2 %v4817_v5, %s12221_s21  ;;  %v14402_v5 = vld [vmem:[%s16795_s4 + $0x1b0] sm:$0xff] }
 0x931   : > { %vm4775_vm14 = vcmp.ge.f32.partialorder %v4763_v34, 0.0  ;;  %v4787_v31 = vmul.f32 0.01, %v4763_v34 }
 0x932   : > { %v4800_v50 = vsel %vm4776_vm0, %v4764_v54, %v4788_v49  ;;  %vm16983_vm0 = vmmov %vm16982_vm15 }
 0x933   : > { %v4799_v33 = vsel %vm4775_vm14, %v4763_v34, %v4787_v31  ;;  %v4812_v53 = vmul.f32 %v4800_v50, %v16980_v51  ;;  %vm16984_vm14 = vmmov %vm16983_vm0 }
 0x934   : > { %v4811_v3 = vmul.f32 %v4799_v33, %v12650_v48  ;;  %vm16985_vm9 = vmmov %vm16983_vm0 }
 0x935   : > { %v4820_v43 = vpack.c.bf16 %v4812_v53, %v4812_v53 }
 0x936   : > { %v4819_v41 = vpack.c.bf16 %v4811_v3, %v4810_v47 }
 0x937   : > { %4833 = vrot.lane.b32.xlu1 %v4815_v23, %s12221_s21 }
 0x938   : > { %4841 = vrot.lane.b32.xlu0 %v4819_v41, %s12221_s21  ;;  %4843 = vrot.lane.b32.xlu2 %v4820_v43, %s12221_s21  ;;  %v11992_v43 = vld [vmem:[%s16795_s4 + $0x1c0] sm:$0xff] }
 0x940   : > { %4831 = vrot.lane.b32.xlu2 %v4814_v9, %s12221_s21  ;;  %4835 = vrot.lane.b32.xlu0 %v4816_v39, %s12221_s21 }
 0x98a   : > { %v4838_v4 = vpop.permute.xlu2 %4837 }
 0x98b   : > { %v4847_v6 = vrot.slane %v4838_v4, 4 }
 0x98d   : > { %v4853_v17 = vsel %vm1428_vm10, %v4847_v6, %v4838_v4 }
 0x98e   : > { %4869 = vst.msk [vmem:[#allocation5 + $0x18] sm:$0xff] %vm12803_vm11, %v4853_v17  ;;  %v11124_v17 = vld [vmem:[%s16796_s5 + $0x68] sm:$0xff] }
 0x992   : > { %v4830_v35 = vpop.permute.xlu0 %4829  ;;  %v4844_v60 = vpop.permute.xlu2 %4843 }
 0x993   : > { %v4845_v10 = vrot.slane %v4830_v35, 4 }
 0x995   : > { %v4849_v45 = vsel %vm1428_vm10, %v4845_v10, %v4830_v35  ;;  %v12011_v7 = vld [vmem:[#allocation5 + $0x1c] sm:$0xf]  ;;  %v11149_v38 = vld [vmem:[#allocation5 + $0x18] sm:$0xf] }
 0x996   : > { %4865 = vst.msk [vmem:[#allocation5] sm:$0xff] %vm12803_vm11, %v4849_v45 }
 0x99a   : > { %v4832_v36 = vpop.permute.xlu2 %4831 }
 0x99b   : > { %v4850_v23 = vsel %vm1428_vm10, %v4845_v10, %v4832_v36  ;;  %v11993_v10 = vld [vmem:[%s16795_s4 + $0x1c8] sm:$0xff] }
 0x99c   : > { %4866 = vst.msk [vmem:[#allocation5 + $0x8] sm:$0xf] %vm1449_vm12, %v4850_v23 }
 0x99d   : > { %v11137_v57 = vld [vmem:[#allocation5] sm:$0xf]  ;;  %v12008_v20 = vld [vmem:[#allocation5 + $0x4] sm:$0xf] }
 0x9a1   : > { %v4840_v13 = vpop.permute.xlu1 %4839 }
 0x9a2   : > { %v4854_v28 = vsel %vm1428_vm10, %v4847_v6, %v4840_v13  ;;  %v11994_v13 = vld [vmem:[%s16795_s4 + $0x1d0] sm:$0xff] }
 0x9a3   : > { %4870 = vst.msk [vmem:[#allocation5 + $0x20] sm:$0xf] %vm1449_vm12, %v4854_v28  ;;  %v11145_v32 = vld [vmem:[#allocation5 + $0x8] sm:$0xf] }
 0x9a9   : > { %v4834_v22 = vpop.permute.xlu1 %4833 }
 0x9aa   : > { %v4846_v29 = vrot.slane %v4834_v22, 4  ;;  %v4842_v44 = vpop.permute.xlu0 %4841  ;;  %v11157_v18 = vld [vmem:[#allocation5 + $0x20] sm:$0xf] }
 0x9ab   : > { %v4848_v27 = vrot.slane %v4842_v44, 4 }
 0x9ac   : > { %v4851_v11 = vsel %vm1428_vm10, %v4846_v29, %v4834_v22 }
 0x9ad   : > { %4867 = vst.msk [vmem:[#allocation5 + $0xc] sm:$0xff] %vm12803_vm11, %v4851_v11  ;;  %v4855_v42 = vsel %vm1428_vm10, %v4848_v27, %v4842_v44  ;;  %v4856_v46 = vsel %vm1428_vm10, %v4848_v27, %v4844_v60 }
 0x9ae   : > { %4871 = vst.msk [vmem:[#allocation5 + $0x24] sm:$0xff] %vm12803_vm11, %v4855_v42 }
 0x9af   : > { %4872 = vst.msk [vmem:[#allocation5 + $0x2c] sm:$0xf] %vm1449_vm12, %v4856_v46 }
 0x9b2   : > { %v4836_v21 = vpop.permute.xlu0 %4835 }
 0x9b3   : > { %v4852_v59 = vsel %vm1428_vm10, %v4846_v29, %v4836_v21 }
 0x9b4   : > { %4868 = vst.msk [vmem:[#allocation5 + $0x14] sm:$0xf] %vm1449_vm12, %v4852_v59  ;;  %v12009_v19 = vld [vmem:[#allocation5 + $0x8] sm:$0xf0]  ;;  %v11139_v12 = vld [vmem:[#allocation5 + $0xc] sm:$0xf0] }
 0x9b5   : > { %v11151_v15 = vld [vmem:[#allocation5 + $0x24] sm:$0xf0]  ;;  %v12012_v62 = vld [vmem:[#allocation5 + $0x20] sm:$0xf0]  ;;  %v14338_v55 = vor.u32 %v12009_v19, %v11137_v57  ;;  %v14341_v37 = vor.u32 %v12008_v20, %v11139_v12 }
 0x9b6   : > { %v14325_v8 = vor.u32 %v12012_v62, %v11149_v38  ;;  %v14327_v58 = vor.u32 %v12011_v7, %v11151_v15  ;;  %v12013_v26 = vld [vmem:[#allocation5 + $0x28] sm:$0xf0]  ;;  %v11995_v59 = vld [vmem:[%s16795_s4 + $0x1d8] sm:$0xff] }
 0x9b7   : > { %v14329_v2 = vor.u32 %v12013_v26, %v11157_v18  ;;  %v11996_v57 = vld [vmem:[%s16795_s4 + $0x1e0] sm:$0xff] }
 0x9b8   : > { %5072 = vmatpush.bf16.msrb.mxu3 %v14325_v8  ;;  %4967 = vrot.lane.b32.xlu2 %v14327_v58, %s12212_s11 }
 0x9b9   : > { %4965 = vrot.lane.b32.xlu1 %v14325_v8, %s12212_s11  ;;  %4969 = vrot.lane.b32.xlu0 %v14329_v2, %s12212_s11 }
 0x9bb   : > { %v12010_v16 = vld [vmem:[#allocation5 + $0x10] sm:$0xf0] }
 0x9bc   : > { %5073 = vmatpush.bf16.msrb.mxu3 %v14338_v55  ;;  %v14343_v54 = vor.u32 %v12010_v16, %v11145_v32 }
 0x9bf   : > { %11173 = vmatmul.msk.bf16.vlgmr.msrb.gmra.mxu3 %vm1563_vm13, %v14402_v5 }
 0x9c0   : > { %4961 = vrot.lane.b32.xlu2 %v14341_v37, %s12212_s11 }
 0x9c1   : > { %4963 = vrot.lane.b32.xlu0 %v14343_v54, %s12212_s11  ;;  %4959 = vrot.lane.b32.xlu1 %v14338_v55, %s12212_s11 }
 0x9c8   : > { %5141 = vrot.lane.b32.xlu2 %v14327_v58, %s12213_s12 }
 0x9c9   : > { %5133 = vrot.lane.b32.xlu0 %v14338_v55, %s12213_s12  ;;  %5139 = vrot.lane.b32.xlu1 %v14325_v8, %s12213_s12 }
 0x9cf   : > { %11174 = vmatmul.msk.bf16.gmra.mxu3 %vm1563_vm13, %v14421_v1 }
 0x9d0   : > { %5143 = vrot.lane.b32.xlu2 %v14329_v2, %s12213_s12 }
 0x9d1   : > { %5137 = vrot.lane.b32.xlu0 %v14343_v54, %s12213_s12  ;;  %5135 = vrot.lane.b32.xlu1 %v14341_v37, %s12213_s12 }
 0x9d8   : > { %5250 = vrot.lane.b32.xlu2 %v14329_v2, %s12214_s13 }
 0x9d9   : > { %5246 = vrot.lane.b32.xlu0 %v14325_v8, %s12214_s13  ;;  %5248 = vrot.lane.b32.xlu1 %v14327_v58, %s12214_s13 }
 0x9e0   : > { %5242 = vrot.lane.b32.xlu2 %v14341_v37, %s12214_s13 }
 0x9e1   : > { %5244 = vrot.lane.b32.xlu0 %v14343_v54, %s12214_s13  ;;  %5240 = vrot.lane.b32.xlu1 %v14338_v55, %s12214_s13 }
 0x9e8   : > { %5355 = vrot.lane.b32.xlu2 %v14327_v58, %s12215_s14 }
 0x9e9   : > { %5357 = vrot.lane.b32.xlu0 %v14329_v2, %s12215_s14  ;;  %5353 = vrot.lane.b32.xlu1 %v14325_v8, %s12215_s14 }
 0x9f0   : > { %5349 = vrot.lane.b32.xlu2 %v14341_v37, %s12215_s14 }
 0x9f1   : > { %5351 = vrot.lane.b32.xlu0 %v14343_v54, %s12215_s14  ;;  %5347 = vrot.lane.b32.xlu1 %v14338_v55, %s12215_s14 }
 0x9f8   : > { %5462 = vrot.lane.b32.xlu2 %v14327_v58, %s12216_s15 }
 0x9f9   : > { %5454 = vrot.lane.b32.xlu0 %v14338_v55, %s12216_s15  ;;  %5456 = vrot.lane.b32.xlu1 %v14341_v37, %s12216_s15 }
 0xa00   : > { %5569 = vrot.lane.b32.xlu2 %v14327_v58, %s12217_s16 }
 0xa01   : > { %5464 = vrot.lane.b32.xlu0 %v14329_v2, %s12216_s15  ;;  %5460 = vrot.lane.b32.xlu1 %v14325_v8, %s12216_s15 }
 0xa08   : > { %5458 = vrot.lane.b32.xlu2 %v14343_v54, %s12216_s15 }
 0xa09   : > { %5561 = vrot.lane.b32.xlu0 %v14338_v55, %s12217_s16  ;;  %5567 = vrot.lane.b32.xlu1 %v14325_v8, %s12217_s16 }
 0xa10   : > { %5571 = vrot.lane.b32.xlu2 %v14329_v2, %s12217_s16 }
 0xa11   : > { %5565 = vrot.lane.b32.xlu0 %v14343_v54, %s12217_s16  ;;  %5563 = vrot.lane.b32.xlu1 %v14341_v37, %s12217_s16 }
 0xa12   : > { %v4968_v0 = vpop.permute.xlu2 %4967 }
 0xa18   : > { %5678 = vrot.lane.b32.xlu2 %v14329_v2, %s12218_s17 }
 0xa19   : > { %5674 = vrot.lane.b32.xlu0 %v14325_v8, %s12218_s17  ;;  %5676 = vrot.lane.b32.xlu1 %v14327_v58, %s12218_s17 }
 0xa1a   : > { %v4962_v34 = vpop.permute.xlu2 %4961 }
 0xa20   : > { %5670 = vrot.lane.b32.xlu2 %v14341_v37, %s12218_s17 }
 0xa21   : > { %5672 = vrot.lane.b32.xlu0 %v14343_v54, %s12218_s17  ;;  %5668 = vrot.lane.b32.xlu1 %v14338_v55, %s12218_s17 }
 0xa22   : > { %v5142_v49 = vpop.permute.xlu2 %5141 }
 0xa28   : > { %5783 = vrot.lane.b32.xlu2 %v14327_v58, %s12219_s18 }
 0xa29   : > { %5785 = vrot.lane.b32.xlu0 %v14329_v2, %s12219_s18  ;;  %5781 = vrot.lane.b32.xlu1 %v14325_v8, %s12219_s18 }
 0xa2a   : > { %v5144_v30 = vpop.permute.xlu2 %5143 }
 0xa2b   : > { %v4970_v31 = vpop.permute.xlu0 %4969  ;;  %v4966_v50 = vpop.permute.xlu1 %4965  ;;  %v5148_v25 = vsel %vm600_vm2, %v5142_v49, %v5144_v30 }
 0xa2c   : > { %v4973_v40 = vsel %vm425_vm3, %v4966_v50, %v4968_v0  ;;  %5031 = vmatpush.bf16.msrb.mxu2 %v4970_v31  ;;  %v4974_v33 = vsel %vm425_vm3, %v4968_v0, %v4970_v31  ;;  %5186 = vmatpush.bf16.msra.mxu3 %v5148_v25 }
 0xa2d   : > { %4993 = vmatpush.bf16.msrb.mxu0 %v4973_v40  ;;  %5012 = vmatpush.bf16.msrb.mxu1 %v4974_v33 }
 0xa30   : > { %5777 = vrot.lane.b32.xlu2 %v14341_v37, %s12219_s18 }
 0xa31   : > { %5779 = vrot.lane.b32.xlu0 %v14343_v54, %s12219_s18  ;;  %5775 = vrot.lane.b32.xlu1 %v14338_v55, %s12219_s18 }
 0xa32   : > { %v5251_v53 = vpop.permute.xlu2 %5250 }
 0xa33   : > { %v4964_v47 = vpop.permute.xlu0 %4963  ;;  %v4960_v3 = vpop.permute.xlu1 %4959 }
 0xa34   : > { %5032 = vmatpush.bf16.msrb.mxu2 %v4964_v47  ;;  %v4971_v41 = vsel %vm425_vm3, %v4960_v3, %v4962_v34  ;;  %v4972_v52 = vsel %vm425_vm3, %v4962_v34, %v4964_v47  ;;  %v12000_v47 = vld [vmem:[%s16795_s4 + $0x200] sm:$0xff] }
 0xa35   : > { %4994 = vmatpush.bf16.msrb.mxu0 %v4971_v41  ;;  %5013 = vmatpush.bf16.msrb.mxu1 %v4972_v52 }
 0xa37   : > { %11163 = vmatmul.msk.bf16.vlgmr.msrb.gmra.mxu2 %vm1563_vm13, %v11992_v43 }
 0xa38   : > { %11159 = vmatmul.msk.bf16.vlgmr.msrb.gmra.mxu0 %vm1563_vm13, %v11992_v43  ;;  %11161 = vmatmul.msk.bf16.vlgmr.msrb.gmra.mxu1 %vm1563_vm13, %v11992_v43 }
 0xa39   : > { %5091 = vmatpush.bf16.msra.mxu0 %v14327_v58  ;;  %5110 = vmatpush.bf16.msra.mxu1 %v14329_v2 }
 0xa3a   : > { %5874 = vperm.xlu0 %12111, %v11123_v56   ;;  %5884 = vperm.xlu1 %12112, %v11125_v61   ;;  %v5243_v9 = vpop.permute.xlu2 %5242  ;;  %v11998_v56 = vld [vmem:[%s16795_s4 + $0x1f0] sm:$0xff]  ;;  %v12001_v61 = vld [vmem:[%s16795_s4 + $0x208] sm:$0xff] }
 0xa3b   : > { %5889 = vperm.xlu2 %12113, %v11126_v24   ;;  %v5134_v39 = vpop.permute.xlu0 %5133  ;;  %v5140_v4 = vpop.permute.xlu1 %5139 }
 0xa3c   : > { %v5147_v6 = vsel %vm600_vm2, %v5140_v4, %v5142_v49 }
 0xa3d   : > { %5092 = vmatpush.bf16.msra.mxu0 %v14341_v37  ;;  %5111 = vmatpush.bf16.msra.mxu1 %v14343_v54  ;;  %v11997_v54 = vld [vmem:[%s16795_s4 + $0x1e8] sm:$0xff] }
 0xa3e   : > { %5167 = vmatpush.bf16.msra.mxu2 %v5147_v6 }
 0xa41   : > { %5205 = vmatpush.bf16.msrb.mxu0 %v5144_v30 }
 0xa42   : > { %5879 = vperm.xlu1 %12112, %v11124_v17   ;;  %v5356_v45 = vpop.permute.xlu2 %5355 }
 0xa43   : > { %v5138_v35 = vpop.permute.xlu0 %5137  ;;  %v5136_v60 = vpop.permute.xlu1 %5135 }
 0xa44   : > { %v5145_v36 = vsel %vm600_vm2, %v5134_v39, %v5136_v60  ;;  %v5146_v23 = vsel %vm600_vm2, %v5136_v60, %v5138_v35  ;;  %v12002_v60 = vld [vmem:[%s16795_s4 + $0x210] sm:$0xff] }
 0xa45   : > { %5206 = vmatpush.bf16.msrb.mxu0 %v5138_v35  ;;  %5168 = vmatpush.bf16.msra.mxu2 %v5145_v36  ;;  %v11999_v35 = vld [vmem:[%s16795_s4 + $0x1f8] sm:$0xff] }
 0xa46   : > { %5187 = vmatpush.bf16.msra.mxu3 %v5146_v23 }
 0xa47   : > { %11164 = vmatmul.msk.bf16.gmra.mxu2 %vm1563_vm13, %v11993_v10 }
 0xa48   : > { %11160 = vmatmul.msk.bf16.gmra.mxu0 %vm1563_vm13, %v11993_v10  ;;  %11162 = vmatmul.msk.bf16.gmra.mxu1 %vm1563_vm13, %v11993_v10  ;;  %v5075_v10 = vpop.f32.mrf.mxu3 }
 0xa49   : > { %11189 = vmatmul.msk.bf16.vlgmr.msra.gmra.mxu3 %vm1563_vm13, %v11994_v13 }
 0xa4a   : > { %5312 = vmatpush.bf16.msrb.mxu3 %v5251_v53  ;;  %v5350_v27 = vpop.permute.xlu2 %5349 }
 0xa4b   : > { %v5247_v28 = vpop.permute.xlu0 %5246  ;;  %v5249_v22 = vpop.permute.xlu1 %5248 }
 0xa4c   : > { %v5254_v29 = vsel %vm703_vm4, %v5247_v28, %v5249_v22  ;;  %v5255_v44 = vsel %vm703_vm4, %v5249_v22, %v5251_v53 }
 0xa4d   : > { %5274 = vmatpush.bf16.msrb.mxu1 %v5254_v29  ;;  %5293 = vmatpush.bf16.msrb.mxu2 %v5255_v44  ;;  %v12003_v44 = vld [vmem:[%s16795_s4 + $0x218] sm:$0xff] }
 0xa50   : > { %v14561_v23 = vpop.f32.mrf.mxu3 }
 0xa52   : > { %v5463_v7 = vpop.permute.xlu2 %5462 }
 0xa53   : > { %v5245_v11 = vpop.permute.xlu0 %5244  ;;  %v5241_v42 = vpop.permute.xlu1 %5240 }
 0xa54   : > { %5313 = vmatpush.bf16.msrb.mxu3 %v5245_v11  ;;  %v5252_v46 = vsel %vm703_vm4, %v5241_v42, %v5243_v9  ;;  %v5253_v21 = vsel %vm703_vm4, %v5243_v9, %v5245_v11 }
 0xa55   : > { %5275 = vmatpush.bf16.msrb.mxu1 %v5252_v46  ;;  %5294 = vmatpush.bf16.msrb.mxu2 %v5253_v21 }
 0xa57   : > { %11187 = vmatmul.msk.bf16.vlgmr.msra.gmra.mxu2 %vm1563_vm13, %v11994_v13 }
 0xa58   : > { %11175 = vmatmul.msk.bf16.vlgmr.msra.gmra.mxu0 %vm1563_vm13, %v14402_v5  ;;  %11177 = vmatmul.msk.bf16.vlgmr.msra.gmra.mxu1 %vm1563_vm13, %v14402_v5 }
 0xa59   : > { %11190 = vmatmul.msk.bf16.gmra.mxu3 %vm1563_vm13, %v11995_v59 }
 0xa5a   : > { %v5570_v8 = vpop.permute.xlu2 %5569 }
 0xa5b   : > { %v5358_v38 = vpop.permute.xlu0 %5357  ;;  %v5354_v15 = vpop.permute.xlu1 %5353 }
 0xa5c   : > { %v5361_v62 = vsel %vm806_vm5, %v5354_v15, %v5356_v45  ;;  %5419 = vmatpush.bf16.msra.mxu2 %v5358_v38  ;;  %v5362_v18 = vsel %vm806_vm5, %v5356_v45, %v5358_v38 }
 0xa5d   : > { %5381 = vmatpush.bf16.msra.mxu0 %v5361_v62  ;;  %5400 = vmatpush.bf16.msra.mxu1 %v5362_v18 }
 0xa62   : > { %v5459_v16 = vpop.permute.xlu2 %5458 }
 0xa63   : > { %v5352_v58 = vpop.permute.xlu0 %5351  ;;  %v5348_v26 = vpop.permute.xlu1 %5347 }
 0xa64   : > { %5420 = vmatpush.bf16.msra.mxu2 %v5352_v58  ;;  %v5359_v19 = vsel %vm806_vm5, %v5348_v26, %v5350_v27  ;;  %v5360_v2 = vsel %vm806_vm5, %v5350_v27, %v5352_v58 }
 0xa65   : > { %5382 = vmatpush.bf16.msra.mxu0 %v5359_v19  ;;  %5401 = vmatpush.bf16.msra.mxu1 %v5360_v2 }
 0xa67   : > { %11188 = vmatmul.msk.bf16.gmra.mxu2 %vm1563_vm13, %v11995_v59 }
 0xa68   : > { %11176 = vmatmul.msk.bf16.gmra.mxu0 %vm1563_vm13, %v14421_v1  ;;  %11178 = vmatmul.msk.bf16.gmra.mxu1 %vm1563_vm13, %v14421_v1 }
 0xa69   : > { %11205 = vmatmul.msk.bf16.vlgmr.msrb.gmra.mxu3 %vm1563_vm13, %v11996_v57 }
 0xa6a   : > { %v5572_v5 = vpop.permute.xlu2 %5571 }
 0xa6b   : > { %v5455_v55 = vpop.permute.xlu0 %5454  ;;  %v5457_v12 = vpop.permute.xlu1 %5456  ;;  %v5576_v34 = vsel %vm1012_vm7, %v5570_v8, %v5572_v5 }
 0xa6c   : > { %v5466_v1 = vsel %vm909_vm6, %v5455_v55, %v5457_v12  ;;  %v5467_v50 = vsel %vm909_vm6, %v5457_v12, %v5459_v16 }
 0xa72   : > { %v5679_v3 = vpop.permute.xlu2 %5678 }
 0xa73   : > { %v5465_v20 = vpop.permute.xlu0 %5464  ;;  %v5461_v32 = vpop.permute.xlu1 %5460 }
 0xa74   : > { %v5468_v37 = vsel %vm909_vm6, %v5461_v32, %v5463_v7  ;;  %v5469_v0 = vsel %vm909_vm6, %v5463_v7, %v5465_v20 }
 0xa75   : > { %5488 = vmatpush.bf16.msra.mxu3 %v5468_v37 }
 0xa77   : > { %11203 = vmatmul.msk.bf16.vlgmr.msrb.gmra.mxu2 %vm1563_vm13, %v11996_v57 }
 0xa78   : > { %11191 = vmatmul.msk.bf16.vlgmr.msrb.gmra.mxu0 %vm1563_vm13, %v11994_v13  ;;  %11201 = vmatmul.msk.bf16.vlgmr.msrb.gmra.mxu1 %vm1563_vm13, %v11996_v57  ;;  %v12004_v57 = vld [vmem:[%s16795_s4 + $0x220] sm:$0xff] }
 0xa79   : > { %11206 = vmatmul.msk.bf16.gmra.mxu3 %vm1563_vm13, %v11997_v54  ;;  %5507 = vmatpush.bf16.msrb.mxu0 %v5469_v0 }
 0xa7a   : > { %5526 = vmatpush.bf16.msrb.mxu1 %v5465_v20  ;;  %5489 = vmatpush.bf16.msra.mxu3 %v5466_v1  ;;  %v5671_v39 = vpop.permute.xlu2 %5670 }
 0xa7b   : > { %v5562_v49 = vpop.permute.xlu0 %5561  ;;  %v5568_v30 = vpop.permute.xlu1 %5567 }
 0xa7c   : > { %v5575_v31 = vsel %vm1012_vm7, %v5568_v30, %v5570_v8 }
 0xa7d   : > { %5508 = vmatpush.bf16.msrb.mxu0 %v5467_v50  ;;  %5595 = vmatpush.bf16.msrb.mxu2 %v5575_v31 }
 0xa7e   : > { %5614 = vmatpush.bf16.msrb.mxu3 %v5576_v34  ;;  %5527 = vmatpush.bf16.msrb.mxu1 %v5459_v16  ;;  %v12005_v34 = vld [vmem:[%s16795_s4 + $0x228] sm:$0xff] }
 0xa82   : > { %v5784_v13 = vpop.permute.xlu2 %5783 }
 0xa83   : > { %v5566_v25 = vpop.permute.xlu0 %5565  ;;  %v5564_v40 = vpop.permute.xlu1 %5563 }
 0xa84   : > { %v5573_v33 = vsel %vm1012_vm7, %v5562_v49, %v5564_v40  ;;  %v5574_v53 = vsel %vm1012_vm7, %v5564_v40, %v5566_v25 }
 0xa85   : > { %5596 = vmatpush.bf16.msrb.mxu2 %v5573_v33  ;;  %5615 = vmatpush.bf16.msrb.mxu3 %v5574_v53 }
 0xa87   : > { %11204 = vmatmul.msk.bf16.gmra.mxu2 %vm1563_vm13, %v11997_v54 }
 0xa88   : > { %11192 = vmatmul.msk.bf16.gmra.mxu0 %vm1563_vm13, %v11995_v59  ;;  %11202 = vmatmul.msk.bf16.gmra.mxu1 %vm1563_vm13, %v11997_v54  ;;  %v5080_v59 = vpop.f32.mrf.mxu3 }
 0xa89   : > { %11229 = vmatmul.msk.bf16.vlgmr.msra.gmra.mxu3 %vm1563_vm13, %v12000_v47 }
 0xa8a   : > { %5740 = vmatpush.bf16.msra.mxu3 %v5679_v3  ;;  %v5778_v7 = vpop.permute.xlu2 %5777 }
 0xa8b   : > { %v5675_v43 = vpop.permute.xlu0 %5674  ;;  %v5677_v41 = vpop.permute.xlu1 %5676 }
 0xa8c   : > { %v5683_v24 = vsel %vm1115_vm8, %v5677_v41, %v5679_v3  ;;  %v5682_v9 = vsel %vm1115_vm8, %v5675_v43, %v5677_v41 }
 0xa90   : > { %v14580_v58 = vpop.f32.mrf.mxu3 }
 0xa93   : > { %v5673_v52 = vpop.permute.xlu0 %5672  ;;  %v5669_v4 = vpop.permute.xlu1 %5668 }
 0xa94   : > { %5741 = vmatpush.bf16.msra.mxu3 %v5673_v52  ;;  %v5681_v6 = vsel %vm1115_vm8, %v5671_v39, %v5673_v52  ;;  %v5680_v17 = vsel %vm1115_vm8, %v5669_v4, %v5671_v39 }
 0xa97   : > { %11219 = vmatmul.msk.bf16.vlgmr.msra.gmra.mxu2 %vm1563_vm13, %v11998_v56 }
 0xa98   : > { %5721 = vmatpush.bf16.msra.mxu2 %v5683_v24  ;;  %11215 = vmatmul.msk.bf16.vlgmr.msra.gmra.mxu0 %vm1563_vm13, %v11998_v56 }
 0xa99   : > { %11217 = vmatmul.msk.bf16.vlgmr.msra.gmra.mxu1 %vm1563_vm13, %v11998_v56  ;;  %5633 = vmatpush.bf16.msra.mxu0 %v5572_v5 }
 0xa9a   : > { %5702 = vmatpush.bf16.msra.mxu1 %v5682_v9  ;;  %11230 = vmatmul.msk.bf16.gmra.mxu3 %vm1563_vm13, %v12001_v61 }
 0xa9b   : > { %v5786_v45 = vpop.permute.xlu0 %5785  ;;  %v5782_v36 = vpop.permute.xlu1 %5781 }
 0xa9c   : > { %5722 = vmatpush.bf16.msra.mxu2 %v5681_v6  ;;  %v5789_v27 = vsel %vm16982_vm15, %v5782_v36, %v5784_v13  ;;  %v5790_v46 = vsel %vm16983_vm0, %v5784_v13, %v5786_v45  ;;  %v12006_v6 = vld [vmem:[%s16795_s4 + $0x230] sm:$0xff] }
 0xa9d   : > { %5634 = vmatpush.bf16.msra.mxu0 %v5566_v25 }
 0xa9e   : > { %5703 = vmatpush.bf16.msra.mxu1 %v5680_v17 }
 0xaa3   : > { %v5780_v11 = vpop.permute.xlu0 %5779  ;;  %v5776_v42 = vpop.permute.xlu1 %5775 }
 0xaa4   : > { %v5787_v38 = vsel %vm16984_vm14, %v5776_v42, %v5778_v7  ;;  %v5788_v15 = vsel %vm16985_vm9, %v5778_v7, %v5780_v11 }
 0xaa7   : > { %11220 = vmatmul.msk.bf16.gmra.mxu2 %vm1563_vm13, %v11999_v35 }
 0xaa8   : > { %11216 = vmatmul.msk.bf16.gmra.mxu0 %vm1563_vm13, %v11999_v35 }
 0xaa9   : > { %11218 = vmatmul.msk.bf16.gmra.mxu1 %vm1563_vm13, %v11999_v35 }
 0xaaa   : > { %11245 = vmatmul.msk.bf16.vlgmr.msrb.gmra.mxu3 %vm1563_vm13, %v12002_v60 }
 0xab5   : > { %v4996_v28 = vpop.f32.mrf.mxu0  ;;  %v5015_v22 = vpop.f32.mrf.mxu1 }
 0xab6   : > { %v5076_v29 = vadd.f32 %v5075_v10, %v4996_v28 }
 0xab7   : > { %11243 = vmatmul.msk.bf16.vlgmr.msrb.gmra.mxu2 %vm1563_vm13, %v12002_v60 }
 0xab8   : > { %5847 = vmatpush.bf16.msrb.mxu2 %v5786_v45  ;;  %11231 = vmatmul.msk.bf16.vlgmr.msrb.gmra.mxu0 %vm1563_vm13, %v12000_v47 }
 0xab9   : > { %11233 = vmatmul.msk.bf16.vlgmr.msrb.gmra.mxu1 %vm1563_vm13, %v12000_v47  ;;  %5809 = vmatpush.bf16.msrb.mxu0 %v5789_v27  ;;  %v12007_v27 = vld [vmem:[%s16795_s4 + $0x238] sm:$0xff] }
 0xaba   : > { %5828 = vmatpush.bf16.msrb.mxu1 %v5790_v46  ;;  %v5034_v21 = vpop.f32.mrf.mxu2  ;;  %11246 = vmatmul.msk.bf16.gmra.mxu3 %vm1563_vm13, %v12003_v44 }
 0xabc   : > { %5848 = vmatpush.bf16.msrb.mxu2 %v5780_v11 }
 0xabd   : > { %5810 = vmatpush.bf16.msrb.mxu0 %v5787_v38  ;;  %v14574_v62 = vpop.f32.mrf.mxu0  ;;  %v14576_v18 = vpop.f32.mrf.mxu1 }
 0xabe   : > { %5829 = vmatpush.bf16.msrb.mxu1 %v5788_v15 }
 0xac2   : > { %v14578_v8 = vpop.f32.mrf.mxu2 }
 0xac5   : > { %v5001_v26 = vpop.f32.mrf.mxu0  ;;  %v5020_v19 = vpop.f32.mrf.mxu1 }
 0xac6   : > { %v5081_v2 = vadd.f32 %v5080_v59, %v5001_v26 }
 0xac7   : > { %11244 = vmatmul.msk.bf16.gmra.mxu2 %vm1563_vm13, %v12003_v44 }
 0xac8   : > { %11232 = vmatmul.msk.bf16.gmra.mxu0 %vm1563_vm13, %v12001_v61 }
 0xac9   : > { %11234 = vmatmul.msk.bf16.gmra.mxu1 %vm1563_vm13, %v12001_v61 }
 0xaca   : > { %v5039_v55 = vpop.f32.mrf.mxu2  ;;  %11261 = vmatmul.msk.bf16.vlgmr.msra.gmra.mxu3 %vm1563_vm13, %v12004_v57 }
 0xacc   : > { %v5189_v12 = vpop.f32.mrf.mxu3 }
 0xacd   : > { %v14589_v16 = vpop.f32.mrf.mxu0  ;;  %v14591_v20 = vpop.f32.mrf.mxu1 }
 0xad2   : > { %v14593_v32 = vpop.f32.mrf.mxu2 }
 0xad4   : > { %v14595_v37 = vpop.f32.mrf.mxu3 }
 0xad5   : > { %v5094_v54 = vpop.f32.mrf.mxu0  ;;  %v5113_v5 = vpop.f32.mrf.mxu1 }
 0xad6   : > { %v5095_v0 = vadd.f32 %v5094_v54, %v5015_v22  ;;  %v5114_v1 = vadd.f32 %v5113_v5, %v5034_v21 }
 0xad7   : > { %11259 = vmatmul.msk.bf16.vlgmr.msra.gmra.mxu2 %vm1563_vm13, %v12004_v57 }
 0xad8   : > { %v5219_v49 = vadd.f32 %v5189_v12, %v5095_v0  ;;  %11247 = vmatmul.msk.bf16.vlgmr.msra.gmra.mxu0 %vm1563_vm13, %v12002_v60 }
 0xad9   : > { %11257 = vmatmul.msk.bf16.vlgmr.msra.gmra.mxu1 %vm1563_vm13, %v12004_v57 }
 0xada   : > { %v5170_v30 = vpop.f32.mrf.mxu2  ;;  %11262 = vmatmul.msk.bf16.gmra.mxu3 %vm1563_vm13, %v12005_v34 }
 0xadb   : > { %v5218_v31 = vadd.f32 %v5170_v30, %v5076_v29 }
 0xadc   : > { %v5194_v50 = vpop.f32.mrf.mxu3 }
 0xadd   : > { %v14604_v25 = vpop.f32.mrf.mxu0  ;;  %v14606_v40 = vpop.f32.mrf.mxu1 }
 0xae2   : > { %v14608_v33 = vpop.f32.mrf.mxu2 }
 0xae4   : > { %v14610_v41 = vpop.f32.mrf.mxu3 }
 0xae5   : > { %v5099_v53 = vpop.f32.mrf.mxu0  ;;  %v5118_v47 = vpop.f32.mrf.mxu1 }
 0xae6   : > { %v5100_v3 = vadd.f32 %v5099_v53, %v5020_v19  ;;  %v5119_v43 = vadd.f32 %v5118_v47, %v5039_v55 }
 0xae7   : > { %11260 = vmatmul.msk.bf16.gmra.mxu2 %vm1563_vm13, %v12005_v34 }
 0xae8   : > { %v5225_v52 = vadd.f32 %v5194_v50, %v5100_v3  ;;  %11248 = vmatmul.msk.bf16.gmra.mxu0 %vm1563_vm13, %v12003_v44 }
 0xae9   : > { %11258 = vmatmul.msk.bf16.gmra.mxu1 %vm1563_vm13, %v12005_v34 }
 0xaea   : > { %v5175_v56 = vpop.f32.mrf.mxu2 }
 0xaeb   : > { %v5224_v61 = vadd.f32 %v5175_v56, %v5081_v2 }
 0xaec   : > { %v5315_v39 = vpop.f32.mrf.mxu3 }
 0xaed   : > { %v14615_v24 = vpop.f32.mrf.mxu0  ;;  %v14617_v9 = vpop.f32.mrf.mxu1 }
 0xaf2   : > { %v14619_v4 = vpop.f32.mrf.mxu2 }
 0xaf4   : > { %v14627_v13 = vpop.f32.mrf.mxu3 }
 0xaf5   : > { %v5208_v17 = vpop.f32.mrf.mxu0  ;;  %v5277_v35 = vpop.f32.mrf.mxu1 }
 0xaf6   : > { %v5220_v60 = vadd.f32 %v5208_v17, %v5114_v1  ;;  %v5325_v10 = vadd.f32 %v5277_v35, %v5218_v31 }
 0xaf7   : > { %11275 = vmatmul.msk.bf16.vlgmr.msrb.gmra.mxu2 %vm1563_vm13, %v12006_v6 }
 0xaf8   : > { %v5327_v45 = vadd.f32 %v5315_v39, %v5220_v60  ;;  %11271 = vmatmul.msk.bf16.vlgmr.msrb.gmra.mxu0 %vm1563_vm13, %v12006_v6 }
 0xaf9   : > { %11273 = vmatmul.msk.bf16.vlgmr.msrb.gmra.mxu1 %vm1563_vm13, %v12006_v6 }
 0xafa   : > { %v5296_v36 = vpop.f32.mrf.mxu2 }
 0xafb   : > { %v5326_v28 = vadd.f32 %v5296_v36, %v5219_v49 }
 0xafc   : > { %v5320_v11 = vpop.f32.mrf.mxu3 }
 0xafd   : > { %v14629_v22 = vpop.f32.mrf.mxu0  ;;  %v14631_v29 = vpop.f32.mrf.mxu1 }
 0xb02   : > { %v14633_v44 = vpop.f32.mrf.mxu2 }
 0xb04   : > { %v14647_v55 = vpop.f32.mrf.mxu3 }
 0xb05   : > { %v5213_v42 = vpop.f32.mrf.mxu0  ;;  %v5282_v46 = vpop.f32.mrf.mxu1 }
 0xb06   : > { %v5226_v21 = vadd.f32 %v5213_v42, %v5119_v43  ;;  %v5331_v59 = vadd.f32 %v5282_v46, %v5224_v61 }
 0xb07   : > { %11276 = vmatmul.msk.bf16.gmra.mxu2 %vm1563_vm13, %v12007_v27 }
 0xb08   : > { %v5333_v7 = vadd.f32 %v5320_v11, %v5226_v21  ;;  %11272 = vmatmul.msk.bf16.gmra.mxu0 %vm1563_vm13, %v12007_v27 }
 0xb09   : > { %11274 = vmatmul.msk.bf16.gmra.mxu1 %vm1563_vm13, %v12007_v27 }
 0xb0a   : > { %v5301_v38 = vpop.f32.mrf.mxu2 }
 0xb0b   : > { %v5332_v15 = vadd.f32 %v5301_v38, %v5225_v52 }
 0xb0c   : > { %v5491_v30 = vpop.f32.mrf.mxu3 }
 0xb0d   : > { %v14641_v26 = vpop.f32.mrf.mxu0  ;;  %v14643_v19 = vpop.f32.mrf.mxu1 }
 0xb12   : > { %v14645_v2 = vpop.f32.mrf.mxu2 }
 0xb14   : > { %v5493_v43 = vpop.f32.mrf.mxu3 }
 0xb15   : > { %v5384_v57 = vpop.f32.mrf.mxu0 }
 0xb16   : > { %v5432_v12 = vadd.f32 %v5384_v57, %v5325_v10  ;;  %v5403_v54 = vpop.f32.mrf.mxu1 }
 0xb17   : > { %v5433_v5 = vadd.f32 %v5403_v54, %v5326_v28 }
 0xb1a   : > { %v5422_v0 = vpop.f32.mrf.mxu2 }
 0xb1b   : > { %v5434_v1 = vadd.f32 %v5422_v0, %v5327_v45 }
 0xb1d   : > { %v5386_v34 = vpop.f32.mrf.mxu0  ;;  %v14661_v17 = vpop.f32.mrf.mxu3 }
 0xb1e   : > { %v5405_v49 = vpop.f32.mrf.mxu1 }
 0xb22   : > { %v14649_v31 = vpop.f32.mrf.mxu2 }
 0xb23   : > { %16986 = vst [vmem:[#allocation21_spill] sm:$0xff] %v14649_v31 }
 0xb25   : > { %v5389_v50 = vpop.f32.mrf.mxu0  ;;  %v14665_v28 = vpop.f32.mrf.mxu3 }
 0xb26   : > { %v14651_v53 = vadd.f32 %v5389_v50, %v5331_v59  ;;  %v5408_v47 = vpop.f32.mrf.mxu1  ;;  %16989 = vst [vmem:[#allocation9_spill] sm:$0xff] %v14665_v28  ;;  %v5078_v28 = vadd.f32 %v14561_v23, %v14574_v62  ;;  %v14711_v62 = vpop.permute.xlu1 %5884 }
 0xb27   : > { %v14653_v3 = vadd.f32 %v5408_v47, %v5332_v15 }
 0xb2a   : > { %v5427_v52 = vpop.f32.mrf.mxu2 }
 0xb2b   : > { %v5440_v56 = vadd.f32 %v5427_v52, %v5333_v7 }
 0xb2d   : > { %v14655_v61 = vpop.f32.mrf.mxu0  ;;  %v5617_v59 = vpop.f32.mrf.mxu3 }
 0xb2e   : > { %v14657_v39 = vpop.f32.mrf.mxu1 }
 0xb32   : > { %v14659_v6 = vpop.f32.mrf.mxu2 }
 0xb33   : > { %16987 = vst [vmem:[#allocation25_spill] sm:$0xff] %v14659_v6 }
 0xb35   : > { %v5510_v35 = vpop.f32.mrf.mxu0  ;;  %v5619_v57 = vpop.f32.mrf.mxu3 }
 0xb36   : > { %v5529_v60 = vpop.f32.mrf.mxu1 }
 0xb37   : > { %v14663_v10 = vadd.f32 %v5529_v60, %v5434_v1 }
 0xb39   : > { %16988 = vst [vmem:[#allocation26_spill] sm:$0xff] %v14663_v10 }
 0xb3a   : > { %v5598_v45 = vpop.f32.mrf.mxu2 }
 0xb3d   : > { %v5512_v36 = vpop.f32.mrf.mxu0  ;;  %v14683_v47 = vpop.f32.mrf.mxu3 }
 0xb3e   : > { %v14667_v27 = vpop.f32.mrf.mxu1 }
 0xb3f   : > { %16990 = vst [vmem:[#allocation14_spill] sm:$0xff] %v14667_v27 }
 0xb42   : > { %v5600_v11 = vpop.f32.mrf.mxu2 }
 0xb45   : > { %v14669_v42 = vpop.f32.mrf.mxu0  ;;  %v14689_v14 = vpop.f32.mrf.mxu3 }
 0xb46   : > { %v5534_v46 = vpop.f32.mrf.mxu1  ;;  %16998 = vst [vmem:[#allocation11_spill] sm:$0xff] %v14689_v14 }
 0xb47   : > { %v14671_v21 = vadd.f32 %v5534_v46, %v5440_v56 }
 0xb49   : > { %16991 = vst [vmem:[#allocation17_spill] sm:$0xff] %v14671_v21 }
 0xb4a   : > { %v14673_v7 = vpop.f32.mrf.mxu2 }
 0xb4d   : > { %v14675_v38 = vpop.f32.mrf.mxu0  ;;  %v14704_v6 = vpop.f32.mrf.mxu3 }
 0xb4e   : > { %16992 = vst [vmem:[#allocation13_spill] sm:$0xff] %v14675_v38  ;;  %v14677_v15 = vpop.f32.mrf.mxu1  ;;  %v5221_v38 = vadd.f32 %v14608_v33, %v5078_v28  ;;  %v14713_v28 = vpop.permute.xlu0 %5874 }
 0xb4f   : > { %16993 = vst [vmem:[#allocation18_spill] sm:$0xff] %v14677_v15 }
 0xb52   : > { %v14679_v54 = vpop.f32.mrf.mxu2 }
 0xb53   : > { %16994 = vst [vmem:[#allocation24_spill] sm:$0xff] %v14679_v54  ;;  %v5097_v54 = vadd.f32 %v14604_v25, %v14576_v18 }
 0xb55   : > { %v14681_v0 = vpop.f32.mrf.mxu0  ;;  %v5222_v14 = vadd.f32 %v14595_v37, %v5097_v54 }
 0xb56   : > { %16995 = vst [vmem:[#allocation10_spill] sm:$0xff] %v14681_v0  ;;  %v5705_v1 = vpop.f32.mrf.mxu1  ;;  %v5328_v0 = vadd.f32 %v14631_v29, %v5221_v38 }
 0xb57   : > { %v5329_v18 = vadd.f32 %v14633_v44, %v5222_v14  ;;  %v14717_v44 = vpop.f32.mrf.mxu3 }
 0xb5a   : > { %v5724_v50 = vpop.f32.mrf.mxu2 }
 0xb5d   : > { %v14685_v52 = vpop.f32.mrf.mxu0 }
 0xb5e   : > { %16996 = vst [vmem:[#allocation7_spill] sm:$0xff] %v14685_v52  ;;  %v5707_v56 = vpop.f32.mrf.mxu1  ;;  %v5540_v52 = vadd.f32 %v5510_v35, %v5433_v5  ;;  %v5436_v5 = vadd.f32 %v5405_v49, %v5329_v18  ;;  %v5116_v49 = vadd.f32 %v14606_v40, %v14578_v8  ;;  %v5121_v8 = vadd.f32 %v14617_v9, %v14593_v32 }
 0xb60   : > { %v5647_v25 = vadd.f32 %v5617_v59, %v5540_v52  ;;  %v5543_v37 = vadd.f32 %v5512_v36, %v5436_v5  ;;  %v5102_v36 = vadd.f32 %v14615_v24, %v14591_v20  ;;  %v5546_v20 = vadd.f32 %v14669_v42, %v14653_v3 }
 0xb62   : > { %v5726_v60 = vpop.f32.mrf.mxu2  ;;  %v5754_v35 = vadd.f32 %v5724_v50, %v5647_v25  ;;  %v5650_v59 = vadd.f32 %v5619_v57, %v5543_v37  ;;  %v5228_v9 = vadd.f32 %v14610_v41, %v5102_v36 }
 0xb64   : > { %v5757_v50 = vadd.f32 %v5726_v60, %v5650_v59 }
 0xb65   : > { %v14687_v46 = vpop.f32.mrf.mxu0 }
 0xb66   : > { %16997 = vst [vmem:[#allocation20_spill] sm:$0xff] %v14687_v46  ;;  %v14691_v51 = vpop.f32.mrf.mxu1  ;;  %v5539_v46 = vadd.f32 %v5491_v30, %v5432_v12 }
 0xb68   : > { %v5646_v10 = vadd.f32 %v5598_v45, %v5539_v46 }
 0xb6a   : > { %v14693_v15 = vpop.f32.mrf.mxu2  ;;  %v5753_v23 = vadd.f32 %v5705_v1, %v5646_v10  ;;  %v5223_v1 = vadd.f32 %v14629_v22, %v5116_v49  ;;  %v5229_v22 = vadd.f32 %v14641_v26, %v5121_v8 }
 0xb6d   : > { %v14697_v27 = vpop.f32.mrf.mxu0 }
 0xb6e   : > { %16999 = vst [vmem:[#allocation16_spill] sm:$0xff] %v14697_v27  ;;  %v14701_v21 = vpop.f32.mrf.mxu1  ;;  %v5435_v27 = vadd.f32 %v5386_v34, %v5328_v0 }
 0xb70   : > { %v5542_v29 = vadd.f32 %v5493_v43, %v5435_v27  ;;  %v5083_v43 = vadd.f32 %v14580_v58, %v14589_v16  ;;  %v14732_v58 = vpop.permute.xlu1 %5879 }
 0xb72   : > { %v14708_v31 = vpop.f32.mrf.mxu2  ;;  %v5649_v14 = vadd.f32 %v5600_v11, %v5542_v29  ;;  %v5227_v16 = vadd.f32 %v14619_v4, %v5083_v43 }
 0xb74   : > { %v5756_v27 = vadd.f32 %v5707_v56, %v5649_v14  ;;  %v5545_v56 = vadd.f32 %v14661_v17, %v14651_v53  ;;  %v5334_v4 = vadd.f32 %v14643_v19, %v5227_v16  ;;  %v5335_v53 = vadd.f32 %v14645_v2, %v5228_v9 }
 0xb75   : > { %v5812_v33 = vpop.f32.mrf.mxu0  ;;  %v5653_v17 = vadd.f32 %v14683_v47, %v5546_v20  ;;  %v17000_v47 = vld [vmem:[#allocation21_spill] sm:$0xff]  ;;  %v17012_v9 = vld [vmem:[#allocation16_spill] sm:$0xff] }
 0xb76   : > { %v5860_v12 = vadd.f32 %v5812_v33, %v5753_v23  ;;  %v5831_v30 = vpop.f32.mrf.mxu1  ;;  %v5330_v23 = vadd.f32 %v14627_v13, %v5223_v1  ;;  %v5336_v13 = vadd.f32 %v14647_v55, %v5229_v22  ;;  %v5441_v42 = vadd.f32 %v14655_v61, %v5334_v4  ;;  %v5748_v33 = vpop.f32.mrf.mxu3  ;;  %v17011_v22 = vld [vmem:[#allocation11_spill] sm:$0xff] }
 0xb77   : > { %v5861_v54 = vadd.f32 %v5831_v30, %v5754_v35  ;;  %v5652_v35 = vadd.f32 %v14673_v7, %v5545_v56  ;;  %v5760_v30 = vadd.f32 %v14693_v15, %v5653_v17  ;;  %v17005_v15 = vld [vmem:[#allocation17_spill] sm:$0xff] }
 0xb78   : > { %v5892_v45 = vadd.f32 %v14713_v28, %v5860_v12  ;;  %v5442_v12 = vadd.f32 %v14657_v39, %v5335_v53  ;;  %v5437_v29 = vadd.f32 %v17000_v47, %v5330_v23  ;;  %v17004_v39 = vld [vmem:[#allocation13_spill] sm:$0xff] }
 0xb79   : > { %v5893_v38 = vadd.f32 %v14713_v28, %v5861_v54  ;;  %v5759_v19 = vadd.f32 %v14691_v51, %v5652_v35 }
 0xb7a   : > { %vm5904_vm1 = vcmp.ge.f32.partialorder %v5892_v45, 0.0  ;;  %v5916_v34 = vmul.f32 0.01, %v5892_v45  ;;  %v14719_v10 = vpop.f32.mrf.mxu2  ;;  %v5549_v59 = vadd.f32 %v17004_v39, %v5442_v12 }
 0xb7b   : > { %vm5905_vm15 = vcmp.ge.f32.partialorder %v5893_v38, 0.0  ;;  %v5917_v0 = vmul.f32 0.01, %v5893_v38 }
 0xb7c   : > { %v5928_v11 = vsel %vm5904_vm1, %v5892_v45, %v5916_v34  ;;  %v17001_v45 = vld [vmem:[#allocation26_spill] sm:$0xff]  ;;  %v17003_v34 = vld [vmem:[#allocation25_spill] sm:$0xff]  ;;  %v5656_v56 = vadd.f32 %v17011_v22, %v5549_v59 }
 0xb7d   : > { %v5940_v52 = vmul.f32 %v5928_v11, %v12647_v63  ;;  %v5929_v46 = vsel %vm5905_vm15, %v5893_v38, %v5917_v0  ;;  %v5814_v18 = vpop.f32.mrf.mxu0  ;;  %v17002_v38 = vld [vmem:[#allocation10_spill] sm:$0xff]  ;;  %v5443_v49 = vadd.f32 %v17003_v34, %v5336_v13  ;;  %v17006_v0 = vld [vmem:[#allocation20_spill] sm:$0xff]  ;;  %v17013_v13 = vld [vmem:[#allocation7_spill] sm:$0xff] }
 0xb7e   : > { %v5941_v40 = vmul.f32 %v5929_v46, %v12650_v48  ;;  %v5863_v57 = vadd.f32 %v5814_v18, %v5756_v27  ;;  %v5833_v25 = vpop.f32.mrf.mxu1  ;;  %v5648_v55 = vadd.f32 %v17002_v38, %v17001_v45  ;;  %v5654_v43 = vadd.f32 %v17006_v0, %v17005_v15  ;;  %v17007_v27 = vld [vmem:[#allocation9_spill] sm:$0xff]  ;;  %v17009_v18 = vld [vmem:[#allocation18_spill] sm:$0xff] }
 0xb7f   : > { %v5864_v24 = vadd.f32 %v5833_v25, %v5757_v50  ;;  %v5548_v11 = vadd.f32 %v17007_v27, %v5441_v42  ;;  %v5550_v8 = vadd.f32 %v17009_v18, %v5443_v49 }
 0xb80   : > { %v5895_v60 = vadd.f32 %v14732_v58, %v5863_v57  ;;  %v5952_v32 = vpack.c.bf16 %v5941_v40, %v5940_v52  ;;  %v17008_v52 = vld [vmem:[#allocation14_spill] sm:$0xff]  ;;  %v17010_v57 = vld [vmem:[#allocation24_spill] sm:$0xff]  ;;  %v5755_v16 = vadd.f32 %v14704_v6, %v5648_v55 }
 0xb81   : > { %v5896_v5 = vadd.f32 %v14732_v58, %v5864_v24  ;;  %v5544_v46 = vadd.f32 %v17008_v52, %v5437_v29  ;;  %v5655_v25 = vadd.f32 %v17010_v57, %v5548_v11  ;;  %v5657_v23 = vadd.f32 %v17012_v9, %v5550_v8 }
 0xb82   : > { %vm5907_vm0 = vcmp.ge.f32.partialorder %v5895_v60, 0.0  ;;  %v5919_v3 = vmul.f32 0.01, %v5895_v60  ;;  %5968 = vrot.lane.b32.xlu1 %v5952_v32, %s12221_s21  ;;  %v14747_v26 = vpop.f32.mrf.mxu2  ;;  %v5862_v4 = vadd.f32 %v14719_v10, %v5755_v16 }
 0xb83   : > { %vm5908_vm14 = vcmp.ge.f32.partialorder %v5896_v5, 0.0  ;;  %v5920_v41 = vmul.f32 0.01, %v5896_v5  ;;  %v5651_v42 = vadd.f32 %v17013_v13, %v5544_v46 }
 0xb84   : > { %v5931_v7 = vsel %vm5907_vm0, %v5895_v60, %v5919_v3  ;;  %v5761_v60 = vadd.f32 %v5748_v33, %v5654_v43  ;;  %v5763_v3 = vadd.f32 %v14708_v31, %v5656_v56 }
 0xb85   : > { %v14757_v37 = vmul.f32 %v5931_v7, %v12647_v63  ;;  %v5932_v2 = vsel %vm5908_vm14, %v5896_v5, %v5920_v41  ;;  %v5817_v54 = vpop.f32.mrf.mxu0  ;;  %v5762_v5 = vadd.f32 %v14701_v21, %v5655_v25  ;;  %v5894_v21 = vadd.f32 %v14713_v28, %v5862_v4 }
 0xb86   : > { %v14763_v61 = vmul.f32 %v5932_v2, %v12650_v48  ;;  %v5866_v51 = vadd.f32 %v5817_v54, %v5759_v19  ;;  %v5836_v14 = vpop.f32.mrf.mxu1  ;;  %v5750_v19 = vpop.f32.mrf.mxu3  ;;  %v5758_v29 = vadd.f32 %v14717_v44, %v5651_v42 }
 0xb87   : > { %v5867_v36 = vadd.f32 %v5836_v14, %v5760_v30  ;;  %v5890_v30 = vpop.permute.xlu2 %5889  ;;  %v5764_v54 = vadd.f32 %v5750_v19, %v5657_v23  ;;  %vm5906_vm14 = vcmp.ge.f32.partialorder %v5894_v21, 0.0 }
 0xb88   : > { %v5898_v1 = vadd.f32 %v14711_v62, %v5866_v51  ;;  %v5954_v50 = vpack.c.bf16 %v14763_v61, %v14757_v37  ;;  %v5918_v51 = vmul.f32 0.01, %v5894_v21  ;;  %v5865_v14 = vadd.f32 %v14747_v26, %v5758_v29  ;;  %v17014_v26 = vld [vmem:[#allocation12_spill] sm:$0xff] }
 0xb89   : > { %v5899_v40 = vadd.f32 %v14711_v62, %v5867_v36 }
 0xb8a   : > { %vm5910_vm9 = vcmp.ge.f32.partialorder %v5898_v1, 0.0  ;;  %v5922_v20 = vmul.f32 0.01, %v5898_v1  ;;  %v5855_v24 = vpop.f32.mrf.mxu2  ;;  %v5930_v0 = vsel %vm5906_vm14, %v5894_v21, %v5918_v51  ;;  %v5897_v43 = vadd.f32 %v14732_v58, %v5865_v14 }
 0xb8b   : > { %vm5911_vm1 = vcmp.ge.f32.partialorder %v5899_v40, 0.0  ;;  %v5923_v32 = vmul.f32 0.01, %v5899_v40  ;;  %v5868_v17 = vadd.f32 %v5855_v24, %v5761_v60  ;;  %v5942_v46 = vmul.f32 %v5930_v0, %v17014_v26 }
 0xb8c   : > { %v5934_v35 = vsel %vm5910_vm9, %v5898_v1, %v5922_v20  ;;  %v5921_v18 = vmul.f32 0.01, %v5897_v43 }
 0xb8d   : > { %v5946_v53 = vmul.f32 %v5934_v35, %v12647_v63  ;;  %v5935_v6 = vsel %vm5911_vm1, %v5899_v40, %v5923_v32  ;;  %v5819_v41 = vpop.f32.mrf.mxu0  ;;  %v5900_v31 = vadd.f32 %v14711_v62, %v5868_v17  ;;  %v5953_v40 = vpack.c.bf16 %v5942_v46, %v5942_v46  ;;  %v11315_v46 = vld [vmem:[%s16796_s5 + $0x90] sm:$0xff] }
 0xb8e   : > { %v5947_v33 = vmul.f32 %v5935_v6, %v12650_v48  ;;  %v5869_v7 = vadd.f32 %v5819_v41, %v5762_v5  ;;  %v5838_v12 = vpop.f32.mrf.mxu1 }
 0xb8f   : > { %v5870_v37 = vadd.f32 %v5838_v12, %v5763_v3  ;;  %v5924_v34 = vmul.f32 0.01, %v5900_v31  ;;  %vm5912_vm9 = vcmp.ge.f32.partialorder %v5900_v31, 0.0 }
 0xb90   : > { %v5901_v10 = vadd.f32 %v5890_v30, %v5869_v7  ;;  %v5956_v2 = vpack.c.bf16 %v5947_v33, %v5946_v53 }
 0xb91   : > { %v5902_v47 = vadd.f32 %v5890_v30, %v5870_v37  ;;  %v5936_v36 = vsel %vm5912_vm9, %v5900_v31, %v5924_v34 }
 0xb92   : > { %vm5913_vm15 = vcmp.ge.f32.partialorder %v5901_v10, 0.0  ;;  %v5925_v45 = vmul.f32 0.01, %v5901_v10  ;;  %5976 = vrot.lane.b32.xlu2 %v5956_v2, %s12221_s21  ;;  %v5857_v38 = vpop.f32.mrf.mxu2  ;;  %v5948_v52 = vmul.f32 %v5936_v36, %v17014_v26 }
 0xb93   : > { %vm5914_vm0 = vcmp.ge.f32.partialorder %v5902_v47, 0.0  ;;  %v5926_v55 = vmul.f32 0.01, %v5902_v47  ;;  %v5871_v61 = vadd.f32 %v5857_v38, %v5764_v54 }
 0xb94   : > { %v5937_v28 = vsel %vm5913_vm15, %v5901_v10, %v5925_v45  ;;  %vm5909_vm15 = vcmp.ge.f32.partialorder %v5897_v43, 0.0  ;;  %v5957_v8 = vpack.c.bf16 %v5948_v52, %v5948_v52  ;;  %v12016_v52 = vld [vmem:[%s16795_s4 + $0x250] sm:$0xff] }
 0xb95   : > { %v5949_v49 = vmul.f32 %v5937_v28, %v12647_v63  ;;  %v5938_v39 = vsel %vm5914_vm0, %v5902_v47, %v5926_v55  ;;  %v5903_v62 = vadd.f32 %v5890_v30, %v5871_v61  ;;  %v5933_v58 = vsel %vm5909_vm15, %v5897_v43, %v5921_v18  ;;  %v14909_v28 = vld [vmem:[%s16795_s4 + $0x240] sm:$0xff] }
 0xb96   : > { %v5950_v44 = vmul.f32 %v5938_v39, %v12650_v48  ;;  %v7047_v18 = vld [vmem:[#allocation4 + $0x18] sm:$0xff]  ;;  %vm17016_vm0 = vcmask 736256  }
 0xb97   : > { %vm5915_vm1 = vcmp.ge.f32.partialorder %v5903_v62, 0.0  ;;  %v5927_v59 = vmul.f32 0.01, %v5903_v62  ;;  %vm17017_vm14 = vmmov %vm17016_vm0 }
 0xb98   : > { %v5958_v15 = vpack.c.bf16 %v5950_v44, %v5949_v49  ;;  %vm17018_vm9 = vmmov %vm17016_vm0 }
 0xb99   : > { %v5939_v27 = vsel %vm5915_vm1, %v5903_v62, %v5927_v59  ;;  %v14929_v62 = vld [vmem:[%s16795_s4 + $0x248] sm:$0xff]  ;;  %vm17019_vm1 = vmmov %vm17016_vm0 }
 0xb9a   : > { %5980 = vrot.lane.b32.xlu0 %v5958_v15, %s12221_s21  ;;  %5972 = vrot.lane.b32.xlu2 %v5954_v50, %s12221_s21  ;;  %v5951_v11 = vmul.f32 %v5939_v27, %v17014_v26  ;;  %v5945_v50 = vmul.f32 %v5933_v58, %v17014_v26 }
 0xb9c   : > { %v5959_v1 = vpack.c.bf16 %v5951_v11, %v5951_v11  ;;  %v5955_v57 = vpack.c.bf16 %v5945_v50, %v5945_v50  ;;  %v7057_v50 = vunpack.c.l.bf16 %v7047_v18 }
 0xb9e   : > { %5982 = vrot.lane.b32.xlu1 %v5959_v1, %s12221_s21 }
 0xba2   : > { %5978 = vrot.lane.b32.xlu0 %v5957_v8, %s12221_s21  ;;  %5970 = vrot.lane.b32.xlu2 %v5953_v40, %s12221_s21  ;;  %v11316_v8 = vld [vmem:[%s16796_s5 + $0x98] sm:$0xff]  ;;  %v7049_v40 = vld [vmem:[#allocation4 + $0x24] sm:$0xff] }
 0xbaa   : > { %5974 = vrot.lane.b32.xlu0 %v5955_v57, %s12221_s21  ;;  %v7058_v57 = vunpack.c.h.bf16 %v7047_v18 }
 0xbec   : > { %v5977_v25 = vpop.permute.xlu2 %5976 }
 0xbed   : > { %v5986_v16 = vrot.slane %v5977_v25, 4 }
 0xbef   : > { %v5992_v20 = vsel %vm1428_vm10, %v5986_v16, %v5977_v25  ;;  %v7050_v25 = vld [vmem:[#allocation4 + $0x2c] sm:$0xf] }
 0xbf0   : > { %6008 = vst.msk [vmem:[#allocation6 + $0x18] sm:$0xff] %vm12803_vm11, %v5992_v20  ;;  %v7048_v20 = vld [vmem:[#allocation4 + $0x20] sm:$0xf] }
 0xbf4   : > { %v5973_v22 = vpop.permute.xlu2 %5972  ;;  %v5969_v56 = vpop.permute.xlu1 %5968 }
 0xbf5   : > { %v5985_v60 = vrot.slane %v5973_v22, 4  ;;  %v5984_v32 = vrot.slane %v5969_v56, 4 }
 0xbf7   : > { %v5990_v9 = vsel %vm1428_vm10, %v5985_v60, %v5973_v22  ;;  %v5988_v23 = vsel %vm1428_vm10, %v5984_v32, %v5969_v56  ;;  %v12035_v7 = vld [vmem:[#allocation6 + $0x1c] sm:$0xf]  ;;  %v11339_v12 = vld [vmem:[#allocation6 + $0x18] sm:$0xf]  ;;  %v7060_v56 = vunpack.c.l.bf16 %v7049_v40 }
 0xbf8   : > { %6006 = vst.msk [vmem:[#allocation6 + $0xc] sm:$0xff] %vm12803_vm11, %v5990_v9  ;;  %v7061_v9 = vunpack.c.h.bf16 %v7049_v40 }
 0xbf9   : > { %6004 = vst.msk [vmem:[#allocation6] sm:$0xff] %vm12803_vm11, %v5988_v23  ;;  %v7062_v23 = vunpack.c.l.bf16 %v7050_v25 }
 0xbfc   : > { %v5971_v5 = vpop.permute.xlu2 %5970 }
 0xbfd   : > { %v5989_v4 = vsel %vm1428_vm10, %v5984_v32, %v5971_v5  ;;  %v12114_v5 = vpack.i.bf16 %v7058_v57, %v7057_v50  ;;  %v12020_v57 = vld [vmem:[%s16795_s4 + $0x270] sm:$0xff] }
 0xbfe   : > { %6005 = vst.msk [vmem:[#allocation6 + $0x8] sm:$0xf] %vm1449_vm12, %v5989_v4  ;;  %v7059_v4 = vunpack.c.l.bf16 %v7048_v20 }
 0xbff   : > { %v12033_v35 = vld [vmem:[#allocation6 + $0x8] sm:$0xf0]  ;;  %v11329_v54 = vld [vmem:[#allocation6 + $0xc] sm:$0xf0] }
 0xc00   : > { %v11327_v3 = vld [vmem:[#allocation6] sm:$0xf]  ;;  %v12032_v31 = vld [vmem:[#allocation6 + $0x4] sm:$0xf] }
 0xc01   : > { %v14815_v53 = vor.u32 %v12033_v35, %v11327_v3  ;;  %v14838_v45 = vor.u32 %v12032_v31, %v11329_v54  ;;  %v12119_v35 = vpack.i.bf16 %v7060_v56, %v7059_v4  ;;  %v12124_v3 = vpack.i.bf16 %v7062_v23, %v7061_v9 }
 0xc03   : > { %6098 = vrot.lane.b32.xlu0 %v14815_v53, %s12212_s11 }
 0xc05   : > { %v11335_v61 = vld [vmem:[#allocation6 + $0x8] sm:$0xf] }
 0xc0c   : > { %v5981_v6 = vpop.permute.xlu0 %5980 }
 0xc0d   : > { %v5987_v17 = vrot.slane %v5981_v6, 4 }
 0xc0f   : > { %v5994_v41 = vsel %vm1428_vm10, %v5987_v17, %v5981_v6  ;;  %v7043_v6 = vld [vmem:[#allocation4] sm:$0xff] }
 0xc10   : > { %6010 = vst.msk [vmem:[#allocation6 + $0x24] sm:$0xff] %vm12803_vm11, %v5994_v41  ;;  %v5983_v13 = vpop.permute.xlu1 %5982 }
 0xc11   : > { %v5995_v42 = vsel %vm1428_vm10, %v5987_v17, %v5983_v13 }
 0xc12   : > { %6011 = vst.msk [vmem:[#allocation6 + $0x2c] sm:$0xf] %vm1449_vm12, %v5995_v42  ;;  %v11313_v42 = vld [vmem:[%s16796_s5 + $0x80] sm:$0xff] }
 0xc14   : > { %v5979_v19 = vpop.permute.xlu0 %5978 }
 0xc15   : > { %v5993_v33 = vsel %vm1428_vm10, %v5986_v16, %v5979_v19  ;;  %v12017_v19 = vld [vmem:[%s16795_s4 + $0x258] sm:$0xff] }
 0xc16   : > { %6009 = vst.msk [vmem:[#allocation6 + $0x20] sm:$0xf] %vm1449_vm12, %v5993_v33  ;;  %v7051_v33 = vunpack.c.l.bf16 %v7043_v6 }
 0xc17   : > { %v11341_v30 = vld [vmem:[#allocation6 + $0x24] sm:$0xf0]  ;;  %v12036_v37 = vld [vmem:[#allocation6 + $0x20] sm:$0xf0] }
 0xc18   : > { %v14826_v21 = vor.u32 %v12036_v37, %v11339_v12  ;;  %v14828_v10 = vor.u32 %v12035_v7, %v11341_v30  ;;  %v7052_v7 = vunpack.c.h.bf16 %v7043_v6  ;;  %v11314_v12 = vld [vmem:[%s16796_s5 + $0x88] sm:$0xff]  ;;  %v7045_v30 = vld [vmem:[#allocation4 + $0xc] sm:$0xff] }
 0xc19   : > { %v12037_v38 = vld [vmem:[#allocation6 + $0x28] sm:$0xf0]  ;;  %v7054_v54 = vunpack.c.l.bf16 %v7045_v30 }
 0xc1a   : > { %6104 = vrot.lane.b32.xlu1 %v14826_v21, %s12212_s11  ;;  %6211 = vmatpush.bf16.msra.mxu2 %v14826_v21  ;;  %v12129_v37 = vpack.i.bf16 %v7052_v7, %v7051_v33 }
 0xc1b   : > { %6106 = vrot.lane.b32.xlu2 %v14828_v10, %s12212_s11 }
 0xc1c   : > { %v5975_v2 = vpop.permute.xlu0 %5974 }
 0xc1d   : > { %v5991_v47 = vsel %vm1428_vm10, %v5985_v60, %v5975_v2  ;;  %v11347_v29 = vld [vmem:[#allocation6 + $0x20] sm:$0xf] }
 0xc1e   : > { %6007 = vst.msk [vmem:[#allocation6 + $0x14] sm:$0xf] %vm1449_vm12, %v5991_v47  ;;  %6212 = vmatpush.bf16.msra.mxu2 %v14815_v53  ;;  %v14840_v55 = vor.u32 %v12037_v38, %v11347_v29  ;;  %v14993_v47 = vld [vmem:[%s16795_s4 + $0x260] sm:$0xff] }
 0xc21   : > { %11363 = vmatmul.msk.bf16.vlgmr.msra.gmra.mxu2 %vm1563_vm13, %v14909_v28 }
 0xc22   : > { %6100 = vrot.lane.b32.xlu1 %v14838_v45, %s12212_s11 }
 0xc23   : > { %6108 = vrot.lane.b32.xlu2 %v14840_v55, %s12212_s11 }
 0xc25   : > { %v12034_v51 = vld [vmem:[#allocation6 + $0x10] sm:$0xf0] }
 0xc26   : > { %v14846_v14 = vor.u32 %v12034_v51, %v11335_v61 }
 0xc28   : > { %6102 = vrot.lane.b32.xlu0 %v14846_v14, %s12212_s11 }
 0xc2a   : > { %6278 = vrot.lane.b32.xlu1 %v14826_v21, %s12213_s12 }
 0xc2b   : > { %6280 = vrot.lane.b32.xlu2 %v14828_v10, %s12213_s12 }
 0xc30   : > { %6272 = vrot.lane.b32.xlu0 %v14815_v53, %s12213_s12 }
 0xc31   : > { %11364 = vmatmul.msk.bf16.gmra.mxu2 %vm1563_vm13, %v14929_v62 }
 0xc32   : > { %6274 = vrot.lane.b32.xlu1 %v14838_v45, %s12213_s12 }
 0xc33   : > { %6282 = vrot.lane.b32.xlu2 %v14840_v55, %s12213_s12 }
 0xc38   : > { %6276 = vrot.lane.b32.xlu0 %v14846_v14, %s12213_s12 }
 0xc3a   : > { %6385 = vrot.lane.b32.xlu1 %v14826_v21, %s12214_s13 }
 0xc3b   : > { %6387 = vrot.lane.b32.xlu2 %v14828_v10, %s12214_s13 }
 0xc40   : > { %6389 = vrot.lane.b32.xlu0 %v14840_v55, %s12214_s13 }
 0xc42   : > { %6379 = vrot.lane.b32.xlu1 %v14815_v53, %s12214_s13 }
 0xc43   : > { %6381 = vrot.lane.b32.xlu2 %v14838_v45, %s12214_s13 }
 0xc48   : > { %6383 = vrot.lane.b32.xlu0 %v14846_v14, %s12214_s13 }
 0xc4a   : > { %6492 = vrot.lane.b32.xlu1 %v14826_v21, %s12215_s14 }
 0xc4b   : > { %6494 = vrot.lane.b32.xlu2 %v14828_v10, %s12215_s14 }
 0xc50   : > { %6486 = vrot.lane.b32.xlu0 %v14815_v53, %s12215_s14 }
 0xc52   : > { %6488 = vrot.lane.b32.xlu1 %v14838_v45, %s12215_s14 }
 0xc53   : > { %6496 = vrot.lane.b32.xlu2 %v14840_v55, %s12215_s14 }
 0xc58   : > { %6490 = vrot.lane.b32.xlu0 %v14846_v14, %s12215_s14 }
 0xc5a   : > { %6599 = vrot.lane.b32.xlu1 %v14826_v21, %s12216_s15 }
 0xc5b   : > { %6601 = vrot.lane.b32.xlu2 %v14828_v10, %s12216_s15 }
 0xc60   : > { %6603 = vrot.lane.b32.xlu0 %v14840_v55, %s12216_s15 }
 0xc62   : > { %6593 = vrot.lane.b32.xlu1 %v14815_v53, %s12216_s15 }
 0xc63   : > { %6595 = vrot.lane.b32.xlu2 %v14838_v45, %s12216_s15 }
 0xc68   : > { %6597 = vrot.lane.b32.xlu0 %v14846_v14, %s12216_s15 }
 0xc6a   : > { %6706 = vrot.lane.b32.xlu1 %v14826_v21, %s12217_s16 }
 0xc6b   : > { %6708 = vrot.lane.b32.xlu2 %v14828_v10, %s12217_s16 }
 0xc70   : > { %6700 = vrot.lane.b32.xlu0 %v14815_v53, %s12217_s16 }
 0xc72   : > { %6702 = vrot.lane.b32.xlu1 %v14838_v45, %s12217_s16 }
 0xc73   : > { %6710 = vrot.lane.b32.xlu2 %v14840_v55, %s12217_s16 }
 0xc75   : > { %v6107_v34 = vpop.permute.xlu2 %6106  ;;  %v6099_v36 = vpop.permute.xlu0 %6098 }
 0xc78   : > { %6704 = vrot.lane.b32.xlu0 %v14846_v14, %s12217_s16 }
 0xc7a   : > { %6813 = vrot.lane.b32.xlu1 %v14826_v21, %s12218_s17 }
 0xc7b   : > { %6815 = vrot.lane.b32.xlu2 %v14828_v10, %s12218_s17 }
 0xc7d   : > { %v6109_v49 = vpop.permute.xlu2 %6108 }
 0xc7e   : > { %6170 = vmatpush.bf16.msra.mxu1 %v6109_v49  ;;  %v6113_v39 = vsel %vm425_vm3, %v6107_v34, %v6109_v49 }
 0xc7f   : > { %6151 = vmatpush.bf16.msra.mxu0 %v6113_v39 }
 0xc80   : > { %6817 = vrot.lane.b32.xlu0 %v14840_v55, %s12218_s17 }
 0xc82   : > { %6807 = vrot.lane.b32.xlu1 %v14815_v53, %s12218_s17 }
 0xc83   : > { %6809 = vrot.lane.b32.xlu2 %v14838_v45, %s12218_s17 }
 0xc85   : > { %v6281_v44 = vpop.permute.xlu2 %6280 }
 0xc88   : > { %6811 = vrot.lane.b32.xlu0 %v14846_v14, %s12218_s17 }
 0xc8a   : > { %6920 = vrot.lane.b32.xlu1 %v14826_v21, %s12219_s18  ;;  %v7044_v21 = vld [vmem:[#allocation4 + $0x8] sm:$0xf] }
 0xc8b   : > { %6922 = vrot.lane.b32.xlu2 %v14828_v10, %s12219_s18 }
 0xc8c   : > { %v6105_v59 = vpop.permute.xlu1 %6104 }
 0xc8d   : > { %v6283_v15 = vpop.permute.xlu2 %6282  ;;  %v6112_v0 = vsel %vm425_vm3, %v6105_v59, %v6107_v34 }
 0xc8e   : > { %6132 = vmatpush.bf16.msrb.mxu3 %v6112_v0  ;;  %v6287_v43 = vsel %vm600_vm2, %v6281_v44, %v6283_v15 }
 0xc8f   : > { %6325 = vmatpush.bf16.msrb.mxu2 %v6287_v43 }
 0xc90   : > { %6914 = vrot.lane.b32.xlu0 %v14815_v53, %s12219_s18 }
 0xc92   : > { %6916 = vrot.lane.b32.xlu1 %v14838_v45, %s12219_s18 }
 0xc93   : > { %6924 = vrot.lane.b32.xlu2 %v14840_v55, %s12219_s18 }
 0xc94   : > { %v6101_v27 = vpop.permute.xlu1 %6100 }
 0xc95   : > { %v14949_v11 = vpop.permute.xlu2 %6387  ;;  %v6110_v1 = vsel %vm425_vm3, %v6099_v36, %v6101_v27 }
 0xc96   : > { %6133 = vmatpush.bf16.msrb.mxu3 %v6110_v1 }
 0xc98   : > { %6918 = vrot.lane.b32.xlu0 %v14846_v14, %s12219_s18 }
 0xc99   : > { %11349 = vmatmul.msk.bf16.vlgmr.msrb.gmra.mxu3 %vm1563_vm13, %v12016_v52 }
 0xc9a   : > { %6230 = vmatpush.bf16.msra.mxu3 %v14828_v10  ;;  %v6103_v58 = vpop.permute.xlu0 %6102  ;;  %7023 = vperm.xlu1 %12112, %v11315_v46   ;;  %v7046_v10 = vld [vmem:[#allocation4 + $0x14] sm:$0xf] }
 0xc9b   : > { %7028 = vperm.xlu2 %12113, %v11316_v8   ;;  %6171 = vmatpush.bf16.msra.mxu1 %v6103_v58  ;;  %v6111_v16 = vsel %vm425_vm3, %v6101_v27, %v6103_v58  ;;  %v7056_v38 = vunpack.c.l.bf16 %v7046_v10  ;;  %v12019_v27 = vld [vmem:[%s16795_s4 + $0x268] sm:$0xff] }
 0xc9c   : > { %6152 = vmatpush.bf16.msra.mxu0 %v6111_v16  ;;  %v6279_v22 = vpop.permute.xlu1 %6278 }
 0xc9d   : > { %v14967_v60 = vpop.permute.xlu2 %6381  ;;  %v6286_v32 = vsel %vm600_vm2, %v6279_v22, %v6281_v44 }
 0xc9e   : > { %6231 = vmatpush.bf16.msra.mxu3 %v14838_v45  ;;  %11353 = vmatmul.msk.bf16.vlgmr.msra.gmra.mxu1 %vm1563_vm13, %v12016_v52  ;;  %v7053_v45 = vunpack.c.l.bf16 %v7044_v21 }
 0xc9f   : > { %6306 = vmatpush.bf16.msrb.mxu1 %v6286_v32  ;;  %11351 = vmatmul.msk.bf16.vlgmr.msra.gmra.mxu0 %vm1563_vm13, %v12016_v52 }
 0xca0   : > { %6249 = vmatpush.bf16.msrb.mxu0 %v14840_v55  ;;  %12115 = vrot.lane.b32.xlu0 %v12114_v5, %s12215_s14  ;;  %v12134_v51 = vpack.i.bf16 %v7054_v54, %v7053_v45  ;;  %v12021_v5 = vld [vmem:[%s16795_s4 + $0x278] sm:$0xff] }
 0xca2   : > { %6344 = vmatpush.bf16.msrb.mxu3 %v6283_v15  ;;  %v6273_v53 = vpop.permute.xlu0 %6272  ;;  %12120 = vrot.lane.b32.xlu1 %v12119_v35, %s12215_s14 }
 0xca3   : > { %12125 = vrot.lane.b32.xlu2 %v12124_v3, %s12215_s14 }
 0xca4   : > { %6250 = vmatpush.bf16.msrb.mxu0 %v14846_v14  ;;  %v6275_v17 = vpop.permute.xlu1 %6274  ;;  %v7055_v14 = vunpack.c.h.bf16 %v7045_v30 }
 0xca5   : > { %v6495_v41 = vpop.permute.xlu2 %6494  ;;  %v6284_v13 = vsel %vm600_vm2, %v6273_v53, %v6275_v17 }
 0xca6   : > { %6307 = vmatpush.bf16.msrb.mxu1 %v6284_v13  ;;  %v12139_v34 = vpack.i.bf16 %v7056_v38, %v7055_v14 }
 0xca8   : > { %7013 = vperm.xlu0 %12111, %v11313_v42   ;;  %v12022_v42 = vld [vmem:[%s16795_s4 + $0x280] sm:$0xff] }
 0xca9   : > { %11350 = vmatmul.msk.bf16.gmra.mxu3 %vm1563_vm13, %v12017_v19 }
 0xcaa   : > { %v6277_v2 = vpop.permute.xlu0 %6276  ;;  %7018 = vperm.xlu1 %12112, %v11314_v12   ;;  %v12025_v12 = vld [vmem:[%s16795_s4 + $0x298] sm:$0xff] }
 0xcab   : > { %12130 = vrot.lane.b32.xlu2 %v12129_v37, %s12215_s14  ;;  %6345 = vmatpush.bf16.msrb.mxu3 %v6277_v2  ;;  %v6285_v31 = vsel %vm600_vm2, %v6275_v17, %v6277_v2 }
 0xcac   : > { %6326 = vmatpush.bf16.msrb.mxu2 %v6285_v31  ;;  %v6386_v29 = vpop.permute.xlu1 %6385  ;;  %v12023_v31 = vld [vmem:[%s16795_s4 + $0x288] sm:$0xff] }
 0xcad   : > { %v6497_v55 = vpop.permute.xlu2 %6496  ;;  %v6393_v61 = vsel %vm703_vm4, %v6386_v29, %v14949_v11  ;;  %v6214_v29 = vpop.f32.mrf.mxu2 }
 0xcae   : > { %11354 = vmatmul.msk.bf16.gmra.mxu1 %vm1563_vm13, %v12017_v19  ;;  %6413 = vmatpush.bf16.msra.mxu0 %v6393_v61  ;;  %v6501_v52 = vsel %vm806_vm5, %v6495_v41, %v6497_v55 }
 0xcaf   : > { %11352 = vmatmul.msk.bf16.gmra.mxu0 %vm1563_vm13, %v12017_v19  ;;  %11379 = vmatmul.msk.bf16.vlgmr.msrb.gmra.mxu2 %vm1563_vm13, %v14993_v47 }
 0xcb0   : > { %12135 = vrot.lane.b32.xlu0 %v12134_v51, %s12215_s14 }
 0xcb2   : > { %12140 = vrot.lane.b32.xlu1 %v12139_v34, %s12215_s14  ;;  %v6390_v49 = vpop.permute.xlu0 %6389 }
 0xcb3   : > { %6451 = vmatpush.bf16.msra.mxu2 %v6390_v49  ;;  %v6394_v39 = vsel %vm703_vm4, %v14949_v11, %v6390_v49 }
 0xcb4   : > { %6432 = vmatpush.bf16.msra.mxu1 %v6394_v39  ;;  %v6380_v44 = vpop.permute.xlu1 %6379 }
 0xcb5   : > { %v6602_v59 = vpop.permute.xlu2 %6601  ;;  %v6391_v15 = vsel %vm703_vm4, %v6380_v44, %v14967_v60  ;;  %v15079_v61 = vpop.f32.mrf.mxu2 }
 0xcb6   : > { %6414 = vmatpush.bf16.msra.mxu0 %v6391_v15 }
 0xcb9   : > { %11365 = vmatmul.msk.bf16.vlgmr.msra.gmra.mxu3 %vm1563_vm13, %v14909_v28 }
 0xcba   : > { %v6384_v0 = vpop.permute.xlu0 %6383 }
 0xcbb   : > { %6452 = vmatpush.bf16.msra.mxu2 %v6384_v0  ;;  %v6392_v43 = vsel %vm703_vm4, %v14967_v60, %v6384_v0 }
 0xcbc   : > { %6433 = vmatpush.bf16.msra.mxu1 %v6392_v43  ;;  %v6493_v36 = vpop.permute.xlu1 %6492 }
 0xcbd   : > { %v6500_v11 = vsel %vm806_vm5, %v6493_v36, %v6495_v41  ;;  %v6596_v1 = vpop.permute.xlu2 %6595  ;;  %v12024_v41 = vld [vmem:[%s16795_s4 + $0x290] sm:$0xff] }
 0xcbe   : > { %11377 = vmatmul.msk.bf16.vlgmr.msrb.gmra.mxu1 %vm1563_vm13, %v14993_v47  ;;  %6520 = vmatpush.bf16.msra.mxu3 %v6500_v11 }
 0xcbf   : > { %11367 = vmatmul.msk.bf16.vlgmr.msrb.gmra.mxu0 %vm1563_vm13, %v14909_v28  ;;  %11380 = vmatmul.msk.bf16.gmra.mxu2 %vm1563_vm13, %v12019_v27 }
 0xcc0   : > { %6558 = vmatpush.bf16.msrb.mxu1 %v6497_v55  ;;  %6539 = vmatpush.bf16.msrb.mxu0 %v6501_v52 }
 0xcc2   : > { %v6487_v46 = vpop.permute.xlu0 %6486 }
 0xcc4   : > { %v6489_v18 = vpop.permute.xlu1 %6488 }
 0xcc5   : > { %v6498_v8 = vsel %vm806_vm5, %v6487_v46, %v6489_v18  ;;  %v6709_v40 = vpop.permute.xlu2 %6708 }
 0xcc6   : > { %6521 = vmatpush.bf16.msra.mxu3 %v6498_v8 }
 0xcc9   : > { %11366 = vmatmul.msk.bf16.gmra.mxu3 %vm1563_vm13, %v14929_v62 }
 0xcca   : > { %v6491_v58 = vpop.permute.xlu0 %6490 }
 0xccb   : > { %6559 = vmatpush.bf16.msrb.mxu1 %v6491_v58  ;;  %v6499_v50 = vsel %vm806_vm5, %v6489_v18, %v6491_v58 }
 0xccc   : > { %6540 = vmatpush.bf16.msrb.mxu0 %v6499_v50  ;;  %v6600_v28 = vpop.permute.xlu1 %6599  ;;  %v12028_v50 = vld [vmem:[%s16795_s4 + $0x2b0] sm:$0xff] }
 0xccd   : > { %v6607_v25 = vsel %vm909_vm6, %v6600_v28, %v6602_v59  ;;  %v6711_v20 = vpop.permute.xlu2 %6710 }
 0xcce   : > { %11378 = vmatmul.msk.bf16.gmra.mxu1 %vm1563_vm13, %v12019_v27  ;;  %6627 = vmatpush.bf16.msrb.mxu2 %v6607_v25  ;;  %v6715_v60 = vsel %vm1012_vm7, %v6709_v40, %v6711_v20 }
 0xccf   : > { %11368 = vmatmul.msk.bf16.gmra.mxu0 %vm1563_vm13, %v14929_v62  ;;  %11395 = vmatmul.msk.bf16.vlgmr.msra.gmra.mxu2 %vm1563_vm13, %v12020_v57 }
 0xcd2   : > { %v6604_v16 = vpop.permute.xlu0 %6603 }
 0xcd3   : > { %v6608_v32 = vsel %vm909_vm6, %v6602_v59, %v6604_v16  ;;  %v12027_v59 = vld [vmem:[%s16795_s4 + $0x2a8] sm:$0xff] }
 0xcd4   : > { %v6594_v22 = vpop.permute.xlu1 %6593 }
 0xcd5   : > { %v6605_v56 = vsel %vm909_vm6, %v6594_v22, %v6596_v1  ;;  %v6816_v33 = vpop.permute.xlu2 %6815 }
 0xcd6   : > { %6628 = vmatpush.bf16.msrb.mxu2 %v6605_v56 }
 0xcd9   : > { %11381 = vmatmul.msk.bf16.vlgmr.msrb.gmra.mxu3 %vm1563_vm13, %v14993_v47  ;;  %v12026_v47 = vld [vmem:[%s16795_s4 + $0x2a0] sm:$0xff] }
 0xcda   : > { %6753 = vmatpush.bf16.msra.mxu2 %v6715_v60  ;;  %6646 = vmatpush.bf16.msrb.mxu3 %v6608_v32  ;;  %v6598_v9 = vpop.permute.xlu0 %6597 }
 0xcdb   : > { %v6606_v62 = vsel %vm909_vm6, %v6596_v1, %v6598_v9 }
 0xcdc   : > { %v6707_v23 = vpop.permute.xlu1 %6706 }
 0xcdd   : > { %v6714_v4 = vsel %vm1012_vm7, %v6707_v23, %v6709_v40  ;;  %v6810_v10 = vpop.permute.xlu2 %6809 }
 0xcde   : > { %6647 = vmatpush.bf16.msrb.mxu3 %v6606_v62  ;;  %11393 = vmatmul.msk.bf16.vlgmr.msra.gmra.mxu1 %vm1563_vm13, %v12020_v57  ;;  %v12029_v62 = vld [vmem:[%s16795_s4 + $0x2b8] sm:$0xff] }
 0xcdf   : > { %6734 = vmatpush.bf16.msra.mxu1 %v6714_v4  ;;  %11391 = vmatmul.msk.bf16.vlgmr.msra.gmra.mxu0 %vm1563_vm13, %v12020_v57 }
 0xce0   : > { %6665 = vmatpush.bf16.msra.mxu0 %v6604_v16  ;;  %11396 = vmatmul.msk.bf16.gmra.mxu2 %vm1563_vm13, %v12021_v5 }
 0xce2   : > { %v6701_v35 = vpop.permute.xlu0 %6700 }
 0xce4   : > { %6666 = vmatpush.bf16.msra.mxu0 %v6598_v9  ;;  %v6703_v3 = vpop.permute.xlu1 %6702 }
 0xce5   : > { %v6712_v53 = vsel %vm1012_vm7, %v6701_v35, %v6703_v3  ;;  %v6923_v38 = vpop.permute.xlu2 %6922 }
 0xce6   : > { %6735 = vmatpush.bf16.msra.mxu1 %v6712_v53 }
 0xce9   : > { %11382 = vmatmul.msk.bf16.gmra.mxu3 %vm1563_vm13, %v12019_v27  ;;  %v6219_v27 = vpop.f32.mrf.mxu2 }
 0xcea   : > { %v6705_v6 = vpop.permute.xlu0 %6704 }
 0xceb   : > { %v6713_v17 = vsel %vm1012_vm7, %v6703_v3, %v6705_v6 }
 0xcec   : > { %6754 = vmatpush.bf16.msra.mxu2 %v6713_v17  ;;  %v6814_v19 = vpop.permute.xlu1 %6813 }
 0xced   : > { %v6821_v37 = vsel %vm1115_vm8, %v6814_v19, %v6816_v33  ;;  %v6925_v34 = vpop.permute.xlu2 %6924 }
 0xcee   : > { %11394 = vmatmul.msk.bf16.gmra.mxu1 %vm1563_vm13, %v12021_v5  ;;  %v6929_v43 = vsel %vm17018_vm9, %v6923_v38, %v6925_v34 }
 0xcef   : > { %11392 = vmatmul.msk.bf16.gmra.mxu0 %vm1563_vm13, %v12021_v5 }
 0xcf0   : > { %11419 = vmatmul.msk.bf16.vlgmr.msrb.gmra.mxu2 %vm1563_vm13, %v12024_v41 }
 0xcf1   : > { %v15099_v18 = vpop.f32.mrf.mxu2 }
 0xcf2   : > { %v6818_v13 = vpop.permute.xlu0 %6817 }
 0xcf3   : > { %6879 = vmatpush.bf16.msrb.mxu2 %v6818_v13  ;;  %v6822_v30 = vsel %vm1115_vm8, %v6816_v33, %v6818_v13 }
 0xcf4   : > { %v6808_v21 = vpop.permute.xlu1 %6807 }
 0xcf5   : > { %v6819_v54 = vsel %vm1115_vm8, %v6808_v21, %v6810_v10 }
 0xcf9   : > { %11405 = vmatmul.msk.bf16.vlgmr.msra.gmra.mxu3 %vm1563_vm13, %v12022_v42 }
 0xcfa   : > { %6772 = vmatpush.bf16.msra.mxu3 %v6711_v20  ;;  %v6812_v7 = vpop.permute.xlu0 %6811 }
 0xcfb   : > { %6880 = vmatpush.bf16.msrb.mxu2 %v6812_v7  ;;  %v6820_v2 = vsel %vm1115_vm8, %v6810_v10, %v6812_v7  ;;  %v12030_v10 = vld [vmem:[%s16795_s4 + $0x2c0] sm:$0xff] }
 0xcfc   : > { %v6921_v45 = vpop.permute.xlu1 %6920 }
 0xcfd   : > { %v6928_v51 = vsel %vm17016_vm0, %v6921_v45, %v6923_v38 }
 0xcfe   : > { %6773 = vmatpush.bf16.msra.mxu3 %v6705_v6  ;;  %11409 = vmatmul.msk.bf16.vlgmr.msrb.gmra.mxu1 %vm1563_vm13, %v12022_v42 }
 0xcff   : > { %6860 = vmatpush.bf16.msrb.mxu1 %v6822_v30  ;;  %11407 = vmatmul.msk.bf16.vlgmr.msrb.gmra.mxu0 %vm1563_vm13, %v12022_v42 }
 0xd00   : > { %6841 = vmatpush.bf16.msrb.mxu0 %v6821_v37  ;;  %11420 = vmatmul.msk.bf16.gmra.mxu2 %vm1563_vm13, %v12025_v12 }
 0xd02   : > { %v6915_v55 = vpop.permute.xlu0 %6914 }
 0xd03   : > { %6861 = vmatpush.bf16.msrb.mxu1 %v6820_v2 }
 0xd04   : > { %6842 = vmatpush.bf16.msrb.mxu0 %v6819_v54  ;;  %v6917_v14 = vpop.permute.xlu1 %6916 }
 0xd05   : > { %v6926_v0 = vsel %vm17017_vm14, %v6915_v55, %v6917_v14 }
 0xd09   : > { %11406 = vmatmul.msk.bf16.gmra.mxu3 %vm1563_vm13, %v12023_v31 }
 0xd0a   : > { %v6919_v36 = vpop.permute.xlu0 %6918 }
 0xd0b   : > { %v6927_v1 = vsel %vm17019_vm1, %v6917_v14, %v6919_v36 }
 0xd0e   : > { %11410 = vmatmul.msk.bf16.gmra.mxu1 %vm1563_vm13, %v12023_v31 }
 0xd0f   : > { %11408 = vmatmul.msk.bf16.gmra.mxu0 %vm1563_vm13, %v12023_v31 }
 0xd10   : > { %11435 = vmatmul.msk.bf16.vlgmr.msra.gmra.mxu2 %vm1563_vm13, %v12026_v47 }
 0xd19   : > { %11421 = vmatmul.msk.bf16.vlgmr.msrb.gmra.mxu3 %vm1563_vm13, %v12024_v41 }
 0xd1a   : > { %6948 = vmatpush.bf16.msrb.mxu3 %v6928_v51 }
 0xd1b   : > { %v6173_v49 = vpop.f32.mrf.mxu1 }
 0xd1c   : > { %v6135_v39 = vpop.f32.mrf.mxu3  ;;  %v6154_v44 = vpop.f32.mrf.mxu0 }
 0xd1d   : > { %v6215_v15 = vadd.f32 %v6214_v29, %v6135_v39  ;;  %v12031_v39 = vld [vmem:[%s16795_s4 + $0x2c8] sm:$0xff] }
 0xd1e   : > { %6949 = vmatpush.bf16.msrb.mxu3 %v6926_v0  ;;  %11433 = vmatmul.msk.bf16.vlgmr.msra.gmra.mxu1 %vm1563_vm13, %v12026_v47 }
 0xd1f   : > { %6986 = vmatpush.bf16.msra.mxu1 %v6925_v34  ;;  %11423 = vmatmul.msk.bf16.vlgmr.msra.gmra.mxu0 %vm1563_vm13, %v12024_v41 }
 0xd20   : > { %6967 = vmatpush.bf16.msra.mxu0 %v6929_v43  ;;  %11436 = vmatmul.msk.bf16.gmra.mxu2 %vm1563_vm13, %v12027_v59 }
 0xd23   : > { %6987 = vmatpush.bf16.msra.mxu1 %v6919_v36  ;;  %v15091_v11 = vpop.f32.mrf.mxu1 }
 0xd24   : > { %6968 = vmatpush.bf16.msra.mxu0 %v6927_v1  ;;  %v15094_v52 = vpop.f32.mrf.mxu3  ;;  %v15096_v46 = vpop.f32.mrf.mxu0 }
 0xd25   : > { %v6217_v63 = vadd.f32 %v15079_v61, %v15094_v52 }
 0xd29   : > { %11422 = vmatmul.msk.bf16.gmra.mxu3 %vm1563_vm13, %v12025_v12 }
 0xd2b   : > { %v6178_v8 = vpop.f32.mrf.mxu1 }
 0xd2c   : > { %v6140_v40 = vpop.f32.mrf.mxu3  ;;  %v6159_v58 = vpop.f32.mrf.mxu0 }
 0xd2d   : > { %v6220_v28 = vadd.f32 %v6219_v27, %v6140_v40 }
 0xd2e   : > { %11434 = vmatmul.msk.bf16.gmra.mxu1 %vm1563_vm13, %v12027_v59 }
 0xd2f   : > { %11424 = vmatmul.msk.bf16.gmra.mxu0 %vm1563_vm13, %v12025_v12 }
 0xd30   : > { %11451 = vmatmul.msk.bf16.vlgmr.msrb.gmra.mxu2 %vm1563_vm13, %v12028_v50 }
 0xd32   : > { %v6328_v57 = vpop.f32.mrf.mxu2 }
 0xd33   : > { %v15107_v25 = vpop.f32.mrf.mxu1 }
 0xd34   : > { %v15109_v16 = vpop.f32.mrf.mxu3  ;;  %v15111_v20 = vpop.f32.mrf.mxu0 }
 0xd39   : > { %11437 = vmatmul.msk.bf16.vlgmr.msra.gmra.mxu3 %vm1563_vm13, %v12026_v47 }
 0xd3a   : > { %v15114_v22 = vpop.f32.mrf.mxu2 }
 0xd3b   : > { %v6309_v56 = vpop.f32.mrf.mxu1 }
 0xd3c   : > { %v6357_v60 = vadd.f32 %v6309_v56, %v6215_v15  ;;  %v6233_v32 = vpop.f32.mrf.mxu3  ;;  %v6252_v9 = vpop.f32.mrf.mxu0 }
 0xd3d   : > { %v6234_v23 = vadd.f32 %v6233_v32, %v6154_v44  ;;  %v6253_v5 = vadd.f32 %v6252_v9, %v6173_v49 }
 0xd3e   : > { %11449 = vmatmul.msk.bf16.vlgmr.msrb.gmra.mxu1 %vm1563_vm13, %v12028_v50 }
 0xd3f   : > { %v6358_v4 = vadd.f32 %v6328_v57, %v6234_v23  ;;  %11447 = vmatmul.msk.bf16.vlgmr.msrb.gmra.mxu0 %vm1563_vm13, %v12028_v50 }
 0xd40   : > { %11452 = vmatmul.msk.bf16.gmra.mxu2 %vm1563_vm13, %v12029_v62 }
 0xd42   : > { %v6333_v3 = vpop.f32.mrf.mxu2 }
 0xd43   : > { %v15122_v35 = vpop.f32.mrf.mxu1 }
 0xd44   : > { %v15124_v53 = vpop.f32.mrf.mxu3  ;;  %v15126_v6 = vpop.f32.mrf.mxu0 }
 0xd49   : > { %11438 = vmatmul.msk.bf16.gmra.mxu3 %vm1563_vm13, %v12027_v59 }
 0xd4a   : > { %v15129_v7 = vpop.f32.mrf.mxu2 }
 0xd4b   : > { %v6314_v17 = vpop.f32.mrf.mxu1 }
 0xd4c   : > { %v6363_v41 = vadd.f32 %v6314_v17, %v6220_v28  ;;  %v6238_v13 = vpop.f32.mrf.mxu3  ;;  %v6257_v42 = vpop.f32.mrf.mxu0 }
 0xd4d   : > { %v6239_v19 = vadd.f32 %v6238_v13, %v6159_v58  ;;  %v6258_v33 = vadd.f32 %v6257_v42, %v6178_v8 }
 0xd4e   : > { %11450 = vmatmul.msk.bf16.gmra.mxu1 %vm1563_vm13, %v12029_v62 }
 0xd4f   : > { %v6364_v12 = vadd.f32 %v6333_v3, %v6239_v19  ;;  %11448 = vmatmul.msk.bf16.gmra.mxu0 %vm1563_vm13, %v12029_v62 }
 0xd52   : > { %v6454_v2 = vpop.f32.mrf.mxu2 }
 0xd53   : > { %v15133_v30 = vpop.f32.mrf.mxu1 }
 0xd54   : > { %v15135_v37 = vpop.f32.mrf.mxu3  ;;  %v15137_v21 = vpop.f32.mrf.mxu0 }
 0xd59   : > { %11461 = vmatmul.msk.bf16.vlgmr.msrb.gmra.mxu3 %vm1563_vm13, %v12030_v10 }
 0xd5a   : > { %v15145_v51 = vpop.f32.mrf.mxu2 }
 0xd5b   : > { %v6435_v54 = vpop.f32.mrf.mxu1 }
 0xd5c   : > { %v6465_v31 = vadd.f32 %v6435_v54, %v6358_v4  ;;  %v6347_v47 = vpop.f32.mrf.mxu3  ;;  %v6416_v29 = vpop.f32.mrf.mxu0 }
 0xd5d   : > { %v6359_v45 = vadd.f32 %v6347_v47, %v6253_v5  ;;  %v6464_v38 = vadd.f32 %v6416_v29, %v6357_v60 }
 0xd5e   : > { %11465 = vmatmul.msk.bf16.vlgmr.msra.gmra.mxu1 %vm1563_vm13, %v12030_v10 }
 0xd5f   : > { %v6466_v55 = vadd.f32 %v6454_v2, %v6359_v45  ;;  %11463 = vmatmul.msk.bf16.vlgmr.msra.gmra.mxu0 %vm1563_vm13, %v12030_v10 }
 0xd63   : > { %v15147_v14 = vpop.f32.mrf.mxu1  ;;  %v6459_v59 = vpop.f32.mrf.mxu2 }
 0xd64   : > { %v15149_v34 = vpop.f32.mrf.mxu3  ;;  %v15151_v49 = vpop.f32.mrf.mxu0 }
 0xd69   : > { %11462 = vmatmul.msk.bf16.gmra.mxu3 %vm1563_vm13, %v12031_v39 }
 0xd6b   : > { %v6440_v44 = vpop.f32.mrf.mxu1  ;;  %v15165_v50 = vpop.f32.mrf.mxu2 }
 0xd6c   : > { %v6471_v15 = vadd.f32 %v6440_v44, %v6364_v12  ;;  %v6352_v0 = vpop.f32.mrf.mxu3  ;;  %v6421_v43 = vpop.f32.mrf.mxu0 }
 0xd6d   : > { %v6365_v36 = vadd.f32 %v6352_v0, %v6258_v33  ;;  %v6470_v27 = vadd.f32 %v6421_v43, %v6363_v41 }
 0xd6e   : > { %11466 = vmatmul.msk.bf16.gmra.mxu1 %vm1563_vm13, %v12031_v39 }
 0xd6f   : > { %v6472_v1 = vadd.f32 %v6459_v59, %v6365_v36  ;;  %11464 = vmatmul.msk.bf16.gmra.mxu0 %vm1563_vm13, %v12031_v39 }
 0xd73   : > { %v15159_v8 = vpop.f32.mrf.mxu1  ;;  %v15169_v62 = vpop.f32.mrf.mxu2 }
 0xd74   : > { %v15161_v40 = vpop.f32.mrf.mxu3  ;;  %v15163_v58 = vpop.f32.mrf.mxu0 }
 0xd7b   : > { %v6561_v28 = vpop.f32.mrf.mxu1  ;;  %v15177_v3 = vpop.f32.mrf.mxu2 }
 0xd7c   : > { %v6573_v57 = vadd.f32 %v6561_v28, %v6466_v55  ;;  %v6523_v56 = vpop.f32.mrf.mxu3  ;;  %v6542_v60 = vpop.f32.mrf.mxu0 }
 0xd7d   : > { %v15167_v32 = vadd.f32 %v6523_v56, %v6464_v38  ;;  %v6572_v9 = vadd.f32 %v6542_v60, %v6465_v31 }
 0xd7f   : > { %v6678_v61 = vadd.f32 %v15169_v62, %v15167_v32  ;;  %v6255_v32 = vadd.f32 %v15126_v6, %v15091_v11  ;;  %v6260_v11 = vadd.f32 %v15137_v21, %v15107_v25 }
 0xd81   : > { %v6362_v6 = vadd.f32 %v15149_v34, %v6255_v32 }
 0xd83   : > { %v15171_v23 = vpop.f32.mrf.mxu1  ;;  %v15191_v54 = vpop.f32.mrf.mxu2 }
 0xd84   : > { %v15173_v5 = vpop.f32.mrf.mxu3  ;;  %v15175_v4 = vpop.f32.mrf.mxu0 }
 0xd8b   : > { %v6566_v17 = vpop.f32.mrf.mxu1  ;;  %v15195_v38 = vpop.f32.mrf.mxu2 }
 0xd8c   : > { %v15179_v41 = vadd.f32 %v6566_v17, %v6472_v1  ;;  %v6528_v13 = vpop.f32.mrf.mxu3  ;;  %v6547_v42 = vpop.f32.mrf.mxu0  ;;  %17023 = vst [vmem:[#allocation21_spill] sm:$0xff] %v15195_v38 }
 0xd8d   : > { %v15181_v19 = vadd.f32 %v6528_v13, %v6470_v27  ;;  %v15183_v33 = vadd.f32 %v6547_v42, %v6471_v15  ;;  %v15221_v13 = vpop.permute.xlu2 %7028 }
 0xd8e   : > { %17032 = vst [vmem:[#allocation18_spill] sm:$0xff] %v15221_v13 }
 0xd93   : > { %v15185_v12 = vpop.f32.mrf.mxu1  ;;  %v6756_v59 = vpop.f32.mrf.mxu2 }
 0xd94   : > { %17020 = vst [vmem:[#allocation8_spill] sm:$0xff] %v15185_v12  ;;  %v15187_v10 = vpop.f32.mrf.mxu3  ;;  %v15189_v2 = vpop.f32.mrf.mxu0 }
 0xd95   : > { %17021 = vst [vmem:[#allocation27_spill] sm:$0xff] %v15189_v2 }
 0xd9b   : > { %v6737_v31 = vpop.f32.mrf.mxu1  ;;  %v15209_v36 = vpop.f32.mrf.mxu2 }
 0xd9c   : > { %v6649_v47 = vpop.f32.mrf.mxu3  ;;  %v6668_v29 = vpop.f32.mrf.mxu0 }
 0xd9d   : > { %v15193_v45 = vadd.f32 %v6668_v29, %v6573_v57  ;;  %v15217_v57 = vpop.permute.xlu1 %7023  ;;  %v12116_v29 = vpop.permute.xlu0 %12115 }
 0xd9e   : > { %17030 = vst [vmem:[#allocation9_spill] sm:$0xff] %v15217_v57 }
 0xd9f   : > { %17022 = vst [vmem:[#allocation19_spill] sm:$0xff] %v15193_v45 }
 0xda3   : > { %v15197_v55 = vpop.f32.mrf.mxu1  ;;  %v15223_v42 = vpop.f32.mrf.mxu2 }
 0xda4   : > { %v15199_v39 = vpop.f32.mrf.mxu3  ;;  %v15201_v44 = vpop.f32.mrf.mxu0  ;;  %17033 = vst [vmem:[#allocation24_spill] sm:$0xff] %v15223_v42 }
 0xda5   : > { %17024 = vst [vmem:[#allocation26_spill] sm:$0xff] %v15201_v44  ;;  %v15225_v24 = vpop.permute.xlu1 %12120  ;;  %v15237_v38 = vpop.permute.xlu0 %7013  ;;  %v12117_v44 = vunpack.i.l.bf16 %v12116_v29 }
 0xda6   : > { %v12122_v52 = vunpack.i.l.bf16 %v15225_v24 }
 0xdab   : > { %v15203_v15 = vpop.f32.mrf.mxu1  ;;  %v15235_v57 = vpop.f32.mrf.mxu2 }
 0xdac   : > { %17025 = vst [vmem:[#allocation10_spill] sm:$0xff] %v15203_v15  ;;  %v15205_v0 = vpop.f32.mrf.mxu3  ;;  %v15207_v43 = vpop.f32.mrf.mxu0 }
 0xdad   : > { %17026 = vst [vmem:[#allocation25_spill] sm:$0xff] %v15207_v43  ;;  %v15245_v45 = vpop.permute.xlu1 %7018  ;;  %v15259_v43 = vpop.permute.xlu0 %12135 }
 0xdae   : > { %17035 = vst [vmem:[#allocation16_spill] sm:$0xff] %v15235_v57 }
 0xdaf   : > { %17039 = vst [vmem:[#allocation30_spill] sm:$0xff] %v15245_v45  ;;  %v6679_v45 = vadd.f32 %v6649_v47, %v6572_v9 }
 0xdb3   : > { %v15211_v27 = vpop.f32.mrf.mxu1  ;;  %v15247_v15 = vpop.f32.mrf.mxu2 }
 0xdb4   : > { %17027 = vst [vmem:[#allocation13_spill] sm:$0xff] %v15211_v27  ;;  %v15213_v1 = vpop.f32.mrf.mxu3  ;;  %v15215_v28 = vpop.f32.mrf.mxu0 }
 0xdb5   : > { %17028 = vst [vmem:[#allocation17_spill] sm:$0xff] %v15213_v1 }
 0xdb6   : > { %17029 = vst [vmem:[#allocation20_spill] sm:$0xff] %v15215_v28  ;;  %v15233_v28 = vpop.permute.xlu2 %12125 }
 0xdb7   : > { %17040 = vst [vmem:[#allocation31_spill] sm:$0xff] %v15247_v15  ;;  %v6360_v15 = vadd.f32 %v15122_v35, %v6217_v63  ;;  %v12137_v63 = vunpack.i.l.bf16 %v15259_v43  ;;  %v6786_v35 = vadd.f32 %v6756_v59, %v6679_v45 }
 0xdb9   : > { %v6467_v9 = vadd.f32 %v15151_v49, %v6360_v15  ;;  %v12138_v49 = vunpack.i.h.bf16 %v15259_v43  ;;  %v6241_v15 = vadd.f32 %v15135_v37, %v15111_v20  ;;  %v6222_v20 = vadd.f32 %v15099_v18, %v15109_v16 }
 0xdbb   : > { %v6863_v56 = vpop.f32.mrf.mxu1  ;;  %v6574_v62 = vadd.f32 %v15173_v5, %v6467_v9  ;;  %v15285_v45 = vpop.f32.mrf.mxu2  ;;  %v6367_v18 = vadd.f32 %v15129_v7, %v6241_v15 }
 0xdbc   : > { %v15219_v60 = vpop.f32.mrf.mxu3  ;;  %v6844_v17 = vpop.f32.mrf.mxu0 }
 0xdbd   : > { %17031 = vst [vmem:[#allocation14_spill] sm:$0xff] %v15219_v60  ;;  %v6681_v25 = vadd.f32 %v15177_v3, %v6574_v62  ;;  %v6474_v9 = vadd.f32 %v15159_v8, %v6367_v18  ;;  %v6684_v8 = vadd.f32 %v15191_v54, %v15181_v19  ;;  %v17045_v19 = vld [vmem:[#allocation22_spill] sm:$0xff] }
 0xdbe   : > { %v12131_v42 = vpop.permute.xlu2 %12130 }
 0xdbf   : > { %v12133_v48 = vunpack.i.h.bf16 %v12131_v42  ;;  %v12132_v57 = vunpack.i.l.bf16 %v12131_v42 }
 0xdc1   : > { %v7100_v47 = vsel %vm806_vm5, %v12132_v57, %v12133_v48  ;;  %v6893_v57 = vadd.f32 %v6863_v56, %v6786_v35  ;;  %v7101_v21 = vsel %vm806_vm5, %v12133_v48, %v12137_v63 }
 0xdc3   : > { %v15227_v26 = vpop.f32.mrf.mxu1 }
 0xdc4   : > { %v15229_v27 = vpop.f32.mrf.mxu3  ;;  %v15231_v1 = vpop.f32.mrf.mxu0  ;;  %v17052_v18 = vld [vmem:[#allocation14_spill] sm:$0xff] }
 0xdc5   : > { %17034 = vst [vmem:[#allocation11_spill] sm:$0xff] %v15229_v27  ;;  %v6236_v27 = vadd.f32 %v15124_v53, %v15096_v46  ;;  %v12128_v53 = vunpack.i.h.bf16 %v15233_v28 }
 0xdc7   : > { %v6361_v46 = vadd.f32 %v15114_v22, %v6236_v27  ;;  %v6785_v22 = vadd.f32 %v6737_v31, %v6678_v61  ;;  %v6368_v61 = vadd.f32 %v15161_v40, %v6260_v11  ;;  %v6788_v40 = vadd.f32 %v15197_v55, %v6681_v25  ;;  %v17043_v11 = vld [vmem:[#allocation26_spill] sm:$0xff]  ;;  %v17050_v25 = vld [vmem:[#allocation24_spill] sm:$0xff] }
 0xdc9   : > { %v6892_v31 = vadd.f32 %v6844_v17, %v6785_v22  ;;  %v6475_v35 = vadd.f32 %v15165_v50, %v6368_v61  ;;  %v6895_v55 = vadd.f32 %v15231_v1, %v6788_v40  ;;  %v17042_v50 = vld [vmem:[#allocation25_spill] sm:$0xff] }
 0xdcb   : > { %v15239_v12 = vpop.f32.mrf.mxu1 }
 0xdcc   : > { %17036 = vst [vmem:[#allocation7_spill] sm:$0xff] %v15239_v12  ;;  %v15241_v13 = vpop.f32.mrf.mxu3  ;;  %v15243_v60 = vpop.f32.mrf.mxu0 }
 0xdcd   : > { %17037 = vst [vmem:[#allocation28_spill] sm:$0xff] %v15241_v13 }
 0xdce   : > { %17038 = vst [vmem:[#allocation29_spill] sm:$0xff] %v15243_v60  ;;  %v12118_v60 = vunpack.i.h.bf16 %v12116_v29  ;;  %v6468_v29 = vadd.f32 %v15147_v14, %v6361_v46 }
 0xdd0   : > { %v15275_v27 = vsel %vm806_vm5, %v12117_v44, %v12118_v60  ;;  %v6575_v14 = vadd.f32 %v15175_v4, %v6468_v29  ;;  %v15299_v17 = vsel %vm806_vm5, %v12118_v60, %v12122_v52  ;;  %v6469_v60 = vadd.f32 %v15145_v51, %v6362_v6 }
 0xdd2   : > { %v6682_v5 = vadd.f32 %v15199_v39, %v6575_v14  ;;  %v6366_v39 = vadd.f32 %v15133_v30, %v6222_v20  ;;  %v6576_v32 = vadd.f32 %v15171_v23, %v6469_v60  ;;  %v6686_v23 = vadd.f32 %v17042_v50, %v15179_v41  ;;  %v17047_v20 = vld [vmem:[#allocation27_spill] sm:$0xff]  ;;  %v17049_v41 = vld [vmem:[#allocation30_spill] sm:$0xff] }
 0xdd3   : > { %v15251_v2 = vpop.f32.mrf.mxu1 }
 0xdd4   : > { %17041 = vst [vmem:[#allocation32_spill] sm:$0xff] %v15251_v2  ;;  %v15255_v12 = vpop.f32.mrf.mxu3  ;;  %v15257_v13 = vpop.f32.mrf.mxu0  ;;  %v6789_v3 = vadd.f32 %v15209_v36, %v6682_v5  ;;  %v6473_v30 = vadd.f32 %v15163_v58, %v6366_v39  ;;  %v6683_v6 = vadd.f32 %v17043_v11, %v6576_v32  ;;  %v17044_v5 = vld [vmem:[#allocation28_spill] sm:$0xff]  ;;  %v17051_v39 = vld [vmem:[#allocation19_spill] sm:$0xff] }
 0xdd5   : > { %v15265_v2 = vpop.permute.xlu1 %12140 }
 0xdd6   : > { %v12142_v42 = vunpack.i.l.bf16 %v15265_v2  ;;  %v12143_v59 = vunpack.i.h.bf16 %v15265_v2  ;;  %v6896_v51 = vadd.f32 %v15227_v26, %v6789_v3  ;;  %v6580_v58 = vadd.f32 %v15187_v10, %v6473_v30  ;;  %v17046_v10 = vld [vmem:[#allocation23_spill] sm:$0xff]  ;;  %v17054_v3 = vld [vmem:[#allocation8_spill] sm:$0xff] }
 0xdd7   : > { %v6582_v30 = vadd.f32 %v17054_v3, %v6475_v35 }
 0xdd8   : > { %v7102_v34 = vsel %vm806_vm5, %v12138_v49, %v12142_v42  ;;  %v7103_v48 = vsel %vm806_vm5, %v12142_v42, %v12143_v59  ;;  %v6685_v42 = vadd.f32 %v15205_v0, %v15183_v33  ;;  %v6887_v49 = vpop.f32.mrf.mxu2  ;;  %v6581_v33 = vadd.f32 %v17047_v20, %v6474_v9  ;;  %v17048_v0 = vld [vmem:[#allocation10_spill] sm:$0xff] }
 0xddb   : > { %v15287_v44 = vpop.f32.mrf.mxu1 }
 0xddc   : > { %v6951_v4 = vpop.f32.mrf.mxu3  ;;  %v6970_v46 = vpop.f32.mrf.mxu0 }
 0xddd   : > { %v6999_v37 = vadd.f32 %v6951_v4, %v6892_v31  ;;  %v7000_v56 = vadd.f32 %v6970_v46, %v6893_v57  ;;  %v6793_v4 = vadd.f32 %v17044_v5, %v6686_v23 }
 0xddf   : > { %v7031_v16 = vadd.f32 %v15237_v38, %v6999_v37  ;;  %v7032_v29 = vadd.f32 %v15237_v38, %v7000_v56  ;;  %v6791_v37 = vadd.f32 %v17048_v0, %v6684_v8  ;;  %v17058_v8 = vld [vmem:[#allocation29_spill] sm:$0xff]  ;;  %v6900_v23 = vadd.f32 %v6887_v49, %v6793_v4 }
 0xde0   : > { %v17062_v0 = vld [vmem:[#allocation13_spill] sm:$0xff] }
 0xde1   : > { %v7120_v22 = vadd.f32 %v7100_v47, %v7031_v16  ;;  %v7121_v7 = vadd.f32 %v7101_v21, %v7032_v29  ;;  %v6792_v21 = vadd.f32 %v17050_v25, %v6685_v42  ;;  %v6787_v16 = vadd.f32 %v17052_v18, %v17051_v39  ;;  %v17053_v29 = vld [vmem:[#allocation11_spill] sm:$0xff] }
 0xde2   : > { %v6790_v60 = vadd.f32 %v17053_v29, %v6683_v6  ;;  %v6898_v50 = vadd.f32 %v17058_v8, %v6791_v37  ;;  %v12123_v29 = vunpack.i.h.bf16 %v15225_v24 }
 0xde3   : > { %vm7132_vm15 = vcmp.ge.f32.partialorder %v7120_v22, 0.0  ;;  %v7144_v36 = vmul.f32 0.01, %v7120_v22  ;;  %vm7133_vm0 = vcmp.ge.f32.partialorder %v7121_v7, 0.0  ;;  %v7145_v62 = vmul.f32 0.01, %v7121_v7  ;;  %v6991_v14 = vpop.f32.mrf.mxu1 }
 0xde4   : > { %v6953_v47 = vpop.f32.mrf.mxu3  ;;  %v6972_v26 = vpop.f32.mrf.mxu0 }
 0xde5   : > { %v7156_v1 = vsel %vm7132_vm15, %v7120_v22, %v7144_v36  ;;  %v7157_v15 = vsel %vm7133_vm0, %v7121_v7, %v7145_v62  ;;  %v7002_v57 = vadd.f32 %v6953_v47, %v6895_v55  ;;  %v7003_v31 = vadd.f32 %v6972_v26, %v6896_v51  ;;  %v17055_v22 = vld [vmem:[#allocation21_spill] sm:$0xff]  ;;  %v17057_v36 = vld [vmem:[#allocation7_spill] sm:$0xff] }
 0xde6   : > { %v7168_v54 = vmul.f32 %v7156_v1, %v17045_v19  ;;  %v7169_v46 = vmul.f32 %v7157_v15, %v17046_v10  ;;  %v6687_v7 = vadd.f32 %v17055_v22, %v6580_v58  ;;  %v17056_v51 = vld [vmem:[#allocation17_spill] sm:$0xff]  ;;  %v6899_v62 = vadd.f32 %v17057_v36, %v6792_v21  ;;  %v17059_v1 = vld [vmem:[#allocation20_spill] sm:$0xff]  ;;  %v17060_v15 = vld [vmem:[#allocation31_spill] sm:$0xff] }
 0xde7   : > { %v7034_v56 = vadd.f32 %v17049_v41, %v7002_v57  ;;  %v7035_v61 = vadd.f32 %v17049_v41, %v7003_v31  ;;  %v6688_v55 = vadd.f32 %v17056_v51, %v6581_v33  ;;  %v6689_v35 = vadd.f32 %v17059_v1, %v6582_v30 }
 0xde8   : > { %v7180_v40 = vpack.c.bf16 %v7169_v46, %v7168_v54  ;;  %v6894_v58 = vadd.f32 %v17060_v15, %v6787_v16  ;;  %v17061_v54 = vld [vmem:[#allocation9_spill] sm:$0xff]  ;;  %v6794_v37 = vadd.f32 %v17062_v0, %v6687_v7 }
 0xde9   : > { %v7123_v32 = vadd.f32 %v7102_v34, %v7034_v56  ;;  %v7124_v9 = vadd.f32 %v7103_v48, %v7035_v61  ;;  %v6897_v34 = vadd.f32 %v15285_v45, %v6790_v60  ;;  %v6796_v4 = vadd.f32 %v15255_v12, %v6689_v35  ;;  %v17063_v45 = vld [vmem:[#allocation16_spill] sm:$0xff]  ;;  %v6889_v61 = vpop.f32.mrf.mxu2 }
 0xdea   : > { %7196 = vrot.lane.b32.xlu0 %v7180_v40, %s12221_s21  ;;  %v6795_v56 = vadd.f32 %v17063_v45, %v6688_v55  ;;  %v7001_v39 = vadd.f32 %v15287_v44, %v6894_v58  ;;  %v17064_v60 = vld [vmem:[#allocation32_spill] sm:$0xff]  ;;  %v6901_v22 = vadd.f32 %v15257_v13, %v6794_v37  ;;  %v17067_v35 = vunpack.i.l.bf16 %v15233_v28 }
 0xdeb   : > { %vm7135_vm14 = vcmp.ge.f32.partialorder %v7123_v32, 0.0  ;;  %v7147_v42 = vmul.f32 0.01, %v7123_v32  ;;  %vm7136_vm9 = vcmp.ge.f32.partialorder %v7124_v9, 0.0  ;;  %v7148_v47 = vmul.f32 0.01, %v7124_v9  ;;  %v6994_v26 = vpop.f32.mrf.mxu1 }
 0xdec   : > { %v7007_v48 = vadd.f32 %v6994_v26, %v6900_v23  ;;  %v6956_v57 = vpop.f32.mrf.mxu3  ;;  %v6975_v31 = vpop.f32.mrf.mxu0  ;;  %v7004_v12 = vadd.f32 %v6991_v14, %v6897_v34  ;;  %v6902_v40 = vadd.f32 %v17064_v60, %v6795_v56  ;;  %v6903_v7 = vadd.f32 %v6889_v61, %v6796_v4 }
 0xded   : > { %v7159_v11 = vsel %vm7135_vm14, %v7123_v32, %v7147_v42  ;;  %v7160_v6 = vsel %vm7136_vm9, %v7124_v9, %v7148_v47  ;;  %v7005_v5 = vadd.f32 %v6956_v57, %v6898_v50  ;;  %v7006_v49 = vadd.f32 %v6975_v31, %v6899_v62  ;;  %v17065_v50 = vld [vmem:[#allocation18_spill] sm:$0xff]  ;;  %v17066_v42 = vld [vmem:[#allocation12_spill] sm:$0xff] }
 0xdee   : > { %v7039_v46 = vadd.f32 %v17061_v54, %v7007_v48  ;;  %v15354_v20 = vmul.f32 %v7159_v11, %v17045_v19  ;;  %v15357_v33 = vmul.f32 %v7160_v6, %v17046_v10  ;;  %v7033_v9 = vadd.f32 %v15237_v38, %v7001_v39 }
 0xdef   : > { %v7037_v25 = vadd.f32 %v17061_v54, %v7005_v5  ;;  %v7038_v21 = vadd.f32 %v17061_v54, %v7006_v49  ;;  %v7036_v24 = vadd.f32 %v17049_v41, %v7004_v12  ;;  %v7107_v15 = vsel %vm806_vm5, %v17067_v35, %v12128_v53 }
 0xdf0   : > { %v7128_v18 = vadd.f32 %v12122_v52, %v7039_v46  ;;  %v7182_v16 = vpack.c.bf16 %v15357_v33, %v15354_v20  ;;  %v17068_v34 = vmov %v17067_v35  ;;  %v7122_v49 = vadd.f32 %v12137_v63, %v7033_v9 }
 0xdf1   : > { %v7126_v3 = vadd.f32 %v15275_v27, %v7037_v25  ;;  %v7127_v30 = vadd.f32 %v15299_v17, %v7038_v21  ;;  %v7106_v48 = vsel %vm806_vm5, %v12123_v29, %v17068_v34  ;;  %v7125_v11 = vadd.f32 %v12143_v59, %v7036_v24 }
 0xdf2   : > { %vm7140_vm1 = vcmp.ge.f32.partialorder %v7128_v18, 0.0  ;;  %v7152_v44 = vmul.f32 0.01, %v7128_v18  ;;  %v7146_v33 = vmul.f32 0.01, %v7122_v49 }
 0xdf3   : > { %vm7138_vm15 = vcmp.ge.f32.partialorder %v7126_v3, 0.0  ;;  %v7150_v14 = vmul.f32 0.01, %v7126_v3  ;;  %vm7139_vm0 = vcmp.ge.f32.partialorder %v7127_v30, 0.0  ;;  %v7151_v52 = vmul.f32 0.01, %v7127_v30  ;;  %v6996_v32 = vpop.f32.mrf.mxu1 }
 0xdf4   : > { %v7010_v51 = vadd.f32 %v6996_v32, %v6903_v7  ;;  %v6958_v55 = vpop.f32.mrf.mxu3  ;;  %v6977_v36 = vpop.f32.mrf.mxu0  ;;  %v7164_v27 = vsel %vm7140_vm1, %v7128_v18, %v7152_v44  ;;  %v7149_v46 = vmul.f32 0.01, %v7125_v11 }
 0xdf5   : > { %v7162_v62 = vsel %vm7138_vm15, %v7126_v3, %v7150_v14  ;;  %v7163_v17 = vsel %vm7139_vm0, %v7127_v30, %v7151_v52  ;;  %v7008_v8 = vadd.f32 %v6958_v55, %v6901_v22  ;;  %v7009_v13 = vadd.f32 %v6977_v36, %v6902_v40 }
 0xdf6   : > { %v7042_v23 = vadd.f32 %v17065_v50, %v7010_v51  ;;  %v7176_v47 = vmul.f32 %v7164_v27, %v17066_v42  ;;  %v7174_v26 = vmul.f32 %v7162_v62, %v17045_v19  ;;  %v7175_v1 = vmul.f32 %v7163_v17, %v17046_v10 }
 0xdf7   : > { %v7040_v38 = vadd.f32 %v17065_v50, %v7008_v8  ;;  %v7041_v41 = vadd.f32 %v17065_v50, %v7009_v13  ;;  %vm7137_vm15 = vcmp.ge.f32.partialorder %v7125_v11, 0.0  ;;  %vm7134_vm0 = vcmp.ge.f32.partialorder %v7122_v49, 0.0 }
 0xdf8   : > { %v7131_v58 = vadd.f32 %v12128_v53, %v7042_v23  ;;  %v7185_v57 = vpack.c.bf16 %v7176_v47, %v7176_v47  ;;  %v7184_v31 = vpack.c.bf16 %v7175_v1, %v7174_v26  ;;  %v7161_v45 = vsel %vm7137_vm15, %v7125_v11, %v7149_v46 }
 0xdf9   : > { %v7129_v6 = vadd.f32 %v7106_v48, %v7040_v38  ;;  %v7130_v5 = vadd.f32 %v7107_v15, %v7041_v41  ;;  %v7158_v56 = vsel %vm7134_vm0, %v7122_v49, %v7146_v33  ;;  %v7173_v61 = vmul.f32 %v7161_v45, %v17066_v42 }
 0xdfa   : > { %vm7143_vm14 = vcmp.ge.f32.partialorder %v7131_v58, 0.0  ;;  %v7155_v4 = vmul.f32 0.01, %v7131_v58  ;;  %7206 = vrot.lane.b32.xlu1 %v7185_v57, %s12221_s21  ;;  %7204 = vrot.lane.b32.xlu2 %v7184_v31, %s12221_s21  ;;  %v7170_v25 = vmul.f32 %v7158_v56, %v17066_v42 }
 0xdfb   : > { %vm7141_vm9 = vcmp.ge.f32.partialorder %v7129_v6, 0.0  ;;  %v7153_v28 = vmul.f32 0.01, %v7129_v6  ;;  %vm7142_vm1 = vcmp.ge.f32.partialorder %v7130_v5, 0.0  ;;  %v7154_v53 = vmul.f32 0.01, %v7130_v5 }
 0xdfc   : > { %v7167_v54 = vsel %vm7143_vm14, %v7131_v58, %v7155_v4  ;;  %v7183_v21 = vpack.c.bf16 %v7173_v61, %v7173_v61  ;;  %v7181_v39 = vpack.c.bf16 %v7170_v25, %v7170_v25  ;;  %v11505_v61 = vld [vmem:[%s16796_s5 + $0xb0] sm:$0xff]  ;;  %v11506_v25 = vld [vmem:[%s16796_s5 + $0xb8] sm:$0xff]  ;;  %vm17070_vm14 = vcmask 736256  }
 0xdfd   : > { %v7165_v20 = vsel %vm7141_vm9, %v7129_v6, %v7153_v28  ;;  %v7166_v2 = vsel %vm7142_vm1, %v7130_v5, %v7154_v53  ;;  %v7179_v59 = vmul.f32 %v7167_v54, %v17066_v42  ;;  %v15507_v5 = vld [vmem:[%s16795_s4 + $0x2d0] sm:$0xff]  ;;  %v15527_v28 = vld [vmem:[%s16795_s4 + $0x2d8] sm:$0xff]  ;;  %vm17071_vm9 = vmmov %vm17070_vm14 }
 0xdfe   : > { %v7177_v43 = vmul.f32 %v7165_v20, %v17045_v19  ;;  %v7178_v63 = vmul.f32 %v7166_v2, %v17046_v10  ;;  %vm17072_vm1 = vmmov %vm17071_vm9 }
 0xdff   : > { %v7187_v0 = vpack.c.bf16 %v7179_v59, %v7179_v59  ;;  %v8275_v59 = vld [vmem:[#allocation3 + $0x18] sm:$0xff]  ;;  %vm17073_vm15 = vmmov %vm17072_vm1 }
 0xe00   : > { %v7186_v37 = vpack.c.bf16 %v7178_v63, %v7177_v43  ;;  %v8286_v45 = vunpack.c.h.bf16 %v8275_v59 }
 0xe02   : > { %7200 = vrot.lane.b32.xlu1 %v7182_v16, %s12221_s21  ;;  %7208 = vrot.lane.b32.xlu0 %v7186_v37, %s12221_s21  ;;  %v8285_v37 = vunpack.c.l.bf16 %v8275_v59 }
 0xe03   : > { %7210 = vrot.lane.b32.xlu2 %v7187_v0, %s12221_s21  ;;  %v12040_v0 = vld [vmem:[%s16795_s4 + $0x2e0] sm:$0xff] }
 0xe0a   : > { %7202 = vrot.lane.b32.xlu0 %v7183_v21, %s12221_s21  ;;  %v12144_v21 = vpack.i.bf16 %v8286_v45, %v8285_v37 }
 0xe0b   : > { %7198 = vrot.lane.b32.xlu2 %v7181_v39, %s12221_s21  ;;  %v8277_v39 = vld [vmem:[#allocation3 + $0x24] sm:$0xff] }
 0xe54   : > { %v7205_v12 = vpop.permute.xlu2 %7204 }
 0xe55   : > { %v7214_v18 = vrot.slane %v7205_v12, 4 }
 0xe57   : > { %v7220_v29 = vsel %vm1428_vm10, %v7214_v18, %v7205_v12  ;;  %v8278_v12 = vld [vmem:[#allocation3 + $0x2c] sm:$0xf] }
 0xe58   : > { %7236 = vst.msk [vmem:[#allocation5 + $0x18] sm:$0xff] %vm12803_vm11, %v7220_v29  ;;  %v8276_v29 = vld [vmem:[#allocation3 + $0x20] sm:$0xf] }
 0xe5c   : > { %v7197_v60 = vpop.permute.xlu0 %7196 }
 0xe5d   : > { %v7212_v40 = vrot.slane %v7197_v60, 4  ;;  %v7211_v3 = vpop.permute.xlu2 %7210 }
 0xe5f   : > { %v7216_v30 = vsel %vm1428_vm10, %v7212_v40, %v7197_v60  ;;  %v11529_v17 = vld [vmem:[#allocation5 + $0x18] sm:$0xf]  ;;  %v12059_v13 = vld [vmem:[#allocation5 + $0x1c] sm:$0xf] }
 0xe60   : > { %7232 = vst.msk [vmem:[#allocation5] sm:$0xff] %vm12803_vm11, %v7216_v30 }
 0xe65   : > { %v7199_v22 = vpop.permute.xlu2 %7198 }
 0xe66   : > { %v7217_v7 = vsel %vm1428_vm10, %v7212_v40, %v7199_v22  ;;  %v8288_v40 = vunpack.c.l.bf16 %v8277_v39  ;;  %v8289_v22 = vunpack.c.h.bf16 %v8277_v39 }
 0xe67   : > { %7233 = vst.msk [vmem:[#allocation5 + $0x8] sm:$0xf] %vm1449_vm12, %v7217_v7  ;;  %v11517_v35 = vld [vmem:[#allocation5] sm:$0xf]  ;;  %v12056_v57 = vld [vmem:[#allocation5 + $0x4] sm:$0xf]  ;;  %v8290_v7 = vunpack.c.l.bf16 %v8278_v12 }
 0xe6c   : > { %v7207_v44 = vpop.permute.xlu1 %7206 }
 0xe6d   : > { %v7221_v14 = vsel %vm1428_vm10, %v7214_v18, %v7207_v44  ;;  %v8287_v44 = vunpack.c.l.bf16 %v8276_v29  ;;  %v12044_v29 = vld [vmem:[%s16795_s4 + $0x300] sm:$0xff] }
 0xe6e   : > { %7237 = vst.msk [vmem:[#allocation5 + $0x20] sm:$0xf] %vm1449_vm12, %v7221_v14  ;;  %v11525_v48 = vld [vmem:[#allocation5 + $0x8] sm:$0xf] }
 0xe6f   : > { %v12149_v14 = vpack.i.bf16 %v8288_v40, %v8287_v44 }
 0xe74   : > { %v7201_v52 = vpop.permute.xlu1 %7200  ;;  %v7209_v32 = vpop.permute.xlu0 %7208 }
 0xe75   : > { %v7213_v9 = vrot.slane %v7201_v52, 4  ;;  %v7215_v24 = vrot.slane %v7209_v32, 4  ;;  %v11537_v23 = vld [vmem:[#allocation5 + $0x20] sm:$0xf] }
 0xe77   : > { %v7218_v51 = vsel %vm1428_vm10, %v7213_v9, %v7201_v52  ;;  %v7222_v55 = vsel %vm1428_vm10, %v7215_v24, %v7209_v32  ;;  %v7223_v36 = vsel %vm1428_vm10, %v7215_v24, %v7211_v3  ;;  %v11503_v52 = vld [vmem:[%s16796_s5 + $0xa0] sm:$0xff]  ;;  %v12154_v32 = vpack.i.bf16 %v8290_v7, %v8289_v22 }
 0xe78   : > { %7234 = vst.msk [vmem:[#allocation5 + $0xc] sm:$0xff] %vm12803_vm11, %v7218_v51  ;;  %v8273_v24 = vld [vmem:[#allocation3 + $0xc] sm:$0xff] }
 0xe79   : > { %7238 = vst.msk [vmem:[#allocation5 + $0x24] sm:$0xff] %vm12803_vm11, %v7222_v55  ;;  %v8272_v55 = vld [vmem:[#allocation3 + $0x8] sm:$0xf] }
 0xe7a   : > { %7239 = vst.msk [vmem:[#allocation5 + $0x2c] sm:$0xf] %vm1449_vm12, %v7223_v36 }
 0xe7c   : > { %v7203_v27 = vpop.permute.xlu0 %7202 }
 0xe7d   : > { %v7219_v62 = vsel %vm1428_vm10, %v7213_v9, %v7203_v27  ;;  %v8271_v9 = vld [vmem:[#allocation3] sm:$0xff] }
 0xe7e   : > { %7235 = vst.msk [vmem:[#allocation5 + $0x14] sm:$0xf] %vm1449_vm12, %v7219_v62 }
 0xe7f   : > { %v12057_v41 = vld [vmem:[#allocation5 + $0x8] sm:$0xf0]  ;;  %v11519_v34 = vld [vmem:[#allocation5 + $0xc] sm:$0xf0] }
 0xe80   : > { %v12060_v8 = vld [vmem:[#allocation5 + $0x20] sm:$0xf0]  ;;  %v11531_v50 = vld [vmem:[#allocation5 + $0x24] sm:$0xf0]  ;;  %v15436_v15 = vor.u32 %v12057_v41, %v11517_v35  ;;  %v15441_v11 = vor.u32 %v12056_v57, %v11519_v34  ;;  %v8274_v35 = vld [vmem:[#allocation3 + $0x14] sm:$0xf] }
 0xe81   : > { %v11530_v47 = vor.u32 %v12060_v8, %v11529_v17  ;;  %v15427_v26 = vor.u32 %v12059_v13, %v11531_v50  ;;  %v12061_v1 = vld [vmem:[#allocation5 + $0x28] sm:$0xf0]  ;;  %v12041_v17 = vld [vmem:[%s16795_s4 + $0x2e8] sm:$0xff]  ;;  %v8279_v8 = vunpack.c.l.bf16 %v8271_v9  ;;  %v8280_v13 = vunpack.c.h.bf16 %v8271_v9 }
 0xe82   : > { %v15429_v38 = vor.u32 %v12061_v1, %v11537_v23  ;;  %v8282_v50 = vunpack.c.l.bf16 %v8273_v24  ;;  %v8281_v1 = vunpack.c.l.bf16 %v8272_v55 }
 0xe83   : > { %7332 = vrot.lane.b32.xlu1 %v11530_v47, %s12212_s11  ;;  %7439 = vmatpush.bf16.msrb.mxu1 %v11530_v47 }
 0xe84   : > { %7334 = vrot.lane.b32.xlu2 %v15427_v26, %s12212_s11  ;;  %7336 = vrot.lane.b32.xlu0 %v15429_v38, %s12212_s11  ;;  %v12164_v41 = vpack.i.bf16 %v8282_v50, %v8281_v1 }
 0xe85   : > { %v12058_v58 = vld [vmem:[#allocation5 + $0x10] sm:$0xf0] }
 0xe86   : > { %v15439_v31 = vor.u32 %v12058_v58, %v11525_v48  ;;  %v8284_v58 = vunpack.c.l.bf16 %v8274_v35 }
 0xe87   : > { %7440 = vmatpush.bf16.msrb.mxu1 %v15436_v15 }
 0xe8a   : > { %11553 = vmatmul.msk.bf16.vlgmr.msrb.gmra.mxu1 %vm1563_vm13, %v15507_v5 }
 0xe8b   : > { %7326 = vrot.lane.b32.xlu1 %v15436_v15, %s12212_s11 }
 0xe8c   : > { %7328 = vrot.lane.b32.xlu2 %v15441_v11, %s12212_s11  ;;  %7330 = vrot.lane.b32.xlu0 %v15439_v31, %s12212_s11 }
 0xe93   : > { %7506 = vrot.lane.b32.xlu1 %v11530_v47, %s12213_s12 }
 0xe94   : > { %7508 = vrot.lane.b32.xlu2 %v15427_v26, %s12213_s12  ;;  %7500 = vrot.lane.b32.xlu0 %v15436_v15, %s12213_s12 }
 0xe9a   : > { %11554 = vmatmul.msk.bf16.gmra.mxu1 %vm1563_vm13, %v15527_v28 }
 0xe9b   : > { %7502 = vrot.lane.b32.xlu1 %v15441_v11, %s12213_s12 }
 0xe9c   : > { %7607 = vrot.lane.b32.xlu2 %v15436_v15, %s12214_s13  ;;  %7615 = vrot.lane.b32.xlu0 %v15427_v26, %s12214_s13 }
 0xea3   : > { %7510 = vrot.lane.b32.xlu1 %v15429_v38, %s12213_s12 }
 0xea4   : > { %7613 = vrot.lane.b32.xlu2 %v11530_v47, %s12214_s13  ;;  %7609 = vrot.lane.b32.xlu0 %v15441_v11, %s12214_s13 }
 0xeab   : > { %7504 = vrot.lane.b32.xlu1 %v15439_v31, %s12213_s12 }
 0xeac   : > { %7617 = vrot.lane.b32.xlu2 %v15429_v38, %s12214_s13  ;;  %7611 = vrot.lane.b32.xlu0 %v15439_v31, %s12214_s13 }
 0xeb3   : > { %7720 = vrot.lane.b32.xlu1 %v11530_v47, %s12215_s14 }
 0xeb4   : > { %7722 = vrot.lane.b32.xlu2 %v15427_v26, %s12215_s14  ;;  %7724 = vrot.lane.b32.xlu0 %v15429_v38, %s12215_s14 }
 0xebb   : > { %7714 = vrot.lane.b32.xlu1 %v15436_v15, %s12215_s14 }
 0xebc   : > { %7716 = vrot.lane.b32.xlu2 %v15441_v11, %s12215_s14  ;;  %7718 = vrot.lane.b32.xlu0 %v15439_v31, %s12215_s14 }
 0xec3   : > { %7825 = vrot.lane.b32.xlu1 %v15439_v31, %s12216_s15 }
 0xec4   : > { %7831 = vrot.lane.b32.xlu2 %v15429_v38, %s12216_s15  ;;  %7823 = vrot.lane.b32.xlu0 %v15441_v11, %s12216_s15 }
 0xecb   : > { %7829 = vrot.lane.b32.xlu1 %v15427_v26, %s12216_s15 }
 0xecc   : > { %7827 = vrot.lane.b32.xlu2 %v11530_v47, %s12216_s15  ;;  %7934 = vrot.lane.b32.xlu0 %v11530_v47, %s12217_s16 }
 0xed3   : > { %7936 = vrot.lane.b32.xlu1 %v15427_v26, %s12217_s16 }
 0xed4   : > { %7821 = vrot.lane.b32.xlu2 %v15436_v15, %s12216_s15  ;;  %7928 = vrot.lane.b32.xlu0 %v15436_v15, %s12217_s16 }
 0xedb   : > { %7930 = vrot.lane.b32.xlu1 %v15441_v11, %s12217_s16 }
 0xedc   : > { %8035 = vrot.lane.b32.xlu2 %v15436_v15, %s12218_s17  ;;  %8043 = vrot.lane.b32.xlu0 %v15427_v26, %s12218_s17 }
 0xede   : > { %v7335_v6 = vpop.permute.xlu2 %7334 }
 0xee3   : > { %7938 = vrot.lane.b32.xlu1 %v15429_v38, %s12217_s16 }
 0xee4   : > { %8041 = vrot.lane.b32.xlu2 %v11530_v47, %s12218_s17  ;;  %8037 = vrot.lane.b32.xlu0 %v15441_v11, %s12218_s17 }
 0xee6   : > { %v7329_v49 = vpop.permute.xlu2 %7328 }
 0xeeb   : > { %7932 = vrot.lane.b32.xlu1 %v15439_v31, %s12217_s16 }
 0xeec   : > { %8045 = vrot.lane.b32.xlu2 %v15429_v38, %s12218_s17  ;;  %8039 = vrot.lane.b32.xlu0 %v15439_v31, %s12218_s17 }
 0xeee   : > { %v15522_v4 = vpop.permute.xlu2 %7508 }
 0xef3   : > { %8148 = vrot.lane.b32.xlu1 %v11530_v47, %s12219_s18 }
 0xef4   : > { %8150 = vrot.lane.b32.xlu2 %v15427_v26, %s12219_s18  ;;  %8152 = vrot.lane.b32.xlu0 %v15429_v38, %s12219_s18 }
 0xef5   : > { %v7333_v53 = vpop.permute.xlu1 %7332 }
 0xef6   : > { %v7340_v54 = vsel %vm425_vm3, %v7333_v53, %v7335_v6  ;;  %v7337_v46 = vpop.permute.xlu0 %7336  ;;  %v15538_v2 = vpop.permute.xlu2 %7607 }
 0xef7   : > { %7398 = vmatpush.bf16.msrb.mxu0 %v7337_v46  ;;  %7360 = vmatpush.bf16.msra.mxu2 %v7340_v54  ;;  %v7341_v20 = vsel %vm425_vm3, %v7335_v6, %v7337_v46  ;;  %v12042_v46 = vld [vmem:[%s16795_s4 + $0x2f0] sm:$0xff] }
 0xef8   : > { %7379 = vmatpush.bf16.msra.mxu3 %v7341_v20 }
 0xefb   : > { %8142 = vrot.lane.b32.xlu1 %v15436_v15, %s12219_s18 }
 0xefc   : > { %8144 = vrot.lane.b32.xlu2 %v15441_v11, %s12219_s18  ;;  %8146 = vrot.lane.b32.xlu0 %v15439_v31, %s12219_s18 }
 0xefd   : > { %v7327_v33 = vpop.permute.xlu1 %7326 }
 0xefe   : > { %v7331_v43 = vpop.permute.xlu0 %7330  ;;  %v7338_v63 = vsel %vm425_vm3, %v7327_v33, %v7329_v49  ;;  %v7614_v18 = vpop.permute.xlu2 %7613 }
 0xeff   : > { %7399 = vmatpush.bf16.msrb.mxu0 %v7331_v43  ;;  %7361 = vmatpush.bf16.msra.mxu2 %v7338_v63  ;;  %v7339_v56 = vsel %vm425_vm3, %v7329_v49, %v7331_v43 }
 0xf00   : > { %7380 = vmatpush.bf16.msra.mxu3 %v7339_v56 }
 0xf02   : > { %11543 = vmatmul.msk.bf16.vlgmr.msrb.gmra.mxu0 %vm1563_vm13, %v12040_v0  ;;  %11539 = vmatmul.msk.bf16.vlgmr.msra.gmra.mxu2 %vm1563_vm13, %v12040_v0 }
 0xf03   : > { %7458 = vmatpush.bf16.msrb.mxu2 %v15427_v26  ;;  %11541 = vmatmul.msk.bf16.vlgmr.msra.gmra.mxu3 %vm1563_vm13, %v12040_v0  ;;  %v11504_v26 = vld [vmem:[%s16796_s5 + $0xa8] sm:$0xff] }
 0xf04   : > { %7477 = vmatpush.bf16.msrb.mxu3 %v15429_v38  ;;  %8251 = vperm.xlu1 %12112, %v11505_v61   ;;  %v12159_v38 = vpack.i.bf16 %v8280_v13, %v8279_v8  ;;  %v12048_v8 = vld [vmem:[%s16795_s4 + $0x320] sm:$0xff] }
 0xf05   : > { %8256 = vperm.xlu2 %12113, %v11506_v25   ;;  %12145 = vrot.lane.b32.xlu0 %v12144_v21, %s12215_s14  ;;  %v7507_v60 = vpop.permute.xlu1 %7506 }
 0xf06   : > { %v7514_v3 = vsel %vm600_vm2, %v7507_v60, %v15522_v4  ;;  %v7501_v30 = vpop.permute.xlu0 %7500  ;;  %v7618_v36 = vpop.permute.xlu2 %7617 }
 0xf07   : > { %7459 = vmatpush.bf16.msrb.mxu2 %v15441_v11  ;;  %7534 = vmatpush.bf16.msra.mxu0 %v7514_v3  ;;  %v7442_v35 = vpop.f32.mrf.mxu1 }
 0xf08   : > { %7478 = vmatpush.bf16.msrb.mxu3 %v15439_v31  ;;  %v8283_v31 = vunpack.c.h.bf16 %v8273_v24 }
 0xf0a   : > { %v12169_v11 = vpack.i.bf16 %v8284_v58, %v8283_v31 }
 0xf0c   : > { %12150 = vrot.lane.b32.xlu1 %v12149_v14, %s12215_s14 }
 0xf0d   : > { %12155 = vrot.lane.b32.xlu2 %v12154_v32, %s12215_s14  ;;  %8241 = vperm.xlu0 %12111, %v11503_v52   ;;  %v7503_v51 = vpop.permute.xlu1 %7502  ;;  %v12045_v32 = vld [vmem:[%s16795_s4 + $0x308] sm:$0xff] }
 0xf0e   : > { %v7616_v27 = vpop.permute.xlu0 %7615  ;;  %v7512_v62 = vsel %vm600_vm2, %v7501_v30, %v7503_v51  ;;  %v7723_v6 = vpop.permute.xlu2 %7722 }
 0xf0f   : > { %7535 = vmatpush.bf16.msra.mxu0 %v7512_v62  ;;  %v7621_v23 = vsel %vm703_vm4, %v7614_v18, %v7616_v27  ;;  %v7622_v47 = vsel %vm703_vm4, %v7616_v27, %v7618_v36 }
 0xf10   : > { %7641 = vmatpush.bf16.msra.mxu3 %v7621_v23 }
 0xf12   : > { %11544 = vmatmul.msk.bf16.gmra.mxu0 %vm1563_vm13, %v12041_v17  ;;  %11540 = vmatmul.msk.bf16.gmra.mxu2 %vm1563_vm13, %v12041_v17 }
 0xf13   : > { %7660 = vmatpush.bf16.msrb.mxu0 %v7622_v47  ;;  %11542 = vmatmul.msk.bf16.gmra.mxu3 %vm1563_vm13, %v12041_v17  ;;  %v12046_v17 = vld [vmem:[%s16795_s4 + $0x310] sm:$0xff] }
 0xf14   : > { %8246 = vperm.xlu1 %12112, %v11504_v26  }
 0xf15   : > { %12160 = vrot.lane.b32.xlu2 %v12159_v38, %s12215_s14  ;;  %12165 = vrot.lane.b32.xlu0 %v12164_v41, %s12215_s14  ;;  %v7511_v15 = vpop.permute.xlu1 %7510  ;;  %v12047_v38 = vld [vmem:[%s16795_s4 + $0x318] sm:$0xff]  ;;  %v12049_v41 = vld [vmem:[%s16795_s4 + $0x328] sm:$0xff] }
 0xf16   : > { %v7610_v34 = vpop.permute.xlu0 %7609  ;;  %7572 = vmatpush.bf16.msra.mxu2 %v7511_v15  ;;  %v7515_v48 = vsel %vm600_vm2, %v15522_v4, %v7511_v15  ;;  %v7717_v20 = vpop.permute.xlu2 %7716 }
 0xf17   : > { %7553 = vmatpush.bf16.msra.mxu1 %v7515_v48  ;;  %v7619_v57 = vsel %vm703_vm4, %v15538_v2, %v7610_v34  ;;  %v12050_v48 = vld [vmem:[%s16795_s4 + $0x330] sm:$0xff] }
 0xf18   : > { %7642 = vmatpush.bf16.msra.mxu3 %v7619_v57 }
 0xf1c   : > { %12170 = vrot.lane.b32.xlu1 %v12169_v11, %s12215_s14 }
 0xf1d   : > { %v7505_v49 = vpop.permute.xlu1 %7504 }
 0xf1e   : > { %v7612_v53 = vpop.permute.xlu0 %7611  ;;  %7573 = vmatpush.bf16.msra.mxu2 %v7505_v49  ;;  %v7513_v54 = vsel %vm600_vm2, %v7503_v51, %v7505_v49  ;;  %v7832_v45 = vpop.permute.xlu2 %7831 }
 0xf1f   : > { %7554 = vmatpush.bf16.msra.mxu1 %v7513_v54  ;;  %v7620_v4 = vsel %vm703_vm4, %v7610_v34, %v7612_v53 }
 0xf20   : > { %7661 = vmatpush.bf16.msrb.mxu0 %v7620_v4 }
 0xf22   : > { %11567 = vmatmul.msk.bf16.vlgmr.msra.gmra.mxu0 %vm1563_vm13, %v12042_v46  ;;  %11555 = vmatmul.msk.bf16.vlgmr.msrb.gmra.mxu2 %vm1563_vm13, %v15507_v5 }
 0xf23   : > { %7679 = vmatpush.bf16.msrb.mxu1 %v7618_v36  ;;  %11557 = vmatmul.msk.bf16.vlgmr.msrb.gmra.mxu3 %vm1563_vm13, %v15507_v5  ;;  %v12043_v5 = vld [vmem:[%s16795_s4 + $0x2f8] sm:$0xff] }
 0xf24   : > { %11569 = vmatmul.msk.bf16.vlgmr.msra.gmra.mxu1 %vm1563_vm13, %v12042_v46 }
 0xf25   : > { %v7721_v2 = vpop.permute.xlu1 %7720 }
 0xf26   : > { %v7728_v59 = vsel %vm806_vm5, %v7721_v2, %v7723_v6  ;;  %v7725_v33 = vpop.permute.xlu0 %7724  ;;  %v7828_v21 = vpop.permute.xlu2 %7827 }
 0xf27   : > { %7680 = vmatpush.bf16.msrb.mxu1 %v7612_v53  ;;  %7786 = vmatpush.bf16.msra.mxu0 %v7725_v33  ;;  %v7729_v43 = vsel %vm806_vm5, %v7723_v6, %v7725_v33  ;;  %v15669_v6 = vpop.f32.mrf.mxu1 }
 0xf28   : > { %7748 = vmatpush.bf16.msrb.mxu2 %v7728_v59  ;;  %7767 = vmatpush.bf16.msrb.mxu3 %v7729_v43 }
 0xf2d   : > { %v7715_v63 = vpop.permute.xlu1 %7714 }
 0xf2e   : > { %v7719_v0 = vpop.permute.xlu0 %7718  ;;  %v7726_v37 = vsel %vm806_vm5, %v7715_v63, %v7717_v20  ;;  %v7822_v60 = vpop.permute.xlu2 %7821 }
 0xf2f   : > { %7787 = vmatpush.bf16.msra.mxu0 %v7719_v0  ;;  %7749 = vmatpush.bf16.msrb.mxu2 %v7726_v37  ;;  %v7727_v56 = vsel %vm806_vm5, %v7717_v20, %v7719_v0  ;;  %v12051_v0 = vld [vmem:[%s16795_s4 + $0x338] sm:$0xff]  ;;  %v7447_v37 = vpop.f32.mrf.mxu1 }
 0xf30   : > { %7768 = vmatpush.bf16.msrb.mxu3 %v7727_v56 }
 0xf32   : > { %11568 = vmatmul.msk.bf16.gmra.mxu0 %vm1563_vm13, %v12043_v5  ;;  %11556 = vmatmul.msk.bf16.gmra.mxu2 %vm1563_vm13, %v15527_v28 }
 0xf33   : > { %11558 = vmatmul.msk.bf16.gmra.mxu3 %vm1563_vm13, %v15527_v28 }
 0xf34   : > { %11570 = vmatmul.msk.bf16.gmra.mxu1 %vm1563_vm13, %v12043_v5 }
 0xf35   : > { %v7826_v61 = vpop.permute.xlu1 %7825 }
 0xf36   : > { %v7824_v25 = vpop.permute.xlu0 %7823  ;;  %v8036_v44 = vpop.permute.xlu2 %8035 }
 0xf37   : > { %v7833_v40 = vsel %vm909_vm6, %v7822_v60, %v7824_v25  ;;  %v7834_v7 = vsel %vm909_vm6, %v7824_v25, %v7826_v61 }
 0xf3d   : > { %v7830_v39 = vpop.permute.xlu1 %7829 }
 0xf3e   : > { %v7935_v12 = vpop.permute.xlu0 %7934  ;;  %v7835_v18 = vsel %vm909_vm6, %v7828_v21, %v7830_v39  ;;  %v7836_v28 = vsel %vm909_vm6, %v7830_v39, %v7832_v45  ;;  %v8042_v55 = vpop.permute.xlu2 %8041 }
 0xf3f   : > { %7855 = vmatpush.bf16.msra.mxu1 %v7835_v18  ;;  %v15689_v21 = vpop.f32.mrf.mxu1  ;;  %v12052_v18 = vld [vmem:[%s16795_s4 + $0x340] sm:$0xff] }
 0xf42   : > { %11583 = vmatmul.msk.bf16.vlgmr.msrb.gmra.mxu0 %vm1563_vm13, %v12044_v29  ;;  %11571 = vmatmul.msk.bf16.vlgmr.msra.gmra.mxu2 %vm1563_vm13, %v12042_v46 }
 0xf43   : > { %11581 = vmatmul.msk.bf16.vlgmr.msra.gmra.mxu3 %vm1563_vm13, %v12044_v29  ;;  %7874 = vmatpush.bf16.msra.mxu2 %v7836_v28 }
 0xf44   : > { %11585 = vmatmul.msk.bf16.vlgmr.msrb.gmra.mxu1 %vm1563_vm13, %v12044_v29  ;;  %7893 = vmatpush.bf16.msra.mxu3 %v7832_v45 }
 0xf45   : > { %7856 = vmatpush.bf16.msra.mxu1 %v7833_v40  ;;  %v7937_v3 = vpop.permute.xlu1 %7936 }
 0xf46   : > { %v7929_v30 = vpop.permute.xlu0 %7928  ;;  %v7942_v22 = vsel %vm1012_vm7, %v7935_v12, %v7937_v3  ;;  %v8046_v13 = vpop.permute.xlu2 %8045 }
 0xf47   : > { %7962 = vmatpush.bf16.msrb.mxu0 %v7942_v22  ;;  %7875 = vmatpush.bf16.msra.mxu2 %v7834_v7 }
 0xf48   : > { %7894 = vmatpush.bf16.msra.mxu3 %v7826_v61 }
 0xf4d   : > { %v7931_v14 = vpop.permute.xlu1 %7930 }
 0xf4e   : > { %v7940_v52 = vsel %vm1012_vm7, %v7929_v30, %v7931_v14  ;;  %v8044_v9 = vpop.permute.xlu0 %8043  ;;  %v8151_v34 = vpop.permute.xlu2 %8150 }
 0xf4f   : > { %7963 = vmatpush.bf16.msrb.mxu0 %v7940_v52  ;;  %v8050_v50 = vsel %vm1115_vm8, %v8044_v9, %v8046_v13  ;;  %v8049_v47 = vsel %vm1115_vm8, %v8042_v55, %v8044_v9  ;;  %v12053_v9 = vld [vmem:[%s16795_s4 + $0x348] sm:$0xff] }
 0xf52   : > { %11584 = vmatmul.msk.bf16.gmra.mxu0 %vm1563_vm13, %v12045_v32  ;;  %11572 = vmatmul.msk.bf16.gmra.mxu2 %vm1563_vm13, %v12043_v5 }
 0xf53   : > { %11582 = vmatmul.msk.bf16.gmra.mxu3 %vm1563_vm13, %v12045_v32 }
 0xf54   : > { %11586 = vmatmul.msk.bf16.gmra.mxu1 %vm1563_vm13, %v12045_v32 }
 0xf55   : > { %v7939_v24 = vpop.permute.xlu1 %7938 }
 0xf56   : > { %v7943_v51 = vsel %vm1012_vm7, %v7937_v3, %v7939_v24  ;;  %v8038_v36 = vpop.permute.xlu0 %8037  ;;  %v8145_v46 = vpop.permute.xlu2 %8144 }
 0xf57   : > { %7981 = vmatpush.bf16.msrb.mxu1 %v7943_v51  ;;  %v8047_v1 = vsel %vm1115_vm8, %v8036_v44, %v8038_v36 }
 0xf5d   : > { %v7933_v27 = vpop.permute.xlu1 %7932 }
 0xf5e   : > { %v7941_v62 = vsel %vm1012_vm7, %v7931_v14, %v7933_v27  ;;  %v8040_v23 = vpop.permute.xlu0 %8039 }
 0xf5f   : > { %7982 = vmatpush.bf16.msrb.mxu1 %v7941_v62  ;;  %v8048_v26 = vsel %vm1115_vm8, %v8038_v36, %v8040_v23 }
 0xf62   : > { %11599 = vmatmul.msk.bf16.vlgmr.msra.gmra.mxu0 %vm1563_vm13, %v12046_v17  ;;  %11595 = vmatmul.msk.bf16.vlgmr.msrb.gmra.mxu2 %vm1563_vm13, %v12046_v17 }
 0xf63   : > { %8088 = vmatpush.bf16.msra.mxu0 %v8050_v50  ;;  %11597 = vmatmul.msk.bf16.vlgmr.msrb.gmra.mxu3 %vm1563_vm13, %v12046_v17 }
 0xf64   : > { %11609 = vmatmul.msk.bf16.vlgmr.msra.gmra.mxu1 %vm1563_vm13, %v12048_v8  ;;  %8000 = vmatpush.bf16.msrb.mxu2 %v7939_v24 }
 0xf65   : > { %8069 = vmatpush.bf16.msrb.mxu3 %v8049_v47  ;;  %8107 = vmatpush.bf16.msra.mxu1 %v8046_v13  ;;  %v8149_v15 = vpop.permute.xlu1 %8148 }
 0xf66   : > { %v8153_v58 = vpop.permute.xlu0 %8152  ;;  %v8156_v31 = vsel %vm17070_vm14, %v8149_v15, %v8151_v34 }
 0xf67   : > { %8089 = vmatpush.bf16.msra.mxu0 %v8048_v26  ;;  %v8157_v11 = vsel %vm17071_vm9, %v8151_v34, %v8153_v58  ;;  %v12054_v26 = vld [vmem:[%s16795_s4 + $0x350] sm:$0xff] }
 0xf68   : > { %8001 = vmatpush.bf16.msrb.mxu2 %v7933_v27 }
 0xf69   : > { %8070 = vmatpush.bf16.msrb.mxu3 %v8047_v1  ;;  %8108 = vmatpush.bf16.msra.mxu1 %v8040_v23 }
 0xf6d   : > { %v8143_v49 = vpop.permute.xlu1 %8142 }
 0xf6e   : > { %v8147_v53 = vpop.permute.xlu0 %8146  ;;  %v8154_v59 = vsel %vm17072_vm1, %v8143_v49, %v8145_v46 }
 0xf6f   : > { %v8155_v33 = vsel %vm17073_vm15, %v8145_v46, %v8147_v53 }
 0xf72   : > { %11600 = vmatmul.msk.bf16.gmra.mxu0 %vm1563_vm13, %v12047_v38  ;;  %11596 = vmatmul.msk.bf16.gmra.mxu2 %vm1563_vm13, %v12047_v38 }
 0xf73   : > { %11598 = vmatmul.msk.bf16.gmra.mxu3 %vm1563_vm13, %v12047_v38 }
 0xf74   : > { %11610 = vmatmul.msk.bf16.gmra.mxu1 %vm1563_vm13, %v12049_v41 }
 0xf7f   : > { %v7401_v57 = vpop.f32.mrf.mxu0 }
 0xf82   : > { %11623 = vmatmul.msk.bf16.vlgmr.msrb.gmra.mxu0 %vm1563_vm13, %v12050_v48  ;;  %11611 = vmatmul.msk.bf16.vlgmr.msra.gmra.mxu2 %vm1563_vm13, %v12048_v8 }
 0xf83   : > { %8214 = vmatpush.bf16.msrb.mxu0 %v8153_v58  ;;  %11613 = vmatmul.msk.bf16.vlgmr.msra.gmra.mxu3 %vm1563_vm13, %v12048_v8 }
 0xf84   : > { %8176 = vmatpush.bf16.msra.mxu2 %v8156_v31  ;;  %8195 = vmatpush.bf16.msra.mxu3 %v8157_v11 }
 0xf85   : > { %v7363_v54 = vpop.f32.mrf.mxu2  ;;  %11625 = vmatmul.msk.bf16.vlgmr.msrb.gmra.mxu1 %vm1563_vm13, %v12050_v48 }
 0xf86   : > { %v7443_v4 = vadd.f32 %v7442_v35, %v7363_v54  ;;  %v7382_v20 = vpop.f32.mrf.mxu3 }
 0xf87   : > { %8215 = vmatpush.bf16.msrb.mxu0 %v8147_v53  ;;  %v15672_v2 = vpop.f32.mrf.mxu0  ;;  %v12055_v53 = vld [vmem:[%s16795_s4 + $0x358] sm:$0xff] }
 0xf88   : > { %8177 = vmatpush.bf16.msra.mxu2 %v8154_v59  ;;  %8196 = vmatpush.bf16.msra.mxu3 %v8155_v33 }
 0xf8d   : > { %v15676_v43 = vpop.f32.mrf.mxu2 }
 0xf8e   : > { %v15678_v63 = vpop.f32.mrf.mxu3 }
 0xf8f   : > { %v7406_v5 = vpop.f32.mrf.mxu0 }
 0xf92   : > { %11624 = vmatmul.msk.bf16.gmra.mxu0 %vm1563_vm13, %v12051_v0  ;;  %11612 = vmatmul.msk.bf16.gmra.mxu2 %vm1563_vm13, %v12049_v41 }
 0xf93   : > { %11614 = vmatmul.msk.bf16.gmra.mxu3 %vm1563_vm13, %v12049_v41 }
 0xf95   : > { %v7368_v45 = vpop.f32.mrf.mxu2  ;;  %11626 = vmatmul.msk.bf16.gmra.mxu1 %vm1563_vm13, %v12051_v0 }
 0xf96   : > { %v7387_v56 = vpop.f32.mrf.mxu3  ;;  %v7448_v61 = vadd.f32 %v7447_v37, %v7368_v45 }
 0xf97   : > { %v15687_v25 = vpop.f32.mrf.mxu0 }
 0xf9d   : > { %v15691_v39 = vpop.f32.mrf.mxu2 }
 0xf9e   : > { %v15693_v12 = vpop.f32.mrf.mxu3 }
 0xf9f   : > { %v7537_v29 = vpop.f32.mrf.mxu0 }
 0xfa0   : > { %v7585_v60 = vadd.f32 %v7537_v29, %v7443_v4 }
 0xfa1   : > { %v7556_v28 = vpop.f32.mrf.mxu1 }
 0xfa2   : > { %11639 = vmatmul.msk.bf16.vlgmr.msra.gmra.mxu0 %vm1563_vm13, %v12052_v18  ;;  %11627 = vmatmul.msk.bf16.vlgmr.msrb.gmra.mxu2 %vm1563_vm13, %v12050_v48 }
 0xfa3   : > { %11637 = vmatmul.msk.bf16.vlgmr.msrb.gmra.mxu3 %vm1563_vm13, %v12052_v18 }
 0xfa5   : > { %v7461_v40 = vpop.f32.mrf.mxu2  ;;  %11641 = vmatmul.msk.bf16.vlgmr.msra.gmra.mxu1 %vm1563_vm13, %v12052_v18 }
 0xfa6   : > { %v7462_v3 = vadd.f32 %v7461_v40, %v7382_v20  ;;  %v7480_v30 = vpop.f32.mrf.mxu3 }
 0xfa7   : > { %v7481_v22 = vadd.f32 %v7480_v30, %v7401_v57  ;;  %v15702_v7 = vpop.f32.mrf.mxu0 }
 0xfa8   : > { %v7586_v44 = vadd.f32 %v7556_v28, %v7462_v3 }
 0xfa9   : > { %v15704_v14 = vpop.f32.mrf.mxu1 }
 0xfad   : > { %v15706_v52 = vpop.f32.mrf.mxu2 }
 0xfae   : > { %v15708_v32 = vpop.f32.mrf.mxu3 }
 0xfaf   : > { %v7542_v24 = vpop.f32.mrf.mxu0 }
 0xfb0   : > { %v7591_v51 = vadd.f32 %v7542_v24, %v7448_v61 }
 0xfb1   : > { %v7561_v55 = vpop.f32.mrf.mxu1 }
 0xfb2   : > { %11640 = vmatmul.msk.bf16.gmra.mxu0 %vm1563_vm13, %v12053_v9  ;;  %11628 = vmatmul.msk.bf16.gmra.mxu2 %vm1563_vm13, %v12051_v0 }
 0xfb3   : > { %11638 = vmatmul.msk.bf16.gmra.mxu3 %vm1563_vm13, %v12053_v9 }
 0xfb5   : > { %v7466_v36 = vpop.f32.mrf.mxu2  ;;  %11642 = vmatmul.msk.bf16.gmra.mxu1 %vm1563_vm13, %v12053_v9 }
 0xfb6   : > { %v7467_v27 = vadd.f32 %v7466_v36, %v7387_v56  ;;  %v7485_v62 = vpop.f32.mrf.mxu3 }
 0xfb7   : > { %v7486_v17 = vadd.f32 %v7485_v62, %v7406_v5  ;;  %v15717_v8 = vpop.f32.mrf.mxu0 }
 0xfb8   : > { %v7592_v13 = vadd.f32 %v7561_v55, %v7467_v27 }
 0xfb9   : > { %v15719_v50 = vpop.f32.mrf.mxu1 }
 0xfbd   : > { %v15721_v23 = vpop.f32.mrf.mxu2 }
 0xfbe   : > { %v15723_v47 = vpop.f32.mrf.mxu3 }
 0xfbf   : > { %v7663_v1 = vpop.f32.mrf.mxu0 }
 0xfc0   : > { %v7693_v38 = vadd.f32 %v7663_v1, %v7586_v44 }
 0xfc1   : > { %v7682_v41 = vpop.f32.mrf.mxu1 }
 0xfc2   : > { %11655 = vmatmul.msk.bf16.vlgmr.msrb.gmra.mxu0 %vm1563_vm13, %v12054_v26  ;;  %11651 = vmatmul.msk.bf16.vlgmr.msra.gmra.mxu2 %vm1563_vm13, %v12054_v26 }
 0xfc3   : > { %11653 = vmatmul.msk.bf16.vlgmr.msra.gmra.mxu3 %vm1563_vm13, %v12054_v26 }
 0xfc5   : > { %v7575_v35 = vpop.f32.mrf.mxu2 }
 0xfc6   : > { %v7587_v15 = vadd.f32 %v7575_v35, %v7481_v22  ;;  %v7644_v58 = vpop.f32.mrf.mxu3 }
 0xfc7   : > { %v7692_v34 = vadd.f32 %v7644_v58, %v7585_v60  ;;  %v15731_v48 = vpop.f32.mrf.mxu0 }
 0xfc8   : > { %v7694_v57 = vadd.f32 %v7682_v41, %v7587_v15 }
 0xfc9   : > { %v15733_v31 = vpop.f32.mrf.mxu1 }
 0xfcd   : > { %v15735_v11 = vpop.f32.mrf.mxu2 }
 0xfce   : > { %v15737_v49 = vpop.f32.mrf.mxu3 }
 0xfcf   : > { %v7668_v54 = vpop.f32.mrf.mxu0 }
 0xfd0   : > { %v7699_v46 = vadd.f32 %v7668_v54, %v7592_v13 }
 0xfd1   : > { %v7687_v4 = vpop.f32.mrf.mxu1 }
 0xfd2   : > { %11656 = vmatmul.msk.bf16.gmra.mxu0 %vm1563_vm13, %v12055_v53  ;;  %11652 = vmatmul.msk.bf16.gmra.mxu2 %vm1563_vm13, %v12055_v53 }
 0xfd3   : > { %11654 = vmatmul.msk.bf16.gmra.mxu3 %vm1563_vm13, %v12055_v53 }
 0xfd5   : > { %v7580_v20 = vpop.f32.mrf.mxu2 }
 0xfd6   : > { %v7593_v59 = vadd.f32 %v7580_v20, %v7486_v17  ;;  %v7649_v33 = vpop.f32.mrf.mxu3 }
 0xfd7   : > { %v7698_v0 = vadd.f32 %v7649_v33, %v7591_v51  ;;  %v15745_v37 = vpop.f32.mrf.mxu0 }
 0xfd8   : > { %v7700_v5 = vadd.f32 %v7687_v4, %v7593_v59 }
 0xfd9   : > { %v15747_v45 = vpop.f32.mrf.mxu1 }
 0xfdd   : > { %v15749_v56 = vpop.f32.mrf.mxu2 }
 0xfde   : > { %v15751_v61 = vpop.f32.mrf.mxu3 }
 0xfdf   : > { %v7789_v18 = vpop.f32.mrf.mxu0 }
 0xfe0   : > { %v7801_v29 = vadd.f32 %v7789_v18, %v7694_v57 }
 0xfe1   : > { %v7858_v60 = vpop.f32.mrf.mxu1 }
 0xfe5   : > { %v7751_v28 = vpop.f32.mrf.mxu2 }
 0xfe6   : > { %v7799_v40 = vadd.f32 %v7751_v28, %v7692_v34  ;;  %v7770_v3 = vpop.f32.mrf.mxu3 }
 0xfe7   : > { %v15753_v30 = vadd.f32 %v7770_v3, %v7693_v38  ;;  %v15755_v22 = vpop.f32.mrf.mxu0 }
 0xfe8   : > { %v7906_v44 = vadd.f32 %v7858_v60, %v7799_v40 }
 0xfe9   : > { %v15757_v9 = vpop.f32.mrf.mxu1 }
 0xfed   : > { %v15759_v24 = vpop.f32.mrf.mxu2 }
 0xfee   : > { %v15761_v51 = vpop.f32.mrf.mxu3 }
 0xfef   : > { %v7794_v55 = vpop.f32.mrf.mxu0 }
 0xff0   : > { %v15763_v36 = vadd.f32 %v7794_v55, %v7700_v5  ;;  %v15801_v55 = vpop.permute.xlu1 %8251 }
 0xff1   : > { %v7863_v62 = vpop.f32.mrf.mxu1  ;;  %17083 = vst [vmem:[#allocation11_spill] sm:$0xff] %v15801_v55 }
 0xff5   : > { %v7756_v27 = vpop.f32.mrf.mxu2 }
 0xff6   : > { %v7805_v17 = vadd.f32 %v7756_v27, %v7698_v0  ;;  %v7775_v13 = vpop.f32.mrf.mxu3  ;;  %v15803_v27 = vpop.permute.xlu2 %8256 }
 0xff7   : > { %v15765_v26 = vadd.f32 %v7775_v13, %v7699_v46  ;;  %v15767_v1 = vpop.f32.mrf.mxu0  ;;  %17084 = vst [vmem:[#allocation8_spill] sm:$0xff] %v15803_v27 }
 0xff8   : > { %v7912_v38 = vadd.f32 %v7863_v62, %v7805_v17 }
 0xff9   : > { %v15775_v34 = vpop.f32.mrf.mxu1 }
 0xffa   : > { %17075 = vst [vmem:[#allocation26_spill] sm:$0xff] %v15775_v34 }
 0xffd   : > { %v15769_v41 = vpop.f32.mrf.mxu2 }
 0xffe   : > { %v15771_v35 = vpop.f32.mrf.mxu3  ;;  %v15817_v42 = vpop.permute.xlu2 %12155 }
 0xfff   : > { %17074 = vst [vmem:[#allocation25_spill] sm:$0xff] %v15771_v35  ;;  %v7965_v15 = vpop.f32.mrf.mxu0 }
0x1000   : > { %v15773_v58 = vadd.f32 %v7965_v15, %v7906_v44 }
0x1002   : > { %v7984_v46 = vpop.f32.mrf.mxu1 }
0x1005   : > { %v7877_v57 = vpop.f32.mrf.mxu2 }
0x1006   : > { %v7896_v53 = vpop.f32.mrf.mxu3 }
0x1007   : > { %v15777_v54 = vadd.f32 %v7896_v53, %v7801_v29  ;;  %v15779_v4 = vpop.f32.mrf.mxu0  ;;  %v15811_v53 = vpop.permute.xlu1 %12150 }
0x1009   : > { %17076 = vst [vmem:[#allocation28_spill] sm:$0xff] %v15777_v54 }
0x100a   : > { %v15789_v18 = vpop.f32.mrf.mxu1 }
0x100d   : > { %v15781_v20 = vpop.f32.mrf.mxu2 }
0x100e   : > { %v15783_v59 = vpop.f32.mrf.mxu3 }
0x100f   : > { %17077 = vst [vmem:[#allocation27_spill] sm:$0xff] %v15783_v59  ;;  %v7970_v33 = vpop.f32.mrf.mxu0  ;;  %v12161_v59 = vpop.permute.xlu2 %12160 }
0x1010   : > { %v15785_v0 = vadd.f32 %v7970_v33, %v7912_v38  ;;  %v12146_v38 = vpop.permute.xlu0 %12145  ;;  %v12163_v34 = vunpack.i.h.bf16 %v12161_v59 }
0x1011   : > { %v12148_v10 = vunpack.i.h.bf16 %v12146_v38  ;;  %v12147_v35 = vunpack.i.l.bf16 %v12146_v38 }
0x1012   : > { %17078 = vst [vmem:[#allocation10_spill] sm:$0xff] %v15785_v0  ;;  %v15799_v44 = vpop.f32.mrf.mxu1 }
0x1013   : > { %17082 = vst [vmem:[#allocation14_spill] sm:$0xff] %v15799_v44 }
0x1015   : > { %v15787_v5 = vpop.f32.mrf.mxu2 }
0x1016   : > { %v15791_v60 = vpop.f32.mrf.mxu3 }
0x1017   : > { %v15793_v28 = vpop.f32.mrf.mxu0 }
0x1018   : > { %17079 = vst [vmem:[#allocation30_spill] sm:$0xff] %v15793_v28  ;;  %v15821_v0 = vpop.permute.xlu0 %8241 }
0x101a   : > { %v15809_v15 = vpop.f32.mrf.mxu1 }
0x101b   : > { %17086 = vst [vmem:[#allocation17_spill] sm:$0xff] %v15809_v15 }
0x101d   : > { %v15795_v29 = vpop.f32.mrf.mxu2 }
0x101e   : > { %17080 = vst [vmem:[#allocation24_spill] sm:$0xff] %v15795_v29  ;;  %v15797_v40 = vpop.f32.mrf.mxu3  ;;  %v15825_v29 = vpop.permute.xlu1 %8246 }
0x101f   : > { %17081 = vst [vmem:[#allocation19_spill] sm:$0xff] %v15797_v40  ;;  %v8091_v3 = vpop.f32.mrf.mxu0  ;;  %v12152_v40 = vunpack.i.l.bf16 %v15811_v53 }
0x1020   : > { %17090 = vst [vmem:[#allocation31_spill] sm:$0xff] %v15825_v29  ;;  %v15831_v19 = vpop.permute.xlu0 %12165 }
0x1022   : > { %v15823_v27 = vpop.f32.mrf.mxu1 }
0x1023   : > { %17089 = vst [vmem:[#allocation20_spill] sm:$0xff] %v15823_v27  ;;  %v7445_v27 = vadd.f32 %v15669_v6, %v15676_v43 }
0x1025   : > { %v15805_v62 = vpop.f32.mrf.mxu2 }
0x1026   : > { %17085 = vst [vmem:[#allocation21_spill] sm:$0xff] %v15805_v62  ;;  %v8072_v17 = vpop.f32.mrf.mxu3 }
0x1027   : > { %v15807_v13 = vpop.f32.mrf.mxu0 }
0x102a   : > { %v15839_v29 = vpop.f32.mrf.mxu1 }
0x102b   : > { %17093 = vst [vmem:[#allocation16_spill] sm:$0xff] %v15839_v29  ;;  %v8120_v29 = vadd.f32 %v8072_v17, %v15773_v58 }
0x102d   : > { %v15813_v33 = vpop.f32.mrf.mxu2 }
0x102e   : > { %17087 = vst [vmem:[#allocation7_spill] sm:$0xff] %v15813_v33  ;;  %v15815_v16 = vpop.f32.mrf.mxu3  ;;  %v12162_v33 = vunpack.i.l.bf16 %v12161_v59  ;;  %v7907_v59 = vadd.f32 %v7877_v57, %v15753_v30  ;;  %v7483_v57 = vadd.f32 %v15708_v32, %v15672_v2  ;;  %v15873_v2 = vsel %vm806_vm5, %v12148_v10, %v12152_v40 }
0x102f   : > { %v15819_v28 = vpop.f32.mrf.mxu0 }
0x1030   : > { %17088 = vst [vmem:[#allocation29_spill] sm:$0xff] %v15819_v28  ;;  %v7464_v28 = vadd.f32 %v15706_v52, %v15678_v63  ;;  %v7588_v63 = vadd.f32 %v15702_v7, %v7445_v27  ;;  %v12167_v52 = vunpack.i.l.bf16 %v15831_v19  ;;  %v8327_v43 = vsel %vm806_vm5, %v12162_v33, %v12163_v34 }
0x1031   : > { %v7469_v7 = vadd.f32 %v15721_v23, %v15693_v12  ;;  %v8014_v27 = vadd.f32 %v7984_v46, %v7907_v59  ;;  %v7590_v32 = vadd.f32 %v15735_v11, %v7483_v57 }
0x1032   : > { %v7589_v6 = vadd.f32 %v15704_v14, %v7464_v28  ;;  %v7695_v38 = vadd.f32 %v15737_v49, %v7588_v63  ;;  %v7488_v14 = vadd.f32 %v15723_v47, %v15687_v25  ;;  %v7450_v49 = vadd.f32 %v15689_v21, %v15691_v39 }
0x1033   : > { %v8121_v23 = vadd.f32 %v8091_v3, %v8014_v27  ;;  %v7914_v39 = vadd.f32 %v15791_v60, %v15763_v36 }
0x1034   : > { %v7696_v28 = vadd.f32 %v15731_v48, %v7589_v6  ;;  %v7802_v33 = vadd.f32 %v15759_v24, %v7695_v38  ;;  %v7596_v12 = vadd.f32 %v15749_v56, %v7488_v14  ;;  %v7595_v56 = vadd.f32 %v15719_v50, %v7469_v7 }
0x1035   : > { %v8008_v55 = vpop.f32.mrf.mxu2  ;;  %v7594_v59 = vadd.f32 %v15717_v8, %v7450_v49  ;;  %v7697_v38 = vadd.f32 %v15733_v31, %v7590_v32 }
0x1036   : > { %v15827_v44 = vpop.f32.mrf.mxu3  ;;  %v7803_v25 = vadd.f32 %v15761_v51, %v7696_v28  ;;  %v7909_v21 = vadd.f32 %v15757_v9, %v7802_v33  ;;  %v7702_v63 = vadd.f32 %v15745_v37, %v7595_v56  ;;  %v7703_v50 = vadd.f32 %v15747_v45, %v7596_v12  ;;  %v17104_v56 = vld [vmem:[#allocation27_spill] sm:$0xff] }
0x1037   : > { %17091 = vst [vmem:[#allocation9_spill] sm:$0xff] %v15827_v44  ;;  %v15829_v15 = vpop.f32.mrf.mxu0  ;;  %v7701_v6 = vadd.f32 %v15751_v61, %v7594_v59  ;;  %v7804_v57 = vadd.f32 %v15755_v22, %v7697_v38  ;;  %v7913_v61 = vadd.f32 %v15787_v5, %v15765_v26  ;;  %v17096_v22 = vld [vmem:[#allocation19_spill] sm:$0xff]  ;;  %v17100_v26 = vld [vmem:[#allocation25_spill] sm:$0xff] }
0x1038   : > { %17092 = vst [vmem:[#allocation13_spill] sm:$0xff] %v15829_v15  ;;  %v15843_v15 = vpop.permute.xlu1 %12170  ;;  %v7910_v51 = vadd.f32 %v15781_v20, %v7803_v25  ;;  %v8016_v8 = vadd.f32 %v15779_v4, %v7909_v21  ;;  %v7810_v36 = vadd.f32 %v15767_v1, %v7703_v50  ;;  %v17099_v25 = vld [vmem:[#allocation22_spill] sm:$0xff]  ;;  %v7809_v5 = vadd.f32 %v17100_v26, %v7702_v63  ;;  %v17106_v38 = vld [vmem:[#allocation11_spill] sm:$0xff] }
0x1039   : > { %v12172_v30 = vunpack.i.l.bf16 %v15843_v15  ;;  %v17095_v46 = vunpack.i.h.bf16 %v15843_v15  ;;  %v7808_v31 = vadd.f32 %v15769_v41, %v7701_v6  ;;  %v17098_v41 = vld [vmem:[#allocation21_spill] sm:$0xff]  ;;  %v17105_v21 = vld [vmem:[#allocation14_spill] sm:$0xff] }
0x103a   : > { %v8017_v60 = vadd.f32 %v15789_v18, %v7910_v51  ;;  %v8123_v37 = vadd.f32 %v15815_v16, %v8016_v8  ;;  %v7917_v14 = vadd.f32 %v17096_v22, %v7810_v36  ;;  %v7911_v51 = vadd.f32 %v17104_v56, %v7804_v57  ;;  %v17108_v8 = vld [vmem:[#allocation20_spill] sm:$0xff] }
0x103b   : > { %v8330_v11 = vsel %vm806_vm5, %v12172_v30, %v17095_v46  ;;  %v17116_v56 = vld [vmem:[#allocation8_spill] sm:$0xff] }
0x103c   : > { %v8124_v4 = vadd.f32 %v15807_v13, %v8017_v60  ;;  %v17101_v13 = vld [vmem:[#allocation31_spill] sm:$0xff] }
0x103d   : > { %v15835_v62 = vpop.f32.mrf.mxu2 }
0x103e   : > { %v15841_v44 = vpop.f32.mrf.mxu3  ;;  %v17111_v57 = vld [vmem:[#allocation9_spill] sm:$0xff] }
0x103f   : > { %17094 = vst [vmem:[#allocation32_spill] sm:$0xff] %v15841_v44  ;;  %v15846_v54 = vpop.f32.mrf.mxu0  ;;  %v15855_v44 = vsel %vm806_vm5, %v12147_v35, %v12148_v10  ;;  %v12168_v35 = vunpack.i.h.bf16 %v15831_v19  ;;  %v8328_v10 = vsel %vm806_vm5, %v12163_v34, %v12167_v52 }
0x1041   : > { %v8329_v48 = vsel %vm806_vm5, %v12168_v35, %v12172_v30  ;;  %v8021_v30 = vadd.f32 %v8008_v55, %v7914_v39  ;;  %v17097_v35 = vld [vmem:[#allocation28_spill] sm:$0xff]  ;;  %v8020_v39 = vadd.f32 %v17105_v21, %v7913_v61  ;;  %v17117_v21 = vld [vmem:[#allocation17_spill] sm:$0xff] }
0x1042   : > { %v8015_v33 = vadd.f32 %v17098_v41, %v17097_v35 }
0x1045   : > { %v8179_v47 = vpop.f32.mrf.mxu2 }
0x1046   : > { %v8227_v24 = vadd.f32 %v8179_v47, %v8120_v29  ;;  %v8198_v58 = vpop.f32.mrf.mxu3  ;;  %v8115_v29 = vpop.f32.mrf.mxu1 }
0x1047   : > { %v8228_v3 = vadd.f32 %v8198_v58, %v8121_v23  ;;  %v15889_v17 = vpop.f32.mrf.mxu0  ;;  %v8128_v1 = vadd.f32 %v8115_v29, %v8021_v30  ;;  %v8122_v30 = vadd.f32 %v17108_v8, %v8015_v33 }
0x1048   : > { %v8259_v34 = vadd.f32 %v15821_v0, %v8227_v24  ;;  %v17102_v24 = vld [vmem:[#allocation23_spill] sm:$0xff] }
0x1049   : > { %v8260_v20 = vadd.f32 %v15821_v0, %v8228_v3  ;;  %v8024_v3 = vadd.f32 %v15835_v62, %v7917_v14  ;;  %v8229_v26 = vadd.f32 %v15846_v54, %v8122_v30 }
0x104a   : > { %v8347_v9 = vadd.f32 %v8327_v43, %v8259_v34 }
0x104b   : > { %v8348_v7 = vadd.f32 %v8328_v10, %v8260_v20  ;;  %v17103_v10 = vld [vmem:[#allocation26_spill] sm:$0xff]  ;;  %v17107_v20 = vld [vmem:[#allocation24_spill] sm:$0xff] }
0x104c   : > { %vm8359_vm0 = vcmp.ge.f32.partialorder %v8347_v9, 0.0  ;;  %v8371_v45 = vmul.f32 0.01, %v8347_v9  ;;  %v7915_v46 = vadd.f32 %v17103_v10, %v7808_v31  ;;  %v7916_v6 = vadd.f32 %v17107_v20, %v7809_v5 }
0x104d   : > { %vm8360_vm14 = vcmp.ge.f32.partialorder %v8348_v7, 0.0  ;;  %v8372_v55 = vmul.f32 0.01, %v8348_v7  ;;  %v8181_v43 = vpop.f32.mrf.mxu2 }
0x104e   : > { %v8383_v28 = vsel %vm8359_vm0, %v8347_v9, %v8371_v45  ;;  %v8230_v18 = vadd.f32 %v8181_v43, %v8123_v37  ;;  %v8200_v27 = vpop.f32.mrf.mxu3  ;;  %v8117_v29 = vpop.f32.mrf.mxu1  ;;  %v17109_v9 = vld [vmem:[#allocation7_spill] sm:$0xff] }
0x104f   : > { %v8384_v16 = vsel %vm8360_vm14, %v8348_v7, %v8372_v55  ;;  %v8231_v32 = vadd.f32 %v8200_v27, %v8124_v4  ;;  %v8222_v12 = vpop.f32.mrf.mxu0  ;;  %v8395_v23 = vmul.f32 %v8383_v28, %v17099_v25  ;;  %v8018_v36 = vadd.f32 %v17109_v9, %v7911_v51  ;;  %v17110_v7 = vld [vmem:[#allocation10_spill] sm:$0xff] }
0x1050   : > { %v8262_v47 = vadd.f32 %v17101_v13, %v8230_v18  ;;  %v8235_v49 = vadd.f32 %v8222_v12, %v8128_v1  ;;  %v8396_v58 = vmul.f32 %v8384_v16, %v17102_v24  ;;  %v8126_v31 = vadd.f32 %v17111_v57, %v17110_v7  ;;  %v17113_v1 = vld [vmem:[#allocation16_spill] sm:$0xff]  ;;  %v17114_v12 = vld [vmem:[#allocation30_spill] sm:$0xff] }
0x1051   : > { %v8263_v59 = vadd.f32 %v17101_v13, %v8231_v32  ;;  %v8131_v61 = vadd.f32 %v8117_v29, %v8024_v3  ;;  %v8125_v28 = vadd.f32 %v17113_v1, %v8018_v36 }
0x1052   : > { %v8350_v34 = vadd.f32 %v8329_v48, %v8262_v47  ;;  %v8267_v50 = vadd.f32 %v17106_v38, %v8235_v49  ;;  %v8407_v63 = vpack.c.bf16 %v8396_v58, %v8395_v23  ;;  %v17112_v48 = vld [vmem:[#allocation29_spill] sm:$0xff]  ;;  %v8022_v23 = vadd.f32 %v17114_v12, %v7915_v46  ;;  %v17115_v47 = vld [vmem:[#allocation12_spill] sm:$0xff] }
0x1053   : > { %v8351_v60 = vadd.f32 %v8330_v11, %v8263_v59  ;;  %v8127_v45 = vadd.f32 %v17112_v48, %v8020_v39  ;;  %v8232_v58 = vadd.f32 %v15889_v17, %v8125_v28  ;;  %v12157_v59 = vunpack.i.l.bf16 %v15817_v42 }
0x1054   : > { %vm8362_vm9 = vcmp.ge.f32.partialorder %v8350_v34, 0.0  ;;  %v8374_v62 = vmul.f32 0.01, %v8350_v34  ;;  %v8355_v37 = vadd.f32 %v12152_v40, %v8267_v50  ;;  %8423 = vrot.lane.b32.xlu0 %v8407_v63, %s12221_s21  ;;  %v8023_v39 = vadd.f32 %v17117_v21, %v7916_v6 }
0x1055   : > { %vm8363_vm1 = vcmp.ge.f32.partialorder %v8351_v60, 0.0  ;;  %v8375_v4 = vmul.f32 0.01, %v8351_v60  ;;  %v8184_v55 = vpop.f32.mrf.mxu2  ;;  %v17119_v50 = vunpack.i.h.bf16 %v15817_v42  ;;  %v12153_v17 = vunpack.i.h.bf16 %v15811_v53 }
0x1056   : > { %v8386_v43 = vsel %vm8362_vm9, %v8350_v34, %v8374_v62  ;;  %vm8367_vm15 = vcmp.ge.f32.partialorder %v8355_v37, 0.0  ;;  %v8379_v22 = vmul.f32 0.01, %v8355_v37  ;;  %v8233_v11 = vadd.f32 %v8184_v55, %v8126_v31  ;;  %v8203_v14 = vpop.f32.mrf.mxu3  ;;  %v17118_v34 = vld [vmem:[#allocation32_spill] sm:$0xff] }
0x1057   : > { %v8387_v18 = vsel %vm8363_vm1, %v8351_v60, %v8375_v4  ;;  %v8234_v27 = vadd.f32 %v8203_v14, %v8127_v45  ;;  %v8224_v35 = vpop.f32.mrf.mxu0  ;;  %v8398_v40 = vmul.f32 %v8386_v43, %v17099_v25  ;;  %v8129_v54 = vadd.f32 %v17118_v34, %v8022_v23 }
0x1058   : > { %v8265_v41 = vadd.f32 %v17106_v38, %v8233_v11  ;;  %v8238_v33 = vadd.f32 %v8224_v35, %v8131_v61  ;;  %v8391_v16 = vsel %vm8367_vm15, %v8355_v37, %v8379_v22  ;;  %v8399_v32 = vmul.f32 %v8387_v18, %v17102_v24 }
0x1059   : > { %v8266_v5 = vadd.f32 %v17106_v38, %v8234_v27  ;;  %v8403_v49 = vmul.f32 %v8391_v16, %v17115_v47  ;;  %v8261_v6 = vadd.f32 %v15821_v0, %v8229_v26  ;;  %v8333_v48 = vsel %vm806_vm5, %v12153_v17, %v12157_v59 }
0x105a   : > { %v8353_v10 = vadd.f32 %v15855_v44, %v8265_v41  ;;  %v8270_v51 = vadd.f32 %v17116_v56, %v8238_v33  ;;  %v8409_v3 = vpack.c.bf16 %v8399_v32, %v8398_v40  ;;  %v17120_v44 = vld [vmem:[#allocation13_spill] sm:$0xff]  ;;  %v17121_v0 = vmov %v17119_v50 }
0x105b   : > { %v8354_v29 = vadd.f32 %v15873_v2, %v8266_v5  ;;  %v8412_v46 = vpack.c.bf16 %v8403_v49, %v8403_v49  ;;  %v8130_v20 = vadd.f32 %v17120_v44, %v8023_v39  ;;  %v8264_v2 = vadd.f32 %v17101_v13, %v8232_v58 }
0x105c   : > { %vm8365_vm0 = vcmp.ge.f32.partialorder %v8353_v10, 0.0  ;;  %v8377_v38 = vmul.f32 0.01, %v8353_v10  ;;  %v8358_v63 = vadd.f32 %v17119_v50, %v8270_v51  ;;  %v8334_v13 = vsel %vm806_vm5, %v12157_v59, %v17121_v0 }
0x105d   : > { %vm8366_vm14 = vcmp.ge.f32.partialorder %v8354_v29, 0.0  ;;  %v8378_v8 = vmul.f32 0.01, %v8354_v29  ;;  %8433 = vrot.lane.b32.xlu1 %v8412_v46, %s12221_s21  ;;  %v8186_v30 = vpop.f32.mrf.mxu2  ;;  %v8349_v55 = vadd.f32 %v12167_v52, %v8261_v6  ;;  %v17122_v43 = vunpack.i.h.bf16 %v15843_v15 }
0x105e   : > { %v8389_v9 = vsel %vm8365_vm0, %v8353_v10, %v8377_v38  ;;  %v8236_v36 = vadd.f32 %v8186_v30, %v8129_v54  ;;  %v8205_v60 = vpop.f32.mrf.mxu3  ;;  %v8382_v57 = vmul.f32 0.01, %v8358_v63  ;;  %vm8370_vm9 = vcmp.ge.f32.partialorder %v8358_v63, 0.0 }
0x105f   : > { %v8390_v7 = vsel %vm8366_vm14, %v8354_v29, %v8378_v8  ;;  %v8237_v31 = vadd.f32 %v8205_v60, %v8130_v20  ;;  %v8401_v62 = vmul.f32 %v8389_v9, %v17099_v25  ;;  %v8352_v22 = vadd.f32 %v17122_v43, %v8264_v2 }
0x1060   : > { %v8268_v53 = vadd.f32 %v17116_v56, %v8236_v36  ;;  %v8402_v37 = vmul.f32 %v8390_v7, %v17102_v24  ;;  %v8394_v14 = vsel %vm8370_vm9, %v8358_v63, %v8382_v57  ;;  %v8373_v27 = vmul.f32 0.01, %v8349_v55 }
0x1061   : > { %v8269_v45 = vadd.f32 %v17116_v56, %v8237_v31  ;;  %v8406_v18 = vmul.f32 %v8394_v14, %v17115_v47  ;;  %v8376_v35 = vmul.f32 0.01, %v8352_v22  ;;  %vm8361_vm0 = vcmp.ge.f32.partialorder %v8349_v55, 0.0 }
0x1062   : > { %v8356_v61 = vadd.f32 %v8333_v48, %v8268_v53  ;;  %v8411_v4 = vpack.c.bf16 %v8402_v37, %v8401_v62  ;;  %vm8364_vm14 = vcmp.ge.f32.partialorder %v8352_v22, 0.0  ;;  %v8385_v33 = vsel %vm8361_vm0, %v8349_v55, %v8373_v27 }
0x1063   : > { %v8357_v11 = vadd.f32 %v8334_v13, %v8269_v45  ;;  %v8414_v40 = vpack.c.bf16 %v8406_v18, %v8406_v18  ;;  %v8388_v16 = vsel %vm8364_vm14, %v8352_v22, %v8376_v35  ;;  %v8397_v32 = vmul.f32 %v8385_v33, %v17115_v47  ;;  %v16084_v22 = vld [vmem:[%s16795_s4 + $0x360] sm:$0xff]  ;;  %v12064_v33 = vld [vmem:[%s16795_s4 + $0x370] sm:$0xff] }
0x1064   : > { %vm8368_vm1 = vcmp.ge.f32.partialorder %v8356_v61, 0.0  ;;  %v8380_v1 = vmul.f32 0.01, %v8356_v61  ;;  %8431 = vrot.lane.b32.xlu2 %v8411_v4, %s12221_s21  ;;  %v8400_v12 = vmul.f32 %v8388_v16, %v17115_v47  ;;  %vm17124_vm9 = vcmask 736256  }
0x1065   : > { %vm8369_vm15 = vcmp.ge.f32.partialorder %v8357_v11, 0.0  ;;  %v8381_v28 = vmul.f32 0.01, %v8357_v11  ;;  %8427 = vrot.lane.b32.xlu1 %v8409_v3, %s12221_s21  ;;  %v8408_v23 = vpack.c.bf16 %v8397_v32, %v8397_v32 }
0x1066   : > { %v8392_v42 = vsel %vm8368_vm1, %v8356_v61, %v8380_v1  ;;  %v8410_v26 = vpack.c.bf16 %v8400_v12, %v8400_v12  ;;  %v9502_v1 = vld [vmem:[#allocation2 + $0x18] sm:$0xff]  ;;  %vm17125_vm1 = vmmov %vm17124_vm9 }
0x1067   : > { %v8393_v19 = vsel %vm8369_vm15, %v8357_v11, %v8381_v28  ;;  %v8404_v52 = vmul.f32 %v8392_v42, %v17099_v25  ;;  %v9512_v35 = vunpack.c.l.bf16 %v9502_v1  ;;  %vm17126_vm15 = vmmov %vm17125_vm1 }
0x1068   : > { %v8405_v15 = vmul.f32 %v8393_v19, %v17102_v24  ;;  %v9513_v19 = vunpack.c.h.bf16 %v9502_v1  ;;  %v12066_v1 = vld [vmem:[%s16795_s4 + $0x380] sm:$0xff]  ;;  %vm17127_vm0 = vmmov %vm17125_vm1 }
0x106a   : > { %v8413_v41 = vpack.c.bf16 %v8405_v15, %v8404_v52  ;;  %v16106_v52 = vld [vmem:[%s16795_s4 + $0x368] sm:$0xff] }
0x106c   : > { %8437 = vrot.lane.b32.xlu2 %v8414_v40, %s12221_s21  ;;  %8435 = vrot.lane.b32.xlu0 %v8413_v41, %s12221_s21  ;;  %v12174_v41 = vpack.i.bf16 %v9513_v19, %v9512_v35 }
0x1074   : > { %8425 = vrot.lane.b32.xlu2 %v8408_v23, %s12221_s21  ;;  %8429 = vrot.lane.b32.xlu0 %v8410_v26, %s12221_s21  ;;  %v11695_v23 = vld [vmem:[%s16796_s5 + $0xd0] sm:$0xff]  ;;  %v11696_v26 = vld [vmem:[%s16796_s5 + $0xd8] sm:$0xff] }
0x10be   : > { %v8432_v5 = vpop.permute.xlu2 %8431 }
0x10bf   : > { %v8441_v49 = vrot.slane %v8432_v5, 4 }
0x10c1   : > { %v8447_v58 = vsel %vm1428_vm10, %v8441_v49, %v8432_v5  ;;  %v11693_v5 = vld [vmem:[%s16796_s5 + $0xc0] sm:$0xff] }
0x10c2   : > { %8463 = vst.msk [vmem:[#allocation6 + $0x18] sm:$0xff] %vm12803_vm11, %v8447_v58  ;;  %v9504_v58 = vld [vmem:[#allocation2 + $0x24] sm:$0xff] }
0x10c6   : > { %v8424_v56 = vpop.permute.xlu0 %8423  ;;  %v8438_v51 = vpop.permute.xlu2 %8437 }
0x10c7   : > { %v8439_v3 = vrot.slane %v8424_v56, 4 }
0x10c9   : > { %v8443_v59 = vsel %vm1428_vm10, %v8439_v3, %v8424_v56  ;;  %v12083_v9 = vld [vmem:[#allocation6 + $0x1c] sm:$0xf]  ;;  %v11719_v60 = vld [vmem:[#allocation6 + $0x18] sm:$0xf]  ;;  %v9505_v56 = vld [vmem:[#allocation2 + $0x2c] sm:$0xf] }
0x10ca   : > { %8459 = vst.msk [vmem:[#allocation6] sm:$0xff] %vm12803_vm11, %v8443_v59 }
0x10ce   : > { %v8426_v21 = vpop.permute.xlu2 %8425 }
0x10cf   : > { %v8444_v39 = vsel %vm1428_vm10, %v8439_v3, %v8426_v21  ;;  %v8434_v29 = vpop.permute.xlu1 %8433 }
0x10d0   : > { %8460 = vst.msk [vmem:[#allocation6 + $0x8] sm:$0xf] %vm1449_vm12, %v8444_v39  ;;  %v8448_v46 = vsel %vm1428_vm10, %v8441_v49, %v8434_v29  ;;  %v9503_v49 = vld [vmem:[#allocation2 + $0x20] sm:$0xf]  ;;  %v9500_v39 = vld [vmem:[#allocation2 + $0xc] sm:$0xff] }
0x10d1   : > { %8464 = vst.msk [vmem:[#allocation6 + $0x20] sm:$0xf] %vm1449_vm12, %v8448_v46  ;;  %v12080_v20 = vld [vmem:[#allocation6 + $0x4] sm:$0xf]  ;;  %v11707_v31 = vld [vmem:[#allocation6] sm:$0xf]  ;;  %v9514_v21 = vunpack.c.l.bf16 %v9503_v49 }
0x10d7   : > { %v8428_v34 = vpop.permute.xlu1 %8427  ;;  %v11715_v61 = vld [vmem:[#allocation6 + $0x8] sm:$0xf] }
0x10d8   : > { %v8440_v54 = vrot.slane %v8428_v34, 4  ;;  %v11727_v62 = vld [vmem:[#allocation6 + $0x20] sm:$0xf] }
0x10da   : > { %v8445_v38 = vsel %vm1428_vm10, %v8440_v54, %v8428_v34  ;;  %v9516_v34 = vunpack.c.h.bf16 %v9504_v58 }
0x10db   : > { %8461 = vst.msk [vmem:[#allocation6 + $0xc] sm:$0xff] %vm12803_vm11, %v8445_v38 }
0x10de   : > { %v8436_v50 = vpop.permute.xlu0 %8435 }
0x10df   : > { %v8442_v63 = vrot.slane %v8436_v50, 4 }
0x10e1   : > { %v8449_v17 = vsel %vm1428_vm10, %v8442_v63, %v8436_v50  ;;  %v8450_v44 = vsel %vm1428_vm10, %v8442_v63, %v8438_v51  ;;  %v9499_v51 = vld [vmem:[#allocation2 + $0x8] sm:$0xf]  ;;  %v9515_v63 = vunpack.c.l.bf16 %v9504_v58 }
0x10e2   : > { %v11709_v8 = vld [vmem:[#allocation6 + $0xc] sm:$0xf0]  ;;  %8465 = vst.msk [vmem:[#allocation6 + $0x24] sm:$0xff] %vm12803_vm11, %v8449_v17  ;;  %v12081_v36 = vld [vmem:[#allocation6 + $0x8] sm:$0xf0]  ;;  %v9508_v38 = vunpack.c.l.bf16 %v9499_v51  ;;  %v9509_v17 = vunpack.c.l.bf16 %v9500_v39 }
0x10e3   : > { %8466 = vst.msk [vmem:[#allocation6 + $0x2c] sm:$0xf] %vm1449_vm12, %v8450_v44  ;;  %v15995_v30 = vor.u32 %v12080_v20, %v11709_v8  ;;  %v11708_v0 = vor.u32 %v12081_v36, %v11707_v31  ;;  %v12179_v44 = vpack.i.bf16 %v9515_v63, %v9514_v21  ;;  %v12068_v58 = vld [vmem:[%s16795_s4 + $0x390] sm:$0xff] }
0x10e4   : > { %v12194_v8 = vpack.i.bf16 %v9509_v17, %v9508_v38 }
0x10e5   : > { %8555 = vrot.lane.b32.xlu0 %v15995_v30, %s12212_s11 }
0x10e6   : > { %v8430_v6 = vpop.permute.xlu0 %8429 }
0x10e7   : > { %v8446_v2 = vsel %vm1428_vm10, %v8440_v54, %v8430_v6  ;;  %v9517_v54 = vunpack.c.l.bf16 %v9505_v56  ;;  %v9498_v6 = vld [vmem:[#allocation2] sm:$0xff] }
0x10e8   : > { %8462 = vst.msk [vmem:[#allocation6 + $0x14] sm:$0xf] %vm1449_vm12, %v8446_v2 }
0x10e9   : > { %v11721_v7 = vld [vmem:[#allocation6 + $0x24] sm:$0xf0]  ;;  %v12084_v57 = vld [vmem:[#allocation6 + $0x20] sm:$0xf0]  ;;  %v12184_v20 = vpack.i.bf16 %v9517_v54, %v9516_v34 }
0x10ea   : > { %v12085_v53 = vld [vmem:[#allocation6 + $0x28] sm:$0xf0]  ;;  %v16001_v37 = vor.u32 %v12084_v57, %v11719_v60  ;;  %v16003_v48 = vor.u32 %v12083_v9, %v11721_v7  ;;  %v9506_v7 = vunpack.c.l.bf16 %v9498_v6  ;;  %v9507_v57 = vunpack.c.h.bf16 %v9498_v6 }
0x10eb   : > { %v16005_v45 = vor.u32 %v12085_v53, %v11727_v62  ;;  %v11694_v62 = vld [vmem:[%s16796_s5 + $0xc8] sm:$0xff] }
0x10ec   : > { %8666 = vmatpush.bf16.msra.mxu0 %v16001_v37  ;;  %8561 = vrot.lane.b32.xlu1 %v16003_v48, %s12212_s11  ;;  %v12189_v53 = vpack.i.bf16 %v9507_v57, %v9506_v7 }
0x10ed   : > { %8563 = vrot.lane.b32.xlu2 %v16005_v45, %s12212_s11  ;;  %8553 = vrot.lane.b32.xlu0 %v11708_v0, %s12212_s11 }
0x10ef   : > { %v12082_v13 = vld [vmem:[#allocation6 + $0x10] sm:$0xf0] }
0x10f0   : > { %8667 = vmatpush.bf16.msra.mxu0 %v11708_v0  ;;  %v16013_v4 = vor.u32 %v12082_v13, %v11715_v61  ;;  %v9510_v61 = vunpack.c.h.bf16 %v9500_v39 }
0x10f3   : > { %11743 = vmatmul.msk.bf16.vlgmr.msra.gmra.mxu0 %vm1563_vm13, %v16084_v22 }
0x10f4   : > { %8557 = vrot.lane.b32.xlu1 %v16013_v4, %s12212_s11 }
0x10f5   : > { %8559 = vrot.lane.b32.xlu2 %v16001_v37, %s12212_s11  ;;  %8727 = vrot.lane.b32.xlu0 %v11708_v0, %s12213_s12 }
0x10fc   : > { %8733 = vrot.lane.b32.xlu1 %v16001_v37, %s12213_s12 }
0x10fd   : > { %8735 = vrot.lane.b32.xlu2 %v16003_v48, %s12213_s12  ;;  %8842 = vrot.lane.b32.xlu0 %v16003_v48, %s12214_s13 }
0x1103   : > { %11744 = vmatmul.msk.bf16.gmra.mxu0 %vm1563_vm13, %v16106_v52 }
0x1104   : > { %8729 = vrot.lane.b32.xlu1 %v15995_v30, %s12213_s12 }
0x1105   : > { %8834 = vrot.lane.b32.xlu2 %v11708_v0, %s12214_s13  ;;  %8836 = vrot.lane.b32.xlu0 %v15995_v30, %s12214_s13 }
0x110c   : > { %8844 = vrot.lane.b32.xlu1 %v16005_v45, %s12214_s13 }
0x110d   : > { %8840 = vrot.lane.b32.xlu2 %v16001_v37, %s12214_s13  ;;  %8731 = vrot.lane.b32.xlu0 %v16013_v4, %s12213_s12 }
0x1114   : > { %8737 = vrot.lane.b32.xlu1 %v16005_v45, %s12213_s12 }
0x1115   : > { %8838 = vrot.lane.b32.xlu2 %v16013_v4, %s12214_s13  ;;  %8943 = vrot.lane.b32.xlu0 %v15995_v30, %s12215_s14 }
0x111c   : > { %8949 = vrot.lane.b32.xlu1 %v16003_v48, %s12215_s14 }
0x111d   : > { %8951 = vrot.lane.b32.xlu2 %v16005_v45, %s12215_s14  ;;  %8941 = vrot.lane.b32.xlu0 %v11708_v0, %s12215_s14 }
0x1124   : > { %8945 = vrot.lane.b32.xlu1 %v16013_v4, %s12215_s14 }
0x1125   : > { %8947 = vrot.lane.b32.xlu2 %v16001_v37, %s12215_s14  ;;  %9163 = vrot.lane.b32.xlu0 %v16003_v48, %s12217_s16 }
0x112c   : > { %9052 = vrot.lane.b32.xlu1 %v16013_v4, %s12216_s15 }
0x112d   : > { %9161 = vrot.lane.b32.xlu2 %v16001_v37, %s12217_s16  ;;  %9056 = vrot.lane.b32.xlu0 %v16003_v48, %s12216_s15 }
0x1134   : > { %9058 = vrot.lane.b32.xlu1 %v16005_v45, %s12216_s15 }
0x1135   : > { %9054 = vrot.lane.b32.xlu2 %v16001_v37, %s12216_s15  ;;  %9048 = vrot.lane.b32.xlu0 %v11708_v0, %s12216_s15 }
0x113c   : > { %9155 = vrot.lane.b32.xlu1 %v11708_v0, %s12217_s16 }
0x113d   : > { %9157 = vrot.lane.b32.xlu2 %v15995_v30, %s12217_s16  ;;  %9270 = vrot.lane.b32.xlu0 %v16003_v48, %s12218_s17 }
0x1144   : > { %9050 = vrot.lane.b32.xlu1 %v15995_v30, %s12216_s15 }
0x1145   : > { %9262 = vrot.lane.b32.xlu2 %v11708_v0, %s12218_s17  ;;  %9264 = vrot.lane.b32.xlu0 %v15995_v30, %s12218_s17 }
0x1147   : > { %v8564_v55 = vpop.permute.xlu2 %8563 }
0x1148   : > { %8625 = vmatpush.bf16.msrb.mxu3 %v8564_v55 }
0x114c   : > { %9272 = vrot.lane.b32.xlu1 %v16005_v45, %s12218_s17 }
0x114d   : > { %9268 = vrot.lane.b32.xlu2 %v16001_v37, %s12218_s17  ;;  %9159 = vrot.lane.b32.xlu0 %v16013_v4, %s12217_s16 }
0x114f   : > { %v8560_v43 = vpop.permute.xlu2 %8559 }
0x1154   : > { %9165 = vrot.lane.b32.xlu1 %v16005_v45, %s12217_s16 }
0x1155   : > { %9266 = vrot.lane.b32.xlu2 %v16013_v4, %s12218_s17  ;;  %9371 = vrot.lane.b32.xlu0 %v15995_v30, %s12219_s18 }
0x1157   : > { %v8556_v11 = vpop.permute.xlu0 %8555  ;;  %v16094_v14 = vpop.permute.xlu2 %8735 }
0x115c   : > { %9377 = vrot.lane.b32.xlu1 %v16003_v48, %s12219_s18 }
0x115d   : > { %9379 = vrot.lane.b32.xlu2 %v16005_v45, %s12219_s18  ;;  %9369 = vrot.lane.b32.xlu0 %v11708_v0, %s12219_s18 }
0x115e   : > { %v8562_v28 = vpop.permute.xlu1 %8561 }
0x115f   : > { %v8567_v42 = vsel %vm425_vm3, %v8560_v43, %v8562_v28  ;;  %v8568_v18 = vsel %vm425_vm3, %v8562_v28, %v8564_v55  ;;  %v8554_v27 = vpop.permute.xlu0 %8553  ;;  %v8835_v15 = vpop.permute.xlu2 %8834 }
0x1160   : > { %8587 = vmatpush.bf16.msrb.mxu1 %v8567_v42  ;;  %8606 = vmatpush.bf16.msrb.mxu2 %v8568_v18  ;;  %v8565_v40 = vsel %vm425_vm3, %v8554_v27, %v8556_v11 }
0x1164   : > { %9373 = vrot.lane.b32.xlu1 %v16013_v4, %s12219_s18  ;;  %8588 = vmatpush.bf16.msrb.mxu1 %v8565_v40 }
0x1165   : > { %9375 = vrot.lane.b32.xlu2 %v16001_v37, %s12219_s18  ;;  %12175 = vrot.lane.b32.xlu0 %v12174_v41, %s12215_s14  ;;  %v9501_v37 = vld [vmem:[#allocation2 + $0x14] sm:$0xf] }
0x1166   : > { %v8558_v16 = vpop.permute.xlu1 %8557 }
0x1167   : > { %11729 = vmatmul.msk.bf16.vlgmr.msrb.gmra.mxu1 %vm1563_vm13, %v12064_v33  ;;  %8626 = vmatpush.bf16.msrb.mxu3 %v8558_v16  ;;  %v8728_v32 = vpop.permute.xlu0 %8727  ;;  %v8566_v12 = vsel %vm425_vm3, %v8556_v11, %v8558_v16  ;;  %v8841_v3 = vpop.permute.xlu2 %8840 }
0x1168   : > { %8685 = vmatpush.bf16.msra.mxu1 %v16003_v48  ;;  %8607 = vmatpush.bf16.msrb.mxu2 %v8566_v12 }
0x116a   : > { %11733 = vmatmul.msk.bf16.vlgmr.msrb.gmra.mxu3 %vm1563_vm13, %v12064_v33 }
0x116b   : > { %11731 = vmatmul.msk.bf16.vlgmr.msrb.gmra.mxu2 %vm1563_vm13, %v12064_v33  ;;  %v12067_v33 = vld [vmem:[%s16795_s4 + $0x388] sm:$0xff] }
0x116c   : > { %8704 = vmatpush.bf16.msra.mxu2 %v16005_v45  ;;  %8686 = vmatpush.bf16.msra.mxu1 %v15995_v30  ;;  %v12065_v30 = vld [vmem:[%s16795_s4 + $0x378] sm:$0xff]  ;;  %v9511_v45 = vunpack.c.l.bf16 %v9501_v37 }
0x116d   : > { %9478 = vperm.xlu1 %12112, %v11695_v23   ;;  %9483 = vperm.xlu2 %12113, %v11696_v26  }
0x116e   : > { %9468 = vperm.xlu0 %12111, %v11693_v5   ;;  %v8734_v59 = vpop.permute.xlu1 %8733  ;;  %v12199_v55 = vpack.i.bf16 %v9511_v45, %v9510_v61 }
0x116f   : > { %v8741_v29 = vsel %vm600_vm2, %v8734_v59, %v16094_v14  ;;  %v8843_v46 = vpop.permute.xlu0 %8842  ;;  %v8839_v9 = vpop.permute.xlu2 %8838 }
0x1170   : > { %8705 = vmatpush.bf16.msra.mxu2 %v16013_v4  ;;  %v8848_v50 = vsel %vm703_vm4, %v8841_v3, %v8843_v46  ;;  %8761 = vmatpush.bf16.msra.mxu3 %v8741_v29 }
0x1174   : > { %8868 = vmatpush.bf16.msrb.mxu2 %v8848_v50 }
0x1175   : > { %12180 = vrot.lane.b32.xlu1 %v12179_v44, %s12215_s14  ;;  %12185 = vrot.lane.b32.xlu2 %v12184_v20, %s12215_s14  ;;  %v12070_v44 = vld [vmem:[%s16795_s4 + $0x3a0] sm:$0xff] }
0x1176   : > { %12195 = vrot.lane.b32.xlu0 %v12194_v8, %s12215_s14  ;;  %v8730_v2 = vpop.permute.xlu1 %8729 }
0x1177   : > { %11730 = vmatmul.msk.bf16.gmra.mxu1 %vm1563_vm13, %v12065_v30  ;;  %v8837_v36 = vpop.permute.xlu0 %8836  ;;  %v8739_v60 = vsel %vm600_vm2, %v8728_v32, %v8730_v2  ;;  %v8952_v4 = vpop.permute.xlu2 %8951 }
0x1178   : > { %8762 = vmatpush.bf16.msra.mxu3 %v8739_v60  ;;  %v8846_v31 = vsel %vm703_vm4, %v8835_v15, %v8837_v36  ;;  %v8847_v43 = vsel %vm703_vm4, %v8837_v36, %v8839_v9 }
0x1179   : > { %8869 = vmatpush.bf16.msrb.mxu2 %v8846_v31  ;;  %v12071_v31 = vld [vmem:[%s16795_s4 + $0x3a8] sm:$0xff] }
0x117a   : > { %11734 = vmatmul.msk.bf16.gmra.mxu3 %vm1563_vm13, %v12065_v30 }
0x117b   : > { %11732 = vmatmul.msk.bf16.gmra.mxu2 %vm1563_vm13, %v12065_v30 }
0x117d   : > { %9473 = vperm.xlu1 %12112, %v11694_v62   ;;  %12190 = vrot.lane.b32.xlu2 %v12189_v53, %s12215_s14  ;;  %v12073_v62 = vld [vmem:[%s16795_s4 + $0x3b8] sm:$0xff] }
0x117e   : > { %v8845_v48 = vpop.permute.xlu1 %8844 }
0x117f   : > { %v8849_v0 = vsel %vm703_vm4, %v8843_v46, %v8845_v48  ;;  %v8732_v13 = vpop.permute.xlu0 %8731  ;;  %v8948_v18 = vpop.permute.xlu2 %8947  ;;  %v12069_v46 = vld [vmem:[%s16795_s4 + $0x398] sm:$0xff] }
0x1180   : > { %8887 = vmatpush.bf16.msrb.mxu3 %v8849_v0  ;;  %v8740_v27 = vsel %vm600_vm2, %v8730_v2, %v8732_v13 }
0x1184   : > { %8888 = vmatpush.bf16.msrb.mxu3 %v8847_v43 }
0x1185   : > { %12200 = vrot.lane.b32.xlu1 %v12199_v55, %s12215_s14 }
0x1186   : > { %v8738_v11 = vpop.permute.xlu1 %8737 }
0x1187   : > { %v8742_v28 = vsel %vm600_vm2, %v16094_v14, %v8738_v11  ;;  %11745 = vmatmul.msk.bf16.vlgmr.msra.gmra.mxu1 %vm1563_vm13, %v16084_v22  ;;  %v8944_v42 = vpop.permute.xlu0 %8943 }
0x1188   : > { %8799 = vmatpush.bf16.msrb.mxu1 %v8738_v11  ;;  %8780 = vmatpush.bf16.msrb.mxu0 %v8742_v28 }
0x118a   : > { %11757 = vmatmul.msk.bf16.vlgmr.msra.gmra.mxu3 %vm1563_vm13, %v12066_v1 }
0x118b   : > { %9013 = vmatpush.bf16.msra.mxu3 %v8952_v4  ;;  %11747 = vmatmul.msk.bf16.vlgmr.msra.gmra.mxu2 %vm1563_vm13, %v16084_v22  ;;  %v9162_v22 = vpop.permute.xlu2 %9161 }
0x118c   : > { %8800 = vmatpush.bf16.msrb.mxu1 %v8732_v13  ;;  %8781 = vmatpush.bf16.msrb.mxu0 %v8740_v27 }
0x118e   : > { %v8950_v35 = vpop.permute.xlu1 %8949 }
0x118f   : > { %v8955_v14 = vsel %vm806_vm5, %v8948_v18, %v8950_v35  ;;  %v8956_v19 = vsel %vm806_vm5, %v8950_v35, %v8952_v4  ;;  %11759 = vmatmul.msk.bf16.vlgmr.msrb.gmra.mxu0 %vm1563_vm13, %v12066_v1  ;;  %v8942_v15 = vpop.permute.xlu0 %8941  ;;  %v12074_v4 = vld [vmem:[%s16795_s4 + $0x3c0] sm:$0xff] }
0x1190   : > { %8906 = vmatpush.bf16.msra.mxu0 %v8845_v48  ;;  %8975 = vmatpush.bf16.msra.mxu1 %v8955_v14  ;;  %v8953_v40 = vsel %vm806_vm5, %v8942_v15, %v8944_v42  ;;  %v8669_v48 = vpop.f32.mrf.mxu0 }
0x1191   : > { %8994 = vmatpush.bf16.msra.mxu2 %v8956_v19 }
0x1193   : > { %v9055_v23 = vpop.permute.xlu2 %9054 }
0x1194   : > { %8907 = vmatpush.bf16.msra.mxu0 %v8839_v9  ;;  %8976 = vmatpush.bf16.msra.mxu1 %v8953_v40  ;;  %v12072_v9 = vld [vmem:[%s16795_s4 + $0x3b0] sm:$0xff] }
0x1196   : > { %v8946_v41 = vpop.permute.xlu1 %8945 }
0x1197   : > { %11746 = vmatmul.msk.bf16.gmra.mxu1 %vm1563_vm13, %v16106_v52  ;;  %9014 = vmatpush.bf16.msra.mxu3 %v8946_v41  ;;  %v9164_v16 = vpop.permute.xlu0 %9163  ;;  %v8954_v32 = vsel %vm806_vm5, %v8944_v42, %v8946_v41 }
0x1198   : > { %8995 = vmatpush.bf16.msra.mxu2 %v8954_v32  ;;  %v16234_v11 = vpop.f32.mrf.mxu0 }
0x119a   : > { %11758 = vmatmul.msk.bf16.gmra.mxu3 %vm1563_vm13, %v12067_v33 }
0x119b   : > { %11748 = vmatmul.msk.bf16.gmra.mxu2 %vm1563_vm13, %v16106_v52  ;;  %v9169_v52 = vsel %vm1012_vm7, %v9162_v22, %v9164_v16  ;;  %v9158_v3 = vpop.permute.xlu2 %9157 }
0x119e   : > { %v9053_v12 = vpop.permute.xlu1 %9052 }
0x119f   : > { %11760 = vmatmul.msk.bf16.gmra.mxu0 %vm1563_vm13, %v12067_v33  ;;  %v9057_v26 = vpop.permute.xlu0 %9056 }
0x11a0   : > { %v9062_v5 = vsel %vm909_vm6, %v9055_v23, %v9057_v26  ;;  %v8674_v15 = vpop.f32.mrf.mxu0 }
0x11a1   : > { %9082 = vmatpush.bf16.msrb.mxu0 %v9062_v5 }
0x11a3   : > { %v9263_v38 = vpop.permute.xlu2 %9262 }
0x11a6   : > { %v9059_v49 = vpop.permute.xlu1 %9058 }
0x11a7   : > { %v9063_v56 = vsel %vm909_vm6, %v9057_v26, %v9059_v49  ;;  %11761 = vmatmul.msk.bf16.vlgmr.msrb.gmra.mxu1 %vm1563_vm13, %v12066_v1  ;;  %v9049_v51 = vpop.permute.xlu0 %9048 }
0x11a8   : > { %9101 = vmatpush.bf16.msrb.mxu1 %v9063_v56  ;;  %v16256_v23 = vpop.f32.mrf.mxu0  ;;  %v12076_v56 = vld [vmem:[%s16795_s4 + $0x3d0] sm:$0xff] }
0x11aa   : > { %11773 = vmatmul.msk.bf16.vlgmr.msrb.gmra.mxu3 %vm1563_vm13, %v12068_v58 }
0x11ab   : > { %9189 = vmatpush.bf16.msrb.mxu3 %v9169_v52  ;;  %11771 = vmatmul.msk.bf16.vlgmr.msrb.gmra.mxu2 %vm1563_vm13, %v12068_v58  ;;  %v9269_v17 = vpop.permute.xlu2 %9268 }
0x11ac   : > { %9120 = vmatpush.bf16.msrb.mxu2 %v9059_v49 }
0x11ae   : > { %v9156_v59 = vpop.permute.xlu1 %9155 }
0x11af   : > { %11775 = vmatmul.msk.bf16.vlgmr.msra.gmra.mxu0 %vm1563_vm13, %v12068_v58  ;;  %v9167_v21 = vsel %vm1012_vm7, %v9156_v59, %v9158_v3  ;;  %v9271_v39 = vpop.permute.xlu0 %9270 }
0x11b0   : > { %9121 = vmatpush.bf16.msrb.mxu2 %v9053_v12  ;;  %9190 = vmatpush.bf16.msrb.mxu3 %v9167_v21  ;;  %v9276_v2 = vsel %vm1115_vm8, %v9269_v17, %v9271_v39 }
0x11b3   : > { %v9267_v60 = vpop.permute.xlu2 %9266 }
0x11b6   : > { %v9051_v29 = vpop.permute.xlu1 %9050 }
0x11b7   : > { %11762 = vmatmul.msk.bf16.gmra.mxu1 %vm1563_vm13, %v12067_v33  ;;  %v9060_v34 = vsel %vm909_vm6, %v9049_v51, %v9051_v29  ;;  %v9061_v54 = vsel %vm909_vm6, %v9051_v29, %v9053_v12  ;;  %v9265_v63 = vpop.permute.xlu0 %9264  ;;  %v12075_v33 = vld [vmem:[%s16795_s4 + $0x3c8] sm:$0xff] }
0x11b8   : > { %9083 = vmatpush.bf16.msrb.mxu0 %v9060_v34  ;;  %9102 = vmatpush.bf16.msrb.mxu1 %v9061_v54  ;;  %v9275_v7 = vsel %vm1115_vm8, %v9265_v63, %v9267_v60  ;;  %v9274_v57 = vsel %vm1115_vm8, %v9263_v38, %v9265_v63  ;;  %v12077_v63 = vld [vmem:[%s16795_s4 + $0x3d8] sm:$0xff] }
0x11ba   : > { %11774 = vmatmul.msk.bf16.gmra.mxu3 %vm1563_vm13, %v12069_v46 }
0x11bb   : > { %11772 = vmatmul.msk.bf16.gmra.mxu2 %vm1563_vm13, %v12069_v46  ;;  %v9380_v53 = vpop.permute.xlu2 %9379 }
0x11be   : > { %v9273_v50 = vpop.permute.xlu1 %9272 }
0x11bf   : > { %11776 = vmatmul.msk.bf16.gmra.mxu0 %vm1563_vm13, %v12069_v46  ;;  %v9160_v30 = vpop.permute.xlu0 %9159  ;;  %v9277_v6 = vsel %vm1115_vm8, %v9271_v39, %v9273_v50 }
0x11c0   : > { %v9168_v36 = vsel %vm1012_vm7, %v9158_v3, %v9160_v30 }
0x11c3   : > { %v9376_v61 = vpop.permute.xlu2 %9375 }
0x11c6   : > { %v9166_v20 = vpop.permute.xlu1 %9165 }
0x11c7   : > { %v9170_v8 = vsel %vm1012_vm7, %v9164_v16, %v9166_v20  ;;  %11785 = vmatmul.msk.bf16.vlgmr.msra.gmra.mxu1 %vm1563_vm13, %v12070_v44  ;;  %v9372_v37 = vpop.permute.xlu0 %9371 }
0x11c8   : > { %9227 = vmatpush.bf16.msra.mxu1 %v9166_v20  ;;  %9208 = vmatpush.bf16.msra.mxu0 %v9170_v8 }
0x11ca   : > { %11789 = vmatmul.msk.bf16.vlgmr.msra.gmra.mxu3 %vm1563_vm13, %v12070_v44 }
0x11cb   : > { %9315 = vmatpush.bf16.msra.mxu3 %v9277_v6  ;;  %11787 = vmatmul.msk.bf16.vlgmr.msra.gmra.mxu2 %vm1563_vm13, %v12070_v44 }
0x11cc   : > { %9228 = vmatpush.bf16.msra.mxu1 %v9160_v30  ;;  %9296 = vmatpush.bf16.msra.mxu2 %v9276_v2 }
0x11cd   : > { %9209 = vmatpush.bf16.msra.mxu0 %v9168_v36 }
0x11ce   : > { %v9378_v45 = vpop.permute.xlu1 %9377 }
0x11cf   : > { %9316 = vmatpush.bf16.msra.mxu3 %v9275_v7  ;;  %11799 = vmatmul.msk.bf16.vlgmr.msrb.gmra.mxu0 %vm1563_vm13, %v12072_v9  ;;  %v9383_v55 = vsel %vm17124_vm9, %v9376_v61, %v9378_v45  ;;  %v9370_v43 = vpop.permute.xlu0 %9369  ;;  %v9384_v1 = vsel %vm17125_vm1, %v9378_v45, %v9380_v53  ;;  %v12079_v61 = vld [vmem:[%s16795_s4 + $0x3e8] sm:$0xff] }
0x11d0   : > { %9297 = vmatpush.bf16.msra.mxu2 %v9274_v57  ;;  %v9381_v28 = vsel %vm17126_vm15, %v9370_v43, %v9372_v37 }
0x11d1   : > { %9334 = vmatpush.bf16.msrb.mxu0 %v9273_v50 }
0x11d5   : > { %9335 = vmatpush.bf16.msrb.mxu0 %v9267_v60 }
0x11d6   : > { %v9374_v42 = vpop.permute.xlu1 %9373 }
0x11d7   : > { %11786 = vmatmul.msk.bf16.gmra.mxu1 %vm1563_vm13, %v12071_v31  ;;  %v9382_v14 = vsel %vm17127_vm0, %v9372_v37, %v9374_v42 }
0x11da   : > { %11790 = vmatmul.msk.bf16.gmra.mxu3 %vm1563_vm13, %v12071_v31 }
0x11db   : > { %11788 = vmatmul.msk.bf16.gmra.mxu2 %vm1563_vm13, %v12071_v31 }
0x11df   : > { %11800 = vmatmul.msk.bf16.gmra.mxu0 %vm1563_vm13, %v12073_v62 }
0x11e4   : > { %v8590_v0 = vpop.f32.mrf.mxu1 }
0x11e5   : > { %v8670_v13 = vadd.f32 %v8669_v48, %v8590_v0 }
0x11e7   : > { %11801 = vmatmul.msk.bf16.vlgmr.msrb.gmra.mxu1 %vm1563_vm13, %v12072_v9 }
0x11e8   : > { %9403 = vmatpush.bf16.msrb.mxu1 %v9383_v55 }
0x11ea   : > { %11813 = vmatmul.msk.bf16.vlgmr.msrb.gmra.mxu3 %vm1563_vm13, %v12074_v4 }
0x11eb   : > { %9441 = vmatpush.bf16.msrb.mxu3 %v9380_v53  ;;  %11803 = vmatmul.msk.bf16.vlgmr.msrb.gmra.mxu2 %vm1563_vm13, %v12072_v9  ;;  %v12078_v9 = vld [vmem:[%s16795_s4 + $0x3e0] sm:$0xff] }
0x11ec   : > { %9404 = vmatpush.bf16.msrb.mxu1 %v9381_v28  ;;  %9422 = vmatpush.bf16.msrb.mxu2 %v9384_v1  ;;  %v16239_v18 = vpop.f32.mrf.mxu1 }
0x11ed   : > { %v8628_v27 = vpop.f32.mrf.mxu3 }
0x11ee   : > { %v8609_v35 = vpop.f32.mrf.mxu2 }
0x11ef   : > { %9442 = vmatpush.bf16.msrb.mxu3 %v9374_v42  ;;  %11815 = vmatmul.msk.bf16.vlgmr.msra.gmra.mxu0 %vm1563_vm13, %v12074_v4 }
0x11f0   : > { %9423 = vmatpush.bf16.msrb.mxu2 %v9382_v14 }
0x11f4   : > { %v8595_v19 = vpop.f32.mrf.mxu1 }
0x11f5   : > { %v16243_v40 = vpop.f32.mrf.mxu3  ;;  %v8675_v22 = vadd.f32 %v8674_v15, %v8595_v19 }
0x11f6   : > { %v16245_v41 = vpop.f32.mrf.mxu2 }
0x11f7   : > { %11802 = vmatmul.msk.bf16.gmra.mxu1 %vm1563_vm13, %v12073_v62 }
0x11fa   : > { %11814 = vmatmul.msk.bf16.gmra.mxu3 %vm1563_vm13, %v12075_v33 }
0x11fb   : > { %11804 = vmatmul.msk.bf16.gmra.mxu2 %vm1563_vm13, %v12073_v62 }
0x11fc   : > { %v16253_v16 = vpop.f32.mrf.mxu1 }
0x11fd   : > { %v8633_v32 = vpop.f32.mrf.mxu3 }
0x11fe   : > { %v8614_v12 = vpop.f32.mrf.mxu2 }
0x11ff   : > { %11816 = vmatmul.msk.bf16.gmra.mxu0 %vm1563_vm13, %v12075_v33 }
0x1204   : > { %v8688_v26 = vpop.f32.mrf.mxu1 }
0x1205   : > { %v8689_v5 = vadd.f32 %v8688_v26, %v8609_v35  ;;  %v16258_v49 = vpop.f32.mrf.mxu3 }
0x1206   : > { %v16260_v58 = vpop.f32.mrf.mxu2 }
0x1207   : > { %11817 = vmatmul.msk.bf16.vlgmr.msra.gmra.mxu1 %vm1563_vm13, %v12074_v4 }
0x120a   : > { %11829 = vmatmul.msk.bf16.vlgmr.msra.gmra.mxu3 %vm1563_vm13, %v12076_v56 }
0x120b   : > { %11827 = vmatmul.msk.bf16.vlgmr.msra.gmra.mxu2 %vm1563_vm13, %v12076_v56 }
0x120c   : > { %v16268_v52 = vpop.f32.mrf.mxu1  ;;  %v8783_v51 = vpop.f32.mrf.mxu0 }
0x120d   : > { %v8813_v3 = vadd.f32 %v8783_v51, %v8689_v5  ;;  %v8764_v59 = vpop.f32.mrf.mxu3 }
0x120e   : > { %v8812_v21 = vadd.f32 %v8764_v59, %v8670_v13  ;;  %v8707_v39 = vpop.f32.mrf.mxu2 }
0x120f   : > { %v8708_v29 = vadd.f32 %v8707_v39, %v8628_v27  ;;  %11831 = vmatmul.msk.bf16.vlgmr.msrb.gmra.mxu0 %vm1563_vm13, %v12076_v56 }
0x1214   : > { %v8693_v46 = vpop.f32.mrf.mxu1  ;;  %v16271_v34 = vpop.f32.mrf.mxu0 }
0x1215   : > { %v8694_v54 = vadd.f32 %v8693_v46, %v8614_v12  ;;  %v16273_v38 = vpop.f32.mrf.mxu3 }
0x1216   : > { %v16275_v50 = vpop.f32.mrf.mxu2 }
0x1217   : > { %11818 = vmatmul.msk.bf16.gmra.mxu1 %vm1563_vm13, %v12075_v33 }
0x121a   : > { %11830 = vmatmul.msk.bf16.gmra.mxu3 %vm1563_vm13, %v12077_v63 }
0x121b   : > { %11828 = vmatmul.msk.bf16.gmra.mxu2 %vm1563_vm13, %v12077_v63 }
0x121c   : > { %v16283_v17 = vpop.f32.mrf.mxu1  ;;  %v8788_v44 = vpop.f32.mrf.mxu0 }
0x121d   : > { %v8819_v20 = vadd.f32 %v8788_v44, %v8694_v54  ;;  %v8769_v8 = vpop.f32.mrf.mxu3 }
0x121e   : > { %v8818_v30 = vadd.f32 %v8769_v8, %v8675_v22  ;;  %v8712_v6 = vpop.f32.mrf.mxu2 }
0x121f   : > { %v8713_v2 = vadd.f32 %v8712_v6, %v8633_v32  ;;  %11832 = vmatmul.msk.bf16.gmra.mxu0 %vm1563_vm13, %v12077_v63 }
0x1224   : > { %v16289_v36 = vpop.f32.mrf.mxu0  ;;  %v8802_v60 = vpop.f32.mrf.mxu1 }
0x1225   : > { %v8814_v7 = vadd.f32 %v8802_v60, %v8708_v29  ;;  %v16291_v57 = vpop.f32.mrf.mxu3 }
0x1226   : > { %v16293_v31 = vpop.f32.mrf.mxu2 }
0x1227   : > { %11841 = vmatmul.msk.bf16.vlgmr.msrb.gmra.mxu1 %vm1563_vm13, %v12078_v9 }
0x122a   : > { %11845 = vmatmul.msk.bf16.vlgmr.msrb.gmra.mxu3 %vm1563_vm13, %v12078_v9 }
0x122b   : > { %11843 = vmatmul.msk.bf16.vlgmr.msrb.gmra.mxu2 %vm1563_vm13, %v12078_v9 }
0x122c   : > { %v16298_v62 = vpop.f32.mrf.mxu1  ;;  %v8909_v53 = vpop.f32.mrf.mxu0 }
0x122d   : > { %v8921_v37 = vadd.f32 %v8909_v53, %v8814_v7  ;;  %v8890_v48 = vpop.f32.mrf.mxu3 }
0x122e   : > { %v8920_v45 = vadd.f32 %v8890_v48, %v8813_v3  ;;  %v8871_v0 = vpop.f32.mrf.mxu2 }
0x122f   : > { %v8919_v13 = vadd.f32 %v8871_v0, %v8812_v21 }
0x1234   : > { %v8807_v4 = vpop.f32.mrf.mxu1  ;;  %v16303_v55 = vpop.f32.mrf.mxu0 }
0x1235   : > { %v8820_v43 = vadd.f32 %v8807_v4, %v8713_v2  ;;  %v16305_v1 = vpop.f32.mrf.mxu3 }
0x1236   : > { %v8873_v28 = vpop.f32.mrf.mxu2 }
0x1237   : > { %11842 = vmatmul.msk.bf16.gmra.mxu1 %vm1563_vm13, %v12079_v61 }
0x123a   : > { %11846 = vmatmul.msk.bf16.gmra.mxu3 %vm1563_vm13, %v12079_v61 }
0x123b   : > { %11844 = vmatmul.msk.bf16.gmra.mxu2 %vm1563_vm13, %v12079_v61 }
0x123c   : > { %v16310_v42 = vpop.f32.mrf.mxu1  ;;  %v8914_v27 = vpop.f32.mrf.mxu0 }
0x123d   : > { %v8927_v35 = vadd.f32 %v8914_v27, %v8820_v43  ;;  %v8895_v14 = vpop.f32.mrf.mxu3 }
0x123e   : > { %v8926_v19 = vadd.f32 %v8895_v14, %v8819_v20  ;;  %v8876_v15 = vpop.f32.mrf.mxu2 }
0x123f   : > { %v8925_v22 = vadd.f32 %v8876_v15, %v8818_v30 }
0x1244   : > { %v8978_v33 = vpop.f32.mrf.mxu1  ;;  %v16318_v5 = vpop.f32.mrf.mxu0 }
0x1245   : > { %v16312_v32 = vadd.f32 %v8978_v33, %v8919_v13  ;;  %v16314_v12 = vpop.f32.mrf.mxu3 }
0x1246   : > { %v16316_v26 = vpop.f32.mrf.mxu2 }
0x124c   : > { %v8980_v56 = vpop.f32.mrf.mxu1  ;;  %v9085_v39 = vpop.f32.mrf.mxu0 }
0x124d   : > { %v9016_v51 = vpop.f32.mrf.mxu3 }
0x124e   : > { %v9028_v3 = vadd.f32 %v9016_v51, %v8921_v37  ;;  %v8997_v59 = vpop.f32.mrf.mxu2  ;;  %v8672_v37 = vadd.f32 %v16234_v11, %v16239_v18 }
0x124f   : > { %v16320_v21 = vadd.f32 %v8997_v59, %v8920_v45  ;;  %v16367_v59 = vpop.permute.xlu1 %9478 }
0x1250   : > { %v8815_v0 = vadd.f32 %v16273_v38, %v8672_v37  ;;  %17136 = vst [vmem:[#allocation14_spill] sm:$0xff] %v16367_v59  ;;  %v16373_v37 = vpop.permute.xlu2 %9483 }
0x1251   : > { %17139 = vst [vmem:[#allocation20_spill] sm:$0xff] %v16373_v37 }
0x1252   : > { %v8922_v4 = vadd.f32 %v8873_v28, %v8815_v0  ;;  %v16375_v0 = vpop.permute.xlu0 %12175 }
0x1254   : > { %v8983_v29 = vpop.f32.mrf.mxu1  ;;  %v9087_v20 = vpop.f32.mrf.mxu0  ;;  %v9029_v27 = vadd.f32 %v8980_v56, %v8922_v4 }
0x1255   : > { %v16322_v46 = vadd.f32 %v8983_v29, %v8925_v22  ;;  %v16324_v54 = vpop.f32.mrf.mxu3 }
0x1256   : > { %v16326_v63 = vpop.f32.mrf.mxu2 }
0x1258   : > { %v16385_v10 = vpop.permute.xlu2 %12185 }
0x125a   : > { %v16387_v47 = vpop.permute.xlu0 %9468 }
0x125c   : > { %v16328_v44 = vpop.f32.mrf.mxu1  ;;  %v16338_v53 = vpop.f32.mrf.mxu0 }
0x125d   : > { %v9021_v8 = vpop.f32.mrf.mxu3 }
0x125e   : > { %v16330_v30 = vadd.f32 %v9021_v8, %v8927_v35  ;;  %v9002_v6 = vpop.f32.mrf.mxu2  ;;  %v9136_v35 = vadd.f32 %v9087_v20, %v9029_v27 }
0x125f   : > { %v16332_v2 = vadd.f32 %v9002_v6, %v8926_v19 }
0x1264   : > { %v9104_v9 = vpop.f32.mrf.mxu1  ;;  %v16347_v43 = vpop.f32.mrf.mxu0 }
0x1265   : > { %v16334_v60 = vpop.f32.mrf.mxu3 }
0x1266   : > { %17128 = vst [vmem:[#allocation18_spill] sm:$0xff] %v16334_v60  ;;  %v16336_v7 = vpop.f32.mrf.mxu2 }
0x126c   : > { %v16342_v48 = vpop.f32.mrf.mxu1  ;;  %v9211_v11 = vpop.f32.mrf.mxu0 }
0x126d   : > { %v9192_v45 = vpop.f32.mrf.mxu3 }
0x126e   : > { %v9123_v13 = vpop.f32.mrf.mxu2 }
0x126f   : > { %v16345_v61 = vadd.f32 %v9123_v13, %v9028_v3  ;;  %v16377_v13 = vpop.permute.xlu1 %12180 }
0x1271   : > { %17129 = vst [vmem:[#allocation19_spill] sm:$0xff] %v16345_v61  ;;  %v9133_v61 = vadd.f32 %v9085_v39, %v16312_v32  ;;  %v8691_v39 = vadd.f32 %v16268_v52, %v16245_v41  ;;  %v12183_v52 = vunpack.i.h.bf16 %v16377_v13 }
0x1274   : > { %v16349_v14 = vpop.f32.mrf.mxu1  ;;  %v16361_v28 = vpop.f32.mrf.mxu0 }
0x1275   : > { %v9194_v19 = vpop.f32.mrf.mxu3 }
0x1276   : > { %v9243_v15 = vadd.f32 %v9194_v19, %v9136_v35  ;;  %v16351_v22 = vpop.f32.mrf.mxu2 }
0x1277   : > { %17130 = vst [vmem:[#allocation28_spill] sm:$0xff] %v16351_v22 }
0x127c   : > { %v16353_v18 = vpop.f32.mrf.mxu1  ;;  %v16371_v6 = vpop.f32.mrf.mxu0 }
0x127d   : > { %17131 = vst [vmem:[#allocation21_spill] sm:$0xff] %v16353_v18  ;;  %v16355_v33 = vpop.f32.mrf.mxu3  ;;  %v9240_v18 = vadd.f32 %v9192_v45, %v9133_v61 }
0x127e   : > { %v16357_v38 = vpop.f32.mrf.mxu2  ;;  %17138 = vst [vmem:[#allocation24_spill] sm:$0xff] %v16371_v6  ;;  %v12191_v6 = vpop.permute.xlu2 %12190 }
0x127f   : > { %17132 = vst [vmem:[#allocation25_spill] sm:$0xff] %v16357_v38  ;;  %v12192_v25 = vunpack.i.l.bf16 %v12191_v6  ;;  %v12177_v38 = vunpack.i.l.bf16 %v16375_v0 }
0x1284   : > { %v16359_v51 = vpop.f32.mrf.mxu1  ;;  %v16383_v19 = vpop.f32.mrf.mxu0 }
0x1285   : > { %17133 = vst [vmem:[#allocation31_spill] sm:$0xff] %v16359_v51  ;;  %v16363_v3 = vpop.f32.mrf.mxu3 }
0x1286   : > { %17134 = vst [vmem:[#allocation26_spill] sm:$0xff] %v16363_v3  ;;  %v16365_v56 = vpop.f32.mrf.mxu2  ;;  %v16400_v3 = vpop.permute.xlu0 %12195 }
0x1287   : > { %17135 = vst [vmem:[#allocation27_spill] sm:$0xff] %v16365_v56 }
0x1288   : > { %17141 = vst [vmem:[#allocation10_spill] sm:$0xff] %v16383_v19 }
0x128c   : > { %v16369_v29 = vpop.f32.mrf.mxu1  ;;  %v16396_v22 = vpop.f32.mrf.mxu0 }
0x128d   : > { %17137 = vst [vmem:[#allocation11_spill] sm:$0xff] %v16369_v29  ;;  %v9318_v20 = vpop.f32.mrf.mxu3  ;;  %v16391_v29 = vpop.permute.xlu1 %9473 }
0x128e   : > { %v9299_v8 = vpop.f32.mrf.mxu2  ;;  %17144 = vst [vmem:[#allocation16_spill] sm:$0xff] %v16396_v22  ;;  %v17146_v22 = vunpack.i.h.bf16 %v16375_v0 }
0x1290   : > { %v16420_v41 = vsel %vm806_vm5, %v12177_v38, %v17146_v22 }
0x1294   : > { %v16379_v4 = vpop.f32.mrf.mxu1 }
0x1295   : > { %17140 = vst [vmem:[#allocation7_spill] sm:$0xff] %v16379_v4  ;;  %v16381_v27 = vpop.f32.mrf.mxu3  ;;  %v9347_v4 = vadd.f32 %v9299_v8, %v9240_v18  ;;  %v16406_v32 = vpop.permute.xlu1 %12200 }
0x1296   : > { %v9301_v35 = vpop.f32.mrf.mxu2  ;;  %v12202_v8 = vunpack.i.l.bf16 %v16406_v32  ;;  %v12203_v38 = vunpack.i.h.bf16 %v16406_v32 }
0x129c   : > { %v16389_v56 = vpop.f32.mrf.mxu1 }
0x129d   : > { %17142 = vst [vmem:[#allocation9_spill] sm:$0xff] %v16389_v56  ;;  %v16393_v37 = vpop.f32.mrf.mxu3  ;;  %v12193_v56 = vunpack.i.h.bf16 %v12191_v6  ;;  %v8816_v6 = vadd.f32 %v16271_v34, %v8691_v39  ;;  %v16426_v34 = vpop.f32.mrf.mxu0  ;;  %v8677_v39 = vadd.f32 %v16256_v23, %v16253_v16  ;;  %v8715_v16 = vadd.f32 %v16293_v31, %v16258_v49 }
0x129e   : > { %17143 = vst [vmem:[#allocation29_spill] sm:$0xff] %v16393_v37  ;;  %v9304_v51 = vpop.f32.mrf.mxu2  ;;  %v9350_v37 = vadd.f32 %v9301_v35, %v9243_v15  ;;  %v17147_v35 = vunpack.i.l.bf16 %v16400_v3 }
0x129f   : > { %v8823_v31 = vadd.f32 %v16310_v42, %v8715_v16  ;;  %v17155_v16 = vld [vmem:[#allocation7_spill] sm:$0xff] }
0x12a0   : > { %v9555_v22 = vsel %vm806_vm5, %v12193_v56, %v17147_v35 }
0x12a4   : > { %v9406_v60 = vpop.f32.mrf.mxu1 }
0x12a5   : > { %v9454_v19 = vadd.f32 %v9406_v60, %v9347_v4  ;;  %v16398_v59 = vpop.f32.mrf.mxu3  ;;  %v9134_v60 = vadd.f32 %v9104_v9, %v16320_v21  ;;  %v12182_v21 = vunpack.i.l.bf16 %v16377_v13  ;;  %v12198_v9 = vunpack.i.h.bf16 %v16400_v3 }
0x12a6   : > { %17145 = vst [vmem:[#allocation30_spill] sm:$0xff] %v16398_v59  ;;  %v16402_v24 = vpop.f32.mrf.mxu2  ;;  %v9554_v59 = vsel %vm806_vm5, %v12192_v25, %v12193_v56 }
0x12a7   : > { %v9486_v61 = vadd.f32 %v16387_v47, %v9454_v19  ;;  %v9241_v4 = vadd.f32 %v9211_v11, %v9134_v60  ;;  %v8923_v19 = vadd.f32 %v16305_v1, %v8816_v6  ;;  %v9556_v1 = vsel %vm806_vm5, %v12198_v9, %v12202_v8 }
0x12a9   : > { %v9348_v45 = vadd.f32 %v9318_v20, %v9241_v4  ;;  %v9574_v15 = vadd.f32 %v9554_v59, %v9486_v61  ;;  %v9030_v60 = vadd.f32 %v16326_v63, %v8923_v19  ;;  %v8710_v59 = vadd.f32 %v16275_v50, %v16243_v40 }
0x12aa   : > { %v9139_v61 = vadd.f32 %v16338_v53, %v16322_v46 }
0x12ab   : > { %v9137_v23 = vadd.f32 %v16342_v48, %v9030_v60  ;;  %v8817_v6 = vadd.f32 %v16298_v62, %v8710_v59  ;;  %v9598_v50 = vmul.f32 0.01, %v9574_v15  ;;  %vm9586_vm14 = vcmp.ge.f32.partialorder %v9574_v15, 0.0  ;;  %v17151_v59 = vld [vmem:[#allocation26_spill] sm:$0xff] }
0x12ac   : > { %v9408_v18 = vpop.f32.mrf.mxu1  ;;  %v9246_v40 = vadd.f32 %v16355_v33, %v9139_v61 }
0x12ad   : > { %v9457_v11 = vadd.f32 %v9408_v18, %v9350_v37  ;;  %v16428_v25 = vpop.f32.mrf.mxu3  ;;  %v8696_v37 = vadd.f32 %v16283_v17, %v16260_v58  ;;  %v8821_v18 = vadd.f32 %v16291_v57, %v8677_v39  ;;  %v9244_v57 = vadd.f32 %v16361_v28, %v9137_v23  ;;  %v17148_v39 = vld [vmem:[#allocation25_spill] sm:$0xff] }
0x12ae   : > { %v9425_v20 = vpop.f32.mrf.mxu2  ;;  %v8924_v49 = vadd.f32 %v16303_v55, %v8817_v6  ;;  %v9353_v53 = vadd.f32 %v9304_v51, %v9246_v40  ;;  %v17157_v40 = vld [vmem:[#allocation21_spill] sm:$0xff] }
0x12af   : > { %v9455_v56 = vadd.f32 %v9425_v20, %v9348_v45  ;;  %v9489_v63 = vadd.f32 %v16391_v29, %v9457_v11  ;;  %v8822_v17 = vadd.f32 %v16289_v36, %v8696_v37  ;;  %v8928_v46 = vadd.f32 %v16316_v26, %v8821_v18 }
0x12b0   : > { %v9351_v45 = vadd.f32 %v16381_v27, %v9244_v57  ;;  %v9610_v36 = vsel %vm9586_vm14, %v9574_v15, %v9598_v50  ;;  %v8930_v11 = vadd.f32 %v16318_v5, %v8823_v31  ;;  %v9031_v55 = vadd.f32 %v16324_v54, %v8924_v49  ;;  %v9342_v15 = vpop.f32.mrf.mxu0  ;;  %v17149_v54 = vld [vmem:[#allocation22_spill] sm:$0xff]  ;;  %v17159_v57 = vld [vmem:[#allocation31_spill] sm:$0xff] }
0x12b1   : > { %v9487_v58 = vadd.f32 %v16387_v47, %v9455_v56  ;;  %v8929_v62 = vadd.f32 %v16314_v12, %v8822_v17  ;;  %v9035_v33 = vadd.f32 %v16328_v44, %v8928_v46  ;;  %v9577_v4 = vadd.f32 %v9556_v1, %v9489_v63  ;;  %v17153_v56 = vld [vmem:[#allocation18_spill] sm:$0xff]  ;;  %v17158_v46 = vld [vmem:[#allocation19_spill] sm:$0xff] }
0x12b2   : > { %v9557_v12 = vsel %vm806_vm5, %v12202_v8, %v12203_v38  ;;  %v9140_v27 = vadd.f32 %v16349_v14, %v16332_v2  ;;  %v9141_v5 = vadd.f32 %v17148_v39, %v16330_v30  ;;  %v9622_v1 = vmul.f32 %v9610_v36, %v17149_v54  ;;  %v17152_v8 = vld [vmem:[#allocation14_spill] sm:$0xff]  ;;  %v17154_v14 = vld [vmem:[#allocation24_spill] sm:$0xff] }
0x12b3   : > { %v9575_v48 = vadd.f32 %v9555_v22, %v9487_v58  ;;  %v9142_v42 = vadd.f32 %v16347_v43, %v9035_v33  ;;  %v9036_v44 = vadd.f32 %v16336_v7, %v8929_v62  ;;  %v9601_v60 = vmul.f32 0.01, %v9577_v4  ;;  %v17150_v43 = vld [vmem:[#allocation23_spill] sm:$0xff]  ;;  %v17156_v30 = vld [vmem:[#allocation28_spill] sm:$0xff] }
0x12b4   : > { %v9411_v9 = vpop.f32.mrf.mxu1  ;;  %vm9589_vm1 = vcmp.ge.f32.partialorder %v9577_v4, 0.0  ;;  %v9037_v2 = vadd.f32 %v17153_v56, %v8930_v11  ;;  %v9247_v18 = vadd.f32 %v17154_v14, %v9140_v27  ;;  %v9248_v23 = vadd.f32 %v17155_v16, %v9141_v5 }
0x12b5   : > { %vm9587_vm9 = vcmp.ge.f32.partialorder %v9575_v48, 0.0  ;;  %v9599_v26 = vmul.f32 0.01, %v9575_v48  ;;  %v9460_v19 = vadd.f32 %v9411_v9, %v9353_v53  ;;  %v9446_v28 = vpop.f32.mrf.mxu3  ;;  %v9249_v37 = vadd.f32 %v17151_v59, %v9142_v42  ;;  %v17160_v53 = vld [vmem:[#allocation29_spill] sm:$0xff] }
0x12b6   : > { %v9427_v51 = vpop.f32.mrf.mxu2  ;;  %v9138_v6 = vadd.f32 %v17156_v30, %v9031_v55  ;;  %v9143_v50 = vadd.f32 %v17157_v40, %v9036_v44  ;;  %v9242_v49 = vadd.f32 %v17159_v57, %v17158_v46  ;;  %v9355_v31 = vadd.f32 %v9342_v15, %v9248_v23  ;;  %v17164_v44 = vld [vmem:[#allocation27_spill] sm:$0xff]  ;;  %v17165_v15 = vld [vmem:[#allocation16_spill] sm:$0xff] }
0x12b7   : > { %v9611_v35 = vsel %vm9587_vm9, %v9575_v48, %v9599_v26  ;;  %v9458_v22 = vadd.f32 %v9427_v51, %v9351_v45  ;;  %v9492_v61 = vadd.f32 %v17152_v8, %v9460_v19  ;;  %v9356_v58 = vadd.f32 %v16402_v24, %v9249_v37  ;;  %v17161_v19 = vld [vmem:[#allocation10_spill] sm:$0xff]  ;;  %v17162_v24 = vld [vmem:[#allocation11_spill] sm:$0xff] }
0x12b8   : > { %v9623_v20 = vmul.f32 %v9611_v35, %v17150_v43  ;;  %v9354_v48 = vadd.f32 %v17160_v53, %v9247_v18  ;;  %v9613_v62 = vsel %vm9589_vm1, %v9577_v4, %v9601_v60  ;;  %v9250_v11 = vadd.f32 %v17161_v19, %v9143_v50  ;;  %v17170_v53 = vld [vmem:[#allocation12_spill] sm:$0xff] }
0x12b9   : > { %v9490_v7 = vadd.f32 %v16391_v29, %v9458_v22  ;;  %v9580_v45 = vadd.f32 %v16420_v41, %v9492_v61  ;;  %v9245_v55 = vadd.f32 %v17162_v24, %v9138_v6  ;;  %v9144_v27 = vadd.f32 %v17164_v44, %v9037_v2  ;;  %v17167_v61 = vld [vmem:[#allocation20_spill] sm:$0xff]  ;;  %v17169_v6 = vld [vmem:[#allocation30_spill] sm:$0xff] }
0x12ba   : > { %v9634_v63 = vpack.c.bf16 %v9623_v20, %v9622_v1  ;;  %v9349_v41 = vadd.f32 %v17165_v15, %v9242_v49  ;;  %v16499_v60 = vmul.f32 %v9613_v62, %v17149_v54  ;;  %v17166_v20 = vld [vmem:[#allocation9_spill] sm:$0xff]  ;;  %v17168_v16 = vunpack.i.l.bf16 %v16385_v10 }
0x12bb   : > { %v9578_v17 = vadd.f32 %v9557_v12, %v9490_v7  ;;  %v17163_v12 = vunpack.i.h.bf16 %v16375_v0  ;;  %v9352_v39 = vadd.f32 %v16426_v34, %v9245_v55  ;;  %v9251_v59 = vadd.f32 %v17166_v20, %v9144_v27  ;;  %v9344_v0 = vpop.f32.mrf.mxu0 }
0x12bc   : > { %v9413_v33 = vpop.f32.mrf.mxu1  ;;  %9650 = vrot.lane.b32.xlu0 %v9634_v63, %s12221_s21  ;;  %v9604_v37 = vmul.f32 0.01, %v9580_v45  ;;  %v9456_v2 = vadd.f32 %v16428_v25, %v9349_v41  ;;  %vm9592_vm0 = vcmp.ge.f32.partialorder %v9580_v45, 0.0  ;;  %v9560_v23 = vsel %vm806_vm5, %v12183_v52, %v17168_v16 }
0x12bd   : > { %vm9590_vm15 = vcmp.ge.f32.partialorder %v9578_v17, 0.0  ;;  %v9602_v9 = vmul.f32 0.01, %v9578_v17  ;;  %v9463_v36 = vadd.f32 %v9413_v33, %v9356_v58  ;;  %v9449_v26 = vpop.f32.mrf.mxu3  ;;  %v9559_v4 = vsel %vm806_vm5, %v17163_v12, %v12182_v21 }
0x12be   : > { %v9462_v42 = vadd.f32 %v9449_v26, %v9355_v31  ;;  %v9430_v51 = vpop.f32.mrf.mxu2  ;;  %v9459_v18 = vadd.f32 %v9446_v28, %v9352_v39  ;;  %v9358_v30 = vadd.f32 %v9344_v0, %v9251_v59  ;;  %v9357_v40 = vadd.f32 %v17169_v6, %v9250_v11 }
0x12bf   : > { %v9614_v35 = vsel %vm9590_vm15, %v9578_v17, %v9602_v9  ;;  %v9461_v22 = vadd.f32 %v9430_v51, %v9354_v48  ;;  %v9495_v7 = vadd.f32 %v17167_v61, %v9463_v36  ;;  %v9616_v25 = vsel %vm9592_vm0, %v9580_v45, %v9604_v37  ;;  %v9696_v37 = vld [vmem:[%s16797_s6 + $0x2] sm:$0x1] }
0x12c0   : > { %v9494_v5 = vadd.f32 %v17152_v8, %v9462_v42  ;;  %v9626_v1 = vmul.f32 %v9614_v35, %v17150_v43  ;;  %v12188_v17 = vunpack.i.h.bf16 %v16385_v10  ;;  %v9488_v28 = vadd.f32 %v16387_v47, %v9456_v2 }
0x12c1   : > { %v9493_v56 = vadd.f32 %v17152_v8, %v9461_v22  ;;  %v9583_v50 = vadd.f32 %v9560_v23, %v9495_v7  ;;  %v9491_v52 = vadd.f32 %v16391_v29, %v9459_v18  ;;  %v9628_v33 = vmul.f32 %v9616_v25, %v17149_v54 }
0x12c2   : > { %v9582_v34 = vadd.f32 %v12182_v21, %v9494_v5  ;;  %v9636_v14 = vpack.c.bf16 %v9626_v1, %v16499_v60  ;;  %v17171_v19 = vmov %v17168_v16  ;;  %v17172_v24 = vunpack.i.l.bf16 %v16400_v3 }
0x12c3   : > { %v9581_v63 = vadd.f32 %v9559_v4, %v9493_v56  ;;  %v9607_v9 = vmul.f32 0.01, %v9583_v50  ;;  %vm9595_vm1 = vcmp.ge.f32.partialorder %v9583_v50, 0.0  ;;  %v9561_v29 = vsel %vm806_vm5, %v17171_v19, %v12188_v17 }
0x12c4   : > { %vm9594_vm14 = vcmp.ge.f32.partialorder %v9582_v34, 0.0  ;;  %v9606_v8 = vmul.f32 0.01, %v9582_v34  ;;  %v9576_v55 = vadd.f32 %v17172_v24, %v9488_v28  ;;  %v9579_v42 = vadd.f32 %v12203_v38, %v9491_v52 }
0x12c5   : > { %vm9593_vm9 = vcmp.ge.f32.partialorder %v9581_v63, 0.0  ;;  %v9605_v58 = vmul.f32 0.01, %v9581_v63  ;;  %v9451_v21 = vpop.f32.mrf.mxu3  ;;  %v9619_v4 = vsel %vm9595_vm1, %v9583_v50, %v9607_v9  ;;  %vm10361_vm1 = vcmask 1043456  }
0x12c6   : > { %v9465_v46 = vadd.f32 %v9451_v21, %v9358_v30  ;;  %v9432_v57 = vpop.f32.mrf.mxu2  ;;  %v9618_v13 = vsel %vm9594_vm14, %v9582_v34, %v9606_v8  ;;  %v9600_v27 = vmul.f32 0.01, %v9576_v55  ;;  %v9603_v15 = vmul.f32 0.01, %v9579_v42 }
0x12c7   : > { %v9617_v49 = vsel %vm9593_vm9, %v9581_v63, %v9605_v58  ;;  %v9464_v31 = vadd.f32 %v9432_v57, %v9357_v40  ;;  %v9630_v48 = vmul.f32 %v9618_v13, %v17170_v53  ;;  %vm9588_vm14 = vcmp.ge.f32.partialorder %v9576_v55, 0.0 }
0x12c8   : > { %v9497_v62 = vadd.f32 %v17167_v61, %v9465_v46  ;;  %v9629_v45 = vmul.f32 %v9617_v49, %v17150_v43  ;;  %vm9591_vm9 = vcmp.ge.f32.partialorder %v9579_v42, 0.0  ;;  %v9631_v32 = vmul.f32 %v9619_v4, %v17149_v54 }
0x12c9   : > { %v9496_v36 = vadd.f32 %v17167_v61, %v9464_v31  ;;  %v9639_v26 = vpack.c.bf16 %v9630_v48, %v9630_v48  ;;  %v9615_v39 = vsel %vm9591_vm9, %v9579_v42, %v9603_v15  ;;  %v9612_v5 = vsel %vm9588_vm14, %v9576_v55, %v9600_v27 }
0x12ca   : > { %v9585_v47 = vadd.f32 %v12188_v17, %v9497_v62  ;;  %v9638_v11 = vpack.c.bf16 %v9629_v45, %v9628_v33  ;;  %v9627_v60 = vmul.f32 %v9615_v39, %v17170_v53  ;;  %v9624_v1 = vmul.f32 %v9612_v5, %v17170_v53 }
0x12cb   : > { %v9584_v51 = vadd.f32 %v9561_v29, %v9496_v36  ;;  %9660 = vrot.lane.b32.xlu1 %v9639_v26, %s12221_s21 }
0x12cc   : > { %vm9597_vm15 = vcmp.ge.f32.partialorder %v9585_v47, 0.0  ;;  %v9609_v12 = vmul.f32 0.01, %v9585_v47  ;;  %9658 = vrot.lane.b32.xlu2 %v9638_v11, %s12221_s21  ;;  %v9637_v20 = vpack.c.bf16 %v9627_v60, %v9627_v60  ;;  %v9635_v59 = vpack.c.bf16 %v9624_v1, %v9624_v1  ;;  %v16661_v11 = vld [vmem:[%s16797_s6] sm:$0x1] }
0x12cd   : > { %vm9596_vm0 = vcmp.ge.f32.partialorder %v9584_v51, 0.0  ;;  %v9608_v44 = vmul.f32 0.01, %v9584_v51 }
0x12ce   : > { %v9621_v10 = vsel %vm9597_vm15, %v9585_v47, %v9609_v12 }
0x12cf   : > { %v9620_v41 = vsel %vm9596_vm0, %v9584_v51, %v9608_v44  ;;  %v9633_v3 = vmul.f32 %v9621_v10, %v17170_v53  ;;  %v9703_v44 = vld [vmem:[%s16798_s7] sm:$0x3] }
0x12d0   : > { %v9632_v38 = vmul.f32 %v9620_v41, %v17150_v43  ;;  %v9695_v10 = vld [vmem:[%s16797_s6 + $0x1] sm:$0x1] }
0x12d1   : > { %v9641_v35 = vpack.c.bf16 %v9633_v3, %v9633_v3 }
0x12d2   : > { %v9640_v22 = vpack.c.bf16 %v9632_v38, %v9631_v32 }
0x12d3   : > { %9654 = vrot.lane.b32.xlu1 %v9636_v14, %s12221_s21 }
0x12d4   : > { %9662 = vrot.lane.b32.xlu0 %v9640_v22, %s12221_s21  ;;  %9664 = vrot.lane.b32.xlu2 %v9641_v35, %s12221_s21 }
0x12dc   : > { %9656 = vrot.lane.b32.xlu0 %v9637_v20, %s12221_s21  ;;  %9652 = vrot.lane.b32.xlu2 %v9635_v59, %s12221_s21 }
0x1326   : > { %v9659_v54 = vpop.permute.xlu2 %9658 }
0x1327   : > { %v9668_v43 = vrot.slane %v9659_v54, 4 }
0x1329   : > { %v9674_v0 = vsel %vm1428_vm10, %v9668_v43, %v9659_v54 }
0x132a   : > { %9690 = vst.msk [vmem:[#allocation5 + $0x18] sm:$0xff] %vm12803_vm11, %v9674_v0 }
0x132e   : > { %v9651_v61 = vpop.permute.xlu0 %9650  ;;  %v9665_v7 = vpop.permute.xlu2 %9664 }
0x132f   : > { %v9666_v56 = vrot.slane %v9651_v61, 4 }
0x1331   : > { %v9670_v2 = vsel %vm1428_vm10, %v9666_v56, %v9651_v61  ;;  %v11861_v52 = vld [vmem:[#allocation5 + $0x18] sm:$0xf]  ;;  %v12089_v26 = vld [vmem:[#allocation5 + $0x1c] sm:$0xf] }
0x1332   : > { %9686 = vst.msk [vmem:[#allocation5] sm:$0xff] %vm12803_vm11, %v9670_v2 }
0x1336   : > { %v9653_v34 = vpop.permute.xlu2 %9652 }
0x1337   : > { %v9671_v14 = vsel %vm1428_vm10, %v9666_v56, %v9653_v34 }
0x1338   : > { %9687 = vst.msk [vmem:[#allocation5 + $0x8] sm:$0xf] %vm1449_vm12, %v9671_v14 }
0x1339   : > { %v11849_v21 = vld [vmem:[#allocation5] sm:$0xf]  ;;  %v12086_v17 = vld [vmem:[#allocation5 + $0x4] sm:$0xf] }
0x133d   : > { %v9661_v18 = vpop.permute.xlu1 %9660 }
0x133e   : > { %v9675_v16 = vsel %vm1428_vm10, %v9668_v43, %v9661_v18 }
0x133f   : > { %9691 = vst.msk [vmem:[#allocation5 + $0x20] sm:$0xf] %vm1449_vm12, %v9675_v16  ;;  %v11857_v48 = vld [vmem:[#allocation5 + $0x8] sm:$0xf] }
0x1345   : > { %v9655_v23 = vpop.permute.xlu1 %9654 }
0x1346   : > { %v9667_v63 = vrot.slane %v9655_v23, 4  ;;  %v9663_v30 = vpop.permute.xlu0 %9662  ;;  %v11869_v33 = vld [vmem:[#allocation5 + $0x20] sm:$0xf] }
0x1347   : > { %v9669_v6 = vrot.slane %v9663_v30, 4 }
0x1348   : > { %v9672_v40 = vsel %vm1428_vm10, %v9667_v63, %v9655_v23 }
0x1349   : > { %9688 = vst.msk [vmem:[#allocation5 + $0xc] sm:$0xff] %vm12803_vm11, %v9672_v40  ;;  %v9676_v8 = vsel %vm1428_vm10, %v9669_v6, %v9663_v30  ;;  %v9677_v25 = vsel %vm1428_vm10, %v9669_v6, %v9665_v7  ;;  %v9697_v30 = vld [vmem:[%s16797_s6 + $0x3] sm:$0x1] }
0x134a   : > { %9692 = vst.msk [vmem:[#allocation5 + $0x24] sm:$0xff] %vm12803_vm11, %v9676_v8 }
0x134b   : > { %9693 = vst.msk [vmem:[#allocation5 + $0x2c] sm:$0xf] %vm1449_vm12, %v9677_v25 }
0x134e   : > { %v9657_v50 = vpop.permute.xlu0 %9656 }
0x134f   : > { %v9673_v58 = vsel %vm1428_vm10, %v9667_v63, %v9657_v50  ;;  %vm10359_vm10 = vcmask 1041408  }
0x1350   : > { %9689 = vst.msk [vmem:[#allocation5 + $0x14] sm:$0xf] %vm1449_vm12, %v9673_v58  ;;  %v12087_v28 = vld [vmem:[#allocation5 + $0x8] sm:$0xf0]  ;;  %v11851_v46 = vld [vmem:[#allocation5 + $0xc] sm:$0xf0] }
0x1351   : > { %v16562_v57 = vor.u32 %v12087_v28, %v11849_v21  ;;  %v16564_v13 = vor.u32 %v12086_v17, %v11851_v46  ;;  %v12090_v49 = vld [vmem:[#allocation5 + $0x20] sm:$0xf0]  ;;  %v11863_v36 = vld [vmem:[#allocation5 + $0x24] sm:$0xf0] }
0x1352   : > { %v16566_v31 = vor.u32 %v12090_v49, %v11861_v52  ;;  %v12091_v53 = vld [vmem:[#allocation5 + $0x28] sm:$0xf0]  ;;  %v16584_v47 = vor.u32 %v12089_v26, %v11863_v36 }
0x1353   : > { %9738 = vrot.lane.b32.xlu0 %v16562_v57, %s12212_s11  ;;  %9852 = vrot.lane.b32.xlu1 %v16564_v13, %s12213_s12  ;;  %v16576_v9 = vor.u32 %v12091_v53, %v11869_v33 }
0x1354   : > { %9817 = vmatpush.bf16.msra.mxu3 %v16566_v31 }
0x1357   : > { %v12088_v62 = vld [vmem:[#allocation5 + $0x10] sm:$0xf0] }
0x1358   : > { %9818 = vmatpush.bf16.msra.mxu3 %v16562_v57  ;;  %v16574_v45 = vor.u32 %v12088_v62, %v11857_v48  ;;  %v9699_v48 = vld [vmem:[%s16797_s6 + $0x5] sm:$0x1] }
0x135a   : > { %9742 = vrot.lane.b32.xlu2 %v16574_v45, %s12212_s11 }
0x135b   : > { %9850 = vrot.lane.b32.xlu0 %v16562_v57, %s12213_s12  ;;  %9748 = vrot.lane.b32.xlu1 %v16576_v9, %s12212_s11 }
0x135c   : > { %11874 = vmatmul.msk.bf16.vlgmr.msra.gmra.mxu3 %vm1563_vm13, %v16661_v11 }
0x1362   : > { %9740 = vrot.lane.b32.xlu2 %v16564_v13, %s12212_s11 }
0x1363   : > { %9746 = vrot.lane.b32.xlu0 %v16584_v47, %s12212_s11  ;;  %9921 = vrot.lane.b32.xlu1 %v16574_v45, %s12214_s13 }
0x136a   : > { %9854 = vrot.lane.b32.xlu2 %v16574_v45, %s12213_s12 }
0x136b   : > { %9919 = vrot.lane.b32.xlu0 %v16564_v13, %s12214_s13  ;;  %9744 = vrot.lane.b32.xlu1 %v16566_v31, %s12212_s11 }
0x1372   : > { %9988 = vrot.lane.b32.xlu2 %v16574_v45, %s12215_s14 }
0x1373   : > { %9917 = vrot.lane.b32.xlu0 %v16562_v57, %s12214_s13  ;;  %9856 = vrot.lane.b32.xlu1 %v16566_v31, %s12213_s12 }
0x137a   : > { %9858 = vrot.lane.b32.xlu2 %v16584_v47, %s12213_s12 }
0x137b   : > { %9925 = vrot.lane.b32.xlu0 %v16584_v47, %s12214_s13  ;;  %9927 = vrot.lane.b32.xlu1 %v16576_v9, %s12214_s13 }
0x1382   : > { %9986 = vrot.lane.b32.xlu2 %v16564_v13, %s12215_s14 }
0x1383   : > { %9984 = vrot.lane.b32.xlu0 %v16562_v57, %s12215_s14  ;;  %10118 = vrot.lane.b32.xlu1 %v16562_v57, %s12217_s16 }
0x138a   : > { %9860 = vrot.lane.b32.xlu2 %v16576_v9, %s12213_s12 }
0x138b   : > { %10053 = vrot.lane.b32.xlu0 %v16564_v13, %s12216_s15  ;;  %9994 = vrot.lane.b32.xlu1 %v16576_v9, %s12215_s14 }
0x1392   : > { %9923 = vrot.lane.b32.xlu2 %v16566_v31, %s12214_s13 }
0x1393   : > { %9992 = vrot.lane.b32.xlu0 %v16584_v47, %s12215_s14  ;;  %9990 = vrot.lane.b32.xlu1 %v16566_v31, %s12215_s14 }
0x139a   : > { %10051 = vrot.lane.b32.xlu2 %v16562_v57, %s12216_s15 }
0x139b   : > { %10124 = vrot.lane.b32.xlu0 %v16566_v31, %s12217_s16  ;;  %10057 = vrot.lane.b32.xlu1 %v16566_v31, %s12216_s15 }
0x13a2   : > { %10120 = vrot.lane.b32.xlu2 %v16564_v13, %s12217_s16 }
0x13a3   : > { %10061 = vrot.lane.b32.xlu0 %v16576_v9, %s12216_s15  ;;  %10126 = vrot.lane.b32.xlu1 %v16584_v47, %s12217_s16 }
0x13aa   : > { %10059 = vrot.lane.b32.xlu2 %v16584_v47, %s12216_s15 }
0x13ab   : > { %10193 = vrot.lane.b32.xlu0 %v16584_v47, %s12218_s17  ;;  %10055 = vrot.lane.b32.xlu1 %v16574_v45, %s12216_s15  ;;  %s305_s15 = scalar_lea.vmem %s16799_s8, %s12092_s29 }
0x13b2   : > { %10122 = vrot.lane.b32.xlu2 %v16574_v45, %s12217_s16 }
0x13b3   : > { %10187 = vrot.lane.b32.xlu0 %v16564_v13, %s12218_s17  ;;  %10195 = vrot.lane.b32.xlu1 %v16576_v9, %s12218_s17 }
0x13b4   : > { %v9743_v19 = vpop.permute.xlu2 %9742 }
0x13ba   : > { %10128 = vrot.lane.b32.xlu2 %v16576_v9, %s12217_s16 }
0x13bb   : > { %10185 = vrot.lane.b32.xlu0 %v16562_v57, %s12218_s17  ;;  %10189 = vrot.lane.b32.xlu1 %v16574_v45, %s12218_s17 }
0x13bc   : > { %v9741_v29 = vpop.permute.xlu2 %9740 }
0x13bd   : > { %v9751_v32 = vsel %vm425_vm3, %v9741_v29, %v9743_v19 }
0x13c2   : > { %10191 = vrot.lane.b32.xlu2 %v16566_v31, %s12218_s17 }
0x13c3   : > { %10260 = vrot.lane.b32.xlu0 %v16584_v47, %s12219_s18  ;;  %10262 = vrot.lane.b32.xlu1 %v16576_v9, %s12219_s18 }
0x13c4   : > { %v9855_v24 = vpop.permute.xlu2 %9854 }
0x13c5   : > { %v9853_v55 = vpop.permute.xlu1 %9852  ;;  %v9739_v42 = vpop.permute.xlu0 %9738 }
0x13c6   : > { %v9750_v5 = vsel %vm425_vm3, %v9739_v42, %v9741_v29  ;;  %v9863_v43 = vsel %vm600_vm2, %v9853_v55, %v9855_v24 }
0x13ca   : > { %10256 = vrot.lane.b32.xlu2 %v16574_v45, %s12219_s18 }
0x13cb   : > { %10252 = vrot.lane.b32.xlu0 %v16562_v57, %s12219_s18  ;;  %10258 = vrot.lane.b32.xlu1 %v16566_v31, %s12219_s18  ;;  %v9698_v57 = vld [vmem:[%s16797_s6 + $0x4] sm:$0x1] }
0x13cc   : > { %v16677_v51 = vpop.permute.xlu2 %9988 }
0x13cd   : > { %v9851_v12 = vpop.permute.xlu0 %9850  ;;  %v9749_v4 = vpop.permute.xlu1 %9748 }
0x13ce   : > { %9795 = vmatpush.bf16.msra.mxu2 %v9749_v4  ;;  %v9862_v0 = vsel %vm600_vm2, %v9851_v12, %v9853_v55 }
0x13d2   : > { %10254 = vrot.lane.b32.xlu2 %v16564_v13, %s12219_s18  ;;  %9796 = vmatpush.bf16.msra.mxu2 %v9743_v19 }
0x13d3   : > { %10321 = vperm.xlu1 %12112, %v9703_v44  }
0x13d4   : > { %v9859_v27 = vpop.permute.xlu2 %9858 }
0x13d5   : > { %v9747_v15 = vpop.permute.xlu0 %9746  ;;  %v9922_v41 = vpop.permute.xlu1 %9921  ;;  %11873 = vmatmul.msk.bf16.vlgmr.msra.gmra.mxu2 %vm1563_vm13, %v9695_v10 }
0x13d6   : > { %v9753_v3 = vsel %vm425_vm3, %v9747_v15, %v9749_v4 }
0x13d7   : > { %9782 = vmatpush.bf16.msra.mxu1 %v9753_v3 }
0x13db   : > { %9783 = vmatpush.bf16.msra.mxu1 %v9751_v32 }
0x13dc   : > { %v16691_v38 = vpop.permute.xlu2 %9986 }
0x13dd   : > { %v9920_v35 = vpop.permute.xlu0 %9919  ;;  %v9745_v22 = vpop.permute.xlu1 %9744  ;;  %v9997_v46 = vsel %vm806_vm5, %v16691_v38, %v16677_v51 }
0x13de   : > { %v9752_v39 = vsel %vm425_vm3, %v9745_v22, %v9747_v15  ;;  %11872 = vmatmul.msk.bf16.vlgmr.msra.gmra.mxu1 %vm1563_vm13, %v9695_v10  ;;  %v9930_v18 = vsel %vm703_vm4, %v9920_v35, %v9922_v41 }
0x13df   : > { %9843 = vmatpush.bf16.msrb.mxu1 %v16576_v9  ;;  %9769 = vmatpush.bf16.msra.mxu0 %v9752_v39 }
0x13e3   : > { %9844 = vmatpush.bf16.msrb.mxu1 %v16574_v45  ;;  %9770 = vmatpush.bf16.msra.mxu0 %v9750_v5 }
0x13e4   : > { %v9861_v60 = vpop.permute.xlu2 %9860 }
0x13e5   : > { %v9865_v1 = vsel %vm600_vm2, %v9859_v27, %v9861_v60  ;;  %v9918_v20 = vpop.permute.xlu0 %9917  ;;  %v9857_v59 = vpop.permute.xlu1 %9856 }
0x13e6   : > { %v9864_v54 = vsel %vm600_vm2, %v9857_v59, %v9859_v27  ;;  %11871 = vmatmul.msk.bf16.vlgmr.msra.gmra.mxu0 %vm1563_vm13, %v9695_v10  ;;  %9894 = vmatpush.bf16.msrb.mxu3 %v9865_v1  ;;  %v9929_v14 = vsel %vm703_vm4, %v9918_v20, %v9920_v35  ;;  %v10330_v10 = vld.sshfl [vmem:[#allocation1 + $0x10] sm:$0xff pattern:$0x73625140]  ;;  %v10328_v27 = vld.sshfl [vmem:[#allocation1] sm:$0xff pattern:$0x73625140] }
0x13e7   : > { %9830 = vmatpush.bf16.msrb.mxu0 %v16584_v47  ;;  %9881 = vmatpush.bf16.msrb.mxu2 %v9864_v54  ;;  %v9701_v35 = vld [vmem:[%s16797_s6 + $0x7] sm:$0x1]  ;;  %vm17174_vm2 = vcmask 736256  }
0x13e8   : > { %10335 = vrot.lane.b32.xlu0 %v10330_v10, %s12215_s14  ;;  %10331 = vrot.lane.b32.xlu1 %v10328_v27, %s12215_s14  ;;  %vm17175_vm3 = vmmov %vm17174_vm2 }
0x13ea   : > { %9895 = vmatpush.bf16.msrb.mxu3 %v9863_v43  ;;  %v9702_v43 = vld [vmem:[%s16797_s6 + $0x8] sm:$0x1] }
0x13eb   : > { %9831 = vmatpush.bf16.msrb.mxu0 %v16564_v13  ;;  %9882 = vmatpush.bf16.msrb.mxu2 %v9862_v0 }
0x13ec   : > { %v9924_v61 = vpop.permute.xlu2 %9923 }
0x13ed   : > { %v9926_v7 = vpop.permute.xlu0 %9925  ;;  %v9928_v56 = vpop.permute.xlu1 %9927  ;;  %11878 = vmatmul.msk.bf16.vlgmr.msrb.gmra.mxu3 %vm1563_vm13, %v9696_v37 }
0x13ee   : > { %v9931_v2 = vsel %vm703_vm4, %v9924_v61, %v9926_v7  ;;  %v9932_v34 = vsel %vm703_vm4, %v9926_v7, %v9928_v56  ;;  %11876 = vmatmul.msk.bf16.vlgmr.msrb.gmra.mxu1 %vm1563_vm13, %v16661_v11  ;;  %11877 = vmatmul.msk.bf16.vlgmr.msrb.gmra.mxu2 %vm1563_vm13, %v9696_v37  ;;  %vm17176_vm4 = vmmov %vm17174_vm2  ;;  %v10329_v61 = vld.sshfl [vmem:[#allocation1 + $0x8] sm:$0xff pattern:$0x73625140] }
0x13ef   : > { %9907 = vmatpush.bf16.msra.mxu0 %v9861_v60  ;;  %9974 = vmatpush.bf16.msra.mxu3 %v9928_v56 }
0x13f0   : > { %9948 = vmatpush.bf16.msra.mxu1 %v9931_v2  ;;  %9961 = vmatpush.bf16.msra.mxu2 %v9932_v34 }
0x13f1   : > { %10333 = vrot.lane.b32.xlu2 %v10329_v61, %s12215_s14 }
0x13f3   : > { %9908 = vmatpush.bf16.msra.mxu0 %v9855_v24  ;;  %9975 = vmatpush.bf16.msra.mxu3 %v9922_v41 }
0x13f4   : > { %9949 = vmatpush.bf16.msra.mxu1 %v9929_v14  ;;  %9962 = vmatpush.bf16.msra.mxu2 %v9930_v18  ;;  %v10052_v16 = vpop.permute.xlu2 %10051 }
0x13f5   : > { %v9985_v23 = vpop.permute.xlu0 %9984  ;;  %v10119_v63 = vpop.permute.xlu1 %10118 }
0x13f6   : > { %11875 = vmatmul.msk.bf16.vlgmr.msrb.gmra.mxu0 %vm1563_vm13, %v16661_v11  ;;  %v9996_v28 = vsel %vm806_vm5, %v9985_v23, %v16691_v38  ;;  %v9700_v11 = vld [vmem:[%s16797_s6 + $0x6] sm:$0x1] }
0x13fc   : > { %v10121_v6 = vpop.permute.xlu2 %10120 }
0x13fd   : > { %v10054_v40 = vpop.permute.xlu0 %10053  ;;  %v9995_v8 = vpop.permute.xlu1 %9994  ;;  %11882 = vmatmul.msk.bf16.vlgmr.msra.gmra.mxu3 %vm1563_vm13, %v9697_v30  ;;  %v10130_v47 = vsel %vm1012_vm7, %v10119_v63, %v10121_v6 }
0x13fe   : > { %11880 = vmatmul.msk.bf16.vlgmr.msra.gmra.mxu1 %vm1563_vm13, %v9697_v30  ;;  %11881 = vmatmul.msk.bf16.vlgmr.msra.gmra.mxu2 %vm1563_vm13, %v9697_v30  ;;  %v10063_v53 = vsel %vm909_vm6, %v10052_v16, %v10054_v40 }
0x13ff   : > { %10041 = vmatpush.bf16.msrb.mxu2 %v9995_v8 }
0x1403   : > { %10042 = vmatpush.bf16.msrb.mxu2 %v16677_v51 }
0x1404   : > { %v10060_v25 = vpop.permute.xlu2 %10059 }
0x1405   : > { %v9993_v50 = vpop.permute.xlu0 %9992  ;;  %v9991_v58 = vpop.permute.xlu1 %9990 }
0x1406   : > { %v9999_v21 = vsel %vm806_vm5, %v9993_v50, %v9995_v8  ;;  %v9998_v17 = vsel %vm806_vm5, %v9991_v58, %v9993_v50  ;;  %11879 = vmatmul.msk.bf16.vlgmr.msra.gmra.mxu0 %vm1563_vm13, %v9696_v37  ;;  %v9820_v37 = vpop.f32.mrf.mxu3 }
0x1407   : > { %10015 = vmatpush.bf16.msrb.mxu0 %v9998_v17  ;;  %10028 = vmatpush.bf16.msrb.mxu1 %v9999_v21 }
0x140b   : > { %10016 = vmatpush.bf16.msrb.mxu0 %v9996_v28  ;;  %10029 = vmatpush.bf16.msrb.mxu1 %v9997_v46 }
0x140c   : > { %v10123_v13 = vpop.permute.xlu2 %10122 }
0x140d   : > { %v10125_v52 = vpop.permute.xlu0 %10124  ;;  %v10058_v49 = vpop.permute.xlu1 %10057  ;;  %v10131_v19 = vsel %vm1012_vm7, %v10121_v6, %v10123_v13 }
0x140e   : > { %v10065_v31 = vsel %vm909_vm6, %v10058_v49, %v10060_v25  ;;  %11884 = vmatmul.msk.bf16.vlgmr.msrb.gmra.mxu1 %vm1563_vm13, %v9698_v57  ;;  %11885 = vmatmul.msk.bf16.vlgmr.msrb.gmra.mxu2 %vm1563_vm13, %v9698_v57  ;;  %v9822_v7 = vpop.f32.mrf.mxu3 }
0x140f   : > { %10082 = vmatpush.bf16.msrb.mxu3 %v10065_v31 }
0x1413   : > { %10083 = vmatpush.bf16.msrb.mxu3 %v10063_v53 }
0x1414   : > { %v10129_v62 = vpop.permute.xlu2 %10128 }
0x1415   : > { %v10062_v33 = vpop.permute.xlu0 %10061  ;;  %v10127_v45 = vpop.permute.xlu1 %10126 }
0x1416   : > { %v10066_v9 = vsel %vm909_vm6, %v10060_v25, %v10062_v33  ;;  %v10132_v36 = vsel %vm1012_vm7, %v10125_v52, %v10127_v45  ;;  %v10133_v26 = vsel %vm1012_vm7, %v10127_v45, %v10129_v62  ;;  %11883 = vmatmul.msk.bf16.vlgmr.msrb.gmra.mxu0 %vm1563_vm13, %v9698_v57  ;;  %11886 = vmatmul.msk.bf16.vlgmr.msrb.gmra.mxu3 %vm1563_vm13, %v9699_v48 }
0x1417   : > { %10108 = vmatpush.bf16.msra.mxu1 %v10062_v33  ;;  %10095 = vmatpush.bf16.msra.mxu0 %v10066_v9 }
0x1418   : > { %10149 = vmatpush.bf16.msra.mxu2 %v10132_v36  ;;  %10162 = vmatpush.bf16.msra.mxu3 %v10133_v26 }
0x141c   : > { %10150 = vmatpush.bf16.msra.mxu2 %v10130_v47  ;;  %10163 = vmatpush.bf16.msra.mxu3 %v10131_v19  ;;  %v10192_v29 = vpop.permute.xlu2 %10191 }
0x141d   : > { %v10194_v24 = vpop.permute.xlu0 %10193  ;;  %v10056_v55 = vpop.permute.xlu1 %10055 }
0x141e   : > { %v10199_v42 = vsel %vm1115_vm8, %v10192_v29, %v10194_v24  ;;  %10109 = vmatpush.bf16.msra.mxu1 %v10056_v55  ;;  %v10064_v51 = vsel %vm909_vm6, %v10054_v40, %v10056_v55  ;;  %vm17177_vm6 = vmmov %vm17174_vm2 }
0x141f   : > { %11889 = vmatmul.msk.bf16.vlgmr.msra.gmra.mxu2 %vm1563_vm13, %v9700_v11  ;;  %10096 = vmatpush.bf16.msra.mxu0 %v10064_v51 }
0x1421   : > { %11888 = vmatmul.msk.bf16.vlgmr.msra.gmra.mxu1 %vm1563_vm13, %v9699_v48 }
0x1422   : > { %10216 = vmatpush.bf16.msrb.mxu1 %v10199_v42 }
0x1423   : > { %10175 = vmatpush.bf16.msrb.mxu0 %v10129_v62 }
0x1424   : > { %v10257_v15 = vpop.permute.xlu2 %10256 }
0x1425   : > { %v10188_v12 = vpop.permute.xlu0 %10187  ;;  %v10196_v4 = vpop.permute.xlu1 %10195 }
0x1426   : > { %v10200_v44 = vsel %vm1115_vm8, %v10194_v24, %v10196_v4  ;;  %11887 = vmatmul.msk.bf16.vlgmr.msra.gmra.mxu0 %vm1563_vm13, %v9699_v48  ;;  %11890 = vmatmul.msk.bf16.vlgmr.msra.gmra.mxu3 %vm1563_vm13, %v9700_v11 }
0x1427   : > { %10176 = vmatpush.bf16.msrb.mxu0 %v10123_v13  ;;  %10242 = vmatpush.bf16.msrb.mxu3 %v10196_v4 }
0x1428   : > { %10229 = vmatpush.bf16.msrb.mxu2 %v10200_v44 }
0x142c   : > { %v10255_v60 = vpop.permute.xlu2 %10254 }
0x142d   : > { %v10186_v41 = vpop.permute.xlu0 %10185  ;;  %v10190_v3 = vpop.permute.xlu1 %10189  ;;  %v10265_v1 = vsel %vm17175_vm3, %v10255_v60, %v10257_v15 }
0x142e   : > { %10243 = vmatpush.bf16.msrb.mxu3 %v10190_v3  ;;  %v10197_v32 = vsel %vm1115_vm8, %v10186_v41, %v10188_v12  ;;  %v10198_v38 = vsel %vm1115_vm8, %v10188_v12, %v10190_v3  ;;  %vm10364_vm8 = vcmask 1043458  }
0x142f   : > { %10217 = vmatpush.bf16.msrb.mxu1 %v10197_v32  ;;  %10230 = vmatpush.bf16.msrb.mxu2 %v10198_v38 }
0x1432   : > { %11892 = vmatmul.msk.bf16.vlgmr.msrb.gmra.mxu1 %vm1563_vm13, %v9701_v35  ;;  %11893 = vmatmul.msk.bf16.vlgmr.msrb.gmra.mxu2 %vm1563_vm13, %v9701_v35 }
0x1435   : > { %v10261_v22 = vpop.permute.xlu0 %10260  ;;  %v10263_v39 = vpop.permute.xlu1 %10262 }
0x1436   : > { %v10267_v5 = vsel %vm17174_vm2, %v10261_v22, %v10263_v39  ;;  %11891 = vmatmul.msk.bf16.vlgmr.msrb.gmra.mxu0 %vm1563_vm13, %v9700_v11  ;;  %11894 = vmatmul.msk.bf16.vlgmr.msrb.gmra.mxu3 %vm1563_vm13, %v9701_v35 }
0x1437   : > { %10309 = vmatpush.bf16.msra.mxu2 %v10263_v39  ;;  %10296 = vmatpush.bf16.msra.mxu1 %v10267_v5 }
0x143b   : > { %10310 = vmatpush.bf16.msra.mxu2 %v10257_v15  ;;  %10297 = vmatpush.bf16.msra.mxu1 %v10265_v1 }
0x143d   : > { %v10259_v20 = vpop.permute.xlu1 %10258  ;;  %v10253_v54 = vpop.permute.xlu0 %10252 }
0x143e   : > { %v10266_v59 = vsel %vm17176_vm4, %v10259_v20, %v10261_v22  ;;  %v10264_v0 = vsel %vm17177_vm6, %v10253_v54, %v10255_v60 }
0x143f   : > { %10283 = vmatpush.bf16.msra.mxu0 %v10266_v59 }
0x1442   : > { %11896 = vmatmul.msk.bf16.vlgmr.msra.gmra.mxu1 %vm1563_vm13, %v9702_v43  ;;  %11897 = vmatmul.msk.bf16.vlgmr.msra.gmra.mxu2 %vm1563_vm13, %v9702_v43 }
0x1443   : > { %10284 = vmatpush.bf16.msra.mxu0 %v10264_v0 }
0x1445   : > { %v10322_v39 = vpop.permute.xlu1 %10321 }
0x1446   : > { %11895 = vmatmul.msk.bf16.vlgmr.msra.gmra.mxu0 %vm1563_vm13, %v9702_v43  ;;  %vm10365_vm13 = vmor %vm10364_vm8, %vm10359_vm10 }
0x144b   : > { %v10334_v7 = vpop.permute.xlu2 %10333 }
0x1458   : > { %v9798_v56 = vpop.f32.mrf.mxu2 }
0x145a   : > { %v10336_v61 = vpop.permute.xlu0 %10335 }
0x145b   : > { %v9785_v2 = vpop.f32.mrf.mxu1 }
0x1460   : > { %v9800_v34 = vpop.f32.mrf.mxu2 }
0x1463   : > { %v9772_v14 = vpop.f32.mrf.mxu0  ;;  %v9787_v18 = vpop.f32.mrf.mxu1 }
0x1464   : > { %v9821_v16 = vadd.f32 %v9820_v37, %v9772_v14  ;;  %v10338_v18 = vsel %vm806_vm5, %v10334_v7, %v10336_v61 }
0x146b   : > { %v9774_v23 = vpop.f32.mrf.mxu0  ;;  %v9846_v63 = vpop.f32.mrf.mxu1 }
0x146c   : > { %v9847_v30 = vadd.f32 %v9846_v63, %v9798_v56 }
0x1470   : > { %v9897_v6 = vpop.f32.mrf.mxu3 }
0x1471   : > { %v9884_v40 = vpop.f32.mrf.mxu2 }
0x1472   : > { %v9914_v8 = vadd.f32 %v9884_v40, %v9821_v16 }
0x1473   : > { %v9833_v25 = vpop.f32.mrf.mxu0  ;;  %v9848_v50 = vpop.f32.mrf.mxu1 }
0x1474   : > { %v9834_v58 = vadd.f32 %v9833_v25, %v9785_v2 }
0x1476   : > { %v9915_v21 = vadd.f32 %v9897_v6, %v9834_v58  ;;  %v10332_v6 = vpop.permute.xlu1 %10331 }
0x1478   : > { %v9899_v17 = vpop.f32.mrf.mxu3 }
0x1479   : > { %v9886_v28 = vpop.f32.mrf.mxu2 }
0x147b   : > { %v9835_v46 = vpop.f32.mrf.mxu0  ;;  %v9951_v57 = vpop.f32.mrf.mxu1 }
0x147c   : > { %v9981_v13 = vadd.f32 %v9951_v57, %v9914_v8 }
0x1480   : > { %v9977_v52 = vpop.f32.mrf.mxu3 }
0x1481   : > { %v9964_v49 = vpop.f32.mrf.mxu2 }
0x1482   : > { %v9982_v3 = vadd.f32 %v9964_v49, %v9915_v21  ;;  %v10337_v21 = vsel %vm806_vm5, %v10332_v6, %v10334_v7  ;;  %vm10366_vm5 = vcmask 259076  }
0x1483   : > { %v9910_v31 = vpop.f32.mrf.mxu0  ;;  %v9953_v53 = vpop.f32.mrf.mxu1  ;;  %vm10367_vm15 = vmor %vm10366_vm5, %vm10365_vm13 }
0x1484   : > { %v9916_v38 = vadd.f32 %v9910_v31, %v9847_v30 }
0x1486   : > { %v9983_v1 = vadd.f32 %v9977_v52, %v9916_v38 }
0x1488   : > { %v9979_v48 = vpop.f32.mrf.mxu3 }
0x1489   : > { %v9966_v62 = vpop.f32.mrf.mxu2 }
0x148b   : > { %v9912_v33 = vpop.f32.mrf.mxu0  ;;  %v10031_v45 = vpop.f32.mrf.mxu1 }
0x148c   : > { %v10049_v35 = vadd.f32 %v10031_v45, %v9982_v3 }
0x1491   : > { %v10044_v9 = vpop.f32.mrf.mxu2 }
0x1492   : > { %v10050_v43 = vadd.f32 %v10044_v9, %v9983_v1 }
0x1493   : > { %v10018_v36 = vpop.f32.mrf.mxu0  ;;  %v10033_v26 = vpop.f32.mrf.mxu1 }
0x1494   : > { %v10048_v20 = vadd.f32 %v10018_v36, %v9981_v13 }
0x1499   : > { %v10046_v47 = vpop.f32.mrf.mxu2  ;;  %v10085_v19 = vpop.f32.mrf.mxu3 }
0x149a   : > { %v10115_v0 = vadd.f32 %v10085_v19, %v10048_v20 }
0x149b   : > { %v10020_v29 = vpop.f32.mrf.mxu0 }
0x149e   : > { %v10111_v11 = vpop.f32.mrf.mxu1 }
0x149f   : > { %v10117_v2 = vadd.f32 %v10111_v11, %v10050_v43 }
0x14a1   : > { %v10087_v24 = vpop.f32.mrf.mxu3 }
0x14a2   : > { %v10152_v55 = vpop.f32.mrf.mxu2 }
0x14a3   : > { %v10098_v42 = vpop.f32.mrf.mxu0  ;;  %v10182_v34 = vadd.f32 %v10152_v55, %v10115_v0 }
0x14a4   : > { %v10116_v5 = vadd.f32 %v10098_v42, %v10049_v35 }
0x14a6   : > { %v10113_v51 = vpop.f32.mrf.mxu1 }
0x14a9   : > { %v10165_v12 = vpop.f32.mrf.mxu3 }
0x14aa   : > { %v10154_v4 = vpop.f32.mrf.mxu2  ;;  %v10183_v59 = vadd.f32 %v10165_v12, %v10116_v5 }
0x14ab   : > { %v10100_v44 = vpop.f32.mrf.mxu0 }
0x14af   : > { %v10219_v10 = vpop.f32.mrf.mxu1 }
0x14b0   : > { %v10249_v23 = vadd.f32 %v10219_v10, %v10182_v34 }
0x14b1   : > { %v10167_v27 = vpop.f32.mrf.mxu3 }
0x14b3   : > { %v10178_v15 = vpop.f32.mrf.mxu0 }
0x14b4   : > { %v10184_v63 = vadd.f32 %v10178_v15, %v10117_v2 }
0x14b5   : > { %v10232_v41 = vpop.f32.mrf.mxu2 }
0x14b6   : > { %v10250_v37 = vadd.f32 %v10232_v41, %v10183_v59 }
0x14b7   : > { %v10221_v32 = vpop.f32.mrf.mxu1 }
0x14b9   : > { %v10245_v22 = vpop.f32.mrf.mxu3 }
0x14ba   : > { %v10251_v8 = vadd.f32 %v10245_v22, %v10184_v63 }
0x14bb   : > { %v10180_v60 = vpop.f32.mrf.mxu0 }
0x14bd   : > { %v10234_v54 = vpop.f32.mrf.mxu2 }
0x14bf   : > { %v10299_v56 = vpop.f32.mrf.mxu1 }
0x14c0   : > { %v10317_v14 = vadd.f32 %v10299_v56, %v10250_v37 }
0x14c1   : > { %v10247_v16 = vpop.f32.mrf.mxu3 }
0x14c2   : > { %v10325_v30 = vadd.f32 %v10322_v39, %v10317_v14 }
0x14c3   : > { %v10286_v40 = vpop.f32.mrf.mxu0 }
0x14c4   : > { %v10343_v25 = vadd.f32 %v10338_v18, %v10325_v30  ;;  %v10316_v50 = vadd.f32 %v10286_v40, %v10249_v23 }
0x14c5   : > { %v10312_v58 = vpop.f32.mrf.mxu2 }
0x14c6   : > { %vm10346_vm7 = vcmp.ge.f32.partialorder %v10343_v25, 0.0  ;;  %v10349_v17 = vmul.f32 0.01, %v10343_v25  ;;  %v10324_v28 = vadd.f32 %v10322_v39, %v10316_v50  ;;  %v10318_v46 = vadd.f32 %v10312_v58, %v10251_v8 }
0x14c7   : > { %v10301_v57 = vpop.f32.mrf.mxu1 }
0x14c8   : > { %v10352_v13 = vsel %vm10346_vm7, %v10343_v25, %v10349_v17  ;;  %v10326_v52 = vadd.f32 %v10322_v39, %v10318_v46  ;;  %v10342_v49 = vadd.f32 %v10337_v21, %v10324_v28 }
0x14c9   : > { %v10357_v48 = vrot.slane %v10352_v13, 6 }
0x14ca   : > { %v10344_v31 = vadd.f32 %v10336_v61, %v10326_v52  ;;  %vm10345_vm11 = vcmp.ge.f32.partialorder %v10342_v49, 0.0  ;;  %v10348_v53 = vmul.f32 0.01, %v10342_v49 }
0x14cb   : > { %v10288_v62 = vpop.f32.mrf.mxu0 }
0x14cc   : > { %vm10347_vm12 = vcmp.ge.f32.partialorder %v10344_v31, 0.0  ;;  %v10350_v33 = vmul.f32 0.01, %v10344_v31  ;;  %v10351_v45 = vsel %vm10345_vm11, %v10342_v49, %v10348_v53 }
0x14cd   : > { %v10360_v9 = vsel %vm10359_vm10, %v10351_v45, %v10357_v48  ;;  %v10314_v36 = vpop.f32.mrf.mxu2 }
0x14ce   : > { %v10353_v26 = vsel %vm10347_vm12, %v10344_v31, %v10350_v33 }
0x14cf   : > { %v10358_v47 = vrot.slane %v10353_v26, 4 }
0x14d1   : > { %v10362_v19 = vsel %vm10361_vm1, %v10360_v9, %v10358_v47 }
0x14d2   : > { %10368 = vst.msk [vmem:[%s305_s15] sm:$0x3f] %vm10367_vm15, %v10362_v19 }
0x14d3 PF: > { %s18_s27 = sadd.s32 1, %s12210_s27  }
0x14d4   : > { %p15_p4 = scmp.ge.s32.totalorder %s18_s27, 4  }
0x14d6   :  { %17 = sbr.rel (!%p15_p4) target bundleno = 1 (0x1), region = 94 }

</bundles_post_ra>
